<compile_context>
chip_gen: v5e
topology: v5e:2x2
jax: 0.10.0
libtpu: 0.0.40
codegen_flags: <defaults>
</compile_context>

<pallas_src>
import jax
import jax.numpy as jnp
from jax.experimental import pallas as pl
from jax.experimental.pallas import tpu as pltpu

MODES = 14
CNN_N_FILT = [80, 40, 40]
CNN_LEN_FILT = [16, 5, 5]
CNN_MAX_POOL = [2, 2, 2]
SAMPLE_LEN = 128
FEAT = 440            # 40 channels * 11 time-steps after the encoder
LRELU_SLOPE = 0.2
BN_EPS = 1e-5
HEAD_PAD = 256        # merged lin2{a,v,d} output padded 192 -> 256 (lane dense)
OUT_PAD = 128         # merged lin3{a,v,d} output padded 6 -> 128 (lane dense)
VMEM_LIMIT = 32 * 1024 * 1024   # fits v7x's 64 MiB physical VMEM with headroom


# ----------------------------- Pallas kernels -----------------------------

def _make_matmul_kernel(activation):
    def kernel(a_ref, w_ref, b_ref, o_ref):
        a = a_ref[0]
        w = w_ref[0]
        if a.dtype != w.dtype:           # bf16 weights: run the MXU in bf16
            a = a.astype(w.dtype)
        y = jnp.dot(a, w, preferred_element_type=jnp.float32) + b_ref[0]
        if activation == "relu":
            y = jnp.maximum(y, 0.0)
        o_ref[0] = y
    return kernel


def matmul_bias(a, w, b, activation=None):
    """Grouped matmul: (G, M, K) @ (G, K, N) + (G, 1, N) -> (G, M, N) f32."""
    G, M, K = a.shape
    N = w.shape[-1]
    tn = 128 if N % 128 == 0 else N
    return pl.pallas_call(
        _make_matmul_kernel(activation),
        out_shape=jax.ShapeDtypeStruct((G, M, N), jnp.float32),
        grid=(G, N // tn),
        in_specs=[
            pl.BlockSpec((1, M, K), lambda g, n: (g, 0, 0)),
            pl.BlockSpec((1, K, tn), lambda g, n: (g, 0, n)),
            pl.BlockSpec((1, 1, tn), lambda g, n: (g, 0, n)),
        ],
        out_specs=pl.BlockSpec((1, M, tn), lambda g, n: (g, 0, n)),
        compiler_params=pltpu.CompilerParams(
            dimension_semantics=("parallel", "parallel"),
            vmem_limit_bytes=VMEM_LIMIT),
    )(a, w, b)


def linear(x, w, b, activation=None):
    """x: (B, K) @ (K, N) + (N,) via the Pallas matmul kernel."""
    return matmul_bias(x[None], w[None], b.reshape(1, 1, -1),
                       activation=activation)[0]


def _conv_pool_kernel(a_ref, w_ref, b_ref, o_ref):
    # Conv (as im2col matmul) + MaxPool1d(2) + LeakyReLU(0.2), fused.
    # a_ref[0,0] holds the even conv windows, a_ref[0,1] the odd ones.
    w = w_ref[0]
    b = b_ref[0]
    y0 = jnp.dot(a_ref[0, 0], w, preferred_element_type=jnp.float32) + b
    y1 = jnp.dot(a_ref[0, 1], w, preferred_element_type=jnp.float32) + b
    m = jnp.maximum(y0, y1)
    o_ref[0] = jnp.where(m > 0.0, m, LRELU_SLOPE * m)


def conv_pool_lrelu(a, w, b):
    """a: (G, 2, M, K) even/odd patches; w: (G, K, N); b: (G, 1, N) -> (G, M, N)."""
    G, _, M, K = a.shape
    N = w.shape[-1]
    return pl.pallas_call(
        _conv_pool_kernel,
        out_shape=jax.ShapeDtypeStruct((G, M, N), jnp.float32),
        grid=(G,),
        in_specs=[
            pl.BlockSpec((1, 2, M, K), lambda g: (g, 0, 0, 0)),
            pl.BlockSpec((1, K, N), lambda g: (g, 0, 0)),
            pl.BlockSpec((1, 1, N), lambda g: (g, 0, 0)),
        ],
        out_specs=pl.BlockSpec((1, M, N), lambda g: (g, 0, 0)),
        compiler_params=pltpu.CompilerParams(
            dimension_semantics=("parallel",),      # 14 modes shard across TCs on v7x
            vmem_limit_bytes=VMEM_LIMIT),
    )(a, w, b)


def _gat_kernel(x_ref, adj_ref, w_ref, o_ref):
    # Single-head GAT over ALL batch elements at once. The batch structure is
    # carried entirely by the block-diagonal adjacency mask, so one MXU pass
    # does the dense transform for every node of every batch element, and the
    # attention logits f_src/f_dst come out of the same matmul (augmented W).
    Fo = w_ref.shape[-1] - 2
    x = x_ref[...]
    w = w_ref[...]
    if x.dtype != w.dtype:
        x = x.astype(w.dtype)
    h_aug = jnp.dot(x, w, preferred_element_type=jnp.float32)      # (BN, Fo+2)
    h = h_aug[:, :Fo]
    f_src = h_aug[:, Fo:Fo + 1]                                    # (BN, 1)
    f_dst = h_aug[:, Fo + 1:Fo + 2]                                # (BN, 1)
    e = f_src + jnp.transpose(f_dst)                               # (BN, BN)
    e = jnp.where(e > 0, e, LRELU_SLOPE * e)                       # LeakyReLU(0.2)
    e = jnp.where(adj_ref[...] > 0, e, jnp.float32(-9e15))         # mask non-edges
    e = e - jnp.max(e, axis=-1, keepdims=True)
    p = jnp.exp(e)
    attn = p * pl.reciprocal(jnp.sum(p, axis=-1, keepdims=True), approx=True)
    out = jnp.dot(attn, h, preferred_element_type=jnp.float32)
    # ELU with a clamp so exp never sees large positive values.
    o_ref[...] = jnp.where(out > 0, out, jnp.exp(jnp.minimum(out, 0.0)) - 1.0)


def gat_layer(xg, adj_blk, w_aug):
    """xg: (B*N, F), adj_blk: (B*N, B*N), w_aug: (F, Fo+2) -> (B*N, Fo)."""
    # TODO(synk): GATLayer source was not provided; a standard single-head GAT
    # (linear transform, additive attention, adjacency-masked softmax, ELU) is used.
    BN, _ = xg.shape
    Fo = w_aug.shape[-1] - 2
    return pl.pallas_call(
        _gat_kernel,
        out_shape=jax.ShapeDtypeStruct((BN, Fo), jnp.float32),
        in_specs=[pl.BlockSpec(memory_space=pltpu.MemorySpace.VMEM)] * 3,
        out_specs=pl.BlockSpec(memory_space=pltpu.MemorySpace.VMEM),
        compiler_params=pltpu.CompilerParams(vmem_limit_bytes=VMEM_LIMIT),
    )(xg, adj_blk, w_aug)


# ------------------------------- JAX glue ---------------------------------

def encoder_stack(x, ip):
    """All 14 per-mode EncoderNetworks at once. x: (B, MODES, 128) -> (B, MODES, 440)."""
    h = jnp.transpose(x, (1, 0, 2))[:, :, None, :]      # (M, B, 1, 128)  NCW
    for li in range(3):
        Mm, Bb, C, L = h.shape
        k = CNN_LEN_FILT[li]
        L_out = L - k + 1
        Lp = L_out // 2                                  # MaxPool1d(2) drops the remainder
        # even conv-window positions then odd positions (so pooling = max over halves)
        pos = jnp.concatenate([2 * jnp.arange(Lp), 2 * jnp.arange(Lp) + 1])
        idx = pos[:, None] + jnp.arange(k)[None, :]      # (2*Lp, k)
        patches = h[:, :, :, idx]                        # (M, B, C, 2*Lp, k)
        patches = jnp.moveaxis(patches, 2, 3)            # (M, B, 2*Lp, C, k)
        patches = patches.reshape(Mm, Bb, 2, Lp, C * k)  # split even/odd halves
        patches = jnp.transpose(patches, (0, 2, 1, 3, 4))  # (M, 2, B, Lp, C*k)
        patches = patches.reshape(Mm, 2, Bb * Lp, C * k)
        y = conv_pool_lrelu(patches, ip[f"enc_w{li}"], ip[f"enc_b{li}"])  # (M, B*Lp, Cout)
        Cout = y.shape[-1]
        y = y.reshape(Mm, Bb, Lp, Cout)
        h = jnp.transpose(y, (0, 1, 3, 2))               # (M, B, Cout, Lp)  NCW
    Mm, Bb, C, L = h.shape                               # (14, B, 40, 11)
    # torch.nn.Flatten on (B, C, L) is channel-major -> per-mode (B, 440)
    return jnp.transpose(h, (1, 0, 2, 3)).reshape(Bb, Mm, C * L)   # (B, 14, 440)


def block_diag_adj(adj):
    """(B, N, N) -> (B*N, B*N) block-diagonal adjacency (no cross-batch edges)."""
    B, N, _ = adj.shape
    eye = jnp.eye(B, dtype=adj.dtype)
    blk = eye[:, None, :, None] * adj[:, :, None, :]     # (B, N, B, N)
    return blk.reshape(B * N, B * N)


def graphnet_forward(ip, x, adj):
    B = x.shape[0]
    feats = encoder_stack(x, ip)                          # (B, 14, 440)
    xg = feats.reshape(B * MODES, FEAT)
    adj_blk = block_diag_adj(adj)                         # (B*14, B*14)
    g = gat_layer(xg, adj_blk, ip["gat1_waug"])
    g = gat_layer(g, adj_blk, ip["gat2_waug"])
    flat = g.reshape(B, MODES * FEAT)                     # (B, 6160)
    # lin1 + BN1 folded + ReLU fused into the matmul epilogue.
    h = linear(flat, ip["lin1_w"], ip["lin1_b"], activation="relu")      # (B, 1024)
    # Merged lin2{a,v,d} + BN2{a,v,d} folded + ReLU (padded to 256 lanes).
    h2 = linear(h, ip["lin2_w"], ip["lin2_b"], activation="relu")        # (B, 256)
    # Dropout(p=0.2) is an identity in eval mode.
    # Merged block-diagonal lin3{a,v,d} (padded to 128 lanes).
    z = linear(h2, ip["lin3_w"], ip["lin3_b"], activation=None)          # (B, 128)
    return [z[:, 0:2], z[:, 2:4], z[:, 4:6]]              # [xa, xv, xd]


# ---------------------------- parameter prep -------------------------------

def _fold_bn(W, b, gamma, beta, mean, var):
    """Fold eval-mode BatchNorm1d (running stats) into the preceding Linear."""
    s = gamma / jnp.sqrt(var + BN_EPS)
    return W * s[None, :], (b - mean) * s + beta


def prepare_params(p):
    """PyTorch-layout params -> fused/folded inference params (run once)."""
    ip = {}
    # Encoder convs: (M, Cout, Cin, K) -> (M, Cin*K, Cout)  (matches im2col ordering)
    for li in range(3):
        w = p[f"enc_w{li}"]
        M_, Cout, Cin, K = w.shape
        ip[f"enc_w{li}"] = jnp.transpose(w.reshape(M_, Cout, Cin * K), (0, 2, 1))
        ip[f"enc_b{li}"] = p[f"enc_b{li}"].reshape(M_, 1, Cout)
    # GAT: fold attention vectors into an augmented weight [W | W a_src | W a_dst].
    for name in ("gat1", "gat2"):
        W = p[f"{name}_w"]                                 # (F, Fo)
        w_aug = jnp.concatenate([W, W @ p[f"{name}_asrc"], W @ p[f"{name}_adst"]],
                                axis=1)                    # (F, Fo+2)
        ip[f"{name}_waug"] = w_aug.astype(jnp.bfloat16)
    # lin1 + bn1 folded, bf16 weight.
    W1, b1 = _fold_bn(p["lin1_w"], p["lin1_b"],
                      p["bn1_gamma"], p["bn1_beta"], p["bn1_mean"], p["bn1_var"])
    ip["lin1_w"] = W1.astype(jnp.bfloat16)
    ip["lin1_b"] = b1
    # Merged lin2{a,v,d} + bn2{a,v,d} folded, padded to 256 lanes, bf16 weight.
    w2_cols, b2_cols = [], []
    for hd in ("a", "v", "d"):
        W2, b2 = _fold_bn(p[f"lin2{hd}_w"], p[f"lin2{hd}_b"],
                          p[f"bn2{hd}_gamma"], p[f"bn2{hd}_beta"],
                          p[f"bn2{hd}_mean"], p[f"bn2{hd}_var"])
        w2_cols.append(W2)
        b2_cols.append(b2)
    W2m = jnp.pad(jnp.concatenate(w2_cols, axis=1), ((0, 0), (0, HEAD_PAD - 192)))
    b2m = jnp.pad(jnp.concatenate(b2_cols), (0, HEAD_PAD - 192))
    ip["lin2_w"] = W2m.astype(jnp.bfloat16)
    ip["lin2_b"] = b2m
    # Merged block-diagonal lin3{a,v,d}, padded to 128 output lanes.
    W3 = jnp.zeros((HEAD_PAD, OUT_PAD), jnp.float32)
    b3 = jnp.zeros((OUT_PAD,), jnp.float32)
    for i, hd in enumerate(("a", "v", "d")):
        W3 = W3.at[i * 64:(i + 1) * 64, i * 2:(i + 1) * 2].set(p[f"lin3{hd}_w"])
        b3 = b3.at[i * 2:(i + 1) * 2].set(p[f"lin3{hd}_b"])
    ip["lin3_w"] = W3
    ip["lin3_b"] = b3
    return ip


def init_params(key):
    """Random parameters in PyTorch layout (same architecture as the reference)."""
    params = {}
    keys = iter(jax.random.split(key, 64))
    cins = [1, CNN_N_FILT[0], CNN_N_FILT[1]]
    for li in range(3):
        cin, cout, k = cins[li], CNN_N_FILT[li], CNN_LEN_FILT[li]
        params[f"enc_w{li}"] = (
            jax.random.normal(next(keys), (MODES, cout, cin, k), jnp.float32) * 0.05)
        if li == 0:
            # TODO(synk): SincConv's learnable (low-freq, band) sinc parameterization
            # is not reproduced; the filter bank is materialized as a bias-free conv1d.
            params[f"enc_b{li}"] = jnp.zeros((MODES, cout), jnp.float32)
        else:
            params[f"enc_b{li}"] = (
                jax.random.normal(next(keys), (MODES, cout), jnp.float32) * 0.01)
    for name in ("gat1", "gat2"):
        params[f"{name}_w"] = jax.random.normal(next(keys), (FEAT, FEAT), jnp.float32) * 0.03
        params[f"{name}_asrc"] = jax.random.normal(next(keys), (FEAT, 1), jnp.float32) * 0.03
        params[f"{name}_adst"] = jax.random.normal(next(keys), (FEAT, 1), jnp.float32) * 0.03

    def lin(name, k_in, k_out):
        params[f"{name}_w"] = (jax.random.normal(next(keys), (k_in, k_out), jnp.float32)
                               * (1.0 / float(k_in) ** 0.5))
        params[f"{name}_b"] = jnp.zeros((k_out,), jnp.float32)

    lin("lin1", FEAT * MODES, 1024)
    for hd in ("a", "v", "d"):
        lin(f"lin2{hd}", 1024, 64)
        lin(f"lin3{hd}", 64, 2)
    for name, dim in (("bn1", 1024), ("bn2a", 64), ("bn2v", 64), ("bn2d", 64)):
        params[f"{name}_gamma"] = jnp.ones((dim,), jnp.float32)
        params[f"{name}_beta"] = jnp.zeros((dim,), jnp.float32)
        params[f"{name}_mean"] = jnp.zeros((dim,), jnp.float32)
        params[f"{name}_var"] = jnp.ones((dim,), jnp.float32)
    return params


if __name__ == "__main__":
    key = jax.random.PRNGKey(0)
    kx, kp = jax.random.split(key)
    B = 2
    # x: (batch, modes, samples) raw signal; adj: fully-connected 14-node graph.
    x = jax.random.normal(kx, (B, MODES, SAMPLE_LEN), jnp.float32)
    adj = jnp.ones((B, MODES, MODES), jnp.float32)
    params = init_params(kp)
    iparams = prepare_params(params)       # BN folding / head merge / bf16 cast, once

    fwd = jax.jit(graphnet_forward)
    xa, xv, xd = fwd(iparams, x, adj)
    jax.block_until_ready((xa, xv, xd))
    assert xa.shape == (B, 2) and xv.shape == (B, 2) and xd.shape == (B, 2)
    assert all(bool(jnp.all(jnp.isfinite(o))) for o in (xa, xv, xd))
    print("KERNEL_OK")
</pallas_src>

<mosaic_0001>
module attributes {stable_mosaic.version = 11 : i64} {
  func.func @_conv_pool_kernel(%arg0: i32, %arg1: memref<1x2x112x16xf32, #tpu.memory_space<vmem>>, %arg2: memref<1x16x80xf32, #tpu.memory_space<vmem>>, %arg3: memref<1x1x80xf32, #tpu.memory_space<vmem>>, %arg4: memref<1x112x80xf32, #tpu.memory_space<vmem>>) attributes {dimension_semantics = [#tpu.dimension_semantics<parallel>], iteration_bounds = array<i64: 14>, scalar_prefetch = 0 : i64, scratch_operands = 0 : i64, tpu.core_type = #tpu.core_type<tc>, window_params = [{transform_indices = @transform_0, window_bounds = array<i64: 1, 2, 112, 16>}, {transform_indices = @transform_1, window_bounds = array<i64: 1, 16, 80>}, {transform_indices = @transform_2, window_bounds = array<i64: 1, 1, 80>}, {transform_indices = @transform_3, window_bounds = array<i64: 1, 112, 80>}]} {
    %c0 = arith.constant 0 : index
    %c0_0 = arith.constant 0 : index
    %c0_1 = arith.constant 0 : index
    %0 = vector.load %arg2[%c0, %c0_0, %c0_1] : memref<1x16x80xf32, #tpu.memory_space<vmem>>, vector<1x16x80xf32>
    %1 = vector.shape_cast %0 : vector<1x16x80xf32> to vector<16x80xf32>
    %c0_2 = arith.constant 0 : index
    %c0_3 = arith.constant 0 : index
    %c0_4 = arith.constant 0 : index
    %2 = vector.load %arg3[%c0_2, %c0_3, %c0_4] : memref<1x1x80xf32, #tpu.memory_space<vmem>>, vector<1x1x80xf32>
    %3 = vector.shape_cast %2 : vector<1x1x80xf32> to vector<1x80xf32>
    %c0_5 = arith.constant 0 : index
    %c0_6 = arith.constant 0 : index
    %c0_7 = arith.constant 0 : index
    %c0_8 = arith.constant 0 : index
    %4 = vector.load %arg1[%c0_5, %c0_6, %c0_7, %c0_8] : memref<1x2x112x16xf32, #tpu.memory_space<vmem>>, vector<1x1x112x16xf32>
    %5 = vector.shape_cast %4 : vector<1x1x112x16xf32> to vector<112x16xf32>
    %cst = arith.constant dense<0.000000e+00> : vector<112x80xf32>
    %6 = tpu.matmul %5, %1, %cst {dimension_numbers = #tpu.dot_dimension_numbers<[1], [0], [0], [1], [0, 0, 1, 1], [], []>} : vector<112x16xf32>, vector<16x80xf32>, vector<112x80xf32> -> vector<112x80xf32>
    %7 = vector.broadcast %3 : vector<1x80xf32> to vector<112x80xf32>
    %8 = arith.addf %6, %7 : vector<112x80xf32>
    %c0_9 = arith.constant 0 : index
    %c1 = arith.constant 1 : index
    %c0_10 = arith.constant 0 : index
    %c0_11 = arith.constant 0 : index
    %9 = vector.load %arg1[%c0_9, %c1, %c0_10, %c0_11] : memref<1x2x112x16xf32, #tpu.memory_space<vmem>>, vector<1x1x112x16xf32>
    %10 = vector.shape_cast %9 : vector<1x1x112x16xf32> to vector<112x16xf32>
    %cst_12 = arith.constant dense<0.000000e+00> : vector<112x80xf32>
    %11 = tpu.matmul %10, %1, %cst_12 {dimension_numbers = #tpu.dot_dimension_numbers<[1], [0], [0], [1], [0, 0, 1, 1], [], []>} : vector<112x16xf32>, vector<16x80xf32>, vector<112x80xf32> -> vector<112x80xf32>
    %12 = vector.broadcast %3 : vector<1x80xf32> to vector<112x80xf32>
    %13 = arith.addf %11, %12 : vector<112x80xf32>
    %14 = arith.maximumf %8, %13 : vector<112x80xf32>
    %cst_13 = arith.constant 0.000000e+00 : f32
    %15 = vector.broadcast %cst_13 : f32 to vector<112x80xf32>
    %16 = arith.cmpf ogt, %14, %15 : vector<112x80xf32>
    %cst_14 = arith.constant 2.000000e-01 : f32
    %17 = vector.broadcast %cst_14 : f32 to vector<112x80xf32>
    %18 = arith.mulf %17, %14 : vector<112x80xf32>
    %19 = arith.select %16, %14, %18 : vector<112x80xi1>, vector<112x80xf32>
    %c0_15 = arith.constant 0 : index
    %c0_16 = arith.constant 0 : index
    %c0_17 = arith.constant 0 : index
    %20 = vector.load %arg4[%c0_15, %c0_16, %c0_17] : memref<1x112x80xf32, #tpu.memory_space<vmem>>, vector<1x112x80xf32>
    %21 = vector.shape_cast %20 : vector<1x112x80xf32> to vector<112x80xf32>
    %22 = vector.shape_cast %19 : vector<112x80xf32> to vector<1x112x80xf32>
    tpu.vector_store %arg4[%c0_15, %c0_16, %c0_17], %22 {strides = array<i32>} : memref<1x112x80xf32, #tpu.memory_space<vmem>>, vector<1x112x80xf32>,
    return
  }
  func.func @transform_0(%arg0: i32) -> (i32, i32, i32, i32) {
    %c0_i32 = arith.constant 0 : i32
    %c0_i32_0 = arith.constant 0 : i32
    %c0_i32_1 = arith.constant 0 : i32
    %c0_i32_2 = arith.constant 0 : i32
    return %arg0, %c0_i32, %c0_i32_0, %c0_i32_1 : i32, i32, i32, i32
  }
  func.func @transform_1(%arg0: i32) -> (i32, i32, i32) {
    %c0_i32 = arith.constant 0 : i32
    %c0_i32_0 = arith.constant 0 : i32
    %c0_i32_1 = arith.constant 0 : i32
    return %arg0, %c0_i32, %c0_i32_0 : i32, i32, i32
  }
  func.func @transform_2(%arg0: i32) -> (i32, i32, i32) {
    %c0_i32 = arith.constant 0 : i32
    %c0_i32_0 = arith.constant 0 : i32
    %c0_i32_1 = arith.constant 0 : i32
    return %arg0, %c0_i32, %c0_i32_0 : i32, i32, i32
  }
  func.func @transform_3(%arg0: i32) -> (i32, i32, i32) {
    %c0_i32 = arith.constant 0 : i32
    %c0_i32_0 = arith.constant 0 : i32
    %c0_i32_1 = arith.constant 0 : i32
    return %arg0, %c0_i32, %c0_i32_0 : i32, i32, i32
  }
}

module attributes {stable_mosaic.version = 11 : i64} {
  func.func @_conv_pool_kernel(%arg0: i32, %arg1: memref<1x2x52x400xf32, #tpu.memory_space<vmem>>, %arg2: memref<1x400x40xf32, #tpu.memory_space<vmem>>, %arg3: memref<1x1x40xf32, #tpu.memory_space<vmem>>, %arg4: memref<1x52x40xf32, #tpu.memory_space<vmem>>) attributes {dimension_semantics = [#tpu.dimension_semantics<parallel>], iteration_bounds = array<i64: 14>, scalar_prefetch = 0 : i64, scratch_operands = 0 : i64, tpu.core_type = #tpu.core_type<tc>, window_params = [{transform_indices = @transform_0, window_bounds = array<i64: 1, 2, 52, 400>}, {transform_indices = @transform_1, window_bounds = array<i64: 1, 400, 40>}, {transform_indices = @transform_2, window_bounds = array<i64: 1, 1, 40>}, {transform_indices = @transform_3, window_bounds = array<i64: 1, 52, 40>}]} {
    %c0 = arith.constant 0 : index
    %c0_0 = arith.constant 0 : index
    %c0_1 = arith.constant 0 : index
    %0 = vector.load %arg2[%c0, %c0_0, %c0_1] : memref<1x400x40xf32, #tpu.memory_space<vmem>>, vector<1x400x40xf32>
    %1 = vector.shape_cast %0 : vector<1x400x40xf32> to vector<400x40xf32>
    %c0_2 = arith.constant 0 : index
    %c0_3 = arith.constant 0 : index
    %c0_4 = arith.constant 0 : index
    %2 = vector.load %arg3[%c0_2, %c0_3, %c0_4] : memref<1x1x40xf32, #tpu.memory_space<vmem>>, vector<1x1x40xf32>
    %3 = vector.shape_cast %2 : vector<1x1x40xf32> to vector<1x40xf32>
    %c0_5 = arith.constant 0 : index
    %c0_6 = arith.constant 0 : index
    %c0_7 = arith.constant 0 : index
    %c0_8 = arith.constant 0 : index
    %4 = vector.load %arg1[%c0_5, %c0_6, %c0_7, %c0_8] : memref<1x2x52x400xf32, #tpu.memory_space<vmem>>, vector<1x1x52x400xf32>
    %5 = vector.shape_cast %4 : vector<1x1x52x400xf32> to vector<52x400xf32>
    %cst = arith.constant dense<0.000000e+00> : vector<52x40xf32>
    %6 = tpu.matmul %5, %1, %cst {dimension_numbers = #tpu.dot_dimension_numbers<[1], [0], [0], [1], [0, 0, 1, 1], [], []>} : vector<52x400xf32>, vector<400x40xf32>, vector<52x40xf32> -> vector<52x40xf32>
    %7 = vector.broadcast %3 : vector<1x40xf32> to vector<52x40xf32>
    %8 = arith.addf %6, %7 : vector<52x40xf32>
    %c0_9 = arith.constant 0 : index
    %c1 = arith.constant 1 : index
    %c0_10 = arith.constant 0 : index
    %c0_11 = arith.constant 0 : index
    %9 = vector.load %arg1[%c0_9, %c1, %c0_10, %c0_11] : memref<1x2x52x400xf32, #tpu.memory_space<vmem>>, vector<1x1x52x400xf32>
    %10 = vector.shape_cast %9 : vector<1x1x52x400xf32> to vector<52x400xf32>
    %cst_12 = arith.constant dense<0.000000e+00> : vector<52x40xf32>
    %11 = tpu.matmul %10, %1, %cst_12 {dimension_numbers = #tpu.dot_dimension_numbers<[1], [0], [0], [1], [0, 0, 1, 1], [], []>} : vector<52x400xf32>, vector<400x40xf32>, vector<52x40xf32> -> vector<52x40xf32>
    %12 = vector.broadcast %3 : vector<1x40xf32> to vector<52x40xf32>
    %13 = arith.addf %11, %12 : vector<52x40xf32>
    %14 = arith.maximumf %8, %13 : vector<52x40xf32>
    %cst_13 = arith.constant 0.000000e+00 : f32
    %15 = vector.broadcast %cst_13 : f32 to vector<52x40xf32>
    %16 = arith.cmpf ogt, %14, %15 : vector<52x40xf32>
    %cst_14 = arith.constant 2.000000e-01 : f32
    %17 = vector.broadcast %cst_14 : f32 to vector<52x40xf32>
    %18 = arith.mulf %17, %14 : vector<52x40xf32>
    %19 = arith.select %16, %14, %18 : vector<52x40xi1>, vector<52x40xf32>
    %c0_15 = arith.constant 0 : index
    %c0_16 = arith.constant 0 : index
    %c0_17 = arith.constant 0 : index
    %20 = vector.load %arg4[%c0_15, %c0_16, %c0_17] : memref<1x52x40xf32, #tpu.memory_space<vmem>>, vector<1x52x40xf32>
    %21 = vector.shape_cast %20 : vector<1x52x40xf32> to vector<52x40xf32>
    %22 = vector.shape_cast %19 : vector<52x40xf32> to vector<1x52x40xf32>
    tpu.vector_store %arg4[%c0_15, %c0_16, %c0_17], %22 {strides = array<i32>} : memref<1x52x40xf32, #tpu.memory_space<vmem>>, vector<1x52x40xf32>,
    return
  }
  func.func @transform_0(%arg0: i32) -> (i32, i32, i32, i32) {
    %c0_i32 = arith.constant 0 : i32
    %c0_i32_0 = arith.constant 0 : i32
    %c0_i32_1 = arith.constant 0 : i32
    %c0_i32_2 = arith.constant 0 : i32
    return %arg0, %c0_i32, %c0_i32_0, %c0_i32_1 : i32, i32, i32, i32
  }
  func.func @transform_1(%arg0: i32) -> (i32, i32, i32) {
    %c0_i32 = arith.constant 0 : i32
    %c0_i32_0 = arith.constant 0 : i32
    %c0_i32_1 = arith.constant 0 : i32
    return %arg0, %c0_i32, %c0_i32_0 : i32, i32, i32
  }
  func.func @transform_2(%arg0: i32) -> (i32, i32, i32) {
    %c0_i32 = arith.constant 0 : i32
    %c0_i32_0 = arith.constant 0 : i32
    %c0_i32_1 = arith.constant 0 : i32
    return %arg0, %c0_i32, %c0_i32_0 : i32, i32, i32
  }
  func.func @transform_3(%arg0: i32) -> (i32, i32, i32) {
    %c0_i32 = arith.constant 0 : i32
    %c0_i32_0 = arith.constant 0 : i32
    %c0_i32_1 = arith.constant 0 : i32
    return %arg0, %c0_i32, %c0_i32_0 : i32, i32, i32
  }
}

module attributes {stable_mosaic.version = 11 : i64} {
  func.func @_conv_pool_kernel(%arg0: i32, %arg1: memref<1x2x22x200xf32, #tpu.memory_space<vmem>>, %arg2: memref<1x200x40xf32, #tpu.memory_space<vmem>>, %arg3: memref<1x1x40xf32, #tpu.memory_space<vmem>>, %arg4: memref<1x22x40xf32, #tpu.memory_space<vmem>>) attributes {dimension_semantics = [#tpu.dimension_semantics<parallel>], iteration_bounds = array<i64: 14>, scalar_prefetch = 0 : i64, scratch_operands = 0 : i64, tpu.core_type = #tpu.core_type<tc>, window_params = [{transform_indices = @transform_0, window_bounds = array<i64: 1, 2, 22, 200>}, {transform_indices = @transform_1, window_bounds = array<i64: 1, 200, 40>}, {transform_indices = @transform_2, window_bounds = array<i64: 1, 1, 40>}, {transform_indices = @transform_3, window_bounds = array<i64: 1, 22, 40>}]} {
    %c0 = arith.constant 0 : index
    %c0_0 = arith.constant 0 : index
    %c0_1 = arith.constant 0 : index
    %0 = vector.load %arg2[%c0, %c0_0, %c0_1] : memref<1x200x40xf32, #tpu.memory_space<vmem>>, vector<1x200x40xf32>
    %1 = vector.shape_cast %0 : vector<1x200x40xf32> to vector<200x40xf32>
    %c0_2 = arith.constant 0 : index
    %c0_3 = arith.constant 0 : index
    %c0_4 = arith.constant 0 : index
    %2 = vector.load %arg3[%c0_2, %c0_3, %c0_4] : memref<1x1x40xf32, #tpu.memory_space<vmem>>, vector<1x1x40xf32>
    %3 = vector.shape_cast %2 : vector<1x1x40xf32> to vector<1x40xf32>
    %c0_5 = arith.constant 0 : index
    %c0_6 = arith.constant 0 : index
    %c0_7 = arith.constant 0 : index
    %c0_8 = arith.constant 0 : index
    %4 = vector.load %arg1[%c0_5, %c0_6, %c0_7, %c0_8] : memref<1x2x22x200xf32, #tpu.memory_space<vmem>>, vector<1x1x22x200xf32>
    %5 = vector.shape_cast %4 : vector<1x1x22x200xf32> to vector<22x200xf32>
    %cst = arith.constant dense<0.000000e+00> : vector<22x40xf32>
    %6 = tpu.matmul %5, %1, %cst {dimension_numbers = #tpu.dot_dimension_numbers<[1], [0], [0], [1], [0, 0, 1, 1], [], []>} : vector<22x200xf32>, vector<200x40xf32>, vector<22x40xf32> -> vector<22x40xf32>
    %7 = vector.broadcast %3 : vector<1x40xf32> to vector<22x40xf32>
    %8 = arith.addf %6, %7 : vector<22x40xf32>
    %c0_9 = arith.constant 0 : index
    %c1 = arith.constant 1 : index
    %c0_10 = arith.constant 0 : index
    %c0_11 = arith.constant 0 : index
    %9 = vector.load %arg1[%c0_9, %c1, %c0_10, %c0_11] : memref<1x2x22x200xf32, #tpu.memory_space<vmem>>, vector<1x1x22x200xf32>
    %10 = vector.shape_cast %9 : vector<1x1x22x200xf32> to vector<22x200xf32>
    %cst_12 = arith.constant dense<0.000000e+00> : vector<22x40xf32>
    %11 = tpu.matmul %10, %1, %cst_12 {dimension_numbers = #tpu.dot_dimension_numbers<[1], [0], [0], [1], [0, 0, 1, 1], [], []>} : vector<22x200xf32>, vector<200x40xf32>, vector<22x40xf32> -> vector<22x40xf32>
    %12 = vector.broadcast %3 : vector<1x40xf32> to vector<22x40xf32>
    %13 = arith.addf %11, %12 : vector<22x40xf32>
    %14 = arith.maximumf %8, %13 : vector<22x40xf32>
    %cst_13 = arith.constant 0.000000e+00 : f32
    %15 = vector.broadcast %cst_13 : f32 to vector<22x40xf32>
    %16 = arith.cmpf ogt, %14, %15 : vector<22x40xf32>
    %cst_14 = arith.constant 2.000000e-01 : f32
    %17 = vector.broadcast %cst_14 : f32 to vector<22x40xf32>
    %18 = arith.mulf %17, %14 : vector<22x40xf32>
    %19 = arith.select %16, %14, %18 : vector<22x40xi1>, vector<22x40xf32>
    %c0_15 = arith.constant 0 : index
    %c0_16 = arith.constant 0 : index
    %c0_17 = arith.constant 0 : index
    %20 = vector.load %arg4[%c0_15, %c0_16, %c0_17] : memref<1x22x40xf32, #tpu.memory_space<vmem>>, vector<1x22x40xf32>
    %21 = vector.shape_cast %20 : vector<1x22x40xf32> to vector<22x40xf32>
    %22 = vector.shape_cast %19 : vector<22x40xf32> to vector<1x22x40xf32>
    tpu.vector_store %arg4[%c0_15, %c0_16, %c0_17], %22 {strides = array<i32>} : memref<1x22x40xf32, #tpu.memory_space<vmem>>, vector<1x22x40xf32>,
    return
  }
  func.func @transform_0(%arg0: i32) -> (i32, i32, i32, i32) {
    %c0_i32 = arith.constant 0 : i32
    %c0_i32_0 = arith.constant 0 : i32
    %c0_i32_1 = arith.constant 0 : i32
    %c0_i32_2 = arith.constant 0 : i32
    return %arg0, %c0_i32, %c0_i32_0, %c0_i32_1 : i32, i32, i32, i32
  }
  func.func @transform_1(%arg0: i32) -> (i32, i32, i32) {
    %c0_i32 = arith.constant 0 : i32
    %c0_i32_0 = arith.constant 0 : i32
    %c0_i32_1 = arith.constant 0 : i32
    return %arg0, %c0_i32, %c0_i32_0 : i32, i32, i32
  }
  func.func @transform_2(%arg0: i32) -> (i32, i32, i32) {
    %c0_i32 = arith.constant 0 : i32
    %c0_i32_0 = arith.constant 0 : i32
    %c0_i32_1 = arith.constant 0 : i32
    return %arg0, %c0_i32, %c0_i32_0 : i32, i32, i32
  }
  func.func @transform_3(%arg0: i32) -> (i32, i32, i32) {
    %c0_i32 = arith.constant 0 : i32
    %c0_i32_0 = arith.constant 0 : i32
    %c0_i32_1 = arith.constant 0 : i32
    return %arg0, %c0_i32, %c0_i32_0 : i32, i32, i32
  }
}

module attributes {stable_mosaic.version = 11 : i64} {
  func.func @_gat_kernel(%arg0: memref<28x440xf32, #tpu.memory_space<vmem>>, %arg1: memref<28x28xf32, #tpu.memory_space<vmem>>, %arg2: memref<440x442xbf16, #tpu.memory_space<vmem>>, %arg3: memref<28x440xf32, #tpu.memory_space<vmem>>) attributes {dimension_semantics = [], scalar_prefetch = 0 : i64, scratch_operands = 0 : i64, tpu.core_type = #tpu.core_type<tc>} {
    %c0 = arith.constant 0 : index
    %c0_0 = arith.constant 0 : index
    %0 = vector.load %arg0[%c0, %c0_0] : memref<28x440xf32, #tpu.memory_space<vmem>>, vector<28x440xf32>
    %c0_1 = arith.constant 0 : index
    %c0_2 = arith.constant 0 : index
    %1 = vector.load %arg2[%c0_1, %c0_2] : memref<440x442xbf16, #tpu.memory_space<vmem>>, vector<440x442xbf16>
    %2 = arith.truncf %0 : vector<28x440xf32> to vector<28x440xbf16>
    %cst = arith.constant dense<0.000000e+00> : vector<28x442xf32>
    %3 = tpu.matmul %2, %1, %cst {dimension_numbers = #tpu.dot_dimension_numbers<[1], [0], [0], [1], [0, 0, 1, 1], [], []>} : vector<28x440xbf16>, vector<440x442xbf16>, vector<28x442xf32> -> vector<28x442xf32>
    %4 = vector.extract_strided_slice %3 {offsets = [0, 0], sizes = [28, 440], strides = [1, 1]} : vector<28x442xf32> to vector<28x440xf32>
    %5 = vector.extract_strided_slice %3 {offsets = [0, 440], sizes = [28, 1], strides = [1, 1]} : vector<28x442xf32> to vector<28x1xf32>
    %6 = vector.extract_strided_slice %3 {offsets = [0, 441], sizes = [28, 1], strides = [1, 1]} : vector<28x442xf32> to vector<28x1xf32>
    %7 = tpu.transpose %6, [1, 0] : vector<28x1xf32> -> vector<1x28xf32>
    %8 = vector.broadcast %5 : vector<28x1xf32> to vector<28x28xf32>
    %9 = vector.broadcast %7 : vector<1x28xf32> to vector<28x28xf32>
    %10 = arith.addf %8, %9 : vector<28x28xf32>
    %cst_3 = arith.constant 0.000000e+00 : f32
    %11 = vector.broadcast %cst_3 : f32 to vector<28x28xf32>
    %12 = arith.cmpf ogt, %10, %11 : vector<28x28xf32>
    %cst_4 = arith.constant 2.000000e-01 : f32
    %13 = vector.broadcast %cst_4 : f32 to vector<28x28xf32>
    %14 = arith.mulf %13, %10 : vector<28x28xf32>
    %15 = arith.select %12, %10, %14 : vector<28x28xi1>, vector<28x28xf32>
    %c0_5 = arith.constant 0 : index
    %c0_6 = arith.constant 0 : index
    %16 = vector.load %arg1[%c0_5, %c0_6] : memref<28x28xf32, #tpu.memory_space<vmem>>, vector<28x28xf32>
    %cst_7 = arith.constant 0.000000e+00 : f32
    %17 = vector.broadcast %cst_7 : f32 to vector<28x28xf32>
    %18 = arith.cmpf ogt, %16, %17 : vector<28x28xf32>
    %cst_8 = arith.constant -9.000000e+15 : f32
    %19 = vector.broadcast %cst_8 : f32 to vector<28x28xf32>
    %20 = arith.select %18, %15, %19 : vector<28x28xi1>, vector<28x28xf32>
    %cst_9 = arith.constant dense<0xFF800000> : vector<28xf32>
    %21 = vector.multi_reduction <maximumf>, %20, %cst_9 [1] : vector<28x28xf32> to vector<28xf32>
    %22 = vector.shape_cast %21 : vector<28xf32> to vector<28x1xf32>
    %23 = vector.broadcast %22 : vector<28x1xf32> to vector<28x28xf32>
    %24 = arith.subf %20, %23 : vector<28x28xf32>
    %25 = math.exp %24 : vector<28x28xf32>
    %cst_10 = arith.constant dense<0.000000e+00> : vector<28xf32>
    %26 = vector.multi_reduction <add>, %25, %cst_10 [1] : vector<28x28xf32> to vector<28xf32>
    %27 = vector.shape_cast %26 : vector<28xf32> to vector<28x1xf32>
    %28 = tpu.reciprocal %27 {approx = true} : vector<28x1xf32> -> vector<28x1xf32>
    %29 = vector.broadcast %28 : vector<28x1xf32> to vector<28x28xf32>
    %30 = arith.mulf %25, %29 : vector<28x28xf32>
    %cst_11 = arith.constant dense<0.000000e+00> : vector<28x440xf32>
    %31 = tpu.matmul %30, %4, %cst_11 {dimension_numbers = #tpu.dot_dimension_numbers<[1], [0], [0], [1], [0, 0, 1, 1], [], []>} : vector<28x28xf32>, vector<28x440xf32>, vector<28x440xf32> -> vector<28x440xf32>
    %cst_12 = arith.constant 0.000000e+00 : f32
    %32 = vector.broadcast %cst_12 : f32 to vector<28x440xf32>
    %33 = arith.cmpf ogt, %31, %32 : vector<28x440xf32>
    %cst_13 = arith.constant 0.000000e+00 : f32
    %34 = vector.broadcast %cst_13 : f32 to vector<28x440xf32>
    %35 = arith.minimumf %31, %34 : vector<28x440xf32>
    %36 = math.exp %35 : vector<28x440xf32>
    %cst_14 = arith.constant 1.000000e+00 : f32
    %37 = vector.broadcast %cst_14 : f32 to vector<28x440xf32>
    %38 = arith.subf %36, %37 : vector<28x440xf32>
    %39 = arith.select %33, %31, %38 : vector<28x440xi1>, vector<28x440xf32>
    %c0_15 = arith.constant 0 : index
    %c0_16 = arith.constant 0 : index
    %40 = vector.load %arg3[%c0_15, %c0_16] : memref<28x440xf32, #tpu.memory_space<vmem>>, vector<28x440xf32>
    tpu.vector_store %arg3[%c0_15, %c0_16], %39 {strides = array<i32>} : memref<28x440xf32, #tpu.memory_space<vmem>>, vector<28x440xf32>,
    return
  }
}

module attributes {stable_mosaic.version = 11 : i64} {
  func.func @kernel(%arg0: i32, %arg1: i32, %arg2: memref<1x2x6160xf32, #tpu.memory_space<vmem>>, %arg3: memref<1x6160x128xbf16, #tpu.memory_space<vmem>>, %arg4: memref<1x1x128xf32, #tpu.memory_space<vmem>>, %arg5: memref<1x2x128xf32, #tpu.memory_space<vmem>>) attributes {dimension_semantics = [#tpu.dimension_semantics<parallel>, #tpu.dimension_semantics<parallel>], iteration_bounds = array<i64: 1, 8>, scalar_prefetch = 0 : i64, scratch_operands = 0 : i64, tpu.core_type = #tpu.core_type<tc>, window_params = [{transform_indices = @transform_0, window_bounds = array<i64: 1, 2, 6160>}, {transform_indices = @transform_1, window_bounds = array<i64: 1, 6160, 128>}, {transform_indices = @transform_2, window_bounds = array<i64: 1, 1, 128>}, {transform_indices = @transform_3, window_bounds = array<i64: 1, 2, 128>}]} {
    %c0 = arith.constant 0 : index
    %c0_0 = arith.constant 0 : index
    %c0_1 = arith.constant 0 : index
    %0 = vector.load %arg2[%c0, %c0_0, %c0_1] : memref<1x2x6160xf32, #tpu.memory_space<vmem>>, vector<1x2x6160xf32>
    %1 = vector.shape_cast %0 : vector<1x2x6160xf32> to vector<2x6160xf32>
    %c0_2 = arith.constant 0 : index
    %c0_3 = arith.constant 0 : index
    %c0_4 = arith.constant 0 : index
    %2 = vector.load %arg3[%c0_2, %c0_3, %c0_4] : memref<1x6160x128xbf16, #tpu.memory_space<vmem>>, vector<1x6160x128xbf16>
    %3 = vector.shape_cast %2 : vector<1x6160x128xbf16> to vector<6160x128xbf16>
    %4 = arith.truncf %1 : vector<2x6160xf32> to vector<2x6160xbf16>
    %cst = arith.constant dense<0.000000e+00> : vector<2x128xf32>
    %5 = tpu.matmul %4, %3, %cst {dimension_numbers = #tpu.dot_dimension_numbers<[1], [0], [0], [1], [0, 0, 1, 1], [], []>} : vector<2x6160xbf16>, vector<6160x128xbf16>, vector<2x128xf32> -> vector<2x128xf32>
    %c0_5 = arith.constant 0 : index
    %c0_6 = arith.constant 0 : index
    %c0_7 = arith.constant 0 : index
    %6 = vector.load %arg4[%c0_5, %c0_6, %c0_7] : memref<1x1x128xf32, #tpu.memory_space<vmem>>, vector<1x1x128xf32>
    %7 = vector.shape_cast %6 : vector<1x1x128xf32> to vector<1x128xf32>
    %8 = vector.broadcast %7 : vector<1x128xf32> to vector<2x128xf32>
    %9 = arith.addf %5, %8 : vector<2x128xf32>
    %cst_8 = arith.constant 0.000000e+00 : f32
    %10 = vector.broadcast %cst_8 : f32 to vector<2x128xf32>
    %11 = arith.maximumf %9, %10 : vector<2x128xf32>
    %c0_9 = arith.constant 0 : index
    %c0_10 = arith.constant 0 : index
    %c0_11 = arith.constant 0 : index
    %12 = vector.load %arg5[%c0_9, %c0_10, %c0_11] : memref<1x2x128xf32, #tpu.memory_space<vmem>>, vector<1x2x128xf32>
    %13 = vector.shape_cast %12 : vector<1x2x128xf32> to vector<2x128xf32>
    %14 = vector.shape_cast %11 : vector<2x128xf32> to vector<1x2x128xf32>
    tpu.vector_store %arg5[%c0_9, %c0_10, %c0_11], %14 {strides = array<i32>} : memref<1x2x128xf32, #tpu.memory_space<vmem>>, vector<1x2x128xf32>,
    return
  }
  func.func @transform_0(%arg0: i32, %arg1: i32) -> (i32, i32, i32) {
    %c0_i32 = arith.constant 0 : i32
    %c0_i32_0 = arith.constant 0 : i32
    %c0_i32_1 = arith.constant 0 : i32
    return %arg0, %c0_i32, %c0_i32_0 : i32, i32, i32
  }
  func.func @transform_1(%arg0: i32, %arg1: i32) -> (i32, i32, i32) {
    %c0_i32 = arith.constant 0 : i32
    %c0_i32_0 = arith.constant 0 : i32
    return %arg0, %c0_i32, %arg1 : i32, i32, i32
  }
  func.func @transform_2(%arg0: i32, %arg1: i32) -> (i32, i32, i32) {
    %c0_i32 = arith.constant 0 : i32
    %c0_i32_0 = arith.constant 0 : i32
    return %arg0, %c0_i32, %arg1 : i32, i32, i32
  }
  func.func @transform_3(%arg0: i32, %arg1: i32) -> (i32, i32, i32) {
    %c0_i32 = arith.constant 0 : i32
    %c0_i32_0 = arith.constant 0 : i32
    return %arg0, %c0_i32, %arg1 : i32, i32, i32
  }
}

module attributes {stable_mosaic.version = 11 : i64} {
  func.func @kernel(%arg0: i32, %arg1: i32, %arg2: memref<1x2x1024xf32, #tpu.memory_space<vmem>>, %arg3: memref<1x1024x128xbf16, #tpu.memory_space<vmem>>, %arg4: memref<1x1x128xf32, #tpu.memory_space<vmem>>, %arg5: memref<1x2x128xf32, #tpu.memory_space<vmem>>) attributes {dimension_semantics = [#tpu.dimension_semantics<parallel>, #tpu.dimension_semantics<parallel>], iteration_bounds = array<i64: 1, 2>, scalar_prefetch = 0 : i64, scratch_operands = 0 : i64, tpu.core_type = #tpu.core_type<tc>, window_params = [{transform_indices = @transform_0, window_bounds = array<i64: 1, 2, 1024>}, {transform_indices = @transform_1, window_bounds = array<i64: 1, 1024, 128>}, {transform_indices = @transform_2, window_bounds = array<i64: 1, 1, 128>}, {transform_indices = @transform_3, window_bounds = array<i64: 1, 2, 128>}]} {
    %c0 = arith.constant 0 : index
    %c0_0 = arith.constant 0 : index
    %c0_1 = arith.constant 0 : index
    %0 = vector.load %arg2[%c0, %c0_0, %c0_1] : memref<1x2x1024xf32, #tpu.memory_space<vmem>>, vector<1x2x1024xf32>
    %1 = vector.shape_cast %0 : vector<1x2x1024xf32> to vector<2x1024xf32>
    %c0_2 = arith.constant 0 : index
    %c0_3 = arith.constant 0 : index
    %c0_4 = arith.constant 0 : index
    %2 = vector.load %arg3[%c0_2, %c0_3, %c0_4] : memref<1x1024x128xbf16, #tpu.memory_space<vmem>>, vector<1x1024x128xbf16>
    %3 = vector.shape_cast %2 : vector<1x1024x128xbf16> to vector<1024x128xbf16>
    %4 = arith.truncf %1 : vector<2x1024xf32> to vector<2x1024xbf16>
    %cst = arith.constant dense<0.000000e+00> : vector<2x128xf32>
    %5 = tpu.matmul %4, %3, %cst {dimension_numbers = #tpu.dot_dimension_numbers<[1], [0], [0], [1], [0, 0, 1, 1], [], []>} : vector<2x1024xbf16>, vector<1024x128xbf16>, vector<2x128xf32> -> vector<2x128xf32>
    %c0_5 = arith.constant 0 : index
    %c0_6 = arith.constant 0 : index
    %c0_7 = arith.constant 0 : index
    %6 = vector.load %arg4[%c0_5, %c0_6, %c0_7] : memref<1x1x128xf32, #tpu.memory_space<vmem>>, vector<1x1x128xf32>
    %7 = vector.shape_cast %6 : vector<1x1x128xf32> to vector<1x128xf32>
    %8 = vector.broadcast %7 : vector<1x128xf32> to vector<2x128xf32>
    %9 = arith.addf %5, %8 : vector<2x128xf32>
    %cst_8 = arith.constant 0.000000e+00 : f32
    %10 = vector.broadcast %cst_8 : f32 to vector<2x128xf32>
    %11 = arith.maximumf %9, %10 : vector<2x128xf32>
    %c0_9 = arith.constant 0 : index
    %c0_10 = arith.constant 0 : index
    %c0_11 = arith.constant 0 : index
    %12 = vector.load %arg5[%c0_9, %c0_10, %c0_11] : memref<1x2x128xf32, #tpu.memory_space<vmem>>, vector<1x2x128xf32>
    %13 = vector.shape_cast %12 : vector<1x2x128xf32> to vector<2x128xf32>
    %14 = vector.shape_cast %11 : vector<2x128xf32> to vector<1x2x128xf32>
    tpu.vector_store %arg5[%c0_9, %c0_10, %c0_11], %14 {strides = array<i32>} : memref<1x2x128xf32, #tpu.memory_space<vmem>>, vector<1x2x128xf32>,
    return
  }
  func.func @transform_0(%arg0: i32, %arg1: i32) -> (i32, i32, i32) {
    %c0_i32 = arith.constant 0 : i32
    %c0_i32_0 = arith.constant 0 : i32
    %c0_i32_1 = arith.constant 0 : i32
    return %arg0, %c0_i32, %c0_i32_0 : i32, i32, i32
  }
  func.func @transform_1(%arg0: i32, %arg1: i32) -> (i32, i32, i32) {
    %c0_i32 = arith.constant 0 : i32
    %c0_i32_0 = arith.constant 0 : i32
    return %arg0, %c0_i32, %arg1 : i32, i32, i32
  }
  func.func @transform_2(%arg0: i32, %arg1: i32) -> (i32, i32, i32) {
    %c0_i32 = arith.constant 0 : i32
    %c0_i32_0 = arith.constant 0 : i32
    return %arg0, %c0_i32, %arg1 : i32, i32, i32
  }
  func.func @transform_3(%arg0: i32, %arg1: i32) -> (i32, i32, i32) {
    %c0_i32 = arith.constant 0 : i32
    %c0_i32_0 = arith.constant 0 : i32
    return %arg0, %c0_i32, %arg1 : i32, i32, i32
  }
}

module attributes {stable_mosaic.version = 11 : i64} {
  func.func @kernel(%arg0: i32, %arg1: i32, %arg2: memref<1x2x256xf32, #tpu.memory_space<vmem>>, %arg3: memref<1x256x128xf32, #tpu.memory_space<vmem>>, %arg4: memref<1x1x128xf32, #tpu.memory_space<vmem>>, %arg5: memref<1x2x128xf32, #tpu.memory_space<vmem>>) attributes {dimension_semantics = [#tpu.dimension_semantics<parallel>, #tpu.dimension_semantics<parallel>], iteration_bounds = array<i64: 1, 1>, scalar_prefetch = 0 : i64, scratch_operands = 0 : i64, tpu.core_type = #tpu.core_type<tc>, window_params = [{transform_indices = @transform_0, window_bounds = array<i64: 1, 2, 256>}, {transform_indices = @transform_1, window_bounds = array<i64: 1, 256, 128>}, {transform_indices = @transform_2, window_bounds = array<i64: 1, 1, 128>}, {transform_indices = @transform_3, window_bounds = array<i64: 1, 2, 128>}]} {
    %c0 = arith.constant 0 : index
    %c0_0 = arith.constant 0 : index
    %c0_1 = arith.constant 0 : index
    %0 = vector.load %arg2[%c0, %c0_0, %c0_1] : memref<1x2x256xf32, #tpu.memory_space<vmem>>, vector<1x2x256xf32>
    %1 = vector.shape_cast %0 : vector<1x2x256xf32> to vector<2x256xf32>
    %c0_2 = arith.constant 0 : index
    %c0_3 = arith.constant 0 : index
    %c0_4 = arith.constant 0 : index
    %2 = vector.load %arg3[%c0_2, %c0_3, %c0_4] : memref<1x256x128xf32, #tpu.memory_space<vmem>>, vector<1x256x128xf32>
    %3 = vector.shape_cast %2 : vector<1x256x128xf32> to vector<256x128xf32>
    %cst = arith.constant dense<0.000000e+00> : vector<2x128xf32>
    %4 = tpu.matmul %1, %3, %cst {dimension_numbers = #tpu.dot_dimension_numbers<[1], [0], [0], [1], [0, 0, 1, 1], [], []>} : vector<2x256xf32>, vector<256x128xf32>, vector<2x128xf32> -> vector<2x128xf32>
    %c0_5 = arith.constant 0 : index
    %c0_6 = arith.constant 0 : index
    %c0_7 = arith.constant 0 : index
    %5 = vector.load %arg4[%c0_5, %c0_6, %c0_7] : memref<1x1x128xf32, #tpu.memory_space<vmem>>, vector<1x1x128xf32>
    %6 = vector.shape_cast %5 : vector<1x1x128xf32> to vector<1x128xf32>
    %7 = vector.broadcast %6 : vector<1x128xf32> to vector<2x128xf32>
    %8 = arith.addf %4, %7 : vector<2x128xf32>
    %c0_8 = arith.constant 0 : index
    %c0_9 = arith.constant 0 : index
    %c0_10 = arith.constant 0 : index
    %9 = vector.load %arg5[%c0_8, %c0_9, %c0_10] : memref<1x2x128xf32, #tpu.memory_space<vmem>>, vector<1x2x128xf32>
    %10 = vector.shape_cast %9 : vector<1x2x128xf32> to vector<2x128xf32>
    %11 = vector.shape_cast %8 : vector<2x128xf32> to vector<1x2x128xf32>
    tpu.vector_store %arg5[%c0_8, %c0_9, %c0_10], %11 {strides = array<i32>} : memref<1x2x128xf32, #tpu.memory_space<vmem>>, vector<1x2x128xf32>,
    return
  }
  func.func @transform_0(%arg0: i32, %arg1: i32) -> (i32, i32, i32) {
    %c0_i32 = arith.constant 0 : i32
    %c0_i32_0 = arith.constant 0 : i32
    %c0_i32_1 = arith.constant 0 : i32
    return %arg0, %c0_i32, %c0_i32_0 : i32, i32, i32
  }
  func.func @transform_1(%arg0: i32, %arg1: i32) -> (i32, i32, i32) {
    %c0_i32 = arith.constant 0 : i32
    %c0_i32_0 = arith.constant 0 : i32
    return %arg0, %c0_i32, %arg1 : i32, i32, i32
  }
  func.func @transform_2(%arg0: i32, %arg1: i32) -> (i32, i32, i32) {
    %c0_i32 = arith.constant 0 : i32
    %c0_i32_0 = arith.constant 0 : i32
    return %arg0, %c0_i32, %arg1 : i32, i32, i32
  }
  func.func @transform_3(%arg0: i32, %arg1: i32) -> (i32, i32, i32) {
    %c0_i32 = arith.constant 0 : i32
    %c0_i32_0 = arith.constant 0 : i32
    return %arg0, %c0_i32, %arg1 : i32, i32, i32
  }
}

</mosaic_0001>

<bundles_post_ra>
// kernel: graphnet_forward.8
= control target key start
LH: loop header
LB: loop body
LE: loop exit
PB: predicated region body
PF: predicated region fallthrough
CT: control target
= control target key end

     0   :  { %s687_s12 = smov 0   ;;  %s839_s0 = inlined_call_operand.vmem [shape: f32[14,2,112,16], index: 0, kind: input, shape index: {}]   ;;  %s840_s1 = inlined_call_operand.vmem [shape: f32[14,16,80], index: 1, kind: input, shape index: {}]   ;;  %s841_s2 = inlined_call_operand.vmem [shape: f32[14,1,80], index: 2, kind: input, shape index: {}]   ;;  %s842_s3 = inlined_call_operand.vmem [shape: f32[14,112,80], index: 3, kind: output, shape index: {}]  }
   0x1 LB: > { %s590_s13 = sadd.s32 4294967295, %s665_s12   ;;  %p594_p0 = scmp.ge.s32.totalorder %s665_s12, 1  ;;  %s665_s12 = sphi %s687_s12, %s13_s12  }
   0x2   : > { %p155_p1 = scmp.lt.s32.totalorder %s665_s12, 15 }
   0x4   : > { %p156_p2 = pnand %p594_p0, %p155_p1 }
   0x5   : > { %p187_p3 = scmp.lt.s32.totalorder (!%p156_p2), %s590_s13, 13 }
   0x6   : > { %159 = sbr.rel (%p156_p2) target bundleno = 206 (0xce), region = 32 }
   0xb   : > { %s844_s13 = smov (!%p187_p3, %s590_s13), 13  ;;  %vm225_vm0 = vcmask 130048   ;;  %vm499_vm1 = vcmask 654336  }
   0xc   : > { %s648_s14 = smul.u32 224, %s844_s13  ;;  %s643_s15 = sshll.u32 %s844_s13, 4 }
   0xd   : > { %s196_s18 = scalar_lea.vmem %s840_s1, %s643_s15  ;;  %s199_s21 = scalar_lea.vmem %s841_s2, %s844_s13 }
   0xe   : > { %s709_s24 = scalar_lea.vmem %s839_s0, %s648_s14  ;;  %v206_v0 = vld [vmem:[%s196_s18 + $0x8] sm:$0xff]  ;;  %v205_v1 = vld [vmem:[%s196_s18] sm:$0xff]  ;;  %s649_s27 = smul.u32 112, %s844_s13 }
   0xf   : > { %644 = vmatpush.msra.mxu2 %v206_v0  ;;  %646 = vmatpush.msra.mxu3 %v206_v0  ;;  %v215_v2 = vld [vmem:[%s709_s24 + $0x38] sm:$0xff]  ;;  %v620_v3 = vld [vmem:[%s709_s24 + $0xa8] sm:$0xff]  ;;  %v208_v4 = vld [vmem:[%s709_s24] sm:$0xff] }
  0x10   : > { %282 = vmatpush.msra.mxu0 %v206_v0  ;;  %398 = vmatpush.msra.mxu1 %v206_v0  ;;  %v613_v5 = vld [vmem:[%s709_s24 + $0x70] sm:$0xff]  ;;  %v216_v6 = vld [vmem:[%s709_s24 + $0x40] sm:$0xff]  ;;  %v209_v8 = vld [vmem:[%s709_s24 + $0x8] sm:$0xff]  ;;  %s780_s30 = scalar_lea.vmem %s842_s3, %s649_s27 }
  0x11   : > { %645 = vmatpush.msra.mxu2 %v205_v1  ;;  %647 = vmatpush.msra.mxu3 %v205_v1  ;;  %v621_v7 = vld [vmem:[%s709_s24 + $0xb0] sm:$0xff]  ;;  %v614_v9 = vld [vmem:[%s709_s24 + $0x78] sm:$0xff]  ;;  %v217_v10 = vld [vmem:[%s709_s24 + $0x48] sm:$0xff] }
  0x12   : > { %606 = vmatmul.msk.f32.vlgmr.msra.gmra.mxu2 %vm225_vm0, %v215_v2  ;;  %634 = vmatmul.msk.f32.vlgmr.msra.gmra.mxu3 %vm225_vm0, %v620_v3  ;;  %v622_v11 = vld [vmem:[%s709_s24 + $0xb8] sm:$0xff]  ;;  %v210_v12 = vld [vmem:[%s709_s24 + $0x10] sm:$0xff]  ;;  %v615_v13 = vld [vmem:[%s709_s24 + $0x80] sm:$0xff] }
  0x13   : > { %283 = vmatpush.msra.mxu0 %v205_v1  ;;  %399 = vmatpush.msra.mxu1 %v205_v1  ;;  %v218_v14 = vld [vmem:[%s709_s24 + $0x50] sm:$0xff]  ;;  %v623_v15 = vld [vmem:[%s709_s24 + $0xc0] sm:$0xff]  ;;  %v211_v16 = vld [vmem:[%s709_s24 + $0x18] sm:$0xff] }
  0x14   : > { %599 = vmatmul.msk.f32.vlgmr.msra.gmra.mxu0 %vm225_vm0, %v208_v4  ;;  %627 = vmatmul.msk.f32.vlgmr.msra.gmra.mxu1 %vm225_vm0, %v613_v5  ;;  %v616_v17 = vld [vmem:[%s709_s24 + $0x88] sm:$0xff]  ;;  %v219_v18 = vld [vmem:[%s709_s24 + $0x58] sm:$0xff]  ;;  %v212_v20 = vld [vmem:[%s709_s24 + $0x20] sm:$0xff] }
  0x15   : > { %v624_v19 = vld [vmem:[%s709_s24 + $0xc8] sm:$0xff]  ;;  %v617_v21 = vld [vmem:[%s709_s24 + $0x90] sm:$0xff]  ;;  %v220_v22 = vld [vmem:[%s709_s24 + $0x60] sm:$0xff] }
  0x16   : > { %v625_v23 = vld [vmem:[%s709_s24 + $0xd0] sm:$0xff]  ;;  %v213_v24 = vld [vmem:[%s709_s24 + $0x28] sm:$0xff]  ;;  %v618_v25 = vld [vmem:[%s709_s24 + $0x98] sm:$0xff] }
  0x17   : > { %v221_v26 = vld [vmem:[%s709_s24 + $0x68] sm:$0xff]  ;;  %v626_v27 = vld [vmem:[%s709_s24 + $0xd8] sm:$0xff]  ;;  %v214_v28 = vld [vmem:[%s709_s24 + $0x30] sm:$0xff] }
  0x18   : > { %v619_v29 = vld [vmem:[%s709_s24 + $0xa0] sm:$0xff] }
  0x19   : > { %v772_v30 = vld [vmem:[%s199_s21] ss:$0 sm:$0xff] }
  0x1a   : > { %607 = vmatmul.msk.f32.gmra.mxu2 %vm225_vm0, %v216_v6  ;;  %635 = vmatmul.msk.f32.gmra.mxu3 %vm225_vm0, %v621_v7 }
  0x1c   : > { %600 = vmatmul.msk.f32.gmra.mxu0 %vm225_vm0, %v209_v8  ;;  %628 = vmatmul.msk.f32.gmra.mxu1 %vm225_vm0, %v614_v9 }
  0x22   : > { %608 = vmatmul.msk.f32.gmra.mxu2 %vm225_vm0, %v217_v10  ;;  %636 = vmatmul.msk.f32.gmra.mxu3 %vm225_vm0, %v622_v11 }
  0x24   : > { %601 = vmatmul.msk.f32.gmra.mxu0 %vm225_vm0, %v210_v12  ;;  %629 = vmatmul.msk.f32.gmra.mxu1 %vm225_vm0, %v615_v13 }
  0x2a   : > { %609 = vmatmul.msk.f32.gmra.mxu2 %vm225_vm0, %v218_v14  ;;  %637 = vmatmul.msk.f32.gmra.mxu3 %vm225_vm0, %v623_v15 }
  0x2c   : > { %602 = vmatmul.msk.f32.gmra.mxu0 %vm225_vm0, %v211_v16  ;;  %630 = vmatmul.msk.f32.gmra.mxu1 %vm225_vm0, %v616_v17 }
  0x32   : > { %610 = vmatmul.msk.f32.gmra.mxu2 %vm225_vm0, %v219_v18  ;;  %638 = vmatmul.msk.f32.gmra.mxu3 %vm225_vm0, %v624_v19 }
  0x34   : > { %603 = vmatmul.msk.f32.gmra.mxu0 %vm225_vm0, %v212_v20  ;;  %631 = vmatmul.msk.f32.gmra.mxu1 %vm225_vm0, %v617_v21 }
  0x3a   : > { %611 = vmatmul.msk.f32.gmra.mxu2 %vm225_vm0, %v220_v22  ;;  %639 = vmatmul.msk.f32.gmra.mxu3 %vm225_vm0, %v625_v23 }
  0x3c   : > { %604 = vmatmul.msk.f32.gmra.mxu0 %vm225_vm0, %v213_v24  ;;  %632 = vmatmul.msk.f32.gmra.mxu1 %vm225_vm0, %v618_v25 }
  0x42   : > { %612 = vmatmul.msk.f32.gmra.mxu2 %vm225_vm0, %v221_v26  ;;  %640 = vmatmul.msk.f32.gmra.mxu3 %vm225_vm0, %v626_v27 }
  0x44   : > { %605 = vmatmul.msk.f32.gmra.mxu0 %vm225_vm0, %v214_v28  ;;  %633 = vmatmul.msk.f32.gmra.mxu1 %vm225_vm0, %v619_v29 }
  0x91   : > { %v285_v31 = vpop.f32.mrf.mxu0  ;;  %v401_v32 = vpop.f32.mrf.mxu1 }
  0x92   : > { %v286_v33 = vadd.f32 %v772_v30, %v285_v31  ;;  %v402_v34 = vadd.f32 %v772_v30, %v401_v32 }
  0x94   : > { %v443_v35 = vmax.f32 %v286_v33, %v402_v34 }
  0x95   : > { %v306_v36 = vpop.f32.mrf.mxu2  ;;  %v422_v37 = vpop.f32.mrf.mxu3 }
  0x96   : > { %vm457_vm2 = vcmp.gt.f32.partialorder %v443_v35, 0.0  ;;  %v471_v38 = vmul.f32 0.2, %v443_v35  ;;  %v307_v39 = vadd.f32 %v772_v30, %v306_v36  ;;  %v423_v40 = vadd.f32 %v772_v30, %v422_v37 }
  0x98   : > { %v485_v41 = vsel %vm457_vm2, %v443_v35, %v471_v38  ;;  %v450_v42 = vmax.f32 %v307_v39, %v423_v40 }
  0x99   : > { %500 = vst.msk [vmem:[%s780_s30] sm:$0xff] %vm499_vm1, %v485_v41  ;;  %v288_v43 = vpop.f32.mrf.mxu0  ;;  %v404_v44 = vpop.f32.mrf.mxu1 }
  0x9a   : > { %vm464_vm3 = vcmp.gt.f32.partialorder %v450_v42, 0.0  ;;  %v478_v45 = vmul.f32 0.2, %v450_v42  ;;  %v289_v46 = vadd.f32 %v772_v30, %v288_v43  ;;  %v405_v47 = vadd.f32 %v772_v30, %v404_v44 }
  0x9c   : > { %v492_v48 = vsel %vm464_vm3, %v450_v42, %v478_v45  ;;  %v444_v49 = vmax.f32 %v289_v46, %v405_v47 }
  0x9d   : > { %507 = vst.msk [vmem:[%s780_s30 + $0x38] sm:$0xff] %vm499_vm1, %v492_v48  ;;  %v309_v50 = vpop.f32.mrf.mxu2  ;;  %v425_v51 = vpop.f32.mrf.mxu3 }
  0x9e   : > { %vm458_vm4 = vcmp.gt.f32.partialorder %v444_v49, 0.0  ;;  %v472_v52 = vmul.f32 0.2, %v444_v49  ;;  %v310_v53 = vadd.f32 %v772_v30, %v309_v50  ;;  %v426_v54 = vadd.f32 %v772_v30, %v425_v51 }
  0xa0   : > { %v486_v55 = vsel %vm458_vm4, %v444_v49, %v472_v52  ;;  %v451_v56 = vmax.f32 %v310_v53, %v426_v54 }
  0xa1   : > { %501 = vst.msk [vmem:[%s780_s30 + $0x8] sm:$0xff] %vm499_vm1, %v486_v55  ;;  %v291_v57 = vpop.f32.mrf.mxu0  ;;  %v407_v58 = vpop.f32.mrf.mxu1 }
  0xa2   : > { %vm465_vm5 = vcmp.gt.f32.partialorder %v451_v56, 0.0  ;;  %v479_v59 = vmul.f32 0.2, %v451_v56  ;;  %v292_v60 = vadd.f32 %v772_v30, %v291_v57  ;;  %v408_v61 = vadd.f32 %v772_v30, %v407_v58 }
  0xa4   : > { %v493_v62 = vsel %vm465_vm5, %v451_v56, %v479_v59  ;;  %v445_v63 = vmax.f32 %v292_v60, %v408_v61 }
  0xa5   : > { %508 = vst.msk [vmem:[%s780_s30 + $0x40] sm:$0xff] %vm499_vm1, %v493_v62  ;;  %v312_v0 = vpop.f32.mrf.mxu2  ;;  %v428_v1 = vpop.f32.mrf.mxu3 }
  0xa6   : > { %vm459_vm6 = vcmp.gt.f32.partialorder %v445_v63, 0.0  ;;  %v473_v2 = vmul.f32 0.2, %v445_v63  ;;  %v313_v3 = vadd.f32 %v772_v30, %v312_v0  ;;  %v429_v4 = vadd.f32 %v772_v30, %v428_v1 }
  0xa8   : > { %v487_v5 = vsel %vm459_vm6, %v445_v63, %v473_v2  ;;  %v452_v6 = vmax.f32 %v313_v3, %v429_v4 }
  0xa9   : > { %502 = vst.msk [vmem:[%s780_s30 + $0x10] sm:$0xff] %vm499_vm1, %v487_v5  ;;  %v294_v7 = vpop.f32.mrf.mxu0  ;;  %v410_v8 = vpop.f32.mrf.mxu1 }
  0xaa   : > { %vm466_vm7 = vcmp.gt.f32.partialorder %v452_v6, 0.0  ;;  %v480_v9 = vmul.f32 0.2, %v452_v6  ;;  %v295_v10 = vadd.f32 %v772_v30, %v294_v7  ;;  %v411_v11 = vadd.f32 %v772_v30, %v410_v8 }
  0xac   : > { %v494_v12 = vsel %vm466_vm7, %v452_v6, %v480_v9  ;;  %v446_v13 = vmax.f32 %v295_v10, %v411_v11 }
  0xad   : > { %509 = vst.msk [vmem:[%s780_s30 + $0x48] sm:$0xff] %vm499_vm1, %v494_v12  ;;  %v315_v14 = vpop.f32.mrf.mxu2  ;;  %v431_v15 = vpop.f32.mrf.mxu3 }
  0xae   : > { %vm460_vm8 = vcmp.gt.f32.partialorder %v446_v13, 0.0  ;;  %v474_v16 = vmul.f32 0.2, %v446_v13  ;;  %v316_v17 = vadd.f32 %v772_v30, %v315_v14  ;;  %v432_v18 = vadd.f32 %v772_v30, %v431_v15 }
  0xb0   : > { %v488_v19 = vsel %vm460_vm8, %v446_v13, %v474_v16  ;;  %v453_v20 = vmax.f32 %v316_v17, %v432_v18 }
  0xb1   : > { %503 = vst.msk [vmem:[%s780_s30 + $0x18] sm:$0xff] %vm499_vm1, %v488_v19  ;;  %v297_v21 = vpop.f32.mrf.mxu0  ;;  %v413_v22 = vpop.f32.mrf.mxu1 }
  0xb2   : > { %vm467_vm9 = vcmp.gt.f32.partialorder %v453_v20, 0.0  ;;  %v481_v23 = vmul.f32 0.2, %v453_v20  ;;  %v298_v24 = vadd.f32 %v772_v30, %v297_v21  ;;  %v414_v25 = vadd.f32 %v772_v30, %v413_v22 }
  0xb4   : > { %v495_v26 = vsel %vm467_vm9, %v453_v20, %v481_v23  ;;  %v447_v27 = vmax.f32 %v298_v24, %v414_v25 }
  0xb5   : > { %510 = vst.msk [vmem:[%s780_s30 + $0x50] sm:$0xff] %vm499_vm1, %v495_v26  ;;  %v318_v28 = vpop.f32.mrf.mxu2  ;;  %v434_v29 = vpop.f32.mrf.mxu3 }
  0xb6   : > { %vm461_vm10 = vcmp.gt.f32.partialorder %v447_v27, 0.0  ;;  %v475_v31 = vmul.f32 0.2, %v447_v27  ;;  %v319_v32 = vadd.f32 %v772_v30, %v318_v28  ;;  %v435_v33 = vadd.f32 %v772_v30, %v434_v29 }
  0xb8   : > { %v489_v34 = vsel %vm461_vm10, %v447_v27, %v475_v31  ;;  %v454_v35 = vmax.f32 %v319_v32, %v435_v33 }
  0xb9   : > { %504 = vst.msk [vmem:[%s780_s30 + $0x20] sm:$0xff] %vm499_vm1, %v489_v34  ;;  %v300_v36 = vpop.f32.mrf.mxu0  ;;  %v416_v37 = vpop.f32.mrf.mxu1 }
  0xba   : > { %vm468_vm11 = vcmp.gt.f32.partialorder %v454_v35, 0.0  ;;  %v482_v38 = vmul.f32 0.2, %v454_v35  ;;  %v301_v39 = vadd.f32 %v772_v30, %v300_v36  ;;  %v417_v40 = vadd.f32 %v772_v30, %v416_v37 }
  0xbc   : > { %v496_v41 = vsel %vm468_vm11, %v454_v35, %v482_v38  ;;  %v448_v42 = vmax.f32 %v301_v39, %v417_v40 }
  0xbd   : > { %511 = vst.msk [vmem:[%s780_s30 + $0x58] sm:$0xff] %vm499_vm1, %v496_v41  ;;  %v321_v43 = vpop.f32.mrf.mxu2  ;;  %v437_v44 = vpop.f32.mrf.mxu3 }
  0xbe   : > { %vm462_vm12 = vcmp.gt.f32.partialorder %v448_v42, 0.0  ;;  %v476_v45 = vmul.f32 0.2, %v448_v42  ;;  %v322_v46 = vadd.f32 %v772_v30, %v321_v43  ;;  %v438_v47 = vadd.f32 %v772_v30, %v437_v44 }
  0xc0   : > { %v490_v48 = vsel %vm462_vm12, %v448_v42, %v476_v45  ;;  %v455_v49 = vmax.f32 %v322_v46, %v438_v47 }
  0xc1   : > { %505 = vst.msk [vmem:[%s780_s30 + $0x28] sm:$0xff] %vm499_vm1, %v490_v48  ;;  %v303_v50 = vpop.f32.mrf.mxu0  ;;  %v419_v51 = vpop.f32.mrf.mxu1 }
  0xc2   : > { %vm469_vm13 = vcmp.gt.f32.partialorder %v455_v49, 0.0  ;;  %v483_v52 = vmul.f32 0.2, %v455_v49  ;;  %v304_v53 = vadd.f32 %v772_v30, %v303_v50  ;;  %v420_v54 = vadd.f32 %v772_v30, %v419_v51 }
  0xc4   : > { %v497_v55 = vsel %vm469_vm13, %v455_v49, %v483_v52  ;;  %v449_v56 = vmax.f32 %v304_v53, %v420_v54 }
  0xc5   : > { %512 = vst.msk [vmem:[%s780_s30 + $0x60] sm:$0xff] %vm499_vm1, %v497_v55  ;;  %v324_v57 = vpop.f32.mrf.mxu2  ;;  %v440_v58 = vpop.f32.mrf.mxu3 }
  0xc6   : > { %vm463_vm14 = vcmp.gt.f32.partialorder %v449_v56, 0.0  ;;  %v477_v59 = vmul.f32 0.2, %v449_v56  ;;  %v325_v60 = vadd.f32 %v772_v30, %v324_v57  ;;  %v441_v61 = vadd.f32 %v772_v30, %v440_v58 }
  0xc8   : > { %v491_v62 = vsel %vm463_vm14, %v449_v56, %v477_v59  ;;  %v456_v63 = vmax.f32 %v325_v60, %v441_v61 }
  0xc9   : > { %506 = vst.msk [vmem:[%s780_s30 + $0x30] sm:$0xff] %vm499_vm1, %v491_v62 }
  0xca   : > { %vm470_vm15 = vcmp.gt.f32.partialorder %v456_v63, 0.0  ;;  %v484_v0 = vmul.f32 0.2, %v456_v63 }
  0xcc   : > { %v498_v1 = vsel %vm470_vm15, %v456_v63, %v484_v0 }
  0xcd   : > { %513 = vst.msk [vmem:[%s780_s30 + $0x68] sm:$0xff] %vm499_vm1, %v498_v1 }
  0xce PF: > { %s13_s12 = sadd.s32 1, %s665_s12  }
  0xcf   : > { %p10_p4 = scmp.ge.s32.totalorder %s13_s12, 16  }
  0xd1   :  { %12 = sbr.rel (!%p10_p4) target bundleno = 1 (0x1), region = 69 }

// kernel: graphnet_forward.9
= control target key start
LH: loop header
LB: loop body
LE: loop exit
PB: predicated region body
PF: predicated region fallthrough
CT: control target
= control target key end

     0   :  { %s868_s12 = smov 0   ;;  %s1305_s0 = inlined_call_operand.vmem [shape: f32[14,2,52,400], index: 0, kind: input, shape index: {}]   ;;  %s1306_s1 = inlined_call_operand.vmem [shape: f32[14,400,40], index: 1, kind: input, shape index: {}]   ;;  %s1307_s2 = inlined_call_operand.vmem [shape: f32[14,1,40], index: 2, kind: input, shape index: {}]   ;;  %s1308_s3 = inlined_call_operand.vmem [shape: f32[14,52,40], index: 3, kind: output, shape index: {}]  }
   0x1 LB: > { %s776_s13 = sadd.s32 4294967295, %s846_s12   ;;  %p780_p0 = scmp.ge.s32.totalorder %s846_s12, 1  ;;  %s846_s12 = sphi %s868_s12, %s13_s12  }
   0x2   : > { %p155_p1 = scmp.lt.s32.totalorder %s846_s12, 15 }
   0x4   : > { %p156_p2 = pnand %p780_p0, %p155_p1 }
   0x5   : > { %p187_p3 = scmp.lt.s32.totalorder (!%p156_p2), %s776_s13, 13 }
   0x6   : > { %159 = sbr.rel (%p156_p2) target bundleno = 291 (0x123), region = 32 }
   0xb   : > { %s1310_s13 = smov (!%p187_p3, %s776_s13), 13  ;;  %vm287_vm0 = vcmask 130048   ;;  %vm691_vm2 = vcmask 326656   ;;  %vm698_vm9 = vcmask 322560  }
   0xc   : > { %s829_s14 = smul.u32 400, %s1310_s13  ;;  %s199_s24 = scalar_lea.vmem %s1307_s2, %s1310_s13 }
   0xd   : > { %s828_s18 = smul.u32 448, %s1310_s13 }
   0xe   : > { %s882_s17 = scalar_lea.vmem %s1306_s1, %s829_s14  ;;  %s830_s27 = smul.u32 56, %s1310_s13 }
   0xf   : > { %v885_v0 = vld [vmem:[%s882_s17 + $0x178] sm:$0xff]  ;;  %v891_v2 = vld [vmem:[%s882_s17 + $0x170] sm:$0xff]  ;;  %v903_v5 = vld [vmem:[%s882_s17 + $0x168] sm:$0xff]  ;;  %s956_s21 = scalar_lea.vmem %s1305_s0, %s828_s18 }
  0x10   : > { %v888_v1 = vld [vmem:[%s882_s17 + $0x78] sm:$0xff]  ;;  %385 = vmatpush.msra.mxu2 %v885_v0  ;;  %v896_v3 = vld [vmem:[%s882_s17 + $0x70] sm:$0xff]  ;;  %v906_v6 = vld [vmem:[%s882_s17 + $0x68] sm:$0xff]  ;;  %s1262_s30 = scalar_lea.vmem %s1308_s3, %s830_s27 }
  0x11   : > { %309 = vmatpush.msra.mxu0 %v888_v1  ;;  %v899_v4 = vld [vmem:[%s882_s17 + $0xf8] sm:$0xff]  ;;  %v909_v7 = vld [vmem:[%s882_s17 + $0xf0] sm:$0xff]  ;;  %v914_v8 = vld [vmem:[%s882_s17 + $0xe8] sm:$0xff] }
  0x12   : > { %347 = vmatpush.msra.mxu1 %v899_v4  ;;  %386 = vmatpush.msra.mxu2 %v891_v2  ;;  %v918_v9 = vld [vmem:[%s882_s17 + $0x160] sm:$0xff]  ;;  %v931_v12 = vld [vmem:[%s882_s17 + $0x158] sm:$0xff]  ;;  %v943_v15 = vld [vmem:[%s882_s17 + $0x150] sm:$0xff] }
  0x13   : > { %310 = vmatpush.msra.mxu0 %v896_v3  ;;  %v921_v10 = vld [vmem:[%s882_s17 + $0x60] sm:$0xff]  ;;  %v934_v13 = vld [vmem:[%s882_s17 + $0x58] sm:$0xff]  ;;  %v946_v16 = vld [vmem:[%s882_s17 + $0x50] sm:$0xff] }
  0x14   : > { %348 = vmatpush.msra.mxu1 %v909_v7  ;;  %387 = vmatpush.msra.mxu2 %v903_v5  ;;  %v926_v11 = vld [vmem:[%s882_s17 + $0xe0] sm:$0xff]  ;;  %v939_v14 = vld [vmem:[%s882_s17 + $0xd8] sm:$0xff]  ;;  %v951_v17 = vld [vmem:[%s882_s17 + $0xd0] sm:$0xff] }
  0x15   : > { %311 = vmatpush.msra.mxu0 %v906_v6  ;;  %v960_v18 = vld [vmem:[%s882_s17 + $0x148] sm:$0xff]  ;;  %v975_v22 = vld [vmem:[%s882_s17 + $0x140] sm:$0xff]  ;;  %v259_v26 = vld [vmem:[%s956_s21 + $0x18] sm:$0xff] }
  0x16   : > { %349 = vmatpush.msra.mxu1 %v914_v8  ;;  %388 = vmatpush.msra.mxu2 %v918_v9  ;;  %v963_v19 = vld [vmem:[%s882_s17 + $0x48] sm:$0xff]  ;;  %v978_v23 = vld [vmem:[%s882_s17 + $0x40] sm:$0xff]  ;;  %v992_v27 = vld [vmem:[%s882_s17 + $0x138] sm:$0xff] }
  0x17   : > { %312 = vmatpush.msra.mxu0 %v921_v10  ;;  %v968_v20 = vld [vmem:[%s882_s17 + $0xc8] sm:$0xff]  ;;  %v982_v24 = vld [vmem:[%s882_s17 + $0x180] sm:$0xff]  ;;  %v995_v28 = vld [vmem:[%s882_s17 + $0x38] sm:$0xff] }
  0x18   : > { %350 = vmatpush.msra.mxu1 %v926_v11  ;;  %389 = vmatpush.msra.mxu2 %v931_v12  ;;  %v971_v21 = vld [vmem:[%s882_s17 + $0x188] sm:$0xff]  ;;  %v987_v25 = vld [vmem:[%s882_s17 + $0xc0] sm:$0xff]  ;;  %v1001_v29 = vld [vmem:[%s882_s17 + $0xb8] sm:$0xff] }
  0x19   : > { %313 = vmatpush.msra.mxu0 %v934_v13  ;;  %437 = vmatpush.msra.mxu3 %v971_v21  ;;  %v1005_v30 = vld [vmem:[%s882_s17 + $0x130] sm:$0xff]  ;;  %v1018_v33 = vld [vmem:[%s882_s17 + $0x128] sm:$0xff]  ;;  %v1035_v36 = vld [vmem:[%s882_s17 + $0x120] sm:$0xff] }
  0x1a   : > { %351 = vmatpush.msra.mxu1 %v939_v14  ;;  %390 = vmatpush.msra.mxu2 %v943_v15  ;;  %v1008_v31 = vld [vmem:[%s882_s17 + $0x30] sm:$0xff]  ;;  %v1021_v34 = vld [vmem:[%s882_s17 + $0x28] sm:$0xff]  ;;  %v1038_v37 = vld [vmem:[%s882_s17 + $0x20] sm:$0xff] }
  0x1b   : > { %314 = vmatpush.msra.mxu0 %v946_v16  ;;  %438 = vmatpush.msra.mxu3 %v982_v24  ;;  %v1014_v32 = vld [vmem:[%s882_s17 + $0xb0] sm:$0xff]  ;;  %v1027_v35 = vld [vmem:[%s882_s17 + $0xa8] sm:$0xff]  ;;  %v1044_v38 = vld [vmem:[%s882_s17 + $0xa0] sm:$0xff] }
  0x1c   : > { %352 = vmatpush.msra.mxu1 %v951_v17  ;;  %391 = vmatpush.msra.mxu2 %v960_v18  ;;  %v263_v39 = vld [vmem:[%s956_s21 + $0x38] sm:$0xff]  ;;  %v1062_v43 = vld [vmem:[%s882_s17 + $0x110] sm:$0xff]  ;;  %v1075_v46 = vld [vmem:[%s882_s17 + $0x108] sm:$0xff] }
  0x1d   : > { %315 = vmatpush.msra.mxu0 %v963_v19  ;;  %784 = vmatmul.msk.f32.vlgmr.msra.gmra.mxu3 %vm287_vm0, %v259_v26  ;;  %v1049_v40 = vld [vmem:[%s882_s17 + $0x118] sm:$0xff]  ;;  %v1065_v44 = vld [vmem:[%s882_s17 + $0x10] sm:$0xff]  ;;  %v1078_v47 = vld [vmem:[%s882_s17 + $0x8] sm:$0xff] }
  0x1e   : > { %353 = vmatpush.msra.mxu1 %v968_v20  ;;  %392 = vmatpush.msra.mxu2 %v975_v22  ;;  %v1052_v41 = vld [vmem:[%s882_s17 + $0x18] sm:$0xff]  ;;  %v1071_v45 = vld [vmem:[%s882_s17 + $0x90] sm:$0xff]  ;;  %v1084_v48 = vld [vmem:[%s882_s17 + $0x88] sm:$0xff] }
  0x1f   : > { %316 = vmatpush.msra.mxu0 %v978_v23  ;;  %511 = vmatpush.msrb.mxu3 %v888_v1  ;;  %v1058_v42 = vld [vmem:[%s882_s17 + $0x98] sm:$0xff]  ;;  %v1088_v49 = vld [vmem:[%s882_s17 + $0x100] sm:$0xff]  ;;  %v258_v51 = vld [vmem:[%s956_s21 + $0x10] sm:$0xff] }
  0x20   : > { %354 = vmatpush.msra.mxu1 %v987_v25  ;;  %393 = vmatpush.msra.mxu2 %v992_v27  ;;  %v1091_v50 = vld [vmem:[%s882_s17] sm:$0xff]  ;;  %v267_v54 = vld [vmem:[%s956_s21 + $0x58] sm:$0xff]  ;;  %v257_v55 = vld [vmem:[%s956_s21 + $0x8] sm:$0xff] }
  0x21   : > { %317 = vmatpush.msra.mxu0 %v995_v28  ;;  %512 = vmatpush.msrb.mxu3 %v896_v3  ;;  %v256_v52 = vld [vmem:[%s956_s21] sm:$0xff]  ;;  %v262_v56 = vld [vmem:[%s956_s21 + $0x30] sm:$0xff]  ;;  %v271_v58 = vld [vmem:[%s956_s21 + $0x78] sm:$0xff] }
  0x22   : > { %355 = vmatpush.msra.mxu1 %v1001_v29  ;;  %394 = vmatpush.msra.mxu2 %v1005_v30  ;;  %v1103_v53 = vld [vmem:[%s882_s17 + $0x80] sm:$0xff]  ;;  %v261_v59 = vld [vmem:[%s956_s21 + $0x28] sm:$0xff]  ;;  %v266_v60 = vld [vmem:[%s956_s21 + $0x50] sm:$0xff] }
  0x23   : > { %318 = vmatpush.msra.mxu0 %v1008_v31  ;;  %513 = vmatpush.msrb.mxu3 %v906_v6  ;;  %v260_v57 = vld [vmem:[%s956_s21 + $0x20] sm:$0xff]  ;;  %v275_v62 = vld [vmem:[%s956_s21 + $0x98] sm:$0xff]  ;;  %v265_v63 = vld [vmem:[%s956_s21 + $0x48] sm:$0xff] }
  0x24   : > { %356 = vmatpush.msra.mxu1 %v1014_v32  ;;  %395 = vmatpush.msra.mxu2 %v1018_v33  ;;  %v264_v61 = vld [vmem:[%s956_s21 + $0x40] sm:$0xff]  ;;  %v269_v3 = vld [vmem:[%s956_s21 + $0x68] sm:$0xff]  ;;  %v283_v6 = vld [vmem:[%s956_s21 + $0xd8] sm:$0xf] }
  0x25   : > { %319 = vmatpush.msra.mxu0 %v1021_v34  ;;  %785 = vmatmul.msk.f32.gmra.mxu3 %vm287_vm0, %v263_v39  ;;  %v268_v1 = vld [vmem:[%s956_s21 + $0x60] sm:$0xff]  ;;  %v818_v39 = vld [vmem:[%s956_s21 + $0x1b8] sm:$0xf] }
  0x26   : > { %357 = vmatpush.msra.mxu1 %v1027_v35  ;;  %396 = vmatpush.msra.mxu2 %v1035_v36  ;;  %v807_v26 = vld [vmem:[%s956_s21 + $0x160] sm:$0xff] }
  0x27   : > { %320 = vmatpush.msra.mxu0 %v1038_v37  ;;  %514 = vmatpush.msrb.mxu3 %v921_v10  ;;  %v791_v10 = vld [vmem:[%s956_s21 + $0xe0] sm:$0xff] }
  0x28   : > { %358 = vmatpush.msra.mxu1 %v1044_v38  ;;  %397 = vmatpush.msra.mxu2 %v1049_v40 }
  0x29   : > { %321 = vmatpush.msra.mxu0 %v1052_v41  ;;  %515 = vmatpush.msrb.mxu3 %v934_v13  ;;  %v280_v13 = vld [vmem:[%s956_s21 + $0xc0] sm:$0xf] }
  0x2a   : > { %359 = vmatpush.msra.mxu1 %v1058_v42  ;;  %398 = vmatpush.msra.mxu2 %v1062_v43 }
  0x2b   : > { %322 = vmatpush.msra.mxu0 %v1065_v44  ;;  %516 = vmatpush.msrb.mxu3 %v946_v16  ;;  %v794_v16 = vld [vmem:[%s956_s21 + $0xf8] sm:$0xff] }
  0x2c   : > { %360 = vmatpush.msra.mxu1 %v1071_v45  ;;  %399 = vmatpush.msra.mxu2 %v1075_v46 }
  0x2d   : > { %323 = vmatpush.msra.mxu0 %v1078_v47  ;;  %786 = vmatmul.msk.f32.gmra.mxu3 %vm287_vm0, %v267_v54 }
  0x2e   : > { %361 = vmatpush.msra.mxu1 %v1084_v48  ;;  %400 = vmatpush.msra.mxu2 %v1088_v49 }
  0x2f   : > { %324 = vmatpush.msra.mxu0 %v1091_v50  ;;  %401 = vmatmul.f32.vlgmr.msra.gmra.mxu2 %v258_v51 }
  0x30   : > { %325 = vmatmul.f32.vlgmr.msra.gmra.mxu0 %v256_v52  ;;  %639 = vmatpush.msrb.mxu2 %v971_v21  ;;  %v796_v21 = vld [vmem:[%s956_s21 + $0x108] sm:$0xff] }
  0x31   : > { %549 = vmatpush.msrb.mxu0 %v899_v4  ;;  %362 = vmatpush.msra.mxu1 %v1103_v53  ;;  %v274_v4 = vld [vmem:[%s956_s21 + $0x90] sm:$0xff] }
  0x32   : > { %363 = vmatmul.f32.vlgmr.msra.gmra.mxu1 %v257_v55  ;;  %517 = vmatpush.msrb.mxu3 %v963_v19  ;;  %v793_v19 = vld [vmem:[%s956_s21 + $0xf0] sm:$0xff] }
  0x33   : > { %550 = vmatpush.msrb.mxu0 %v909_v7  ;;  %587 = vmatpush.msrb.mxu1 %v885_v0  ;;  %v270_v0 = vld [vmem:[%s956_s21 + $0x70] sm:$0xff]  ;;  %v273_v7 = vld [vmem:[%s956_s21 + $0x88] sm:$0xff] }
  0x34   : > { %640 = vmatpush.msrb.mxu2 %v982_v24  ;;  %518 = vmatpush.msrb.mxu3 %v978_v23  ;;  %v797_v23 = vld [vmem:[%s956_s21 + $0x110] sm:$0xff]  ;;  %v802_v24 = vld [vmem:[%s956_s21 + $0x138] sm:$0xff] }
  0x35   : > { %551 = vmatpush.msrb.mxu0 %v914_v8  ;;  %588 = vmatpush.msrb.mxu1 %v891_v2  ;;  %v279_v2 = vld [vmem:[%s956_s21 + $0xb8] sm:$0xff]  ;;  %v278_v8 = vld [vmem:[%s956_s21 + $0xb0] sm:$0xff] }
  0x36   : > { %787 = vmatmul.msk.f32.gmra.mxu3 %vm287_vm0, %v271_v58 }
  0x37   : > { %552 = vmatpush.msrb.mxu0 %v926_v11  ;;  %404 = vmatmul.f32.gmra.mxu2 %v262_v56  ;;  %v277_v11 = vld [vmem:[%s956_s21 + $0xa8] sm:$0xff] }
  0x38   : > { %328 = vmatmul.f32.gmra.mxu0 %v260_v57  ;;  %589 = vmatpush.msrb.mxu1 %v903_v5  ;;  %v272_v5 = vld [vmem:[%s956_s21 + $0x80] sm:$0xff] }
  0x39   : > { %553 = vmatpush.msrb.mxu0 %v939_v14  ;;  %519 = vmatpush.msrb.mxu3 %v995_v28  ;;  %v795_v14 = vld [vmem:[%s956_s21 + $0x100] sm:$0xff]  ;;  %v806_v28 = vld [vmem:[%s956_s21 + $0x158] sm:$0xff] }
  0x3a   : > { %366 = vmatmul.f32.gmra.mxu1 %v261_v59 }
  0x3b   : > { %554 = vmatpush.msrb.mxu0 %v951_v17  ;;  %590 = vmatpush.msrb.mxu1 %v918_v9  ;;  %v276_v9 = vld [vmem:[%s956_s21 + $0xa0] sm:$0xff]  ;;  %v792_v17 = vld [vmem:[%s956_s21 + $0xe8] sm:$0xff] }
  0x3c   : > { %520 = vmatpush.msrb.mxu3 %v1008_v31  ;;  %v805_v31 = vld [vmem:[%s956_s21 + $0x150] sm:$0xff] }
  0x3d   : > { %555 = vmatpush.msrb.mxu0 %v968_v20  ;;  %591 = vmatpush.msrb.mxu1 %v931_v12  ;;  %v282_v12 = vld [vmem:[%s956_s21 + $0xd0] sm:$0xf]  ;;  %v798_v20 = vld [vmem:[%s956_s21 + $0x118] sm:$0xff] }
  0x3e   : > { %521 = vmatpush.msrb.mxu3 %v1021_v34  ;;  %v815_v34 = vld [vmem:[%s956_s21 + $0x1a0] sm:$0xf] }
  0x3f   : > { %556 = vmatpush.msrb.mxu0 %v987_v25  ;;  %407 = vmatmul.f32.gmra.mxu2 %v266_v60  ;;  %v800_v25 = vld [vmem:[%s956_s21 + $0x128] sm:$0xff] }
  0x40   : > { %331 = vmatmul.f32.gmra.mxu0 %v264_v61  ;;  %592 = vmatpush.msrb.mxu1 %v943_v15  ;;  %v281_v15 = vld [vmem:[%s956_s21 + $0xc8] sm:$0xf] }
  0x41   : > { %788 = vmatmul.msk.f32.gmra.mxu3 %vm287_vm0, %v275_v62  ;;  %557 = vmatpush.msrb.mxu0 %v1001_v29  ;;  %v804_v29 = vld [vmem:[%s956_s21 + $0x148] sm:$0xff] }
  0x42   : > { %369 = vmatmul.f32.gmra.mxu1 %v265_v63  ;;  %522 = vmatpush.msrb.mxu3 %v1038_v37  ;;  %v812_v37 = vld [vmem:[%s956_s21 + $0x188] sm:$0xff] }
  0x43   : > { %593 = vmatpush.msrb.mxu1 %v960_v18  ;;  %558 = vmatpush.msrb.mxu0 %v1014_v32  ;;  %v799_v18 = vld [vmem:[%s956_s21 + $0x120] sm:$0xff]  ;;  %v810_v32 = vld [vmem:[%s956_s21 + $0x178] sm:$0xff] }
  0x44   : > { %523 = vmatpush.msrb.mxu3 %v1052_v41  ;;  %v817_v41 = vld [vmem:[%s956_s21 + $0x1b0] sm:$0xf] }
  0x45   : > { %594 = vmatpush.msrb.mxu1 %v975_v22  ;;  %559 = vmatpush.msrb.mxu0 %v1027_v35  ;;  %v803_v22 = vld [vmem:[%s956_s21 + $0x140] sm:$0xff]  ;;  %v809_v35 = vld [vmem:[%s956_s21 + $0x170] sm:$0xff] }
  0x46   : > { %524 = vmatpush.msrb.mxu3 %v1065_v44 }
  0x47   : > { %410 = vmatmul.f32.gmra.mxu2 %v270_v0  ;;  %595 = vmatpush.msrb.mxu1 %v992_v27  ;;  %v801_v27 = vld [vmem:[%s956_s21 + $0x130] sm:$0xff] }
  0x48   : > { %334 = vmatmul.f32.gmra.mxu0 %v268_v1  ;;  %525 = vmatpush.msrb.mxu3 %v1078_v47 }
  0x49   : > { %560 = vmatpush.msrb.mxu0 %v1044_v38  ;;  %789 = vmatmul.msk.f32.gmra.mxu3 %vm287_vm0, %v279_v2  ;;  %v813_v38 = vld [vmem:[%s956_s21 + $0x190] sm:$0xff] }
  0x4a   : > { %372 = vmatmul.f32.gmra.mxu1 %v269_v3  ;;  %526 = vmatpush.msrb.mxu3 %v1091_v50  ;;  %v1245_v3 = vld [vmem:[%s199_s24] ss:$0 sm:$0xff] }
  0x4b   : > { %596 = vmatpush.msrb.mxu1 %v1005_v30  ;;  %561 = vmatpush.msrb.mxu0 %v1058_v42  ;;  %v811_v30 = vld [vmem:[%s956_s21 + $0x180] sm:$0xff] }
  0x4d   : > { %597 = vmatpush.msrb.mxu1 %v1018_v33  ;;  %562 = vmatpush.msrb.mxu0 %v1071_v45  ;;  %v808_v33 = vld [vmem:[%s956_s21 + $0x168] sm:$0xff] }
  0x4f   : > { %413 = vmatmul.f32.gmra.mxu2 %v274_v4  ;;  %598 = vmatpush.msrb.mxu1 %v1035_v36  ;;  %v814_v36 = vld [vmem:[%s956_s21 + $0x198] sm:$0xff] }
  0x50   : > { %337 = vmatmul.f32.gmra.mxu0 %v272_v5 }
  0x51   : > { %563 = vmatpush.msrb.mxu0 %v1084_v48  ;;  %790 = vmatmul.msk.f32.gmra.mxu3 %vm287_vm0, %v283_v6 }
  0x52   : > { %375 = vmatmul.f32.gmra.mxu1 %v273_v7 }
  0x53   : > { %564 = vmatpush.msrb.mxu0 %v1103_v53  ;;  %599 = vmatpush.msrb.mxu1 %v1049_v40  ;;  %v816_v40 = vld [vmem:[%s956_s21 + $0x1a8] sm:$0xf] }
  0x55   : > { %600 = vmatpush.msrb.mxu1 %v1062_v43 }
  0x57   : > { %416 = vmatmul.f32.gmra.mxu2 %v278_v8  ;;  %601 = vmatpush.msrb.mxu1 %v1075_v46 }
  0x58   : > { %340 = vmatmul.f32.gmra.mxu0 %v276_v9 }
  0x59   : > { %527 = vmatmul.f32.vlgmr.msrb.gmra.mxu3 %v791_v10  ;;  %602 = vmatpush.msrb.mxu1 %v1088_v49 }
  0x5a   : > { %378 = vmatmul.f32.gmra.mxu1 %v277_v11 }
  0x5f   : > { %419 = vmatmul.f32.gmra.mxu2 %v282_v12 }
  0x60   : > { %343 = vmatmul.f32.gmra.mxu0 %v280_v13 }
  0x61   : > { %530 = vmatmul.f32.gmra.mxu3 %v795_v14 }
  0x62   : > { %381 = vmatmul.f32.gmra.mxu1 %v281_v15 }
  0x67   : > { %819 = vmatmul.msk.f32.vlgmr.msrb.gmra.mxu2 %vm287_vm0, %v794_v16 }
  0x68   : > { %565 = vmatmul.f32.vlgmr.msrb.gmra.mxu0 %v792_v17 }
  0x69   : > { %533 = vmatmul.f32.gmra.mxu3 %v799_v18 }
  0x6a   : > { %603 = vmatmul.f32.vlgmr.msrb.gmra.mxu1 %v793_v19 }
  0x6f   : > { %820 = vmatmul.msk.f32.gmra.mxu2 %vm287_vm0, %v798_v20 }
  0x70   : > { %568 = vmatmul.f32.gmra.mxu0 %v796_v21 }
  0x71   : > { %536 = vmatmul.f32.gmra.mxu3 %v803_v22 }
  0x72   : > { %606 = vmatmul.f32.gmra.mxu1 %v797_v23 }
  0x77   : > { %821 = vmatmul.msk.f32.gmra.mxu2 %vm287_vm0, %v802_v24 }
  0x78   : > { %571 = vmatmul.f32.gmra.mxu0 %v800_v25 }
  0x79   : > { %539 = vmatmul.f32.gmra.mxu3 %v807_v26 }
  0x7a   : > { %609 = vmatmul.f32.gmra.mxu1 %v801_v27 }
  0x7f   : > { %822 = vmatmul.msk.f32.gmra.mxu2 %vm287_vm0, %v806_v28 }
  0x80   : > { %574 = vmatmul.f32.gmra.mxu0 %v804_v29 }
  0x81   : > { %542 = vmatmul.f32.gmra.mxu3 %v811_v30 }
  0x82   : > { %612 = vmatmul.f32.gmra.mxu1 %v805_v31 }
  0x87   : > { %823 = vmatmul.msk.f32.gmra.mxu2 %vm287_vm0, %v810_v32 }
  0x88   : > { %577 = vmatmul.f32.gmra.mxu0 %v808_v33 }
  0x89   : > { %545 = vmatmul.f32.gmra.mxu3 %v815_v34 }
  0x8a   : > { %615 = vmatmul.f32.gmra.mxu1 %v809_v35 }
  0x8f   : > { %824 = vmatmul.msk.f32.gmra.mxu2 %vm287_vm0, %v814_v36 }
  0x90   : > { %580 = vmatmul.f32.gmra.mxu0 %v812_v37 }
  0x92   : > { %618 = vmatmul.f32.gmra.mxu1 %v813_v38 }
  0x97   : > { %825 = vmatmul.msk.f32.gmra.mxu2 %vm287_vm0, %v818_v39 }
  0x98   : > { %583 = vmatmul.f32.gmra.mxu0 %v816_v40 }
  0x9a   : > { %621 = vmatmul.f32.gmra.mxu1 %v817_v41 }
  0xa0   : > { %v440_v42 = vpop.f32.mrf.mxu3 }
  0xa8   : > { %v443_v43 = vpop.f32.mrf.mxu3 }
  0xad   : > { %v326_v44 = vpop.f32.mrf.mxu0 }
  0xae   : > { %v327_v6 = vadd.f32 %v1245_v3, %v326_v44 }
  0xaf   : > { %v364_v45 = vpop.f32.mrf.mxu1 }
  0xb0   : > { %v1214_v48 = vpop.f32.mrf.mxu3  ;;  %v365_v10 = vadd.f32 %v364_v45, %v327_v6 }
  0xb2   : > { %v402_v46 = vpop.f32.mrf.mxu2 }
  0xb3   : > { %v403_v15 = vadd.f32 %v402_v46, %v365_v10 }
  0xb5   : > { %v329_v47 = vpop.f32.mrf.mxu0  ;;  %v441_v21 = vadd.f32 %v440_v42, %v403_v15 }
  0xb6   : > { %v330_v14 = vadd.f32 %v1245_v3, %v329_v47 }
  0xb7   : > { %v367_v49 = vpop.f32.mrf.mxu1 }
  0xb8   : > { %v368_v19 = vadd.f32 %v367_v49, %v330_v14 }
  0xb9   : > { %v1216_v52 = vpop.f32.mrf.mxu3 }
  0xba   : > { %v405_v50 = vpop.f32.mrf.mxu2 }
  0xbb   : > { %v406_v27 = vadd.f32 %v405_v50, %v368_v19 }
  0xbd   : > { %v332_v51 = vpop.f32.mrf.mxu0  ;;  %v444_v35 = vadd.f32 %v443_v43, %v406_v27 }
  0xbe   : > { %v333_v28 = vadd.f32 %v1245_v3, %v332_v51 }
  0xbf   : > { %v370_v53 = vpop.f32.mrf.mxu1 }
  0xc0   : > { %v371_v36 = vadd.f32 %v370_v53, %v333_v28 }
  0xc2   : > { %v408_v54 = vpop.f32.mrf.mxu2 }
  0xc3   : > { %v409_v42 = vadd.f32 %v408_v54, %v371_v36 }
  0xc4   : > { %v1218_v56 = vpop.f32.mrf.mxu3 }
  0xc5   : > { %v335_v55 = vpop.f32.mrf.mxu0  ;;  %v447_v43 = vadd.f32 %v1214_v48, %v409_v42 }
  0xc6   : > { %v336_v44 = vadd.f32 %v1245_v3, %v335_v55 }
  0xc7   : > { %v1220_v57 = vpop.f32.mrf.mxu1 }
  0xc8   : > { %v374_v53 = vadd.f32 %v1220_v57, %v336_v44 }
  0xca   : > { %v1222_v58 = vpop.f32.mrf.mxu2 }
  0xcb   : > { %v412_v10 = vadd.f32 %v1222_v58, %v374_v53 }
  0xcc   : > { %v1226_v60 = vpop.f32.mrf.mxu3 }
  0xcd   : > { %v1224_v59 = vpop.f32.mrf.mxu0  ;;  %v450_v57 = vadd.f32 %v1216_v52, %v412_v10 }
  0xcf   : > { %v1228_v61 = vpop.f32.mrf.mxu1 }
  0xd2   : > { %v1230_v62 = vpop.f32.mrf.mxu2 }
  0xd4   : > { %v1234_v0 = vpop.f32.mrf.mxu3 }
  0xd5   : > { %v1232_v63 = vpop.f32.mrf.mxu0 }
  0xd7   : > { %v1236_v1 = vpop.f32.mrf.mxu1 }
  0xda   : > { %v1238_v2 = vpop.f32.mrf.mxu2 }
  0xdc   : > { %v528_v5 = vpop.f32.mrf.mxu3 }
  0xdd   : > { %v1247_v4 = vpop.f32.mrf.mxu0  ;;  %v529_v8 = vadd.f32 %v1245_v3, %v528_v5 }
  0xdf   : > { %v1250_v7 = vpop.f32.mrf.mxu1 }
  0xe2   : > { %v1253_v9 = vpop.f32.mrf.mxu2 }
  0xe4   : > { %v531_v12 = vpop.f32.mrf.mxu3 }
  0xe5   : > { %v566_v11 = vpop.f32.mrf.mxu0  ;;  %v532_v18 = vadd.f32 %v1245_v3, %v531_v12 }
  0xe6   : > { %v567_v13 = vadd.f32 %v566_v11, %v529_v8  ;;  %v339_v11 = vadd.f32 %v1245_v3, %v1224_v59 }
  0xe7   : > { %v604_v16 = vpop.f32.mrf.mxu1 }
  0xe8   : > { %v605_v17 = vadd.f32 %v604_v16, %v567_v13 }
  0xea   : > { %v642_v20 = vpop.f32.mrf.mxu2 }
  0xeb   : > { %v643_v22 = vadd.f32 %v642_v20, %v605_v17  ;;  %v377_v17 = vadd.f32 %v1228_v61, %v339_v11 }
  0xec   : > { %v534_v24 = vpop.f32.mrf.mxu3 }
  0xed   : > { %v569_v23 = vpop.f32.mrf.mxu0  ;;  %v663_v25 = vmax.f32 %v441_v21, %v643_v22  ;;  %v535_v33 = vadd.f32 %v1245_v3, %v534_v24  ;;  %v415_v21 = vadd.f32 %v1230_v62, %v377_v17  ;;  %v342_v22 = vadd.f32 %v1245_v3, %v1232_v63 }
  0xee   : > { %v570_v26 = vadd.f32 %v569_v23, %v532_v18 }
  0xef   : > { %vm670_vm1 = vcmp.gt.f32.partialorder %v663_v25, 0.0  ;;  %v677_v29 = vmul.f32 0.2, %v663_v25  ;;  %v607_v30 = vpop.f32.mrf.mxu1  ;;  %v453_v61 = vadd.f32 %v1218_v56, %v415_v21  ;;  %v380_v28 = vadd.f32 %v1236_v1, %v342_v22 }
  0xf0   : > { %v608_v31 = vadd.f32 %v607_v30, %v570_v26 }
  0xf1   : > { %v684_v32 = vsel %vm670_vm1, %v663_v25, %v677_v29 }
  0xf2   : > { %692 = vst.msk [vmem:[%s1262_s30] sm:$0xff] %vm691_vm2, %v684_v32  ;;  %v645_v34 = vpop.f32.mrf.mxu2  ;;  %v418_v32 = vadd.f32 %v1238_v2, %v380_v28 }
  0xf3   : > { %v646_v37 = vadd.f32 %v645_v34, %v608_v31 }
  0xf4   : > { %v537_v39 = vpop.f32.mrf.mxu3 }
  0xf5   : > { %v572_v38 = vpop.f32.mrf.mxu0  ;;  %v664_v40 = vmax.f32 %v444_v35, %v646_v37  ;;  %v538_v50 = vadd.f32 %v1245_v3, %v537_v39 }
  0xf6   : > { %v573_v41 = vadd.f32 %v572_v38, %v535_v33  ;;  %v345_v33 = vadd.f32 %v1245_v3, %v1247_v4  ;;  %v456_v38 = vadd.f32 %v1226_v60, %v418_v32 }
  0xf7   : > { %vm671_vm3 = vcmp.gt.f32.partialorder %v664_v40, 0.0  ;;  %v678_v45 = vmul.f32 0.2, %v664_v40  ;;  %v610_v46 = vpop.f32.mrf.mxu1 }
  0xf8   : > { %v611_v47 = vadd.f32 %v610_v46, %v573_v41  ;;  %v383_v39 = vadd.f32 %v1250_v7, %v345_v33 }
  0xf9   : > { %v685_v49 = vsel %vm671_vm3, %v664_v40, %v678_v45 }
  0xfa   : > { %693 = vst.msk [vmem:[%s1262_s30 + $0x8] sm:$0xff] %vm691_vm2, %v685_v49  ;;  %v648_v51 = vpop.f32.mrf.mxu2  ;;  %v421_v4 = vadd.f32 %v1253_v9, %v383_v39 }
  0xfb   : > { %v649_v5 = vadd.f32 %v648_v51, %v611_v47 }
  0xfc   : > { %v540_v54 = vpop.f32.mrf.mxu3  ;;  %v459_v49 = vadd.f32 %v1234_v0, %v421_v4 }
  0xfd   : > { %v575_v6 = vpop.f32.mrf.mxu0  ;;  %v665_v8 = vmax.f32 %v447_v43, %v649_v5  ;;  %v541_v16 = vadd.f32 %v1245_v3, %v540_v54 }
  0xfe   : > { %v576_v55 = vadd.f32 %v575_v6, %v538_v50 }
  0xff   : > { %vm672_vm4 = vcmp.gt.f32.partialorder %v665_v8, 0.0  ;;  %v679_v12 = vmul.f32 0.2, %v665_v8  ;;  %v613_v13 = vpop.f32.mrf.mxu1 }
 0x100   : > { %v614_v14 = vadd.f32 %v613_v13, %v576_v55 }
 0x101   : > { %v686_v15 = vsel %vm672_vm4, %v665_v8, %v679_v12 }
 0x102   : > { %694 = vst.msk [vmem:[%s1262_s30 + $0x10] sm:$0xff] %vm691_vm2, %v686_v15  ;;  %v651_v48 = vpop.f32.mrf.mxu2 }
 0x103   : > { %v652_v18 = vadd.f32 %v651_v48, %v614_v14 }
 0x104   : > { %v543_v19 = vpop.f32.mrf.mxu3 }
 0x105   : > { %v578_v58 = vpop.f32.mrf.mxu0  ;;  %v666_v20 = vmax.f32 %v450_v57, %v652_v18  ;;  %v544_v27 = vadd.f32 %v1245_v3, %v543_v19 }
 0x106   : > { %v579_v59 = vadd.f32 %v578_v58, %v541_v16 }
 0x107   : > { %vm673_vm5 = vcmp.gt.f32.partialorder %v666_v20, 0.0  ;;  %v680_v23 = vmul.f32 0.2, %v666_v20  ;;  %v616_v24 = vpop.f32.mrf.mxu1 }
 0x108   : > { %v617_v25 = vadd.f32 %v616_v24, %v579_v59 }
 0x109   : > { %v687_v26 = vsel %vm673_vm5, %v666_v20, %v680_v23 }
 0x10a   : > { %695 = vst.msk [vmem:[%s1262_s30 + $0x18] sm:$0xff] %vm691_vm2, %v687_v26  ;;  %v654_v52 = vpop.f32.mrf.mxu2 }
 0x10b   : > { %v655_v29 = vadd.f32 %v654_v52, %v617_v25 }
 0x10c   : > { %v546_v63 = vpop.f32.mrf.mxu3 }
 0x10d   : > { %v581_v62 = vpop.f32.mrf.mxu0  ;;  %v667_v30 = vmax.f32 %v453_v61, %v655_v29  ;;  %v547_v56 = vadd.f32 %v1245_v3, %v546_v63 }
 0x10e   : > { %v582_v31 = vadd.f32 %v581_v62, %v544_v27 }
 0x10f   : > { %vm674_vm6 = vcmp.gt.f32.partialorder %v667_v30, 0.0  ;;  %v681_v34 = vmul.f32 0.2, %v667_v30  ;;  %v619_v35 = vpop.f32.mrf.mxu1 }
 0x110   : > { %v620_v36 = vadd.f32 %v619_v35, %v582_v31 }
 0x111   : > { %v688_v37 = vsel %vm674_vm6, %v667_v30, %v681_v34 }
 0x112   : > { %696 = vst.msk [vmem:[%s1262_s30 + $0x20] sm:$0xff] %vm691_vm2, %v688_v37  ;;  %v657_v1 = vpop.f32.mrf.mxu2 }
 0x113   : > { %v658_v40 = vadd.f32 %v657_v1, %v620_v36 }
 0x115   : > { %v584_v2 = vpop.f32.mrf.mxu0  ;;  %v668_v41 = vmax.f32 %v456_v38, %v658_v40 }
 0x116   : > { %v585_v42 = vadd.f32 %v584_v2, %v547_v56 }
 0x117   : > { %vm675_vm7 = vcmp.gt.f32.partialorder %v668_v41, 0.0  ;;  %v682_v44 = vmul.f32 0.2, %v668_v41  ;;  %v622_v45 = vpop.f32.mrf.mxu1 }
 0x118   : > { %v623_v46 = vadd.f32 %v622_v45, %v585_v42 }
 0x119   : > { %v689_v47 = vsel %vm675_vm7, %v668_v41, %v682_v44 }
 0x11a   : > { %697 = vst.msk [vmem:[%s1262_s30 + $0x28] sm:$0xff] %vm691_vm2, %v689_v47  ;;  %v660_v3 = vpop.f32.mrf.mxu2 }
 0x11b   : > { %v661_v60 = vadd.f32 %v660_v3, %v623_v46 }
 0x11d   : > { %v669_v50 = vmax.f32 %v459_v49, %v661_v60 }
 0x11f   : > { %vm676_vm8 = vcmp.gt.f32.partialorder %v669_v50, 0.0  ;;  %v683_v7 = vmul.f32 0.2, %v669_v50 }
 0x121   : > { %v690_v51 = vsel %vm676_vm8, %v669_v50, %v683_v7 }
 0x122   : > { %699 = vst.msk [vmem:[%s1262_s30 + $0x30] sm:$0xf] %vm698_vm9, %v690_v51 }
 0x123 PF: > { %s13_s12 = sadd.s32 1, %s846_s12  }
 0x124   : > { %p10_p4 = scmp.ge.s32.totalorder %s13_s12, 16  }
 0x126   :  { %12 = sbr.rel (!%p10_p4) target bundleno = 1 (0x1), region = 69 }

// kernel: graphnet_forward.10
= control target key start
LH: loop header
LB: loop body
LE: loop exit
PB: predicated region body
PF: predicated region fallthrough
CT: control target
= control target key end

     0   :  { %s525_s12 = smov 0   ;;  %s608_s0 = inlined_call_operand.vmem [shape: f32[14,2,22,200], index: 0, kind: input, shape index: {}]   ;;  %s609_s1 = inlined_call_operand.vmem [shape: f32[14,200,40], index: 1, kind: input, shape index: {}]   ;;  %s610_s2 = inlined_call_operand.vmem [shape: f32[14,1,40], index: 2, kind: input, shape index: {}]   ;;  %s611_s3 = inlined_call_operand.vmem [shape: f32[14,22,40], index: 3, kind: output, shape index: {}]  }
   0x1 LB: > { %s463_s13 = sadd.s32 4294967295, %s503_s12   ;;  %p467_p0 = scmp.ge.s32.totalorder %s503_s12, 1  ;;  %s503_s12 = sphi %s525_s12, %s13_s12  }
   0x2   : > { %p155_p1 = scmp.lt.s32.totalorder %s503_s12, 15 }
   0x4   : > { %p156_p2 = pnand %p467_p0, %p155_p1 }
   0x5   : > { %p187_p3 = scmp.lt.s32.totalorder (!%p156_p2), %s463_s13, 13 }
   0x6   : > { %159 = sbr.rel (%p156_p2) target bundleno = 205 (0xcd), region = 32 }
   0xb   : > { %s613_s13 = smov (!%p187_p3, %s463_s13), 13  ;;  %vm240_vm0 = vcmask 588800   ;;  %vm382_vm2 = vcmask 326656   ;;  %vm385_vm5 = vcmask 324608  }
   0xc   : > { %s486_s14 = smul.u32 200, %s613_s13  ;;  %s199_s17 = scalar_lea.vmem %s610_s2, %s613_s13 }
   0xd   : > { %s485_s21 = smul.u32 96, %s613_s13  ;;  %v496_v37 = vld [vmem:[%s199_s17] ss:$0 sm:$0xff] }
   0xe   : > { %s543_s20 = scalar_lea.vmem %s609_s1, %s486_s14  ;;  %s487_s27 = smul.u32 24, %s613_s13 }
   0xf   : > { %v220_v0 = vld [vmem:[%s543_s20 + $0x78] sm:$0xff]  ;;  %v219_v1 = vld [vmem:[%s543_s20 + $0x70] sm:$0xff]  ;;  %v218_v2 = vld [vmem:[%s543_s20 + $0x68] sm:$0xff]  ;;  %s569_s24 = scalar_lea.vmem %s608_s0, %s485_s21 }
  0x10   : > { %318 = vmatpush.msra.mxu2 %v220_v0  ;;  %250 = vmatpush.msra.mxu0 %v220_v0  ;;  %v229_v3 = vld [vmem:[%s543_s20 + $0xc0] sm:$0xff]  ;;  %v228_v4 = vld [vmem:[%s543_s20 + $0xb8] sm:$0xff]  ;;  %v227_v6 = vld [vmem:[%s543_s20 + $0xb0] sm:$0xff]  ;;  %s204_s30 = scalar_lea.vmem %s611_s3, %s487_s27 }
  0x11   : > { %v217_v5 = vld [vmem:[%s543_s20 + $0x60] sm:$0xff]  ;;  %351 = vmatpush.msra.mxu3 %v229_v3  ;;  %283 = vmatpush.msra.mxu1 %v229_v3  ;;  %v216_v7 = vld [vmem:[%s543_s20 + $0x58] sm:$0xff]  ;;  %v226_v8 = vld [vmem:[%s543_s20 + $0xa8] sm:$0xff] }
  0x12   : > { %319 = vmatpush.msra.mxu2 %v219_v1  ;;  %251 = vmatpush.msra.mxu0 %v219_v1  ;;  %v215_v9 = vld [vmem:[%s543_s20 + $0x50] sm:$0xff]  ;;  %v225_v10 = vld [vmem:[%s543_s20 + $0xa0] sm:$0xff]  ;;  %v214_v11 = vld [vmem:[%s543_s20 + $0x48] sm:$0xff] }
  0x13   : > { %352 = vmatpush.msra.mxu3 %v228_v4  ;;  %284 = vmatpush.msra.mxu1 %v228_v4  ;;  %v224_v12 = vld [vmem:[%s543_s20 + $0x98] sm:$0xff]  ;;  %v213_v13 = vld [vmem:[%s543_s20 + $0x40] sm:$0xff]  ;;  %v223_v14 = vld [vmem:[%s543_s20 + $0x90] sm:$0xff] }
  0x14   : > { %320 = vmatpush.msra.mxu2 %v218_v2  ;;  %252 = vmatpush.msra.mxu0 %v218_v2  ;;  %v212_v15 = vld [vmem:[%s543_s20 + $0x38] sm:$0xff]  ;;  %v222_v16 = vld [vmem:[%s543_s20 + $0x88] sm:$0xff]  ;;  %v211_v17 = vld [vmem:[%s543_s20 + $0x30] sm:$0xff] }
  0x15   : > { %353 = vmatpush.msra.mxu3 %v227_v6  ;;  %285 = vmatpush.msra.mxu1 %v227_v6  ;;  %v221_v18 = vld [vmem:[%s543_s20 + $0x80] sm:$0xff]  ;;  %v210_v19 = vld [vmem:[%s543_s20 + $0x28] sm:$0xff]  ;;  %v475_v20 = vld [vmem:[%s569_s24 + $0x38] sm:$0xff] }
  0x16   : > { %321 = vmatpush.msra.mxu2 %v217_v5  ;;  %253 = vmatpush.msra.mxu0 %v217_v5  ;;  %v232_v21 = vld [vmem:[%s569_s24 + $0x8] sm:$0xff]  ;;  %v209_v22 = vld [vmem:[%s543_s20 + $0x20] sm:$0xff]  ;;  %v208_v23 = vld [vmem:[%s543_s20 + $0x18] sm:$0xff] }
  0x17   : > { %354 = vmatpush.msra.mxu3 %v226_v8  ;;  %286 = vmatpush.msra.mxu1 %v226_v8  ;;  %v207_v24 = vld [vmem:[%s543_s20 + $0x10] sm:$0xff]  ;;  %v206_v25 = vld [vmem:[%s543_s20 + $0x8] sm:$0xff]  ;;  %v234_v27 = vld [vmem:[%s569_s24 + $0x18] sm:$0xff] }
  0x18   : > { %322 = vmatpush.msra.mxu2 %v216_v7  ;;  %254 = vmatpush.msra.mxu0 %v216_v7  ;;  %v477_v26 = vld [vmem:[%s569_s24 + $0x48] sm:$0xff]  ;;  %v205_v28 = vld [vmem:[%s543_s20] sm:$0xff]  ;;  %v474_v29 = vld [vmem:[%s569_s24 + $0x30] sm:$0xff] }
  0x19   : > { %355 = vmatpush.msra.mxu3 %v225_v10  ;;  %287 = vmatpush.msra.mxu1 %v225_v10  ;;  %v231_v30 = vld [vmem:[%s569_s24] sm:$0xff]  ;;  %v479_v31 = vld [vmem:[%s569_s24 + $0x58] sm:$0x3f]  ;;  %v236_v32 = vld [vmem:[%s569_s24 + $0x28] sm:$0x3f] }
  0x1a   : > { %323 = vmatpush.msra.mxu2 %v215_v9  ;;  %255 = vmatpush.msra.mxu0 %v215_v9  ;;  %v476_v33 = vld [vmem:[%s569_s24 + $0x40] sm:$0xff]  ;;  %v233_v34 = vld [vmem:[%s569_s24 + $0x10] sm:$0xff] }
  0x1b   : > { %356 = vmatpush.msra.mxu3 %v224_v12  ;;  %288 = vmatpush.msra.mxu1 %v224_v12  ;;  %v478_v35 = vld [vmem:[%s569_s24 + $0x50] sm:$0x3f]  ;;  %v235_v36 = vld [vmem:[%s569_s24 + $0x20] sm:$0x3f] }
  0x1c   : > { %324 = vmatpush.msra.mxu2 %v214_v11  ;;  %256 = vmatpush.msra.mxu0 %v214_v11 }
  0x1d   : > { %357 = vmatpush.msra.mxu3 %v223_v14  ;;  %289 = vmatpush.msra.mxu1 %v223_v14 }
  0x1e   : > { %325 = vmatpush.msra.mxu2 %v213_v13  ;;  %257 = vmatpush.msra.mxu0 %v213_v13 }
  0x1f   : > { %358 = vmatpush.msra.mxu3 %v222_v16  ;;  %290 = vmatpush.msra.mxu1 %v222_v16 }
  0x20   : > { %326 = vmatpush.msra.mxu2 %v212_v15  ;;  %258 = vmatpush.msra.mxu0 %v212_v15 }
  0x21   : > { %359 = vmatpush.msra.mxu3 %v221_v18  ;;  %291 = vmatpush.msra.mxu1 %v221_v18 }
  0x22   : > { %327 = vmatpush.msra.mxu2 %v211_v17  ;;  %259 = vmatpush.msra.mxu0 %v211_v17 }
  0x23   : > { %480 = vmatmul.msk.f32.vlgmr.msra.gmra.mxu3 %vm240_vm0, %v475_v20  ;;  %471 = vmatmul.msk.f32.vlgmr.msra.gmra.mxu1 %vm240_vm0, %v232_v21 }
  0x24   : > { %328 = vmatpush.msra.mxu2 %v210_v19  ;;  %260 = vmatpush.msra.mxu0 %v210_v19 }
  0x26   : > { %329 = vmatpush.msra.mxu2 %v209_v22  ;;  %261 = vmatpush.msra.mxu0 %v209_v22 }
  0x28   : > { %330 = vmatpush.msra.mxu2 %v208_v23  ;;  %262 = vmatpush.msra.mxu0 %v208_v23 }
  0x2a   : > { %331 = vmatpush.msra.mxu2 %v207_v24  ;;  %263 = vmatpush.msra.mxu0 %v207_v24 }
  0x2b   : > { %481 = vmatmul.msk.f32.gmra.mxu3 %vm240_vm0, %v477_v26  ;;  %472 = vmatmul.msk.f32.gmra.mxu1 %vm240_vm0, %v234_v27 }
  0x2c   : > { %332 = vmatpush.msra.mxu2 %v206_v25  ;;  %264 = vmatpush.msra.mxu0 %v206_v25 }
  0x2e   : > { %333 = vmatpush.msra.mxu2 %v205_v28  ;;  %265 = vmatpush.msra.mxu0 %v205_v28 }
  0x2f   : > { %334 = vmatmul.f32.vlgmr.msra.gmra.mxu2 %v474_v29  ;;  %266 = vmatmul.f32.vlgmr.msra.gmra.mxu0 %v231_v30 }
  0x33   : > { %482 = vmatmul.msk.f32.gmra.mxu3 %vm240_vm0, %v479_v31  ;;  %473 = vmatmul.msk.f32.gmra.mxu1 %vm240_vm0, %v236_v32 }
  0x37   : > { %337 = vmatmul.f32.gmra.mxu2 %v476_v33  ;;  %269 = vmatmul.f32.gmra.mxu0 %v233_v34 }
  0x3f   : > { %340 = vmatmul.f32.gmra.mxu2 %v478_v35  ;;  %272 = vmatmul.f32.gmra.mxu0 %v235_v36 }
  0xa0   : > { %v293_v39 = vpop.f32.mrf.mxu1 }
  0xa6   : > { %v361_v40 = vpop.f32.mrf.mxu3 }
  0xa8   : > { %v296_v47 = vpop.f32.mrf.mxu1 }
  0xac   : > { %v267_v38 = vpop.f32.mrf.mxu0 }
  0xad   : > { %v268_v41 = vadd.f32 %v496_v37, %v267_v38 }
  0xae   : > { %v364_v50 = vpop.f32.mrf.mxu3 }
  0xaf   : > { %v294_v44 = vadd.f32 %v293_v39, %v268_v41 }
  0xb0   : > { %v299_v60 = vpop.f32.mrf.mxu1 }
  0xb2   : > { %v335_v42 = vpop.f32.mrf.mxu2 }
  0xb3   : > { %v336_v43 = vadd.f32 %v496_v37, %v335_v42 }
  0xb4   : > { %v270_v45 = vpop.f32.mrf.mxu0 }
  0xb5   : > { %v362_v46 = vadd.f32 %v361_v40, %v336_v43  ;;  %v271_v49 = vadd.f32 %v496_v37, %v270_v45 }
  0xb6   : > { %v367_v63 = vpop.f32.mrf.mxu3 }
  0xb7   : > { %v370_v48 = vmax.f32 %v294_v44, %v362_v46  ;;  %v297_v55 = vadd.f32 %v296_v47, %v271_v49 }
  0xb9   : > { %vm373_vm1 = vcmp.gt.f32.partialorder %v370_v48, 0.0  ;;  %v376_v51 = vmul.f32 0.2, %v370_v48 }
  0xba   : > { %v338_v52 = vpop.f32.mrf.mxu2 }
  0xbb   : > { %v379_v53 = vsel %vm373_vm1, %v370_v48, %v376_v51  ;;  %v339_v54 = vadd.f32 %v496_v37, %v338_v52 }
  0xbc   : > { %383 = vst.msk [vmem:[%s204_s30] sm:$0xff] %vm382_vm2, %v379_v53  ;;  %v273_v56 = vpop.f32.mrf.mxu0 }
  0xbd   : > { %v365_v57 = vadd.f32 %v364_v50, %v339_v54  ;;  %v274_v59 = vadd.f32 %v496_v37, %v273_v56 }
  0xbf   : > { %v371_v58 = vmax.f32 %v297_v55, %v365_v57  ;;  %v300_v2 = vadd.f32 %v299_v60, %v274_v59 }
  0xc1   : > { %vm374_vm3 = vcmp.gt.f32.partialorder %v371_v58, 0.0  ;;  %v377_v61 = vmul.f32 0.2, %v371_v58 }
  0xc2   : > { %v341_v62 = vpop.f32.mrf.mxu2 }
  0xc3   : > { %v380_v0 = vsel %vm374_vm3, %v371_v58, %v377_v61  ;;  %v342_v1 = vadd.f32 %v496_v37, %v341_v62 }
  0xc4   : > { %384 = vst.msk [vmem:[%s204_s30 + $0x8] sm:$0xff] %vm382_vm2, %v380_v0 }
  0xc5   : > { %v368_v3 = vadd.f32 %v367_v63, %v342_v1 }
  0xc7   : > { %v372_v4 = vmax.f32 %v300_v2, %v368_v3 }
  0xc9   : > { %vm375_vm4 = vcmp.gt.f32.partialorder %v372_v4, 0.0  ;;  %v378_v5 = vmul.f32 0.2, %v372_v4 }
  0xcb   : > { %v381_v6 = vsel %vm375_vm4, %v372_v4, %v378_v5 }
  0xcc   : > { %386 = vst.msk [vmem:[%s204_s30 + $0x10] sm:$0x3f] %vm385_vm5, %v381_v6 }
  0xcd PF: > { %s13_s12 = sadd.s32 1, %s503_s12  }
  0xce   : > { %p10_p4 = scmp.ge.s32.totalorder %s13_s12, 16  }
  0xd0   :  { %12 = sbr.rel (!%p10_p4) target bundleno = 1 (0x1), region = 69 }

// kernel: graphnet_forward.11
= control target key start
LH: loop header
LB: loop body
LE: loop exit
PB: predicated region body
PF: predicated region fallthrough
CT: control target
= control target key end

     0   :  { %vm706_vm0 = vcmask 1043456   ;;  %vm699_vm1 = vcmask 457728   ;;  %vm1116_vm6 = vcmask 228352   ;;  %vm1126_vm11 = vcmask 224256   ;;  %s2948_s2 = inlined_call_operand.vmem [shape: bf16[440,442], index: 2, kind: input, shape index: {}]   ;;  %s2949_s0 = inlined_call_operand.vmem [shape: f32[28,440], index: 0, kind: input, shape index: {}]   ;;  %s2950_s1 = inlined_call_operand.vmem [shape: f32[28,28], index: 1, kind: input, shape index: {}]   ;;  %s2951_s3 = inlined_call_operand.vmem [shape: f32[28,440], index: 3, kind: output, shape index: {}]  }
   0x1   :  { %v1532_v0 = vld [vmem:[%s2948_s2 + $0xe0] sm:$0xf]  ;;  %v1924_v1 = vld [vmem:[%s2948_s2 + $0xec] sm:$0xf0]  ;;  %v1922_v60 = vld [vmem:[%s2948_s2 + $0xe4] sm:$0xf] }
   0x2   :  { %v1660_v2 = vld [vmem:[%s2948_s2 + $0x1e0] sm:$0xf]  ;;  %v1533_v3 = vor.u32 %v1924_v1, %v1532_v0  ;;  %v1956_v4 = vld [vmem:[%s2948_s2 + $0x1ec] sm:$0xf0]  ;;  %v1534_v61 = vld [vmem:[%s2948_s2 + $0xf0] sm:$0xf0] }
   0x3   :  { %v1788_v5 = vld [vmem:[%s2948_s2 + $0x2e0] sm:$0xf]  ;;  %v1988_v6 = vld [vmem:[%s2948_s2 + $0x2ec] sm:$0xf0]  ;;  %v1661_v7 = vor.u32 %v1956_v4, %v1660_v2  ;;  %v18_v2 = vld [vmem:[%s2949_s0 + $0x18] sm:$0xff] }
   0x4   :  { %v1789_v8 = vor.u32 %v1988_v6, %v1788_v5  ;;  %v1516_v9 = vld [vmem:[%s2948_s2 + $0xc0] sm:$0xf]  ;;  %v1920_v10 = vld [vmem:[%s2948_s2 + $0xcc] sm:$0xf0]  ;;  %719 = vmatpush.bf16.msra.mxu0 %v1533_v3  ;;  %v22_v3 = vld [vmem:[%s2949_s0 + $0x38] sm:$0xff]  ;;  %v1537_v5 = vor.u32 %v1922_v60, %v1534_v61 }
   0x5   :  { %v1644_v11 = vld [vmem:[%s2948_s2 + $0x1c0] sm:$0xf]  ;;  %v1517_v12 = vor.u32 %v1920_v10, %v1516_v9  ;;  %v1952_v13 = vld [vmem:[%s2948_s2 + $0x1cc] sm:$0xf0]  ;;  %738 = vmatpush.bf16.msra.mxu1 %v1661_v7  ;;  %v26_v60 = vld [vmem:[%s2949_s0 + $0x58] sm:$0xff] }
   0x6   :  { %v1772_v14 = vld [vmem:[%s2948_s2 + $0x2c0] sm:$0xf]  ;;  %v1984_v15 = vld [vmem:[%s2948_s2 + $0x2cc] sm:$0xf0]  ;;  %757 = vmatpush.bf16.msra.mxu2 %v1789_v8  ;;  %v1645_v16 = vor.u32 %v1952_v13, %v1644_v11  ;;  %v1918_v11 = vld [vmem:[%s2948_s2 + $0xc4] sm:$0xf] }
   0x7   :  { %v1773_v17 = vor.u32 %v1984_v15, %v1772_v14  ;;  %v2116_v18 = vld [vmem:[%s2948_s2 + $0x360] sm:$0xff]  ;;  %v1916_v20 = vld [vmem:[%s2948_s2 + $0xac] sm:$0xf0]  ;;  %v2238_v14 = vpack.c.bf16 %v22_v3, %v18_v2  ;;  %v30_v61 = vld [vmem:[%s2949_s0 + $0x78] sm:$0xf] }
   0x8   :  { %v1500_v19 = vld [vmem:[%s2948_s2 + $0xa0] sm:$0xf]  ;;  %v475_v21 = vunpack.c.l.b16 %v2116_v18  ;;  %v1948_v23 = vld [vmem:[%s2948_s2 + $0x1ac] sm:$0xf0]  ;;  %720 = vmatpush.bf16.msra.mxu0 %v1517_v12  ;;  %v1518_v12 = vld [vmem:[%s2948_s2 + $0xd0] sm:$0xf0]  ;;  %v476_v13 = vunpack.c.h.b16 %v2116_v18 }
   0x9   :  { %v1628_v22 = vld [vmem:[%s2948_s2 + $0x1a0] sm:$0xf]  ;;  %v1980_v25 = vld [vmem:[%s2948_s2 + $0x2ac] sm:$0xf0]  ;;  %v1501_v27 = vor.u32 %v1916_v20, %v1500_v19  ;;  %739 = vmatpush.bf16.msra.mxu1 %v1645_v16  ;;  %v1521_v18 = vor.u32 %v1918_v11, %v1518_v12  ;;  %v1946_v3 = vld [vmem:[%s2948_s2 + $0x1a4] sm:$0xf] }
   0xa   :  { %v1756_v24 = vld [vmem:[%s2948_s2 + $0x2a0] sm:$0xf]  ;;  %v587_v26 = vpack.c.b16 %v475_v21, %v475_v21  ;;  %v2000_v29 = vld [vmem:[%s2948_s2 + $0x34c] sm:$0xf0]  ;;  %758 = vmatpush.bf16.msra.mxu2 %v1773_v17  ;;  %v1629_v31 = vor.u32 %v1948_v23, %v1628_v22  ;;  %v1902_v11 = vld [vmem:[%s2948_s2 + $0x44] sm:$0xf] }
   0xb   :  { %v1836_v28 = vld [vmem:[%s2948_s2 + $0x340] sm:$0xf]  ;;  %v1757_v32 = vor.u32 %v1980_v25, %v1756_v24  ;;  %v1912_v33 = vld [vmem:[%s2948_s2 + $0x8c] sm:$0xf0]  ;;  %v1454_v12 = vld [vmem:[%s2948_s2 + $0x50] sm:$0xf0] }
   0xc   :  { %v1484_v30 = vld [vmem:[%s2948_s2 + $0x80] sm:$0xf]  ;;  %v1944_v35 = vld [vmem:[%s2948_s2 + $0x18c] sm:$0xf0]  ;;  %v708_v36 = vsel %vm706_vm0, %v587_v26, 0  ;;  %v1837_v39 = vor.u32 %v2000_v29, %v1836_v28  ;;  %721 = vmatpush.bf16.msra.mxu0 %v1501_v27  ;;  %v588_v28 = vpack.c.b16 %v476_v13, %v476_v13 }
   0xd   :  { %v1612_v34 = vld [vmem:[%s2948_s2 + $0x180] sm:$0xf]  ;;  %v1976_v38 = vld [vmem:[%s2948_s2 + $0x28c] sm:$0xf0]  ;;  %780 = vmatpush.bf16.msra.mxu3 %v708_v36  ;;  %v1485_v40 = vor.u32 %v1912_v33, %v1484_v30  ;;  %740 = vmatpush.bf16.msra.mxu1 %v1629_v31  ;;  %v1914_v26 = vld [vmem:[%s2948_s2 + $0xa4] sm:$0xf] }
   0xe   :  { %v1740_v37 = vld [vmem:[%s2948_s2 + $0x280] sm:$0xf]  ;;  %v1996_v42 = vld [vmem:[%s2948_s2 + $0x32c] sm:$0xf0]  ;;  %759 = vmatpush.bf16.msra.mxu2 %v1757_v32  ;;  %v1613_v43 = vor.u32 %v1944_v35, %v1612_v34  ;;  %v1502_v27 = vld [vmem:[%s2948_s2 + $0xb0] sm:$0xf0] }
   0xf   :  { %v1820_v41 = vld [vmem:[%s2948_s2 + $0x320] sm:$0xf]  ;;  %v1741_v44 = vor.u32 %v1976_v38, %v1740_v37  ;;  %v1908_v46 = vld [vmem:[%s2948_s2 + $0x6c] sm:$0xf0]  ;;  %v1954_v33 = vld [vmem:[%s2948_s2 + $0x1e4] sm:$0xf]  ;;  %v1505_v36 = vor.u32 %v1914_v26, %v1502_v27 }
  0x10   :  { %v1468_v45 = vld [vmem:[%s2948_s2 + $0x60] sm:$0xf]  ;;  %v1940_v48 = vld [vmem:[%s2948_s2 + $0x16c] sm:$0xf0]  ;;  %v1821_v51 = vor.u32 %v1996_v42, %v1820_v41  ;;  %722 = vmatpush.bf16.msra.mxu0 %v1485_v40  ;;  %v1662_v34 = vld [vmem:[%s2948_s2 + $0x1f0] sm:$0xf0] }
  0x11   :  { %v1596_v47 = vld [vmem:[%s2948_s2 + $0x160] sm:$0xf]  ;;  %v1972_v50 = vld [vmem:[%s2948_s2 + $0x26c] sm:$0xf0]  ;;  %781 = vmatpush.bf16.msra.mxu3 %v1837_v39  ;;  %v1469_v53 = vor.u32 %v1908_v46, %v1468_v45  ;;  %741 = vmatpush.bf16.msra.mxu1 %v1613_v43  ;;  %v16_v37 = vld [vmem:[%s2949_s0 + $0x8] sm:$0xff]  ;;  %v711_v45 = vsel %vm706_vm0, %v588_v28, 0 }
  0x12   :  { %v1724_v49 = vld [vmem:[%s2948_s2 + $0x260] sm:$0xf]  ;;  %v1992_v54 = vld [vmem:[%s2948_s2 + $0x30c] sm:$0xf0]  ;;  %760 = vmatpush.bf16.msra.mxu2 %v1741_v44  ;;  %v1597_v57 = vor.u32 %v1940_v48, %v1596_v47  ;;  %v1986_v38 = vld [vmem:[%s2948_s2 + $0x2e4] sm:$0xf]  ;;  %v1665_v48 = vor.u32 %v1954_v33, %v1662_v34 }
  0x13   :  { %v1804_v52 = vld [vmem:[%s2948_s2 + $0x300] sm:$0xf]  ;;  %v1904_v56 = vld [vmem:[%s2948_s2 + $0x4c] sm:$0xf0]  ;;  %v1725_v58 = vor.u32 %v1972_v50, %v1724_v49  ;;  %v1790_v39 = vld [vmem:[%s2948_s2 + $0x2f0] sm:$0xf0] }
  0x14   :  { %v1452_v55 = vld [vmem:[%s2948_s2 + $0x40] sm:$0xf]  ;;  %v1936_v62 = vld [vmem:[%s2948_s2 + $0x14c] sm:$0xf0]  ;;  %v1805_v1 = vor.u32 %v1992_v54, %v1804_v52  ;;  %723 = vmatpush.bf16.msra.mxu0 %v1469_v53  ;;  %v20_v42 = vld [vmem:[%s2949_s0 + $0x28] sm:$0xff] }
  0x15   :  { %v1580_v59 = vld [vmem:[%s2948_s2 + $0x140] sm:$0xf]  ;;  %v1968_v0 = vld [vmem:[%s2948_s2 + $0x24c] sm:$0xf0]  ;;  %782 = vmatpush.bf16.msra.mxu3 %v1821_v51  ;;  %v1453_v4 = vor.u32 %v1904_v56, %v1452_v55  ;;  %742 = vmatpush.bf16.msra.mxu1 %v1597_v57  ;;  %v1910_v46 = vld [vmem:[%s2948_s2 + $0x84] sm:$0xf]  ;;  %v1793_v51 = vor.u32 %v1986_v38, %v1790_v39  ;;  %v2326_v55 = vpack.c.bf16 %v20_v42, %v16_v37 }
  0x16   :  { %v1708_v63 = vld [vmem:[%s2948_s2 + $0x240] sm:$0xf]  ;;  %v1900_v7 = vld [vmem:[%s2948_s2 + $0x2c] sm:$0xf0]  ;;  %761 = vmatpush.bf16.msra.mxu2 %v1725_v58  ;;  %v1581_v8 = vor.u32 %v1936_v62, %v1580_v59  ;;  %v1486_v47 = vld [vmem:[%s2948_s2 + $0x90] sm:$0xf0] }
  0x17   :  { %v1436_v6 = vld [vmem:[%s2948_s2 + $0x20] sm:$0xf]  ;;  %v1709_v9 = vor.u32 %v1968_v0, %v1708_v63  ;;  %v1932_v15 = vld [vmem:[%s2948_s2 + $0x12c] sm:$0xf0]  ;;  %v1950_v49 = vld [vmem:[%s2948_s2 + $0x1c4] sm:$0xf]  ;;  %v1489_v59 = vor.u32 %v1910_v46, %v1486_v47 }
  0x18   :  { %v1564_v10 = vld [vmem:[%s2948_s2 + $0x120] sm:$0xf]  ;;  %v1964_v17 = vld [vmem:[%s2948_s2 + $0x22c] sm:$0xf0]  ;;  %724 = vmatpush.bf16.msra.mxu0 %v1453_v4  ;;  %v1437_v19 = vor.u32 %v1900_v7, %v1436_v6  ;;  %v1646_v52 = vld [vmem:[%s2948_s2 + $0x1d0] sm:$0xf0] }
  0x19   :  { %v1692_v16 = vld [vmem:[%s2948_s2 + $0x220] sm:$0xf]  ;;  %783 = vmatpush.bf16.msra.mxu3 %v1805_v1  ;;  %v1896_v21 = vld [vmem:[%s2948_s2 + $0xc] sm:$0xf0]  ;;  %743 = vmatpush.bf16.msra.mxu1 %v1581_v8  ;;  %v1565_v23 = vor.u32 %v1932_v15, %v1564_v10  ;;  %v1998_v53 = vld [vmem:[%s2948_s2 + $0x344] sm:$0xf]  ;;  %v1649_v0 = vor.u32 %v1950_v49, %v1646_v52  ;;  %v2369_v10 = vpack.c.bf16 %v30_v61, %v26_v60 }
  0x1a   :  { %v1420_v20 = vld [vmem:[%s2948_s2] sm:$0xf]  ;;  %762 = vmatpush.bf16.msra.mxu2 %v1709_v9  ;;  %v1693_v24 = vor.u32 %v1964_v17, %v1692_v16  ;;  %v1928_v25 = vld [vmem:[%s2948_s2 + $0x10c] sm:$0xf0]  ;;  %v1838_v54 = vld [vmem:[%s2948_s2 + $0x350] sm:$0xf0] }
  0x1b   :  { %v1548_v22 = vld [vmem:[%s2948_s2 + $0x100] sm:$0xf]  ;;  %v1960_v30 = vld [vmem:[%s2948_s2 + $0x20c] sm:$0xf0]  ;;  %v1421_v35 = vor.u32 %v1896_v21, %v1420_v20  ;;  %v1982_v57 = vld [vmem:[%s2948_s2 + $0x2c4] sm:$0xf]  ;;  %v1841_v1 = vor.u32 %v1998_v53, %v1838_v54 }
  0x1c   :  { %1850 = vmatmul.msk.bf16.vlgmr.msra.gmra.mxu3 %vm699_vm1, %v2238_v14  ;;  %v1676_v29 = vld [vmem:[%s2948_s2 + $0x200] sm:$0xf]  ;;  %725 = vmatpush.bf16.msra.mxu0 %v1437_v19  ;;  %v1549_v40 = vor.u32 %v1928_v25, %v1548_v22  ;;  %v17_v43 = vld [vmem:[%s2949_s0 + $0x10] sm:$0xff]  ;;  %v1906_v62 = vld [vmem:[%s2948_s2 + $0x64] sm:$0xf] }
  0x1d   :  { %795 = vmatpush.bf16.msrb.mxu3 %v1537_v5  ;;  %v15_v31 = vld [vmem:[%s2949_s0] sm:$0xff]  ;;  %744 = vmatpush.bf16.msra.mxu1 %v1565_v23  ;;  %v1677_v41 = vor.u32 %v1960_v30, %v1676_v29  ;;  %v21_v44 = vld [vmem:[%s2949_s0 + $0x30] sm:$0xff]  ;;  %v1457_v23 = vor.u32 %v1902_v11, %v1454_v12  ;;  %v24_v30 = vld [vmem:[%s2949_s0 + $0x48] sm:$0xff] }
  0x1e   :  { %v19_v32 = vld [vmem:[%s2949_s0 + $0x20] sm:$0xff]  ;;  %763 = vmatpush.bf16.msra.mxu2 %v1693_v24  ;;  %v2328_v56 = vpack.c.bf16 %v21_v44, %v17_v43  ;;  %v1774_v58 = vld [vmem:[%s2948_s2 + $0x2d0] sm:$0xf0]  ;;  %v28_v38 = vld [vmem:[%s2949_s0 + $0x68] sm:$0xf] }
  0x1f   :  { %v2315_v50 = vpack.c.bf16 %v19_v32, %v15_v31  ;;  %v1470_v63 = vld [vmem:[%s2948_s2 + $0x70] sm:$0xf0]  ;;  %v1777_v2 = vor.u32 %v1982_v57, %v1774_v58  ;;  %v1978_v5 = vld [vmem:[%s2948_s2 + $0x2a4] sm:$0xf]  ;;  %v27_v28 = vld [vmem:[%s2949_s0 + $0x60] sm:$0xf]  ;;  %v2459_v53 = vpack.c.bf16 %v28_v38, %v24_v30 }
  0x20   :  { %726 = vmatpush.bf16.msra.mxu0 %v1421_v35  ;;  %v1630_v4 = vld [vmem:[%s2948_s2 + $0x1b0] sm:$0xf0]  ;;  %v1994_v7 = vld [vmem:[%s2948_s2 + $0x324] sm:$0xf]  ;;  %v1473_v9 = vor.u32 %v1906_v62, %v1470_v63  ;;  %v1540_v49 = vld [vmem:[%s2948_s2 + $0xe8] sm:$0xf] }
  0x21   :  { %796 = vmatpush.bf16.msrb.mxu3 %v1521_v18  ;;  %745 = vmatpush.bf16.msra.mxu1 %v1549_v40  ;;  %v1758_v6 = vld [vmem:[%s2948_s2 + $0x2b0] sm:$0xf0]  ;;  %v1633_v13 = vor.u32 %v1946_v3, %v1630_v4  ;;  %v1942_v16 = vld [vmem:[%s2948_s2 + $0x184] sm:$0xf]  ;;  %v29_v40 = vld [vmem:[%s2949_s0 + $0x70] sm:$0xf] }
  0x22   :  { %764 = vmatpush.bf16.msra.mxu2 %v1677_v41  ;;  %v1822_v8 = vld [vmem:[%s2948_s2 + $0x330] sm:$0xf0]  ;;  %v1761_v15 = vor.u32 %v1978_v5, %v1758_v6  ;;  %v1974_v19 = vld [vmem:[%s2948_s2 + $0x284] sm:$0xf]  ;;  %v1844_v61 = vld [vmem:[%s2948_s2 + $0x348] sm:$0xf] }
  0x23   :  { %727 = vmatmul.bf16.vlgmr.msra.gmra.mxu0 %v2315_v50  ;;  %v1614_v17 = vld [vmem:[%s2948_s2 + $0x190] sm:$0xf0]  ;;  %v1825_v18 = vor.u32 %v1994_v7, %v1822_v8  ;;  %v1990_v21 = vld [vmem:[%s2948_s2 + $0x304] sm:$0xf]  ;;  %v2001_v62 = vld [vmem:[%s2948_s2 + $0x354] sm:$0xf0] }
  0x24   :  { %814 = vmatpush.bf16.msrb.mxu0 %v1665_v48  ;;  %746 = vmatmul.bf16.vlgmr.msra.gmra.mxu1 %v2326_v55  ;;  %v1742_v20 = vld [vmem:[%s2948_s2 + $0x290] sm:$0xf0]  ;;  %v1898_v24 = vld [vmem:[%s2948_s2 + $0x24] sm:$0xf]  ;;  %v1617_v26 = vor.u32 %v1942_v16, %v1614_v17  ;;  %v1845_v5 = vor.u32 %v2001_v62, %v1844_v61  ;;  %v1524_v7 = vld [vmem:[%s2948_s2 + $0xc8] sm:$0xf] }
  0x25   :  { %797 = vmatpush.bf16.msrb.mxu3 %v1505_v36  ;;  %833 = vmatpush.bf16.msrb.mxu1 %v1793_v51  ;;  %v1806_v22 = vld [vmem:[%s2948_s2 + $0x310] sm:$0xf0]  ;;  %v23_v27 = vld [vmem:[%s2949_s0 + $0x40] sm:$0xff]  ;;  %v1745_v29 = vor.u32 %v1974_v19, %v1742_v20  ;;  %v2427_v36 = vld [vmem:[%s2948_s2 + $0x368] sm:$0xff] }
  0x26   :  { %856 = vmatpush.bf16.msrb.mxu2 %v711_v45  ;;  %v1438_v25 = vld [vmem:[%s2948_s2 + $0x30] sm:$0xf0]  ;;  %v1938_v31 = vld [vmem:[%s2948_s2 + $0x164] sm:$0xf]  ;;  %v1809_v33 = vor.u32 %v1990_v21, %v1806_v22  ;;  %v477_v41 = vunpack.c.l.b16 %v2427_v36  ;;  %v2448_v46 = vpack.c.bf16 %v27_v28, %v23_v27  ;;  %v1925_v51 = vld [vmem:[%s2948_s2 + $0xf4] sm:$0xf0] }
  0x27   :  { %765 = vmatmul.bf16.vlgmr.msra.gmra.mxu2 %v2328_v56  ;;  %v1598_v32 = vld [vmem:[%s2948_s2 + $0x170] sm:$0xf0]  ;;  %v1970_v34 = vld [vmem:[%s2948_s2 + $0x264] sm:$0xf]  ;;  %v1441_v37 = vor.u32 %v1898_v24, %v1438_v25  ;;  %v1921_v8 = vld [vmem:[%s2948_s2 + $0xd4] sm:$0xf0] }
  0x28   :  { %815 = vmatpush.bf16.msrb.mxu0 %v1649_v0  ;;  %v1726_v35 = vld [vmem:[%s2948_s2 + $0x270] sm:$0xf0]  ;;  %v1894_v42 = vld [vmem:[%s2948_s2 + $0x4] sm:$0xf]  ;;  %v1601_v44 = vor.u32 %v1938_v31, %v1598_v32  ;;  %v589_v52 = vpack.c.b16 %v477_v41, %v477_v41  ;;  %v1541_v0 = vor.u32 %v1925_v51, %v1540_v49  ;;  %v1828_v12 = vld [vmem:[%s2948_s2 + $0x328] sm:$0xf]  ;;  %v1525_v16 = vor.u32 %v1921_v8, %v1524_v7 }
  0x29   :  { %798 = vmatpush.bf16.msrb.mxu3 %v1489_v59  ;;  %834 = vmatpush.bf16.msrb.mxu1 %v1777_v2  ;;  %v25_v39 = vld [vmem:[%s2949_s0 + $0x50] sm:$0xff]  ;;  %v1934_v45 = vld [vmem:[%s2948_s2 + $0x144] sm:$0xf]  ;;  %v1729_v47 = vor.u32 %v1970_v34, %v1726_v35  ;;  %v1508_v20 = vld [vmem:[%s2948_s2 + $0xa8] sm:$0xf] }
  0x2a   :  { %857 = vmatpush.bf16.msrb.mxu2 %v1841_v1  ;;  %v1422_v43 = vld [vmem:[%s2948_s2 + $0x10] sm:$0xf0]  ;;  %v2461_v54 = vpack.c.bf16 %v29_v40, %v25_v39  ;;  %v1966_v57 = vld [vmem:[%s2948_s2 + $0x244] sm:$0xf]  ;;  %v714_v60 = vsel %vm706_vm0, %v589_v52, 0 }
  0x2b   :  { %v1582_v48 = vld [vmem:[%s2948_s2 + $0x150] sm:$0xf0]  ;;  %v1425_v59 = vor.u32 %v1894_v42, %v1422_v43  ;;  %v1930_v2 = vld [vmem:[%s2948_s2 + $0x124] sm:$0xf]  ;;  %v1917_v21 = vld [vmem:[%s2948_s2 + $0xb4] sm:$0xf0] }
  0x2c   :  { %1851 = vmatmul.msk.bf16.gmra.mxu3 %vm699_vm1, %v2369_v10  ;;  %816 = vmatpush.bf16.msrb.mxu0 %v1633_v13  ;;  %v1710_v58 = vld [vmem:[%s2948_s2 + $0x250] sm:$0xf0]  ;;  %v1585_v63 = vor.u32 %v1934_v45, %v1582_v48  ;;  %v1962_v4 = vld [vmem:[%s2948_s2 + $0x224] sm:$0xf]  ;;  %v1997_v13 = vld [vmem:[%s2948_s2 + $0x334] sm:$0xf0]  ;;  %v1509_v30 = vor.u32 %v1917_v21, %v1508_v20 }
  0x2d   :  { %799 = vmatpush.bf16.msrb.mxu3 %v1473_v9  ;;  %835 = vmatpush.bf16.msrb.mxu1 %v1761_v15  ;;  %v1713_v1 = vor.u32 %v1966_v57, %v1710_v58  ;;  %v1566_v3 = vld [vmem:[%s2948_s2 + $0x130] sm:$0xf0]  ;;  %v1926_v11 = vld [vmem:[%s2948_s2 + $0x104] sm:$0xf]  ;;  %v1668_v22 = vld [vmem:[%s2948_s2 + $0x1e8] sm:$0xf] }
  0x2e   :  { %858 = vmatpush.bf16.msrb.mxu2 %v1825_v18  ;;  %v1694_v6 = vld [vmem:[%s2948_s2 + $0x230] sm:$0xf0]  ;;  %v1569_v9 = vor.u32 %v1930_v2, %v1566_v3  ;;  %v1958_v19 = vld [vmem:[%s2948_s2 + $0x204] sm:$0xf]  ;;  %v1957_v24 = vld [vmem:[%s2948_s2 + $0x1f4] sm:$0xf0] }
  0x2f   :  { %v1697_v15 = vor.u32 %v1962_v4, %v1694_v6  ;;  %v1550_v17 = vld [vmem:[%s2948_s2 + $0x110] sm:$0xf0]  ;;  %v1796_v25 = vld [vmem:[%s2948_s2 + $0x2e8] sm:$0xf]  ;;  %v1993_v31 = vld [vmem:[%s2948_s2 + $0x314] sm:$0xf0]  ;;  %v1669_v34 = vor.u32 %v1957_v24, %v1668_v22 }
  0x30   :  { %817 = vmatpush.bf16.msrb.mxu0 %v1617_v26  ;;  %v1678_v18 = vld [vmem:[%s2948_s2 + $0x210] sm:$0xf0]  ;;  %v1989_v26 = vld [vmem:[%s2948_s2 + $0x2f4] sm:$0xf0]  ;;  %v1553_v27 = vor.u32 %v1926_v11, %v1550_v17  ;;  %v1812_v28 = vld [vmem:[%s2948_s2 + $0x308] sm:$0xf] }
  0x31   :  { %800 = vmatpush.bf16.msrb.mxu3 %v1457_v23  ;;  %836 = vmatpush.bf16.msrb.mxu1 %v1745_v29  ;;  %v1829_v23 = vor.u32 %v1997_v13, %v1828_v12  ;;  %v1681_v29 = vor.u32 %v1958_v19, %v1678_v18  ;;  %v1492_v32 = vld [vmem:[%s2948_s2 + $0x88] sm:$0xf]  ;;  %v1797_v35 = vor.u32 %v1989_v26, %v1796_v25  ;;  %v1953_v39 = vld [vmem:[%s2948_s2 + $0x1d4] sm:$0xf0] }
  0x32   :  { %859 = vmatpush.bf16.msrb.mxu2 %v1809_v33  ;;  %v1913_v33 = vld [vmem:[%s2948_s2 + $0x94] sm:$0xf0]  ;;  %v1813_v38 = vor.u32 %v1993_v31, %v1812_v28  ;;  %v1780_v40 = vld [vmem:[%s2948_s2 + $0x2c8] sm:$0xf]  ;;  %v1923_v28 = vld [vmem:[%s2948_s2 + $0xec] sm:$0xf] }
  0x33   :  { %732 = vmatmul.bf16.gmra.mxu0 %v2448_v46  ;;  %v1985_v41 = vld [vmem:[%s2948_s2 + $0x2d4] sm:$0xf0]  ;;  %v1493_v42 = vor.u32 %v1913_v33, %v1492_v32  ;;  %v1476_v43 = vld [vmem:[%s2948_s2 + $0x68] sm:$0xf] }
  0x34   :  { %818 = vmatpush.bf16.msrb.mxu0 %v1601_v44  ;;  %751 = vmatmul.bf16.gmra.mxu1 %v2459_v53  ;;  %v1909_v44 = vld [vmem:[%s2948_s2 + $0x74] sm:$0xf0]  ;;  %v1636_v48 = vld [vmem:[%s2948_s2 + $0x1a8] sm:$0xf] }
  0x35   :  { %801 = vmatpush.bf16.msrb.mxu3 %v1441_v37  ;;  %837 = vmatpush.bf16.msrb.mxu1 %v1729_v47  ;;  %v1652_v37 = vld [vmem:[%s2948_s2 + $0x1c8] sm:$0xf]  ;;  %v1781_v47 = vor.u32 %v1985_v41, %v1780_v40  ;;  %v1949_v49 = vld [vmem:[%s2948_s2 + $0x1b4] sm:$0xf0]  ;;  %v1477_v57 = vor.u32 %v1909_v44, %v1476_v43  ;;  %v1995_v40 = vld [vmem:[%s2948_s2 + $0x32c] sm:$0xf] }
  0x36   :  { %932 = vmatpush.bf16.msra.mxu2 %v714_v60  ;;  %v1653_v45 = vor.u32 %v1953_v39, %v1652_v37  ;;  %v1764_v51 = vld [vmem:[%s2948_s2 + $0x2a8] sm:$0xf]  ;;  %v1981_v52 = vld [vmem:[%s2948_s2 + $0x2b4] sm:$0xf0]  ;;  %v478_v60 = vunpack.c.h.b16 %v2427_v36  ;;  %v1637_v61 = vor.u32 %v1949_v49, %v1636_v48  ;;  %v1526_v39 = vld [vmem:[%s2948_s2 + $0xd8] sm:$0xf0] }
  0x37   :  { %770 = vmatmul.bf16.gmra.mxu2 %v2461_v54  ;;  %v1460_v58 = vld [vmem:[%s2948_s2 + $0x48] sm:$0xf]  ;;  %v1765_v62 = vor.u32 %v1981_v52, %v1764_v51  ;;  %v1977_v36 = vld [vmem:[%s2948_s2 + $0x294] sm:$0xf0]  ;;  %v1830_v41 = vld [vmem:[%s2948_s2 + $0x338] sm:$0xf0] }
  0x38   :  { %819 = vmatpush.bf16.msrb.mxu0 %v1585_v63  ;;  %v1620_v63 = vld [vmem:[%s2948_s2 + $0x188] sm:$0xf]  ;;  %v590_v2 = vpack.c.b16 %v478_v60, %v478_v60  ;;  %v1941_v11 = vld [vmem:[%s2948_s2 + $0x174] sm:$0xf0]  ;;  %v1955_v51 = vld [vmem:[%s2948_s2 + $0x1ec] sm:$0xf] }
  0x39   :  { %802 = vmatpush.bf16.msrb.mxu3 %v1425_v59  ;;  %838 = vmatpush.bf16.msrb.mxu1 %v1713_v1  ;;  %v1905_v59 = vld [vmem:[%s2948_s2 + $0x54] sm:$0xf0]  ;;  %v1748_v1 = vld [vmem:[%s2948_s2 + $0x288] sm:$0xf]  ;;  %v1915_v60 = vld [vmem:[%s2948_s2 + $0xac] sm:$0xf] }
  0x3a   :  { %933 = vmatpush.bf16.msra.mxu2 %v1845_v5  ;;  %v1461_v3 = vor.u32 %v1905_v59, %v1460_v58  ;;  %v1444_v4 = vld [vmem:[%s2948_s2 + $0x28] sm:$0xf]  ;;  %v1901_v5 = vld [vmem:[%s2948_s2 + $0x34] sm:$0xf0]  ;;  %v717_v6 = vsel %vm706_vm0, %v590_v2, 0  ;;  %v1749_v8 = vor.u32 %v1977_v36, %v1748_v1 }
  0x3b   :  { %v1732_v12 = vld [vmem:[%s2948_s2 + $0x268] sm:$0xf]  ;;  %v1973_v13 = vld [vmem:[%s2948_s2 + $0x274] sm:$0xf0]  ;;  %v1445_v17 = vor.u32 %v1901_v5, %v1444_v4  ;;  %v1987_v58 = vld [vmem:[%s2948_s2 + $0x2ec] sm:$0xf] }
  0x3c   :  { %803 = vmatmul.bf16.vlgmr.msrb.gmra.mxu3 %v2315_v50  ;;  %820 = vmatpush.bf16.msrb.mxu0 %v1569_v9  ;;  %v1604_v9 = vld [vmem:[%s2948_s2 + $0x168] sm:$0xf]  ;;  %v1897_v20 = vld [vmem:[%s2948_s2 + $0x14] sm:$0xf0]  ;;  %v1733_v22 = vor.u32 %v1973_v13, %v1732_v12  ;;  %v1798_v59 = vld [vmem:[%s2948_s2 + $0x2f8] sm:$0xf0] }
  0x3d   :  { %871 = vmatpush.bf16.msra.mxu3 %v1541_v0  ;;  %839 = vmatpush.bf16.msrb.mxu1 %v1697_v15  ;;  %v1945_v0 = vld [vmem:[%s2948_s2 + $0x194] sm:$0xf0]  ;;  %v1999_v15 = vld [vmem:[%s2948_s2 + $0x34c] sm:$0xf]  ;;  %v1428_v18 = vld [vmem:[%s2948_s2 + $0x8] sm:$0xf]  ;;  %v1605_v21 = vor.u32 %v1941_v11, %v1604_v9  ;;  %v1801_v1 = vor.u32 %v1987_v58, %v1798_v59 }
  0x3e   :  { %934 = vmatpush.bf16.msra.mxu2 %v1829_v23  ;;  %v1621_v7 = vor.u32 %v1945_v0, %v1620_v63  ;;  %v1588_v23 = vld [vmem:[%s2948_s2 + $0x148] sm:$0xf]  ;;  %v1937_v24 = vld [vmem:[%s2948_s2 + $0x154] sm:$0xf0]  ;;  %v1951_v36 = vld [vmem:[%s2948_s2 + $0x1cc] sm:$0xf] }
  0x3f   :  { %v1716_v25 = vld [vmem:[%s2948_s2 + $0x248] sm:$0xf]  ;;  %v1969_v26 = vld [vmem:[%s2948_s2 + $0x254] sm:$0xf0]  ;;  %v1991_v2 = vld [vmem:[%s2948_s2 + $0x30c] sm:$0xf] }
  0x40   :  { %821 = vmatpush.bf16.msrb.mxu0 %v1553_v27  ;;  %v1429_v27 = vor.u32 %v1897_v20, %v1428_v18  ;;  %v1717_v31 = vor.u32 %v1969_v26, %v1716_v25  ;;  %v1572_v32 = vld [vmem:[%s2948_s2 + $0x128] sm:$0xf]  ;;  %v1965_v37 = vld [vmem:[%s2948_s2 + $0x234] sm:$0xf0]  ;;  %v1654_v5 = vld [vmem:[%s2948_s2 + $0x1d8] sm:$0xf0] }
  0x41   :  { %872 = vmatpush.bf16.msra.mxu3 %v1525_v16  ;;  %840 = vmatpush.bf16.msrb.mxu1 %v1681_v29  ;;  %v1846_v16 = vld [vmem:[%s2948_s2 + $0x358] sm:$0xf0]  ;;  %v1556_v44 = vld [vmem:[%s2948_s2 + $0x108] sm:$0xf]  ;;  %v1961_v49 = vld [vmem:[%s2948_s2 + $0x214] sm:$0xf0]  ;;  %v1657_v12 = vor.u32 %v1951_v36, %v1654_v5 }
  0x42   :  { %935 = vmatpush.bf16.msra.mxu2 %v1813_v38  ;;  %v1849_v19 = vor.u32 %v1999_v15, %v1846_v16  ;;  %v1542_v29 = vld [vmem:[%s2948_s2 + $0xf8] sm:$0xf0]  ;;  %v1919_v38 = vld [vmem:[%s2948_s2 + $0xcc] sm:$0xf]  ;;  %v1684_v48 = vld [vmem:[%s2948_s2 + $0x208] sm:$0xf] }
  0x43   :  { %822 = vmatmul.bf16.vlgmr.msrb.gmra.mxu0 %v2326_v55  ;;  %v1545_v33 = vor.u32 %v1923_v28, %v1542_v29  ;;  %v1529_v52 = vor.u32 %v1919_v38, %v1526_v39  ;;  %v1685_v63 = vor.u32 %v1961_v49, %v1684_v48  ;;  %v1911_v9 = vld [vmem:[%s2948_s2 + $0x8c] sm:$0xf]  ;;  %v1494_v11 = vld [vmem:[%s2948_s2 + $0x98] sm:$0xf0] }
  0x44   :  { %890 = vmatpush.bf16.msra.mxu0 %v1669_v34  ;;  %841 = vmatmul.bf16.vlgmr.msrb.gmra.mxu1 %v2328_v56  ;;  %v1933_v34 = vld [vmem:[%s2948_s2 + $0x134] sm:$0xf0]  ;;  %v1947_v15 = vld [vmem:[%s2948_s2 + $0x1ac] sm:$0xf]  ;;  %v1497_v16 = vor.u32 %v1911_v9, %v1494_v11  ;;  %v1766_v18 = vld [vmem:[%s2948_s2 + $0x2b8] sm:$0xf0] }
  0x45   :  { %873 = vmatpush.bf16.msra.mxu3 %v1509_v30  ;;  %909 = vmatpush.bf16.msra.mxu1 %v1797_v35  ;;  %v1589_v30 = vor.u32 %v1937_v24, %v1588_v23  ;;  %v1700_v35 = vld [vmem:[%s2948_s2 + $0x228] sm:$0xf]  ;;  %v1907_v20 = vld [vmem:[%s2948_s2 + $0x6c] sm:$0xf]  ;;  %v1462_v28 = vld [vmem:[%s2948_s2 + $0x58] sm:$0xf0] }
  0x46   :  { %v1701_v43 = vor.u32 %v1965_v37, %v1700_v35  ;;  %v1903_v25 = vld [vmem:[%s2948_s2 + $0x4c] sm:$0xf]  ;;  %v1606_v37 = vld [vmem:[%s2948_s2 + $0x178] sm:$0xf0] }
  0x47   :  { %1852 = vmatmul.msk.bf16.vlgmr.msrb.gmra.mxu2 %vm699_vm1, %v2238_v14  ;;  %v1943_v26 = vld [vmem:[%s2948_s2 + $0x18c] sm:$0xf]  ;;  %v1446_v38 = vld [vmem:[%s2948_s2 + $0x38] sm:$0xf0] }
  0x48   :  { %891 = vmatpush.bf16.msra.mxu0 %v1653_v45  ;;  %1008 = vmatpush.bf16.msrb.mxu2 %v717_v6  ;;  %v1929_v45 = vld [vmem:[%s2948_s2 + $0x114] sm:$0xf0]  ;;  %v1983_v6 = vld [vmem:[%s2948_s2 + $0x2cc] sm:$0xf]  ;;  %v1430_v48 = vld [vmem:[%s2948_s2 + $0x18] sm:$0xf0] }
  0x49   :  { %874 = vmatpush.bf16.msra.mxu3 %v1493_v42  ;;  %910 = vmatpush.bf16.msra.mxu1 %v1781_v47  ;;  %v1573_v42 = vor.u32 %v1933_v34, %v1572_v32  ;;  %v1833_v47 = vor.u32 %v1995_v40, %v1830_v41  ;;  %v1975_v29 = vld [vmem:[%s2948_s2 + $0x28c] sm:$0xf]  ;;  %v1465_v32 = vor.u32 %v1903_v25, %v1462_v28  ;;  %v1734_v40 = vld [vmem:[%s2948_s2 + $0x278] sm:$0xf0] }
  0x4a   :  { %v1939_v35 = vld [vmem:[%s2948_s2 + $0x16c] sm:$0xf]  ;;  %v1574_v59 = vld [vmem:[%s2948_s2 + $0x138] sm:$0xf0] }
  0x4b   :  { %v1971_v39 = vld [vmem:[%s2948_s2 + $0x26c] sm:$0xf]  ;;  %v1609_v41 = vor.u32 %v1939_v35, %v1606_v37 }
  0x4c   :  { %892 = vmatpush.bf16.msra.mxu0 %v1637_v61  ;;  %808 = vmatmul.bf16.gmra.mxu3 %v2448_v46  ;;  %v1510_v61 = vld [vmem:[%s2948_s2 + $0xb8] sm:$0xf0]  ;;  %v1931_v58 = vld [vmem:[%s2948_s2 + $0x12c] sm:$0xf] }
  0x4d   :  { %875 = vmatpush.bf16.msra.mxu3 %v1477_v57  ;;  %911 = vmatpush.bf16.msra.mxu1 %v1765_v62  ;;  %v1670_v57 = vld [vmem:[%s2948_s2 + $0x1f8] sm:$0xf0]  ;;  %v1557_v62 = vor.u32 %v1929_v45, %v1556_v44  ;;  %v1513_v4 = vor.u32 %v1915_v60, %v1510_v61  ;;  %v1935_v44 = vld [vmem:[%s2948_s2 + $0x14c] sm:$0xf]  ;;  %v1577_v61 = vor.u32 %v1931_v58, %v1574_v59 }
  0x4e   :  { %1009 = vmatpush.bf16.msrb.mxu2 %v1849_v19  ;;  %v1673_v0 = vor.u32 %v1955_v51, %v1670_v57  ;;  %v1979_v19 = vld [vmem:[%s2948_s2 + $0x2ac] sm:$0xf]  ;;  %v1590_v45 = vld [vmem:[%s2948_s2 + $0x158] sm:$0xf0] }
  0x4f   :  { %v1769_v23 = vor.u32 %v1979_v19, %v1766_v18  ;;  %v1593_v49 = vor.u32 %v1935_v44, %v1590_v45  ;;  %v1967_v51 = vld [vmem:[%s2948_s2 + $0x24c] sm:$0xf] }
  0x50   :  { %893 = vmatpush.bf16.msra.mxu0 %v1621_v7  ;;  %v1782_v7 = vld [vmem:[%s2948_s2 + $0x2d8] sm:$0xf0] }
  0x51   :  { %876 = vmatpush.bf16.msra.mxu3 %v1461_v3  ;;  %912 = vmatpush.bf16.msra.mxu1 %v1749_v8  ;;  %v1814_v3 = vld [vmem:[%s2948_s2 + $0x318] sm:$0xf0]  ;;  %v1785_v13 = vor.u32 %v1983_v6, %v1782_v7 }
  0x52   :  { %1010 = vmatpush.bf16.msrb.mxu2 %v1833_v47  ;;  %v1817_v8 = vor.u32 %v1991_v2, %v1814_v3  ;;  %v1895_v47 = vld [vmem:[%s2948_s2 + $0xc] sm:$0xf] }
  0x53   :  { %827 = vmatmul.bf16.gmra.mxu0 %v2459_v53  ;;  %v1433_v57 = vor.u32 %v1895_v47, %v1430_v48  ;;  %v1959_v3 = vld [vmem:[%s2948_s2 + $0x20c] sm:$0xf] }
  0x54   :  { %894 = vmatpush.bf16.msra.mxu0 %v1605_v21  ;;  %846 = vmatmul.bf16.gmra.mxu1 %v2461_v54  ;;  %v1478_v21 = vld [vmem:[%s2948_s2 + $0x78] sm:$0xf0] }
  0x55   :  { %877 = vmatpush.bf16.msra.mxu3 %v1445_v17  ;;  %913 = vmatpush.bf16.msra.mxu1 %v1733_v22  ;;  %v1638_v17 = vld [vmem:[%s2948_s2 + $0x1b8] sm:$0xf0]  ;;  %v1481_v24 = vor.u32 %v1907_v20, %v1478_v21 }
  0x56   :  { %1011 = vmatpush.bf16.msrb.mxu2 %v1817_v8  ;;  %v1641_v22 = vor.u32 %v1947_v15, %v1638_v17 }
  0x57   :  { %1853 = vmatmul.msk.bf16.gmra.mxu2 %vm699_vm1, %v2369_v10 }
  0x58   :  { %895 = vmatpush.bf16.msra.mxu0 %v1589_v30  ;;  %v1750_v30 = vld [vmem:[%s2948_s2 + $0x298] sm:$0xf0] }
  0x59   :  { %878 = vmatpush.bf16.msra.mxu3 %v1429_v27  ;;  %914 = vmatpush.bf16.msra.mxu1 %v1717_v31  ;;  %v1622_v27 = vld [vmem:[%s2948_s2 + $0x198] sm:$0xf0]  ;;  %v1753_v34 = vor.u32 %v1975_v29, %v1750_v30 }
  0x5a   :  { %v1625_v31 = vor.u32 %v1943_v26, %v1622_v27 }
  0x5c   :  { %896 = vmatpush.bf16.msra.mxu0 %v1573_v42  ;;  %879 = vmatmul.bf16.vlgmr.msra.gmra.mxu3 %v2315_v50 }
  0x5d   :  { %947 = vmatpush.bf16.msrb.mxu3 %v1545_v33  ;;  %915 = vmatpush.bf16.msra.mxu1 %v1701_v43  ;;  %v1899_v33 = vld [vmem:[%s2948_s2 + $0x2c] sm:$0xf]  ;;  %v1737_v43 = vor.u32 %v1971_v39, %v1734_v40 }
  0x5e   :  { %v1449_v42 = vor.u32 %v1899_v33, %v1446_v38 }
  0x60   :  { %897 = vmatpush.bf16.msra.mxu0 %v1557_v62  ;;  %v1963_v62 = vld [vmem:[%s2948_s2 + $0x22c] sm:$0xf] }
  0x61   :  { %948 = vmatpush.bf16.msrb.mxu3 %v1529_v52  ;;  %916 = vmatpush.bf16.msra.mxu1 %v1685_v63  ;;  %v1718_v52 = vld [vmem:[%s2948_s2 + $0x258] sm:$0xf0] }
  0x62   :  { %v1721_v60 = vor.u32 %v1967_v51, %v1718_v52  ;;  %v1702_v63 = vld [vmem:[%s2948_s2 + $0x238] sm:$0xf0] }
  0x63   :  { %898 = vmatmul.bf16.vlgmr.msra.gmra.mxu0 %v2326_v55  ;;  %v1705_v36 = vor.u32 %v1963_v62, %v1702_v63 }
  0x64   :  { %966 = vmatpush.bf16.msrb.mxu0 %v1673_v0  ;;  %917 = vmatmul.bf16.vlgmr.msra.gmra.mxu1 %v2328_v56  ;;  %v1927_v0 = vld [vmem:[%s2948_s2 + $0x10c] sm:$0xf] }
  0x65   :  { %985 = vmatpush.bf16.msrb.mxu1 %v1801_v1  ;;  %949 = vmatpush.bf16.msrb.mxu3 %v1513_v4  ;;  %v1558_v1 = vld [vmem:[%s2948_s2 + $0x118] sm:$0xf0] }
  0x66   :  { %v1561_v2 = vor.u32 %v1927_v0, %v1558_v1  ;;  %v1686_v4 = vld [vmem:[%s2948_s2 + $0x218] sm:$0xf0]  ;;  %s2056_s2 = smov 71  }
  0x67   :  { %1854 = vmatmul.msk.bf16.vlgmr.msra.gmra.mxu2 %vm699_vm1, %v2238_v14  ;;  %v1689_v5 = vor.u32 %v1959_v3, %v1686_v4 }
  0x68   :  { %967 = vmatpush.bf16.msrb.mxu0 %v1657_v12 }
  0x69   :  { %986 = vmatpush.bf16.msrb.mxu1 %v1785_v13  ;;  %950 = vmatpush.bf16.msrb.mxu3 %v1497_v16 }
  0x6c   :  { %968 = vmatpush.bf16.msrb.mxu0 %v1641_v22  ;;  %884 = vmatmul.bf16.gmra.mxu3 %v2448_v46 }
  0x6d   :  { %987 = vmatpush.bf16.msrb.mxu1 %v1769_v23  ;;  %951 = vmatpush.bf16.msrb.mxu3 %v1481_v24 }
  0x70   :  { %969 = vmatpush.bf16.msrb.mxu0 %v1625_v31 }
  0x71   :  { %952 = vmatpush.bf16.msrb.mxu3 %v1465_v32  ;;  %988 = vmatpush.bf16.msrb.mxu1 %v1753_v34 }
  0x73   :  { %903 = vmatmul.bf16.gmra.mxu0 %v2459_v53 }
  0x74   :  { %970 = vmatpush.bf16.msrb.mxu0 %v1609_v41  ;;  %922 = vmatmul.bf16.gmra.mxu1 %v2461_v54 }
  0x75   :  { %953 = vmatpush.bf16.msrb.mxu3 %v1449_v42  ;;  %989 = vmatpush.bf16.msrb.mxu1 %v1737_v43 }
  0x77   :  { %1855 = vmatmul.msk.bf16.gmra.mxu2 %vm699_vm1, %v2369_v10 }
  0x78   :  { %971 = vmatpush.bf16.msrb.mxu0 %v1593_v49 }
  0x79   :  { %954 = vmatpush.bf16.msrb.mxu3 %v1433_v57  ;;  %990 = vmatpush.bf16.msrb.mxu1 %v1721_v60 }
  0x7c   :  { %972 = vmatpush.bf16.msrb.mxu0 %v1577_v61  ;;  %955 = vmatmul.bf16.vlgmr.msrb.gmra.mxu3 %v2315_v50 }
  0x7d   :  { %991 = vmatpush.bf16.msrb.mxu1 %v1705_v36 }
  0x80   :  { %973 = vmatpush.bf16.msrb.mxu0 %v1561_v2 }
  0x81   :  { %992 = vmatpush.bf16.msrb.mxu1 %v1689_v5  ;;  %v2055_v5 = vmov 56  }
  0x82   :  { %2005 = vset.pattern.permute.xlu2 %v2055_v5  ;;  %2006 = vset.pattern.permute.xlu0 %v2055_v5 }
  0x83   :  { %974 = vmatmul.bf16.vlgmr.msrb.gmra.mxu0 %v2326_v55 }
  0x84   :  { %993 = vmatmul.bf16.vlgmr.msrb.gmra.mxu1 %v2328_v56 }
  0x87   :  { %1856 = vmatmul.msk.bf16.vlgmr.msrb.gmra.mxu2 %vm699_vm1, %v2238_v14 }
  0x8c   :  { %960 = vmatmul.bf16.gmra.mxu3 %v2448_v46 }
  0x93   :  { %979 = vmatmul.bf16.gmra.mxu0 %v2459_v53 }
  0x94   :  { %998 = vmatmul.bf16.gmra.mxu1 %v2461_v54 }
  0x97   :  { %1857 = vmatmul.msk.bf16.gmra.mxu2 %vm699_vm1, %v2369_v10 }
  0x9f   :  { %v785_v6 = vpop.f32.mrf.mxu3 }
  0xa0   :  { %v728_v50 = vpop.f32.mrf.mxu0 }
  0xa1   :  { %v747_v7 = vpop.f32.mrf.mxu1 }
  0xa2   :  { %v748_v24 = vadd.f32 %v747_v7, %v728_v50 }
  0xa7   :  { %v787_v8 = vpop.f32.mrf.mxu3 }
  0xa8   :  { %v730_v55 = vpop.f32.mrf.mxu0 }
  0xa9   :  { %v749_v11 = vpop.f32.mrf.mxu1 }
  0xaa   :  { %v766_v9 = vpop.f32.mrf.mxu2  ;;  %v750_v10 = vadd.f32 %v749_v11, %v730_v55 }
  0xab   :  { %v767_v27 = vadd.f32 %v766_v9, %v748_v24 }
  0xad   :  { %v786_v32 = vadd.f32 %v785_v6, %v767_v27 }
  0xaf   :  { %v790_v56 = vpop.f32.mrf.mxu3 }
  0xb0   :  { %v733_v13 = vpop.f32.mrf.mxu0 }
  0xb1   :  { %v752_v14 = vpop.f32.mrf.mxu1 }
  0xb2   :  { %v768_v12 = vpop.f32.mrf.mxu2  ;;  %v753_v54 = vadd.f32 %v752_v14, %v733_v13 }
  0xb3   :  { %v769_v25 = vadd.f32 %v768_v12, %v750_v10 }
  0xb5   :  { %v788_v30 = vadd.f32 %v787_v8, %v769_v25 }
  0xb7   :  { %v792_v15 = vpop.f32.mrf.mxu3 }
  0xb8   :  { %v735_v16 = vpop.f32.mrf.mxu0 }
  0xb9   :  { %v754_v53 = vpop.f32.mrf.mxu1 }
  0xba   :  { %v771_v46 = vpop.f32.mrf.mxu2  ;;  %v755_v19 = vadd.f32 %v754_v53, %v735_v16 }
  0xbb   :  { %v772_v20 = vadd.f32 %v771_v46, %v753_v54 }
  0xbd   :  { %v791_v28 = vadd.f32 %v790_v56, %v772_v20 }
  0xbf   :  { %v804_v17 = vpop.f32.mrf.mxu3 }
  0xc0   :  { %v823_v22 = vpop.f32.mrf.mxu0 }
  0xc1   :  { %v842_v23 = vpop.f32.mrf.mxu1  ;;  %v824_v48 = vadd.f32 %v823_v22, %v804_v17 }
  0xc2   :  { %v773_v18 = vpop.f32.mrf.mxu2 }
  0xc3   :  { %v774_v21 = vadd.f32 %v773_v18, %v755_v19  ;;  %v843_v61 = vadd.f32 %v842_v23, %v824_v48 }
  0xc5   :  { %v793_v26 = vadd.f32 %v792_v15, %v774_v21 }
  0xc7   :  { %1858 = vmatpush.msk.msra.mxu3 %vm706_vm0, %v793_v26  ;;  %v806_v29 = vpop.f32.mrf.mxu3 }
  0xc8   :  { %v825_v33 = vpop.f32.mrf.mxu0 }
  0xc9   :  { %1198 = vmatpush.msra.mxu3 %v791_v28  ;;  %v844_v34 = vpop.f32.mrf.mxu1  ;;  %v826_v49 = vadd.f32 %v825_v33, %v806_v29 }
  0xca   :  { %v861_v31 = vpop.f32.mrf.mxu2 }
  0xcb   :  { %1199 = vmatpush.msra.mxu3 %v788_v30  ;;  %v845_v62 = vadd.f32 %v844_v34, %v826_v49  ;;  %v862_v36 = vadd.f32 %v861_v31, %v843_v61 }
  0xcd   :  { %1200 = vmatpush.msra.mxu3 %v786_v32 }
  0xcf   :  { %v809_v35 = vpop.f32.mrf.mxu3 }
  0xd0   :  { %v828_v38 = vpop.f32.mrf.mxu0 }
  0xd1   :  { %v847_v39 = vpop.f32.mrf.mxu1  ;;  %v829_v44 = vadd.f32 %v828_v38, %v809_v35 }
  0xd2   :  { %v863_v37 = vpop.f32.mrf.mxu2 }
  0xd3   :  { %v848_v51 = vadd.f32 %v847_v39, %v829_v44  ;;  %v864_v0 = vadd.f32 %v863_v37, %v845_v62 }
  0xd7   :  { %v811_v40 = vpop.f32.mrf.mxu3 }
  0xd8   :  { %v830_v42 = vpop.f32.mrf.mxu0 }
  0xd9   :  { %v849_v43 = vpop.f32.mrf.mxu1  ;;  %v831_v45 = vadd.f32 %v830_v42, %v811_v40 }
  0xda   :  { %v866_v41 = vpop.f32.mrf.mxu2 }
  0xdb   :  { %v850_v52 = vadd.f32 %v849_v43, %v831_v45  ;;  %v867_v63 = vadd.f32 %v866_v41, %v848_v51 }
  0xdf   :  { %v880_v47 = vpop.f32.mrf.mxu3 }
  0xe0   :  { %v899_v59 = vpop.f32.mrf.mxu0 }
  0xe1   :  { %v918_v60 = vpop.f32.mrf.mxu1  ;;  %v900_v15 = vadd.f32 %v899_v59, %v880_v47 }
  0xe2   :  { %v868_v57 = vpop.f32.mrf.mxu2 }
  0xe3   :  { %v869_v58 = vadd.f32 %v868_v57, %v850_v52  ;;  %v919_v20 = vadd.f32 %v918_v60, %v900_v15 }
  0xe5   :  { %1863 = vmatpush.msk.msra.mxu0 %vm706_vm0, %v869_v58 }
  0xe7   :  { %1227 = vmatpush.msra.mxu0 %v867_v63  ;;  %v882_v1 = vpop.f32.mrf.mxu3  ;;  %v1105_v63 = vld [vmem:[%s2950_s1 + $0x8] sm:$0xff] }
  0xe8   :  { %v901_v3 = vpop.f32.mrf.mxu0  ;;  %vm1109_vm2 = vcmp.gt.f32.partialorder %v1105_v63, 0.0 }
  0xe9   :  { %1228 = vmatpush.msra.mxu0 %v864_v0  ;;  %v920_v4 = vpop.f32.mrf.mxu1  ;;  %v902_v46 = vadd.f32 %v901_v3, %v882_v1  ;;  %v1104_v0 = vld [vmem:[%s2950_s1] sm:$0xff] }
  0xea   :  { %v937_v2 = vpop.f32.mrf.mxu2  ;;  %vm1108_vm3 = vcmp.gt.f32.partialorder %v1104_v0, 0.0 }
  0xeb   :  { %1229 = vmatpush.msra.mxu0 %v862_v36  ;;  %v921_v21 = vadd.f32 %v920_v4, %v902_v46  ;;  %v938_v26 = vadd.f32 %v937_v2, %v919_v20 }
  0xef   :  { %v885_v6 = vpop.f32.mrf.mxu3 }
  0xf0   :  { %v904_v7 = vpop.f32.mrf.mxu0 }
  0xf1   :  { %v923_v8 = vpop.f32.mrf.mxu1  ;;  %v905_v12 = vadd.f32 %v904_v7, %v885_v6 }
  0xf2   :  { %v939_v50 = vpop.f32.mrf.mxu2 }
  0xf3   :  { %v924_v16 = vadd.f32 %v923_v8, %v905_v12  ;;  %v940_v23 = vadd.f32 %v939_v50, %v921_v21 }
  0xf7   :  { %v887_v9 = vpop.f32.mrf.mxu3 }
  0xf8   :  { %v906_v11 = vpop.f32.mrf.mxu0 }
  0xf9   :  { %v925_v56 = vpop.f32.mrf.mxu1  ;;  %v907_v13 = vadd.f32 %v906_v11, %v887_v9  ;;  %v1106_v11 = vld [vmem:[%s2950_s1 + $0x10] sm:$0xff] }
  0xfa   :  { %v942_v55 = vpop.f32.mrf.mxu2  ;;  %vm1110_vm8 = vcmp.gt.f32.partialorder %v1106_v11, 0.0 }
  0xfb   :  { %v926_v53 = vadd.f32 %v925_v56, %v907_v13  ;;  %v943_v22 = vadd.f32 %v942_v55, %v924_v16 }
  0xff   :  { %v956_v14 = vpop.f32.mrf.mxu3 }
 0x100   :  { %v975_v19 = vpop.f32.mrf.mxu0 }
 0x101   :  { %v976_v18 = vadd.f32 %v975_v19, %v956_v14  ;;  %v994_v10 = vpop.f32.mrf.mxu1 }
 0x102   :  { %v944_v17 = vpop.f32.mrf.mxu2 }
 0x103   :  { %v945_v54 = vadd.f32 %v944_v17, %v926_v53  ;;  %v995_v24 = vadd.f32 %v994_v10, %v976_v18  ;;  %v1107_v53 = vld [vmem:[%s2950_s1 + $0x18] sm:$0xf] }
 0x104   :  { %vm1111_vm10 = vcmp.gt.f32.partialorder %v1107_v53, 0.0 }
 0x105   :  { %1868 = vmatpush.msk.msra.mxu1 %vm706_vm0, %v945_v54 }
 0x107   :  { %1256 = vmatpush.msra.mxu1 %v943_v22  ;;  %v958_v25 = vpop.f32.mrf.mxu3 }
 0x108   :  { %v977_v29 = vpop.f32.mrf.mxu0 }
 0x109   :  { %1257 = vmatpush.msra.mxu1 %v940_v23  ;;  %v996_v30 = vpop.f32.mrf.mxu1  ;;  %v978_v31 = vadd.f32 %v977_v29, %v958_v25 }
 0x10a   :  { %v1013_v27 = vpop.f32.mrf.mxu2 }
 0x10b   :  { %v1014_v28 = vadd.f32 %v1013_v27, %v995_v24  ;;  %1258 = vmatpush.msra.mxu1 %v938_v26  ;;  %v997_v32 = vadd.f32 %v996_v30, %v978_v31 }
 0x10d   :  { %1072 = vperm.xlu2 %2005, %v1014_v28   ;;  %1027 = vrot.lane.b32.xlu0 %v1014_v28, %s2056_s2 }
 0x10f   :  { %v961_v33 = vpop.f32.mrf.mxu3 }
 0x110   :  { %v980_v37 = vpop.f32.mrf.mxu0 }
 0x111   :  { %v981_v38 = vadd.f32 %v980_v37, %v961_v33  ;;  %v999_v39 = vpop.f32.mrf.mxu1 }
 0x112   :  { %v1015_v34 = vpop.f32.mrf.mxu2 }
 0x113   :  { %v1016_v35 = vadd.f32 %v1015_v34, %v997_v32  ;;  %v1000_v40 = vadd.f32 %v999_v39, %v981_v38 }
 0x115   :  { %1076 = vperm.xlu2 %2005, %v1016_v35   ;;  %1029 = vrot.lane.b32.xlu0 %v1016_v35, %s2056_s2 }
 0x117   :  { %v963_v44 = vpop.f32.mrf.mxu3 }
 0x118   :  { %v982_v43 = vpop.f32.mrf.mxu0 }
 0x119   :  { %v983_v45 = vadd.f32 %v982_v43, %v963_v44  ;;  %v1001_v47 = vpop.f32.mrf.mxu1 }
 0x11a   :  { %v1018_v41 = vpop.f32.mrf.mxu2 }
 0x11b   :  { %v1019_v42 = vadd.f32 %v1018_v41, %v1000_v40  ;;  %v1002_v48 = vadd.f32 %v1001_v47, %v983_v45 }
 0x11d   :  { %1031 = vrot.lane.b32.xlu1 %v1019_v42, %s2056_s2  ;;  %1080 = vperm.xlu0 %2006, %v1019_v42  }
 0x122   :  { %v1020_v49 = vpop.f32.mrf.mxu2 }
 0x123   :  { %v1021_v51 = vadd.f32 %v1020_v49, %v1002_v48 }
 0x125   :  { %1873 = vmatpush.msk.msra.mxu2 %vm706_vm0, %v1021_v51  ;;  %1033 = vrot.lane.b32.xlu1 %v1021_v51, %s2056_s2 }
 0x126   :  { %1084 = vperm.xlu2 %2005, %v1021_v51  }
 0x127   :  { %1285 = vmatpush.msra.mxu2 %v1019_v42 }
 0x129   :  { %1286 = vmatpush.msra.mxu2 %v1016_v35 }
 0x12b   :  { %1287 = vmatpush.msra.mxu2 %v1014_v28 }
 0x167   :  { %v1073_v60 = vpop.permute.xlu2 %1072 }
 0x16f   :  { %v1077_v1 = vpop.permute.xlu2 %1076 }
 0x17f   :  { %v1028_v52 = vpop.permute.xlu0 %1027 }
 0x180   :  { %1039 = vxpose.xlu1.b32.start [1/4] (short) (narrow) %v1028_v52, 8  ;;  %v1085_v13 = vpop.permute.xlu2 %1084 }
 0x187   :  { %v1030_v57 = vpop.permute.xlu0 %1029 }
 0x188   :  { %1040 = vxpose.xlu1.b32.cont [2/4] (short) (narrow) %v1030_v57, 8 }
 0x18f   :  { %v1032_v58 = vpop.permute.xlu1 %1031  ;;  %v1081_v36 = vpop.permute.xlu0 %1080 }
 0x190   :  { %1041 = vxpose.xlu1.b32.cont [3/4] (short) (narrow) %v1032_v58, 8 }
 0x197   :  { %v1034_v59 = vpop.permute.xlu1 %1033 }
 0x198   :  { %1042 = vxpose.xlu1.b32.end [4/4] (short) (narrow) %v1034_v59, 8 }
 0x224   :  { %v1055_v61 = vpop.trf.xlu1 }
 0x225   :  { %v1087_v62 = vperm.slane %v1055_v61, 0 }
 0x227   :  { %v1089_v2 = vadd.f32 %v1087_v62, %v1077_v1  ;;  %v1088_v3 = vadd.f32 %v1087_v62, %v1073_v60  ;;  %v1090_v4 = vadd.f32 %v1087_v62, %v1081_v36  ;;  %v1091_v15 = vadd.f32 %v1087_v62, %v1085_v13 }
 0x229   :  { %vm1093_vm4 = vcmp.gt.f32.partialorder %v1089_v2, 0.0  ;;  %v1097_v5 = vmul.f32 0.2, %v1089_v2  ;;  %vm1092_vm5 = vcmp.gt.f32.partialorder %v1088_v3, 0.0  ;;  %v1096_v6 = vmul.f32 0.2, %v1088_v3 }
 0x22a   :  { %v1098_v8 = vmul.f32 0.2, %v1090_v4  ;;  %vm1094_vm7 = vcmp.gt.f32.partialorder %v1090_v4, 0.0  ;;  %v1099_v16 = vmul.f32 0.2, %v1091_v15  ;;  %vm1095_vm9 = vcmp.gt.f32.partialorder %v1091_v15, 0.0 }
 0x22b   :  { %v1101_v50 = vsel %vm1093_vm4, %v1089_v2, %v1097_v5  ;;  %v1100_v7 = vsel %vm1092_vm5, %v1088_v3, %v1096_v6 }
 0x22c   :  { %v1113_v9 = vsel %vm1109_vm2, %v1101_v50, -9e+15  ;;  %v1112_v55 = vsel %vm1108_vm3, %v1100_v7, -9e+15  ;;  %v1102_v14 = vsel %vm1094_vm7, %v1090_v4, %v1098_v8  ;;  %v1103_v54 = vsel %vm1095_vm9, %v1091_v15, %v1099_v16 }
 0x22d   :  { %v1120_v56 = vsel %vm1116_vm6, %v1113_v9, -inf  ;;  %v1117_v12 = vsel %vm1116_vm6, %v1112_v55, -inf  ;;  %v1114_v46 = vsel %vm1110_vm8, %v1102_v14, -9e+15  ;;  %v1115_v19 = vsel %vm1111_vm10, %v1103_v54, -9e+15 }
 0x22e   :  { %1121 = vmax.xlane.f32.xlu0 %v1120_v56  ;;  %1118 = vmax.xlane.f32.xlu2 %v1117_v12  ;;  %v1123_v17 = vsel %vm1116_vm6, %v1114_v46, -inf  ;;  %v1127_v18 = vsel %vm1126_vm11, %v1115_v19, -inf }
 0x236   :  { %1124 = vmax.xlane.f32.xlu2 %v1123_v17 }
 0x23e   :  { %1128 = vmax.xlane.f32.xlu2 %v1127_v18 }
 0x2a1   :  { %v1119_v10 = vpop.xlane.xlu2 %1118  ;;  %v1122_v20 = vpop.xlane.xlu0 %1121 }
 0x2a2   :  { %v1130_v21 = vsub.f32 %v1112_v55, %v1119_v10  ;;  %v1131_v22 = vsub.f32 %v1113_v9, %v1122_v20 }
 0x2a4   :  { %v1134_v23 = vmul.f32 1.442695, %v1130_v21  ;;  %v1136_v24 = vmul.f32 1.442695, %v1131_v22 }
 0x2a6   :  { %2007 = vpow2.f32 %v1134_v23 }
 0x2a7   :  { %2009 = vpow2.f32 %v1136_v24 }
 0x2a9   :  { %v1125_v25 = vpop.xlane.xlu2 %1124 }
 0x2aa   :  { %v1132_v26 = vsub.f32 %v1114_v46, %v1125_v25 }
 0x2ac   :  { %v2008_v27 = vpop.eup %2007  ;;  %v1138_v28 = vmul.f32 1.442695, %v1132_v26 }
 0x2ad   :  { %v2010_v29 = vpop.eup %2009  ;;  %v1142_v30 = vsel %vm1116_vm6, %v2008_v27, 0.0 }
 0x2ae   :  { %2011 = vpow2.f32 %v1138_v28  ;;  %1143 = vadd.xlane.f32.xlu0 %v1142_v30  ;;  %v1145_v31 = vsel %vm1116_vm6, %v2010_v29, 0.0 }
 0x2af   :  { %1146 = vadd.xlane.f32.xlu2 %v1145_v31 }
 0x2b1   :  { %v1129_v32 = vpop.xlane.xlu2 %1128 }
 0x2b2   :  { %v1133_v33 = vsub.f32 %v1115_v19, %v1129_v32 }
 0x2b4   :  { %v2012_v34 = vpop.eup %2011  ;;  %v1140_v35 = vmul.f32 1.442695, %v1133_v33 }
 0x2b5   :  { %v1148_v37 = vsel %vm1116_vm6, %v2012_v34, 0.0 }
 0x2b6   :  { %2013 = vpow2.f32 %v1140_v35  ;;  %1149 = vadd.xlane.f32.xlu0 %v1148_v37 }
 0x2bc   :  { %v2014_v38 = vpop.eup %2013 }
 0x2bd   :  { %v1151_v39 = vsel %vm1126_vm11, %v2014_v38, 0.0 }
 0x2be   :  { %1152 = vadd.xlane.f32.xlu2 %v1151_v39 }
 0x321   :  { %v1144_v40 = vpop.xlane.xlu0 %1143 }
 0x322   :  { %2015 = vrcp.f32 %v1144_v40  ;;  %v1147_v41 = vpop.xlane.xlu2 %1146 }
 0x323   :  { %2017 = vrcp.f32 %v1147_v41 }
 0x328   :  { %v2016_v42 = vpop.eup %2015 }
 0x329   :  { %v1158_v43 = vmul.f32 %v2016_v42, %v2008_v27  ;;  %v1150_v44 = vpop.xlane.xlu0 %1149  ;;  %v2018_v45 = vpop.eup %2017 }
 0x32a   :  { %2019 = vrcp.f32 %v1150_v44  ;;  %v1159_v47 = vmul.f32 %v2018_v45, %v2010_v29 }
 0x32b   :  { %1859 = vmatmul.msk.f32.vlgmr.msra.gmra.mxu3 %vm1116_vm6, %v1158_v43  ;;  %1864 = vmatmul.msk.f32.vlgmr.msra.gmra.mxu0 %vm1116_vm6, %v1158_v43 }
 0x32c   :  { %1869 = vmatmul.msk.f32.vlgmr.msra.gmra.mxu1 %vm1116_vm6, %v1158_v43  ;;  %1874 = vmatmul.msk.f32.vlgmr.msra.gmra.mxu2 %vm1116_vm6, %v1158_v43 }
 0x330   :  { %v2020_v49 = vpop.eup %2019 }
 0x331   :  { %v1153_v48 = vpop.xlane.xlu2 %1152  ;;  %v1160_v51 = vmul.f32 %v2020_v49, %v2012_v34 }
 0x332   :  { %2021 = vrcp.f32 %v1153_v48 }
 0x333   :  { %1860 = vmatmul.msk.f32.gmra.mxu3 %vm1116_vm6, %v1159_v47  ;;  %1865 = vmatmul.msk.f32.gmra.mxu0 %vm1116_vm6, %v1159_v47 }
 0x334   :  { %1870 = vmatmul.msk.f32.gmra.mxu1 %vm1116_vm6, %v1159_v47  ;;  %1875 = vmatmul.msk.f32.gmra.mxu2 %vm1116_vm6, %v1159_v47 }
 0x338   :  { %v2022_v52 = vpop.eup %2021 }
 0x339   :  { %v1161_v57 = vmul.f32 %v2022_v52, %v2014_v38 }
 0x33b   :  { %1861 = vmatmul.msk.f32.gmra.mxu3 %vm1116_vm6, %v1160_v51  ;;  %1866 = vmatmul.msk.f32.gmra.mxu0 %vm1116_vm6, %v1160_v51 }
 0x33c   :  { %1871 = vmatmul.msk.f32.gmra.mxu1 %vm1116_vm6, %v1160_v51  ;;  %1876 = vmatmul.msk.f32.gmra.mxu2 %vm1116_vm6, %v1160_v51 }
 0x343   :  { %1862 = vmatmul.msk.f32.gmra.mxu3 %vm1116_vm6, %v1161_v57  ;;  %1867 = vmatmul.msk.f32.gmra.mxu0 %vm1116_vm6, %v1161_v57 }
 0x344   :  { %1872 = vmatmul.msk.f32.gmra.mxu1 %vm1116_vm6, %v1161_v57  ;;  %1877 = vmatmul.msk.f32.gmra.mxu2 %vm1116_vm6, %v1161_v57 }
 0x3a8   :  { %v1231_v58 = vpop.f32.mrf.mxu0 }
 0x3a9   :  { %v1318_v59 = vmin.f32 %v1231_v58, 0.0  ;;  %v1260_v60 = vpop.f32.mrf.mxu1  ;;  %vm1302_vm12 = vcmp.gt.f32.partialorder %v1231_v58, 0.0 }
 0x3aa   :  { %v1319_v61 = vmin.f32 %v1260_v60, 0.0  ;;  %vm1303_vm13 = vcmp.gt.f32.partialorder %v1260_v60, 0.0 }
 0x3ab   :  { %v1335_v62 = vmul.f32 1.442695, %v1318_v59 }
 0x3ac   :  { %v1337_v63 = vmul.f32 1.442695, %v1319_v61 }
 0x3ad   :  { %2023 = vpow2.f32 %v1335_v62 }
 0x3ae   :  { %2025 = vpow2.f32 %v1337_v63  ;;  %v1202_v0 = vpop.f32.mrf.mxu3 }
 0x3af   :  { %v1317_v1 = vmin.f32 %v1202_v0, 0.0  ;;  %v1289_v36 = vpop.f32.mrf.mxu2  ;;  %vm1301_vm14 = vcmp.gt.f32.partialorder %v1202_v0, 0.0 }
 0x3b0   :  { %v1320_v2 = vmin.f32 %v1289_v36, 0.0  ;;  %v1234_v3 = vpop.f32.mrf.mxu0  ;;  %vm1304_vm15 = vcmp.gt.f32.partialorder %v1289_v36, 0.0 }
 0x3b1   :  { %v1333_v4 = vmul.f32 1.442695, %v1317_v1  ;;  %v1322_v5 = vmin.f32 %v1234_v3, 0.0  ;;  %v1263_v6 = vpop.f32.mrf.mxu1  ;;  %vm1306_vm0 = vcmp.gt.f32.partialorder %v1234_v3, 0.0 }
 0x3b2   :  { %v1339_v50 = vmul.f32 1.442695, %v1320_v2  ;;  %v1323_v7 = vmin.f32 %v1263_v6, 0.0  ;;  %vm1307_vm2 = vcmp.gt.f32.partialorder %v1263_v6, 0.0 }
 0x3b3   :  { %v2024_v8 = vpop.eup %2023  ;;  %2027 = vpow2.f32 %v1333_v4  ;;  %v1343_v9 = vmul.f32 1.442695, %v1322_v5 }
 0x3b4   :  { %v2026_v55 = vpop.eup %2025  ;;  %v1879_v11 = vadd.f32 -1.0, %v2024_v8  ;;  %2029 = vpow2.f32 %v1339_v50  ;;  %v1345_v56 = vmul.f32 1.442695, %v1323_v7 }
 0x3b5   :  { %v1880_v12 = vadd.f32 -1.0, %v2026_v55  ;;  %2031 = vpow2.f32 %v1343_v9 }
 0x3b6   :  { %v1382_v13 = vsel %vm1302_vm12, %v1231_v58, %v1879_v11  ;;  %2033 = vpow2.f32 %v1345_v56  ;;  %v1205_v14 = vpop.f32.mrf.mxu3  ;;  %vm1412_vm12 = vcmask 453632  }
 0x3b7   :  { %1398 = vst [vmem:[%s2951_s3 + $0x8] sm:$0xff] %v1382_v13  ;;  %v1383_v15 = vsel %vm1303_vm13, %v1260_v60, %v1880_v12  ;;  %v1321_v46 = vmin.f32 %v1205_v14, 0.0  ;;  %v1292_v16 = vpop.f32.mrf.mxu2  ;;  %vm1305_vm3 = vcmp.gt.f32.partialorder %v1205_v14, 0.0 }
 0x3b8   :  { %1399 = vst [vmem:[%s2951_s3 + $0x10] sm:$0xff] %v1383_v15  ;;  %v1324_v53 = vmin.f32 %v1292_v16, 0.0  ;;  %v2893_v17 = vpop.f32.mrf.mxu0  ;;  %vm1308_vm4 = vcmp.gt.f32.partialorder %v1292_v16, 0.0 }
 0x3b9   :  { %v2028_v54 = vpop.eup %2027  ;;  %v1341_v19 = vmul.f32 1.442695, %v1321_v46  ;;  %v1326_v18 = vmin.f32 %v2893_v17, 0.0  ;;  %v2896_v10 = vpop.f32.mrf.mxu1  ;;  %vm1310_vm5 = vcmp.gt.f32.partialorder %v2893_v17, 0.0 }
 0x3ba   :  { %v2030_v20 = vpop.eup %2029  ;;  %v1878_v21 = vadd.f32 -1.0, %v2028_v54  ;;  %v1347_v22 = vmul.f32 1.442695, %v1324_v53  ;;  %v1327_v23 = vmin.f32 %v2896_v10, 0.0  ;;  %vm1311_vm6 = vcmp.gt.f32.partialorder %v2896_v10, 0.0 }
 0x3bb   :  { %v2032_v24 = vpop.eup %2031  ;;  %v1881_v25 = vadd.f32 -1.0, %v2030_v20  ;;  %2035 = vpow2.f32 %v1341_v19  ;;  %v1351_v26 = vmul.f32 1.442695, %v1326_v18 }
 0x3bc   :  { %v2034_v27 = vpop.eup %2033  ;;  %v1381_v28 = vsel %vm1301_vm14, %v1202_v0, %v1878_v21  ;;  %v1883_v29 = vadd.f32 -1.0, %v2032_v24  ;;  %2037 = vpow2.f32 %v1347_v22  ;;  %v1353_v30 = vmul.f32 1.442695, %v1327_v23 }
 0x3bd   :  { %1397 = vst [vmem:[%s2951_s3] sm:$0xff] %v1381_v28  ;;  %v1384_v31 = vsel %vm1304_vm15, %v1289_v36, %v1881_v25  ;;  %v1884_v32 = vadd.f32 -1.0, %v2034_v27  ;;  %2039 = vpow2.f32 %v1351_v26 }
 0x3be   :  { %1400 = vst.msk [vmem:[%s2951_s3 + $0x18] sm:$0xff] %vm699_vm1, %v1384_v31  ;;  %v1386_v33 = vsel %vm1306_vm0, %v1234_v3, %v1883_v29  ;;  %2041 = vpow2.f32 %v1353_v30  ;;  %v1208_v34 = vpop.f32.mrf.mxu3 }
 0x3bf   :  { %1402 = vst [vmem:[%s2951_s3 + $0x28] sm:$0xff] %v1386_v33  ;;  %v1387_v35 = vsel %vm1307_vm2, %v1263_v6, %v1884_v32  ;;  %v1325_v37 = vmin.f32 %v1208_v34, 0.0  ;;  %v1295_v38 = vpop.f32.mrf.mxu2  ;;  %vm1309_vm7 = vcmp.gt.f32.partialorder %v1208_v34, 0.0 }
 0x3c0   :  { %1403 = vst [vmem:[%s2951_s3 + $0x30] sm:$0xff] %v1387_v35  ;;  %v1328_v39 = vmin.f32 %v1295_v38, 0.0  ;;  %v1240_v40 = vpop.f32.mrf.mxu0  ;;  %vm1312_vm8 = vcmp.gt.f32.partialorder %v1295_v38, 0.0 }
 0x3c1   :  { %v2036_v41 = vpop.eup %2035  ;;  %v1349_v42 = vmul.f32 1.442695, %v1325_v37  ;;  %v1330_v43 = vmin.f32 %v1240_v40, 0.0  ;;  %v1269_v44 = vpop.f32.mrf.mxu1  ;;  %vm1314_vm9 = vcmp.gt.f32.partialorder %v1240_v40, 0.0 }
 0x3c2   :  { %v2038_v45 = vpop.eup %2037  ;;  %v1882_v47 = vadd.f32 -1.0, %v2036_v41  ;;  %v1355_v48 = vmul.f32 1.442695, %v1328_v39  ;;  %v1331_v49 = vmin.f32 %v1269_v44, 0.0  ;;  %vm1315_vm10 = vcmp.gt.f32.partialorder %v1269_v44, 0.0 }
 0x3c3   :  { %v2040_v51 = vpop.eup %2039  ;;  %v1885_v52 = vadd.f32 -1.0, %v2038_v45  ;;  %2043 = vpow2.f32 %v1349_v42  ;;  %v1359_v57 = vmul.f32 1.442695, %v1330_v43 }
 0x3c4   :  { %v2042_v58 = vpop.eup %2041  ;;  %v1385_v59 = vsel %vm1305_vm3, %v1205_v14, %v1882_v47  ;;  %v1887_v60 = vadd.f32 -1.0, %v2040_v51  ;;  %2045 = vpow2.f32 %v1355_v48  ;;  %v1361_v61 = vmul.f32 1.442695, %v1331_v49 }
 0x3c5   :  { %1401 = vst [vmem:[%s2951_s3 + $0x20] sm:$0xff] %v1385_v59  ;;  %v1388_v62 = vsel %vm1308_vm4, %v1292_v16, %v1885_v52  ;;  %v1888_v63 = vadd.f32 -1.0, %v2042_v58  ;;  %2047 = vpow2.f32 %v1359_v57 }
 0x3c6   :  { %1404 = vst.msk [vmem:[%s2951_s3 + $0x38] sm:$0xff] %vm699_vm1, %v1388_v62  ;;  %v1390_v0 = vsel %vm1310_vm5, %v2893_v17, %v1887_v60  ;;  %2049 = vpow2.f32 %v1361_v61  ;;  %v1211_v1 = vpop.f32.mrf.mxu3 }
 0x3c7   :  { %1406 = vst [vmem:[%s2951_s3 + $0x48] sm:$0xff] %v1390_v0  ;;  %v1391_v36 = vsel %vm1311_vm6, %v2896_v10, %v1888_v63  ;;  %v1329_v2 = vmin.f32 %v1211_v1, 0.0  ;;  %v1298_v3 = vpop.f32.mrf.mxu2  ;;  %vm1313_vm11 = vcmp.gt.f32.partialorder %v1211_v1, 0.0 }
 0x3c8   :  { %1407 = vst [vmem:[%s2951_s3 + $0x50] sm:$0xff] %v1391_v36  ;;  %v1332_v4 = vmin.f32 %v1298_v3, 0.0  ;;  %vm1316_vm13 = vcmp.gt.f32.partialorder %v1298_v3, 0.0 }
 0x3c9   :  { %v2044_v5 = vpop.eup %2043  ;;  %v1357_v6 = vmul.f32 1.442695, %v1329_v2 }
 0x3ca   :  { %v2046_v50 = vpop.eup %2045  ;;  %v1886_v7 = vadd.f32 -1.0, %v2044_v5  ;;  %v1363_v8 = vmul.f32 1.442695, %v1332_v4 }
 0x3cb   :  { %v2048_v9 = vpop.eup %2047  ;;  %v1889_v55 = vadd.f32 -1.0, %v2046_v50  ;;  %2051 = vpow2.f32 %v1357_v6 }
 0x3cc   :  { %v2050_v11 = vpop.eup %2049  ;;  %v1389_v56 = vsel %vm1309_vm7, %v1208_v34, %v1886_v7  ;;  %v1891_v12 = vadd.f32 -1.0, %v2048_v9  ;;  %2053 = vpow2.f32 %v1363_v8 }
 0x3cd   :  { %1405 = vst [vmem:[%s2951_s3 + $0x40] sm:$0xff] %v1389_v56  ;;  %v1392_v13 = vsel %vm1312_vm8, %v1295_v38, %v1889_v55  ;;  %v1892_v14 = vadd.f32 -1.0, %v2050_v11 }
 0x3ce   :  { %1408 = vst.msk [vmem:[%s2951_s3 + $0x58] sm:$0xff] %vm699_vm1, %v1392_v13  ;;  %v1394_v15 = vsel %vm1314_vm9, %v1240_v40, %v1891_v12 }
 0x3cf   :  { %1410 = vst [vmem:[%s2951_s3 + $0x68] sm:$0xf] %v1394_v15  ;;  %v1395_v46 = vsel %vm1315_vm10, %v1269_v44, %v1892_v14 }
 0x3d0   :  { %1411 = vst [vmem:[%s2951_s3 + $0x70] sm:$0xf] %v1395_v46 }
 0x3d1   :  { %v2052_v16 = vpop.eup %2051 }
 0x3d2   :  { %v2054_v53 = vpop.eup %2053  ;;  %v1890_v17 = vadd.f32 -1.0, %v2052_v16 }
 0x3d3   :  { %v1893_v54 = vadd.f32 -1.0, %v2054_v53 }
 0x3d4   :  { %v1393_v19 = vsel %vm1313_vm11, %v1211_v1, %v1890_v17 }
 0x3d5   :  { %1409 = vst [vmem:[%s2951_s3 + $0x60] sm:$0xf] %v1393_v19  ;;  %v1396_v18 = vsel %vm1316_vm13, %v1298_v3, %v1893_v54 }
 0x3d6   :  { %1413 = vst.msk [vmem:[%s2951_s3 + $0x78] sm:$0xf] %vm1412_vm12, %v1396_v18 }

// kernel: graphnet_forward.14
= control target key start
LH: loop header
LB: loop body
LE: loop exit
PB: predicated region body
PF: predicated region fallthrough
CT: control target
= control target key end

     0   :  { %s1996_s12 = smov 0   ;;  %s1998_s13 = smov 0   ;;  %s2406_s0 = inlined_call_operand.vmem [shape: f32[1,2,1024], index: 0, kind: input, shape index: {}]   ;;  %s2407_s1 = inlined_call_operand.vmem [shape: bf16[1,1024,256], index: 1, kind: input, shape index: {}]   ;;  %s2408_s2 = inlined_call_operand.vmem [shape: f32[1,1,256], index: 2, kind: input, shape index: {}]   ;;  %s2409_s3 = inlined_call_operand.vmem [shape: f32[1,2,256], index: 3, kind: output, shape index: {}]  }
   0x1   :  { %s2000_s14 = smov 0   ;;  %s2002_s15 = smov 0  }
   0x2   :  { %s2004_s16 = smov 0  }
   0x3 LB: > { %s22_s17 = sadd.s32 1, %s1970_s15  ;;  %p67_p1 = scmp.ne.s32.totalorder %s1962_s13, %s1958_s12  ;;  %s1974_s16 = sphi %s2004_s16, %s13_s16   ;;  %s1970_s15 = sphi %s2002_s15, %s2413_s15   ;;  %s1966_s14 = sphi %s2000_s14, %s2412_s14   ;;  %s1962_s13 = sphi %s1998_s13, %s2411_s13   ;;  %s1958_s12 = sphi %s1996_s12, %s2410_s12  }
   0x4   : > { %p23_p0 = scmp.ge.s32.totalorder %s22_s17, 2  ;;  %p68_p2 = scmp.eq.s32.totalorder %s1974_s16, 0 }
   0x5   : > { %s60_s19 = sadd.s32 1, %s1962_s13  ;;  %p1567_p5 = scmp.ge.s32.totalorder %s1974_s16, 2 }
   0x6   : > { %s2415_s17 = smov (%p23_p0, %s22_s17), 0  ;;  %p69_p3 = por %p68_p2, %p67_p1 }
   0x7   : > { %s56_s18 = ssub.s32 %s1970_s15, %s2415_s17  ;;  %157 = sbr.rel (%p1567_p5) target bundleno = 144 (0x90), region = 20 }
   0x8   : > { %p58_p4 = scmp.eq.s32.totalorder %s56_s18, 0 }
   0xa   : > { %s2031_s20 = scalar_select %p58_p4, %s1962_s13, %s60_s19  }
   0xc   : > { %160 = sbr.rel (!%p69_p3) target bundleno = 144 (0x90), region = 24  ;;  %s162_s21 = sand.u32 (%p69_p3), 1, %s1962_s13  }
   0xd   : > { %s1569_s22 = sshll.u32 (%p69_p3), %s1970_s15, 2  ;;  %s1568_s23 = sshll.u32 (%p69_p3), %s162_s21, 9 }
   0xe   : > { %s2039_s26 = scalar_lea.vmem (%p69_p3), %s2407_s1, %s1569_s22  ;;  %s2043_s27 = scalar_lea.vmem (%p69_p3), [#allocation2], %s1568_s23 }
   0xf   : > { %v185_v0 = vld [vmem:[%s2039_s26] sm:$0xf] (%p69_p3)  ;;  %v187_v1 = vld [vmem:[%s2039_s26 + $0x8] sm:$0xf] (%p69_p3)  ;;  %v189_v2 = vld [vmem:[%s2039_s26 + $0x10] sm:$0xf] (%p69_p3) }
  0x10   : > { %186 = vst [vmem:[%s2043_s27] sm:$0xf] (%p69_p3), %v185_v0  ;;  %v191_v3 = vld [vmem:[%s2039_s26 + $0x18] sm:$0xf] (%p69_p3)  ;;  %v193_v4 = vld [vmem:[%s2039_s26 + $0x20] sm:$0xf] (%p69_p3) }
  0x11   : > { %188 = vst [vmem:[%s2043_s27 + $0x4] sm:$0xf] %v187_v1  ;;  %v195_v5 = vld [vmem:[%s2039_s26 + $0x28] sm:$0xf]  ;;  %v197_v6 = vld [vmem:[%s2039_s26 + $0x30] sm:$0xf] }
  0x12   : > { %190 = vst [vmem:[%s2043_s27 + $0x8] sm:$0xf] %v189_v2  ;;  %v199_v7 = vld [vmem:[%s2039_s26 + $0x38] sm:$0xf]  ;;  %v201_v8 = vld [vmem:[%s2039_s26 + $0x40] sm:$0xf] }
  0x13   : > { %192 = vst [vmem:[%s2043_s27 + $0xc] sm:$0xf] %v191_v3  ;;  %v203_v9 = vld [vmem:[%s2039_s26 + $0x48] sm:$0xf]  ;;  %v205_v10 = vld [vmem:[%s2039_s26 + $0x50] sm:$0xf] }
  0x14   : > { %194 = vst [vmem:[%s2043_s27 + $0x10] sm:$0xf] %v193_v4  ;;  %v207_v11 = vld [vmem:[%s2039_s26 + $0x58] sm:$0xf]  ;;  %v209_v12 = vld [vmem:[%s2039_s26 + $0x60] sm:$0xf] }
  0x15   : > { %196 = vst [vmem:[%s2043_s27 + $0x14] sm:$0xf] %v195_v5  ;;  %v211_v13 = vld [vmem:[%s2039_s26 + $0x68] sm:$0xf]  ;;  %v213_v14 = vld [vmem:[%s2039_s26 + $0x70] sm:$0xf] }
  0x16   : > { %198 = vst [vmem:[%s2043_s27 + $0x18] sm:$0xf] %v197_v6  ;;  %v215_v15 = vld [vmem:[%s2039_s26 + $0x78] sm:$0xf]  ;;  %v217_v16 = vld [vmem:[%s2039_s26 + $0x80] sm:$0xf] }
  0x17   : > { %200 = vst [vmem:[%s2043_s27 + $0x1c] sm:$0xf] %v199_v7  ;;  %v219_v17 = vld [vmem:[%s2039_s26 + $0x88] sm:$0xf]  ;;  %v221_v18 = vld [vmem:[%s2039_s26 + $0x90] sm:$0xf] }
  0x18   : > { %202 = vst [vmem:[%s2043_s27 + $0x20] sm:$0xf] %v201_v8  ;;  %v223_v19 = vld [vmem:[%s2039_s26 + $0x98] sm:$0xf]  ;;  %v225_v20 = vld [vmem:[%s2039_s26 + $0xa0] sm:$0xf] }
  0x19   : > { %204 = vst [vmem:[%s2043_s27 + $0x24] sm:$0xf] %v203_v9  ;;  %v227_v21 = vld [vmem:[%s2039_s26 + $0xa8] sm:$0xf]  ;;  %v229_v22 = vld [vmem:[%s2039_s26 + $0xb0] sm:$0xf] }
  0x1a   : > { %206 = vst [vmem:[%s2043_s27 + $0x28] sm:$0xf] %v205_v10  ;;  %v231_v23 = vld [vmem:[%s2039_s26 + $0xb8] sm:$0xf]  ;;  %v233_v24 = vld [vmem:[%s2039_s26 + $0xc0] sm:$0xf] }
  0x1b   : > { %208 = vst [vmem:[%s2043_s27 + $0x2c] sm:$0xf] %v207_v11  ;;  %v235_v25 = vld [vmem:[%s2039_s26 + $0xc8] sm:$0xf]  ;;  %v237_v26 = vld [vmem:[%s2039_s26 + $0xd0] sm:$0xf] }
  0x1c   : > { %210 = vst [vmem:[%s2043_s27 + $0x30] sm:$0xf] %v209_v12  ;;  %v239_v27 = vld [vmem:[%s2039_s26 + $0xd8] sm:$0xf]  ;;  %v241_v28 = vld [vmem:[%s2039_s26 + $0xe0] sm:$0xf] }
  0x1d   : > { %212 = vst [vmem:[%s2043_s27 + $0x34] sm:$0xf] %v211_v13  ;;  %v243_v29 = vld [vmem:[%s2039_s26 + $0xe8] sm:$0xf]  ;;  %v245_v30 = vld [vmem:[%s2039_s26 + $0xf0] sm:$0xf] }
  0x1e   : > { %214 = vst [vmem:[%s2043_s27 + $0x38] sm:$0xf] %v213_v14  ;;  %v247_v31 = vld [vmem:[%s2039_s26 + $0xf8] sm:$0xf]  ;;  %v249_v32 = vld [vmem:[%s2039_s26 + $0x100] sm:$0xf] }
  0x1f   : > { %216 = vst [vmem:[%s2043_s27 + $0x3c] sm:$0xf] %v215_v15  ;;  %v251_v33 = vld [vmem:[%s2039_s26 + $0x108] sm:$0xf]  ;;  %v253_v34 = vld [vmem:[%s2039_s26 + $0x110] sm:$0xf] }
  0x20   : > { %218 = vst [vmem:[%s2043_s27 + $0x40] sm:$0xf] %v217_v16  ;;  %v255_v35 = vld [vmem:[%s2039_s26 + $0x118] sm:$0xf]  ;;  %v257_v36 = vld [vmem:[%s2039_s26 + $0x120] sm:$0xf] }
  0x21   : > { %220 = vst [vmem:[%s2043_s27 + $0x44] sm:$0xf] %v219_v17  ;;  %v259_v37 = vld [vmem:[%s2039_s26 + $0x128] sm:$0xf]  ;;  %v261_v38 = vld [vmem:[%s2039_s26 + $0x130] sm:$0xf] }
  0x22   : > { %222 = vst [vmem:[%s2043_s27 + $0x48] sm:$0xf] %v221_v18  ;;  %v263_v39 = vld [vmem:[%s2039_s26 + $0x138] sm:$0xf]  ;;  %v265_v40 = vld [vmem:[%s2039_s26 + $0x140] sm:$0xf] }
  0x23   : > { %224 = vst [vmem:[%s2043_s27 + $0x4c] sm:$0xf] %v223_v19  ;;  %v267_v41 = vld [vmem:[%s2039_s26 + $0x148] sm:$0xf]  ;;  %v269_v42 = vld [vmem:[%s2039_s26 + $0x150] sm:$0xf] }
  0x24   : > { %226 = vst [vmem:[%s2043_s27 + $0x50] sm:$0xf] %v225_v20  ;;  %v271_v43 = vld [vmem:[%s2039_s26 + $0x158] sm:$0xf]  ;;  %v273_v44 = vld [vmem:[%s2039_s26 + $0x160] sm:$0xf] }
  0x25   : > { %228 = vst [vmem:[%s2043_s27 + $0x54] sm:$0xf] %v227_v21  ;;  %v275_v45 = vld [vmem:[%s2039_s26 + $0x168] sm:$0xf]  ;;  %v277_v46 = vld [vmem:[%s2039_s26 + $0x170] sm:$0xf] }
  0x26   : > { %230 = vst [vmem:[%s2043_s27 + $0x58] sm:$0xf] %v229_v22  ;;  %v279_v47 = vld [vmem:[%s2039_s26 + $0x178] sm:$0xf]  ;;  %v281_v48 = vld [vmem:[%s2039_s26 + $0x180] sm:$0xf] }
  0x27   : > { %232 = vst [vmem:[%s2043_s27 + $0x5c] sm:$0xf] %v231_v23  ;;  %v283_v49 = vld [vmem:[%s2039_s26 + $0x188] sm:$0xf]  ;;  %v285_v50 = vld [vmem:[%s2039_s26 + $0x190] sm:$0xf] }
  0x28   : > { %234 = vst [vmem:[%s2043_s27 + $0x60] sm:$0xf] %v233_v24  ;;  %v287_v51 = vld [vmem:[%s2039_s26 + $0x198] sm:$0xf]  ;;  %v289_v52 = vld [vmem:[%s2039_s26 + $0x1a0] sm:$0xf] }
  0x29   : > { %236 = vst [vmem:[%s2043_s27 + $0x64] sm:$0xf] %v235_v25  ;;  %v291_v53 = vld [vmem:[%s2039_s26 + $0x1a8] sm:$0xf]  ;;  %v293_v54 = vld [vmem:[%s2039_s26 + $0x1b0] sm:$0xf] }
  0x2a   : > { %238 = vst [vmem:[%s2043_s27 + $0x68] sm:$0xf] %v237_v26  ;;  %v295_v55 = vld [vmem:[%s2039_s26 + $0x1b8] sm:$0xf]  ;;  %v297_v56 = vld [vmem:[%s2039_s26 + $0x1c0] sm:$0xf] }
  0x2b   : > { %240 = vst [vmem:[%s2043_s27 + $0x6c] sm:$0xf] %v239_v27  ;;  %v299_v57 = vld [vmem:[%s2039_s26 + $0x1c8] sm:$0xf]  ;;  %v301_v58 = vld [vmem:[%s2039_s26 + $0x1d0] sm:$0xf] }
  0x2c   : > { %242 = vst [vmem:[%s2043_s27 + $0x70] sm:$0xf] %v241_v28  ;;  %v303_v59 = vld [vmem:[%s2039_s26 + $0x1d8] sm:$0xf]  ;;  %v305_v60 = vld [vmem:[%s2039_s26 + $0x1e0] sm:$0xf] }
  0x2d   : > { %244 = vst [vmem:[%s2043_s27 + $0x74] sm:$0xf] %v243_v29  ;;  %v307_v61 = vld [vmem:[%s2039_s26 + $0x1e8] sm:$0xf]  ;;  %v309_v62 = vld [vmem:[%s2039_s26 + $0x1f0] sm:$0xf] }
  0x2e   : > { %246 = vst [vmem:[%s2043_s27 + $0x78] sm:$0xf] %v245_v30  ;;  %v311_v63 = vld [vmem:[%s2039_s26 + $0x1f8] sm:$0xf]  ;;  %v313_v0 = vld [vmem:[%s2039_s26 + $0x200] sm:$0xf] }
  0x2f   : > { %248 = vst [vmem:[%s2043_s27 + $0x7c] sm:$0xf] %v247_v31  ;;  %v315_v1 = vld [vmem:[%s2039_s26 + $0x208] sm:$0xf]  ;;  %v317_v2 = vld [vmem:[%s2039_s26 + $0x210] sm:$0xf] }
  0x30   : > { %250 = vst [vmem:[%s2043_s27 + $0x80] sm:$0xf] %v249_v32  ;;  %v319_v3 = vld [vmem:[%s2039_s26 + $0x218] sm:$0xf]  ;;  %v321_v4 = vld [vmem:[%s2039_s26 + $0x220] sm:$0xf] }
  0x31   : > { %252 = vst [vmem:[%s2043_s27 + $0x84] sm:$0xf] %v251_v33  ;;  %v323_v5 = vld [vmem:[%s2039_s26 + $0x228] sm:$0xf]  ;;  %v325_v6 = vld [vmem:[%s2039_s26 + $0x230] sm:$0xf] }
  0x32   : > { %254 = vst [vmem:[%s2043_s27 + $0x88] sm:$0xf] %v253_v34  ;;  %v327_v7 = vld [vmem:[%s2039_s26 + $0x238] sm:$0xf]  ;;  %v329_v8 = vld [vmem:[%s2039_s26 + $0x240] sm:$0xf] }
  0x33   : > { %256 = vst [vmem:[%s2043_s27 + $0x8c] sm:$0xf] %v255_v35  ;;  %v331_v9 = vld [vmem:[%s2039_s26 + $0x248] sm:$0xf]  ;;  %v333_v10 = vld [vmem:[%s2039_s26 + $0x250] sm:$0xf] }
  0x34   : > { %258 = vst [vmem:[%s2043_s27 + $0x90] sm:$0xf] %v257_v36  ;;  %v335_v11 = vld [vmem:[%s2039_s26 + $0x258] sm:$0xf]  ;;  %v337_v12 = vld [vmem:[%s2039_s26 + $0x260] sm:$0xf] }
  0x35   : > { %260 = vst [vmem:[%s2043_s27 + $0x94] sm:$0xf] %v259_v37  ;;  %v339_v13 = vld [vmem:[%s2039_s26 + $0x268] sm:$0xf]  ;;  %v341_v14 = vld [vmem:[%s2039_s26 + $0x270] sm:$0xf] }
  0x36   : > { %262 = vst [vmem:[%s2043_s27 + $0x98] sm:$0xf] %v261_v38  ;;  %v343_v15 = vld [vmem:[%s2039_s26 + $0x278] sm:$0xf]  ;;  %v345_v16 = vld [vmem:[%s2039_s26 + $0x280] sm:$0xf] }
  0x37   : > { %264 = vst [vmem:[%s2043_s27 + $0x9c] sm:$0xf] %v263_v39  ;;  %v347_v17 = vld [vmem:[%s2039_s26 + $0x288] sm:$0xf]  ;;  %v349_v18 = vld [vmem:[%s2039_s26 + $0x290] sm:$0xf] }
  0x38   : > { %266 = vst [vmem:[%s2043_s27 + $0xa0] sm:$0xf] %v265_v40  ;;  %v351_v19 = vld [vmem:[%s2039_s26 + $0x298] sm:$0xf]  ;;  %v353_v20 = vld [vmem:[%s2039_s26 + $0x2a0] sm:$0xf] }
  0x39   : > { %268 = vst [vmem:[%s2043_s27 + $0xa4] sm:$0xf] %v267_v41  ;;  %v355_v21 = vld [vmem:[%s2039_s26 + $0x2a8] sm:$0xf]  ;;  %v357_v22 = vld [vmem:[%s2039_s26 + $0x2b0] sm:$0xf] }
  0x3a   : > { %270 = vst [vmem:[%s2043_s27 + $0xa8] sm:$0xf] %v269_v42  ;;  %v359_v23 = vld [vmem:[%s2039_s26 + $0x2b8] sm:$0xf]  ;;  %v361_v24 = vld [vmem:[%s2039_s26 + $0x2c0] sm:$0xf] }
  0x3b   : > { %272 = vst [vmem:[%s2043_s27 + $0xac] sm:$0xf] %v271_v43  ;;  %v363_v25 = vld [vmem:[%s2039_s26 + $0x2c8] sm:$0xf]  ;;  %v365_v26 = vld [vmem:[%s2039_s26 + $0x2d0] sm:$0xf] }
  0x3c   : > { %274 = vst [vmem:[%s2043_s27 + $0xb0] sm:$0xf] %v273_v44  ;;  %v367_v27 = vld [vmem:[%s2039_s26 + $0x2d8] sm:$0xf]  ;;  %v369_v28 = vld [vmem:[%s2039_s26 + $0x2e0] sm:$0xf] }
  0x3d   : > { %276 = vst [vmem:[%s2043_s27 + $0xb4] sm:$0xf] %v275_v45  ;;  %v371_v29 = vld [vmem:[%s2039_s26 + $0x2e8] sm:$0xf]  ;;  %v373_v30 = vld [vmem:[%s2039_s26 + $0x2f0] sm:$0xf] }
  0x3e   : > { %278 = vst [vmem:[%s2043_s27 + $0xb8] sm:$0xf] %v277_v46  ;;  %v375_v31 = vld [vmem:[%s2039_s26 + $0x2f8] sm:$0xf]  ;;  %v377_v32 = vld [vmem:[%s2039_s26 + $0x300] sm:$0xf] }
  0x3f   : > { %280 = vst [vmem:[%s2043_s27 + $0xbc] sm:$0xf] %v279_v47  ;;  %v379_v33 = vld [vmem:[%s2039_s26 + $0x308] sm:$0xf]  ;;  %v381_v34 = vld [vmem:[%s2039_s26 + $0x310] sm:$0xf] }
  0x40   : > { %282 = vst [vmem:[%s2043_s27 + $0xc0] sm:$0xf] %v281_v48  ;;  %v383_v35 = vld [vmem:[%s2039_s26 + $0x318] sm:$0xf]  ;;  %v385_v36 = vld [vmem:[%s2039_s26 + $0x320] sm:$0xf] }
  0x41   : > { %284 = vst [vmem:[%s2043_s27 + $0xc4] sm:$0xf] %v283_v49  ;;  %v387_v37 = vld [vmem:[%s2039_s26 + $0x328] sm:$0xf]  ;;  %v389_v38 = vld [vmem:[%s2039_s26 + $0x330] sm:$0xf] }
  0x42   : > { %286 = vst [vmem:[%s2043_s27 + $0xc8] sm:$0xf] %v285_v50  ;;  %v391_v39 = vld [vmem:[%s2039_s26 + $0x338] sm:$0xf]  ;;  %v393_v40 = vld [vmem:[%s2039_s26 + $0x340] sm:$0xf] }
  0x43   : > { %288 = vst [vmem:[%s2043_s27 + $0xcc] sm:$0xf] %v287_v51  ;;  %v395_v41 = vld [vmem:[%s2039_s26 + $0x348] sm:$0xf]  ;;  %v397_v42 = vld [vmem:[%s2039_s26 + $0x350] sm:$0xf] }
  0x44   : > { %290 = vst [vmem:[%s2043_s27 + $0xd0] sm:$0xf] %v289_v52  ;;  %v399_v43 = vld [vmem:[%s2039_s26 + $0x358] sm:$0xf]  ;;  %v401_v44 = vld [vmem:[%s2039_s26 + $0x360] sm:$0xf] }
  0x45   : > { %292 = vst [vmem:[%s2043_s27 + $0xd4] sm:$0xf] %v291_v53  ;;  %v403_v45 = vld [vmem:[%s2039_s26 + $0x368] sm:$0xf]  ;;  %v405_v46 = vld [vmem:[%s2039_s26 + $0x370] sm:$0xf] }
  0x46   : > { %294 = vst [vmem:[%s2043_s27 + $0xd8] sm:$0xf] %v293_v54  ;;  %v407_v47 = vld [vmem:[%s2039_s26 + $0x378] sm:$0xf]  ;;  %v409_v48 = vld [vmem:[%s2039_s26 + $0x380] sm:$0xf] }
  0x47   : > { %296 = vst [vmem:[%s2043_s27 + $0xdc] sm:$0xf] %v295_v55  ;;  %v411_v49 = vld [vmem:[%s2039_s26 + $0x388] sm:$0xf]  ;;  %v413_v50 = vld [vmem:[%s2039_s26 + $0x390] sm:$0xf] }
  0x48   : > { %298 = vst [vmem:[%s2043_s27 + $0xe0] sm:$0xf] %v297_v56  ;;  %v415_v51 = vld [vmem:[%s2039_s26 + $0x398] sm:$0xf]  ;;  %v417_v52 = vld [vmem:[%s2039_s26 + $0x3a0] sm:$0xf] }
  0x49   : > { %300 = vst [vmem:[%s2043_s27 + $0xe4] sm:$0xf] %v299_v57  ;;  %v419_v53 = vld [vmem:[%s2039_s26 + $0x3a8] sm:$0xf]  ;;  %v421_v54 = vld [vmem:[%s2039_s26 + $0x3b0] sm:$0xf] }
  0x4a   : > { %302 = vst [vmem:[%s2043_s27 + $0xe8] sm:$0xf] %v301_v58  ;;  %v423_v55 = vld [vmem:[%s2039_s26 + $0x3b8] sm:$0xf]  ;;  %v425_v56 = vld [vmem:[%s2039_s26 + $0x3c0] sm:$0xf] }
  0x4b   : > { %304 = vst [vmem:[%s2043_s27 + $0xec] sm:$0xf] %v303_v59  ;;  %v427_v57 = vld [vmem:[%s2039_s26 + $0x3c8] sm:$0xf]  ;;  %v429_v58 = vld [vmem:[%s2039_s26 + $0x3d0] sm:$0xf] }
  0x4c   : > { %306 = vst [vmem:[%s2043_s27 + $0xf0] sm:$0xf] %v305_v60  ;;  %v431_v59 = vld [vmem:[%s2039_s26 + $0x3d8] sm:$0xf]  ;;  %v433_v60 = vld [vmem:[%s2039_s26 + $0x3e0] sm:$0xf] }
  0x4d   : > { %308 = vst [vmem:[%s2043_s27 + $0xf4] sm:$0xf] %v307_v61  ;;  %v435_v61 = vld [vmem:[%s2039_s26 + $0x3e8] sm:$0xf] }
  0x4e   : > { %310 = vst [vmem:[%s2043_s27 + $0xf8] sm:$0xf] %v309_v62  ;;  %v437_v62 = vld [vmem:[%s2039_s26 + $0x3f0] sm:$0xf] }
  0x4f   : > { %312 = vst [vmem:[%s2043_s27 + $0xfc] sm:$0xf] %v311_v63  ;;  %v439_v63 = vld [vmem:[%s2039_s26 + $0x3f8] sm:$0xf] }
  0x50   : > { %314 = vst [vmem:[%s2043_s27 + $0x100] sm:$0xf] %v313_v0 }
  0x51   : > { %316 = vst [vmem:[%s2043_s27 + $0x104] sm:$0xf] %v315_v1 }
  0x52   : > { %318 = vst [vmem:[%s2043_s27 + $0x108] sm:$0xf] %v317_v2 }
  0x53   : > { %320 = vst [vmem:[%s2043_s27 + $0x10c] sm:$0xf] %v319_v3 }
  0x54   : > { %322 = vst [vmem:[%s2043_s27 + $0x110] sm:$0xf] %v321_v4 }
  0x55   : > { %324 = vst [vmem:[%s2043_s27 + $0x114] sm:$0xf] %v323_v5 }
  0x56   : > { %326 = vst [vmem:[%s2043_s27 + $0x118] sm:$0xf] %v325_v6 }
  0x57   : > { %328 = vst [vmem:[%s2043_s27 + $0x11c] sm:$0xf] %v327_v7 }
  0x58   : > { %330 = vst [vmem:[%s2043_s27 + $0x120] sm:$0xf] %v329_v8 }
  0x59   : > { %332 = vst [vmem:[%s2043_s27 + $0x124] sm:$0xf] %v331_v9 }
  0x5a   : > { %334 = vst [vmem:[%s2043_s27 + $0x128] sm:$0xf] %v333_v10 }
  0x5b   : > { %336 = vst [vmem:[%s2043_s27 + $0x12c] sm:$0xf] %v335_v11 }
  0x5c   : > { %338 = vst [vmem:[%s2043_s27 + $0x130] sm:$0xf] %v337_v12 }
  0x5d   : > { %340 = vst [vmem:[%s2043_s27 + $0x134] sm:$0xf] %v339_v13 }
  0x5e   : > { %342 = vst [vmem:[%s2043_s27 + $0x138] sm:$0xf] %v341_v14 }
  0x5f   : > { %344 = vst [vmem:[%s2043_s27 + $0x13c] sm:$0xf] %v343_v15 }
  0x60   : > { %346 = vst [vmem:[%s2043_s27 + $0x140] sm:$0xf] %v345_v16 }
  0x61   : > { %348 = vst [vmem:[%s2043_s27 + $0x144] sm:$0xf] %v347_v17 }
  0x62   : > { %350 = vst [vmem:[%s2043_s27 + $0x148] sm:$0xf] %v349_v18 }
  0x63   : > { %352 = vst [vmem:[%s2043_s27 + $0x14c] sm:$0xf] %v351_v19 }
  0x64   : > { %354 = vst [vmem:[%s2043_s27 + $0x150] sm:$0xf] %v353_v20 }
  0x65   : > { %356 = vst [vmem:[%s2043_s27 + $0x154] sm:$0xf] %v355_v21 }
  0x66   : > { %358 = vst [vmem:[%s2043_s27 + $0x158] sm:$0xf] %v357_v22 }
  0x67   : > { %360 = vst [vmem:[%s2043_s27 + $0x15c] sm:$0xf] %v359_v23 }
  0x68   : > { %362 = vst [vmem:[%s2043_s27 + $0x160] sm:$0xf] %v361_v24 }
  0x69   : > { %364 = vst [vmem:[%s2043_s27 + $0x164] sm:$0xf] %v363_v25 }
  0x6a   : > { %366 = vst [vmem:[%s2043_s27 + $0x168] sm:$0xf] %v365_v26 }
  0x6b   : > { %368 = vst [vmem:[%s2043_s27 + $0x16c] sm:$0xf] %v367_v27 }
  0x6c   : > { %370 = vst [vmem:[%s2043_s27 + $0x170] sm:$0xf] %v369_v28 }
  0x6d   : > { %372 = vst [vmem:[%s2043_s27 + $0x174] sm:$0xf] %v371_v29 }
  0x6e   : > { %374 = vst [vmem:[%s2043_s27 + $0x178] sm:$0xf] %v373_v30 }
  0x6f   : > { %376 = vst [vmem:[%s2043_s27 + $0x17c] sm:$0xf] %v375_v31 }
  0x70   : > { %378 = vst [vmem:[%s2043_s27 + $0x180] sm:$0xf] %v377_v32 }
  0x71   : > { %380 = vst [vmem:[%s2043_s27 + $0x184] sm:$0xf] %v379_v33 }
  0x72   : > { %382 = vst [vmem:[%s2043_s27 + $0x188] sm:$0xf] %v381_v34 }
  0x73   : > { %384 = vst [vmem:[%s2043_s27 + $0x18c] sm:$0xf] %v383_v35 }
  0x74   : > { %386 = vst [vmem:[%s2043_s27 + $0x190] sm:$0xf] %v385_v36 }
  0x75   : > { %388 = vst [vmem:[%s2043_s27 + $0x194] sm:$0xf] %v387_v37 }
  0x76   : > { %390 = vst [vmem:[%s2043_s27 + $0x198] sm:$0xf] %v389_v38 }
  0x77   : > { %392 = vst [vmem:[%s2043_s27 + $0x19c] sm:$0xf] %v391_v39 }
  0x78   : > { %394 = vst [vmem:[%s2043_s27 + $0x1a0] sm:$0xf] %v393_v40 }
  0x79   : > { %396 = vst [vmem:[%s2043_s27 + $0x1a4] sm:$0xf] %v395_v41 }
  0x7a   : > { %398 = vst [vmem:[%s2043_s27 + $0x1a8] sm:$0xf] %v397_v42 }
  0x7b   : > { %400 = vst [vmem:[%s2043_s27 + $0x1ac] sm:$0xf] %v399_v43 }
  0x7c   : > { %402 = vst [vmem:[%s2043_s27 + $0x1b0] sm:$0xf] %v401_v44 }
  0x7d   : > { %404 = vst [vmem:[%s2043_s27 + $0x1b4] sm:$0xf] %v403_v45 }
  0x7e   : > { %406 = vst [vmem:[%s2043_s27 + $0x1b8] sm:$0xf] %v405_v46 }
  0x7f   : > { %408 = vst [vmem:[%s2043_s27 + $0x1bc] sm:$0xf] %v407_v47 }
  0x80   : > { %410 = vst [vmem:[%s2043_s27 + $0x1c0] sm:$0xf] %v409_v48 }
  0x81   : > { %412 = vst [vmem:[%s2043_s27 + $0x1c4] sm:$0xf] %v411_v49 }
  0x82   : > { %414 = vst [vmem:[%s2043_s27 + $0x1c8] sm:$0xf] %v413_v50 }
  0x83   : > { %416 = vst [vmem:[%s2043_s27 + $0x1cc] sm:$0xf] %v415_v51 }
  0x84   : > { %418 = vst [vmem:[%s2043_s27 + $0x1d0] sm:$0xf] %v417_v52 }
  0x85   : > { %420 = vst [vmem:[%s2043_s27 + $0x1d4] sm:$0xf] %v419_v53 }
  0x86   : > { %422 = vst [vmem:[%s2043_s27 + $0x1d8] sm:$0xf] %v421_v54 }
  0x87   : > { %424 = vst [vmem:[%s2043_s27 + $0x1dc] sm:$0xf] %v423_v55 }
  0x88   : > { %426 = vst [vmem:[%s2043_s27 + $0x1e0] sm:$0xf] %v425_v56 }
  0x89   : > { %428 = vst [vmem:[%s2043_s27 + $0x1e4] sm:$0xf] %v427_v57 }
  0x8a   : > { %430 = vst [vmem:[%s2043_s27 + $0x1e8] sm:$0xf] %v429_v58 }
  0x8b   : > { %432 = vst [vmem:[%s2043_s27 + $0x1ec] sm:$0xf] %v431_v59 }
  0x8c   : > { %434 = vst [vmem:[%s2043_s27 + $0x1f0] sm:$0xf] %v433_v60 }
  0x8d   : > { %436 = vst [vmem:[%s2043_s27 + $0x1f4] sm:$0xf] %v435_v61 }
  0x8e   : > { %438 = vst [vmem:[%s2043_s27 + $0x1f8] sm:$0xf] %v437_v62 }
  0x8f   : > { %440 = vst [vmem:[%s2043_s27 + $0x1fc] sm:$0xf] %v439_v63 }
  0x90 PF: > { %p1570_p6 = scmp.ge.s32.totalorder %s1974_s16, 1  ;;  %p729_p7 = scmp.lt.s32.totalorder %s1974_s16, 3 }
  0x92   : > { %p730_p8 = pnand %p1570_p6, %p729_p7 }
  0x93   : > { %s736_s28 = sand.u32 (!%p730_p8), 1, %s1958_s12   ;;  %p781_p9 = scmp.lt.s32.totalorder (!%p730_p8), %s1966_s14, 1 }
  0x94   : > { %733 = sbr.rel (%p730_p8) target bundleno = 361 (0x169), region = 69  ;;  %s1571_s4 = sshll.u32 (!%p730_p8), %s736_s28, 9 }
  0x95   : > { %s2305_s5 = scalar_lea.vmem (!%p730_p8), [#allocation2], %s1571_s4 }
  0x99   : > { %v794_v0 = vld [vmem:[%s2406_s0] sm:$0xff]  ;;  %v1837_v5 = vld [vmem:[%s2305_s5 + $0x30] sm:$0xff]  ;;  %v1836_v9 = vld [vmem:[%s2305_s5 + $0x28] sm:$0xff]  ;;  %s2417_s14 = smov (!%p781_p9, %s1966_s14), 1 }
  0x9a   : > { %926 = vst [vmem:[#allocation1] ss:$4 sm:$0xff] %v794_v0  ;;  %v1838_v1 = vld [vmem:[%s2305_s5 + $0x38] sm:$0xff]  ;;  %v1845_v6 = vld [vmem:[%s2305_s5 + $0x70] sm:$0xff]  ;;  %v1844_v10 = vld [vmem:[%s2305_s5 + $0x68] sm:$0xff]  ;;  %s785_s8 = scalar_lea.vmem %s2408_s2, %s2417_s14  ;;  %s1572_s18 = sshll.u32 %s2417_s14, 1 }
  0x9b   : > { %v1846_v2 = vld [vmem:[%s2305_s5 + $0x78] sm:$0xff]  ;;  %1341 = vmatpush.bf16.msra.mxu0 %v1838_v1  ;;  %v1853_v7 = vld [vmem:[%s2305_s5 + $0xb0] sm:$0xff]  ;;  %v1852_v11 = vld [vmem:[%s2305_s5 + $0xa8] sm:$0xff]  ;;  %s793_s22 = scalar_lea.vmem %s2409_s3, %s1572_s18 }
  0x9c   : > { %v1854_v3 = vld [vmem:[%s2305_s5 + $0xb8] sm:$0xff]  ;;  %1354 = vmatpush.bf16.msra.mxu1 %v1846_v2  ;;  %v1861_v8 = vld [vmem:[%s2305_s5 + $0xf0] sm:$0xff]  ;;  %v1860_v12 = vld [vmem:[%s2305_s5 + $0xe8] sm:$0xff] }
  0x9d   : > { %v1862_v4 = vld [vmem:[%s2305_s5 + $0xf8] sm:$0xff]  ;;  %1367 = vmatpush.bf16.msra.mxu2 %v1854_v3  ;;  %v1835_v13 = vld [vmem:[%s2305_s5 + $0x20] sm:$0xff]  ;;  %v1833_v21 = vld [vmem:[%s2305_s5 + $0x10] sm:$0xff] }
  0x9e   : > { %1380 = vmatpush.bf16.msra.mxu3 %v1862_v4  ;;  %v1843_v14 = vld [vmem:[%s2305_s5 + $0x60] sm:$0xff]  ;;  %v1834_v17 = vld [vmem:[%s2305_s5 + $0x18] sm:$0xff]  ;;  %v1841_v22 = vld [vmem:[%s2305_s5 + $0x50] sm:$0xff] }
  0x9f   : > { %1342 = vmatpush.bf16.msra.mxu0 %v1837_v5  ;;  %v1851_v15 = vld [vmem:[%s2305_s5 + $0xa0] sm:$0xff]  ;;  %v1842_v18 = vld [vmem:[%s2305_s5 + $0x58] sm:$0xff]  ;;  %v1849_v23 = vld [vmem:[%s2305_s5 + $0x90] sm:$0xff] }
  0xa0   : > { %1355 = vmatpush.bf16.msra.mxu1 %v1845_v6  ;;  %v1859_v16 = vld [vmem:[%s2305_s5 + $0xe0] sm:$0xff]  ;;  %v1850_v19 = vld [vmem:[%s2305_s5 + $0x98] sm:$0xff]  ;;  %v1857_v24 = vld [vmem:[%s2305_s5 + $0xd0] sm:$0xff] }
  0xa1   : > { %1368 = vmatpush.bf16.msra.mxu2 %v1853_v7  ;;  %v1858_v20 = vld [vmem:[%s2305_s5 + $0xd8] sm:$0xff]  ;;  %v795_v25 = vld [vmem:[%s2406_s0 + $0x8] sm:$0xff]  ;;  %v1832_v26 = vld [vmem:[%s2305_s5 + $0x8] sm:$0xff] }
  0xa2   : > { %1381 = vmatpush.bf16.msra.mxu3 %v1861_v8  ;;  %v1840_v27 = vld [vmem:[%s2305_s5 + $0x48] sm:$0xff]  ;;  %928 = vst [vmem:[#allocation1 + $0x20] ss:$4 sm:$0xff] %v795_v25  ;;  %v1831_v30 = vld [vmem:[%s2305_s5] sm:$0xff]  ;;  %v1870_v34 = vld [vmem:[%s2305_s5 + $0x138] sm:$0xff] }
  0xa3   : > { %1343 = vmatpush.bf16.msra.mxu0 %v1836_v9  ;;  %v1848_v28 = vld [vmem:[%s2305_s5 + $0x88] sm:$0xff]  ;;  %v1839_v31 = vld [vmem:[%s2305_s5 + $0x40] sm:$0xff]  ;;  %v1878_v35 = vld [vmem:[%s2305_s5 + $0x178] sm:$0xff] }
  0xa4   : > { %1356 = vmatpush.bf16.msra.mxu1 %v1844_v10  ;;  %v1856_v29 = vld [vmem:[%s2305_s5 + $0xc8] sm:$0xff]  ;;  %v1847_v32 = vld [vmem:[%s2305_s5 + $0x80] sm:$0xff]  ;;  %v932_v37 = vld.sshfl [vmem:[#allocation1 + $0x18] sm:$0xff pattern:$0x73625140] }
  0xa5   : > { %1369 = vmatpush.bf16.msra.mxu2 %v1852_v11  ;;  %v1855_v33 = vld [vmem:[%s2305_s5 + $0xc0] sm:$0xff]  ;;  %v931_v36 = vld.sshfl [vmem:[#allocation1 + $0x10] sm:$0xff pattern:$0x73625140]  ;;  %v1886_v40 = vld [vmem:[%s2305_s5 + $0x1b8] sm:$0xff]  ;;  %v948_v43 = vpack.c.bf16 %v932_v37, %v932_v37 }
  0xa6   : > { %1382 = vmatpush.bf16.msra.mxu3 %v1860_v12  ;;  %v929_v38 = vld.sshfl [vmem:[#allocation1] sm:$0xff pattern:$0x73625140]  ;;  %v930_v39 = vld.sshfl [vmem:[#allocation1 + $0x8] sm:$0xff pattern:$0x73625140]  ;;  %v947_v42 = vpack.c.bf16 %v931_v36, %v931_v36 }
  0xa7   : > { %1344 = vmatpush.bf16.msra.mxu0 %v1835_v13  ;;  %v1894_v41 = vld [vmem:[%s2305_s5 + $0x1f8] sm:$0xff]  ;;  %v945_v44 = vpack.c.bf16 %v929_v38, %v929_v38  ;;  %v946_v45 = vpack.c.bf16 %v930_v39, %v930_v39  ;;  %v1869_v46 = vld [vmem:[%s2305_s5 + $0x130] sm:$0xff]  ;;  %v1868_v50 = vld [vmem:[%s2305_s5 + $0x128] sm:$0xff] }
  0xa8   : > { %1357 = vmatpush.bf16.msra.mxu1 %v1843_v14  ;;  %v1877_v47 = vld [vmem:[%s2305_s5 + $0x170] sm:$0xff]  ;;  %v1876_v51 = vld [vmem:[%s2305_s5 + $0x168] sm:$0xff]  ;;  %v1867_v54 = vld [vmem:[%s2305_s5 + $0x120] sm:$0xff] }
  0xa9   : > { %1370 = vmatpush.bf16.msra.mxu2 %v1851_v15  ;;  %v1885_v48 = vld [vmem:[%s2305_s5 + $0x1b0] sm:$0xff]  ;;  %v1884_v52 = vld [vmem:[%s2305_s5 + $0x1a8] sm:$0xff]  ;;  %v1875_v55 = vld [vmem:[%s2305_s5 + $0x160] sm:$0xff] }
  0xaa   : > { %1383 = vmatpush.bf16.msra.mxu3 %v1859_v16  ;;  %v1893_v49 = vld [vmem:[%s2305_s5 + $0x1f0] sm:$0xff]  ;;  %v1892_v53 = vld [vmem:[%s2305_s5 + $0x1e8] sm:$0xff]  ;;  %v1883_v56 = vld [vmem:[%s2305_s5 + $0x1a0] sm:$0xff] }
  0xab   : > { %1345 = vmatpush.bf16.msra.mxu0 %v1834_v17  ;;  %v1891_v57 = vld [vmem:[%s2305_s5 + $0x1e0] sm:$0xff]  ;;  %v1866_v58 = vld [vmem:[%s2305_s5 + $0x118] sm:$0xff]  ;;  %v1865_v62 = vld [vmem:[%s2305_s5 + $0x110] sm:$0xff] }
  0xac   : > { %1358 = vmatpush.bf16.msra.mxu1 %v1842_v18  ;;  %v1874_v59 = vld [vmem:[%s2305_s5 + $0x158] sm:$0xff]  ;;  %v1873_v63 = vld [vmem:[%s2305_s5 + $0x150] sm:$0xff]  ;;  %v1864_v2 = vld [vmem:[%s2305_s5 + $0x108] sm:$0xff] }
  0xad   : > { %1371 = vmatpush.bf16.msra.mxu2 %v1850_v19  ;;  %v1882_v60 = vld [vmem:[%s2305_s5 + $0x198] sm:$0xff]  ;;  %v1881_v0 = vld [vmem:[%s2305_s5 + $0x190] sm:$0xff]  ;;  %v1872_v3 = vld [vmem:[%s2305_s5 + $0x148] sm:$0xff] }
  0xae   : > { %1384 = vmatpush.bf16.msra.mxu3 %v1858_v20  ;;  %v1890_v61 = vld [vmem:[%s2305_s5 + $0x1d8] sm:$0xff]  ;;  %v1889_v1 = vld [vmem:[%s2305_s5 + $0x1d0] sm:$0xff]  ;;  %v1880_v4 = vld [vmem:[%s2305_s5 + $0x188] sm:$0xff] }
  0xaf   : > { %1346 = vmatpush.bf16.msra.mxu0 %v1833_v21  ;;  %v1888_v5 = vld [vmem:[%s2305_s5 + $0x1c8] sm:$0xff]  ;;  %v1863_v6 = vld [vmem:[%s2305_s5 + $0x100] sm:$0xff]  ;;  %v933_v10 = vld.sshfl [vmem:[#allocation1 + $0x20] sm:$0xff pattern:$0x73625140] }
  0xb0   : > { %1359 = vmatpush.bf16.msra.mxu1 %v1841_v22  ;;  %v1871_v7 = vld [vmem:[%s2305_s5 + $0x140] sm:$0xff]  ;;  %v935_v12 = vld.sshfl [vmem:[#allocation1 + $0x30] sm:$0xff pattern:$0x73625140]  ;;  %v949_v14 = vpack.c.bf16 %v933_v10, %v933_v10 }
  0xb1   : > { %1372 = vmatpush.bf16.msra.mxu2 %v1849_v23  ;;  %v1879_v8 = vld [vmem:[%s2305_s5 + $0x180] sm:$0xff]  ;;  %v936_v13 = vld.sshfl [vmem:[#allocation1 + $0x38] sm:$0xff pattern:$0x73625140]  ;;  %v951_v16 = vpack.c.bf16 %v935_v12, %v935_v12 }
  0xb2   : > { %1385 = vmatpush.bf16.msra.mxu3 %v1857_v24  ;;  %v1887_v9 = vld [vmem:[%s2305_s5 + $0x1c0] sm:$0xff]  ;;  %v952_v17 = vpack.c.bf16 %v936_v13, %v936_v13  ;;  %v1935_v24 = vld [vmem:[%s785_s8] ss:$0 sm:$0xff] }
  0xb3   : > { %1347 = vmatpush.bf16.msra.mxu0 %v1832_v26  ;;  %v934_v11 = vld.sshfl [vmem:[#allocation1 + $0x28] sm:$0xff pattern:$0x73625140] }
  0xb4   : > { %1360 = vmatpush.bf16.msra.mxu1 %v1840_v27  ;;  %v950_v15 = vpack.c.bf16 %v934_v11, %v934_v11 }
  0xb5   : > { %1373 = vmatpush.bf16.msra.mxu2 %v1848_v28 }
  0xb6   : > { %1386 = vmatpush.bf16.msra.mxu3 %v1856_v29 }
  0xb7   : > { %1348 = vmatpush.bf16.msra.mxu0 %v1831_v30 }
  0xb8   : > { %1361 = vmatpush.bf16.msra.mxu1 %v1839_v31 }
  0xb9   : > { %1374 = vmatpush.bf16.msra.mxu2 %v1847_v32 }
  0xba   : > { %1387 = vmatpush.bf16.msra.mxu3 %v1855_v33  ;;  %1349 = vmatmul.bf16.vlgmr.msra.gmra.mxu0 %v945_v44 }
  0xbb   : > { %1393 = vmatpush.bf16.msrb.mxu0 %v1870_v34  ;;  %1362 = vmatmul.bf16.vlgmr.msra.gmra.mxu1 %v946_v45 }
  0xbc   : > { %1406 = vmatpush.bf16.msrb.mxu1 %v1878_v35  ;;  %1375 = vmatmul.bf16.vlgmr.msra.gmra.mxu2 %v947_v42 }
  0xbd   : > { %1419 = vmatpush.bf16.msrb.mxu2 %v1886_v40  ;;  %1388 = vmatmul.bf16.vlgmr.msra.gmra.mxu3 %v948_v43 }
  0xbe   : > { %1432 = vmatpush.bf16.msrb.mxu3 %v1894_v41 }
  0xbf   : > { %1394 = vmatpush.bf16.msrb.mxu0 %v1869_v46 }
  0xc0   : > { %1407 = vmatpush.bf16.msrb.mxu1 %v1877_v47 }
  0xc1   : > { %1420 = vmatpush.bf16.msrb.mxu2 %v1885_v48 }
  0xc2   : > { %1433 = vmatpush.bf16.msrb.mxu3 %v1893_v49 }
  0xc3   : > { %1395 = vmatpush.bf16.msrb.mxu0 %v1868_v50 }
  0xc4   : > { %1408 = vmatpush.bf16.msrb.mxu1 %v1876_v51 }
  0xc5   : > { %1421 = vmatpush.bf16.msrb.mxu2 %v1884_v52 }
  0xc6   : > { %1434 = vmatpush.bf16.msrb.mxu3 %v1892_v53 }
  0xc7   : > { %1396 = vmatpush.bf16.msrb.mxu0 %v1867_v54 }
  0xc8   : > { %1409 = vmatpush.bf16.msrb.mxu1 %v1875_v55 }
  0xc9   : > { %1422 = vmatpush.bf16.msrb.mxu2 %v1883_v56 }
  0xca   : > { %1435 = vmatpush.bf16.msrb.mxu3 %v1891_v57 }
  0xcb   : > { %1397 = vmatpush.bf16.msrb.mxu0 %v1866_v58 }
  0xcc   : > { %1410 = vmatpush.bf16.msrb.mxu1 %v1874_v59 }
  0xcd   : > { %1423 = vmatpush.bf16.msrb.mxu2 %v1882_v60 }
  0xce   : > { %1436 = vmatpush.bf16.msrb.mxu3 %v1890_v61 }
  0xcf   : > { %1398 = vmatpush.bf16.msrb.mxu0 %v1865_v62 }
  0xd0   : > { %1411 = vmatpush.bf16.msrb.mxu1 %v1873_v63 }
  0xd1   : > { %1424 = vmatpush.bf16.msrb.mxu2 %v1881_v0 }
  0xd2   : > { %1437 = vmatpush.bf16.msrb.mxu3 %v1889_v1 }
  0xd3   : > { %1399 = vmatpush.bf16.msrb.mxu0 %v1864_v2 }
  0xd4   : > { %1412 = vmatpush.bf16.msrb.mxu1 %v1872_v3 }
  0xd5   : > { %1425 = vmatpush.bf16.msrb.mxu2 %v1880_v4 }
  0xd6   : > { %1438 = vmatpush.bf16.msrb.mxu3 %v1888_v5 }
  0xd7   : > { %1400 = vmatpush.bf16.msrb.mxu0 %v1863_v6 }
  0xd8   : > { %1413 = vmatpush.bf16.msrb.mxu1 %v1871_v7 }
  0xd9   : > { %1426 = vmatpush.bf16.msrb.mxu2 %v1879_v8 }
  0xda   : > { %1439 = vmatpush.bf16.msrb.mxu3 %v1887_v9  ;;  %1401 = vmatmul.bf16.vlgmr.msrb.gmra.mxu0 %v949_v14 }
  0xdb   : > { %1414 = vmatmul.bf16.vlgmr.msrb.gmra.mxu1 %v950_v15 }
  0xdc   : > { %1427 = vmatmul.bf16.vlgmr.msrb.gmra.mxu2 %v951_v16 }
  0xdd   : > { %1440 = vmatmul.bf16.vlgmr.msrb.gmra.mxu3 %v952_v17 }
 0x137   : > { %v1350_v18 = vpop.f32.mrf.mxu0 }
 0x138   : > { %v1363_v19 = vpop.f32.mrf.mxu1  ;;  %v1351_v27 = vadd.f32 %v1935_v24, %v1350_v18 }
 0x13a   : > { %v1364_v28 = vadd.f32 %v1363_v19, %v1351_v27 }
 0x13f   : > { %v1376_v20 = vpop.f32.mrf.mxu2  ;;  %v1352_v22 = vpop.f32.mrf.mxu0 }
 0x140   : > { %v1389_v21 = vpop.f32.mrf.mxu3  ;;  %v1365_v23 = vpop.f32.mrf.mxu1  ;;  %v1377_v29 = vadd.f32 %v1376_v20, %v1364_v28 }
 0x142   : > { %v1390_v30 = vadd.f32 %v1389_v21, %v1377_v29 }
 0x147   : > { %v1378_v25 = vpop.f32.mrf.mxu2 }
 0x148   : > { %v1391_v26 = vpop.f32.mrf.mxu3 }
 0x157   : > { %v1402_v31 = vpop.f32.mrf.mxu0 }
 0x158   : > { %v1415_v32 = vpop.f32.mrf.mxu1  ;;  %v1403_v33 = vadd.f32 %v1402_v31, %v1390_v30 }
 0x15a   : > { %v1416_v34 = vadd.f32 %v1415_v32, %v1403_v33 }
 0x15f   : > { %v1428_v35 = vpop.f32.mrf.mxu2  ;;  %v1404_v38 = vpop.f32.mrf.mxu0 }
 0x160   : > { %v1441_v36 = vpop.f32.mrf.mxu3  ;;  %v1429_v37 = vadd.f32 %v1428_v35, %v1416_v34  ;;  %v1417_v39 = vpop.f32.mrf.mxu1 }
 0x162   : > { %v1442_v40 = vadd.f32 %v1441_v36, %v1429_v37 }
 0x164   : > { %v1445_v41 = vmax.f32 %v1442_v40, 0.0 }
 0x166   : > { %1446 = vst [vmem:[%s793_s22] sm:$0x3] %v1445_v41 }
 0x167   : > { %v1430_v42 = vpop.f32.mrf.mxu2 }
 0x168   : > { %v1443_v43 = vpop.f32.mrf.mxu3 }
 0x169 PF: > { %s13_s16 = sadd.s32 1, %s1974_s16   ;;  %s2410_s12 = smov %s1962_s13 }
 0x16a   : > { %p10_p10 = scmp.ge.s32.totalorder %s13_s16, 4   ;;  %s2411_s13 = smov %s2031_s20 }
 0x16b   : > { %s2412_s14 = smov %s1970_s15  ;;  %s2413_s15 = smov %s2415_s17 }
 0x16c   :  { %12 = sbr.rel (!%p10_p10) target bundleno = 3 (0x3), region = 115 }

// kernel: graphnet_forward.15
= control target key start
LH: loop header
LB: loop body
LE: loop exit
PB: predicated region body
PF: predicated region fallthrough
CT: control target
= control target key end

     0   :  { %s228_s1 = inlined_call_operand.vmem [shape: f32[1,256,128], index: 1, kind: input, shape index: {}]   ;;  %s229_s0 = inlined_call_operand.vmem [shape: f32[1,2,256], index: 0, kind: input, shape index: {}]   ;;  %s230_s2 = inlined_call_operand.vmem [shape: f32[1,1,128], index: 2, kind: input, shape index: {}]   ;;  %s231_s3 = inlined_call_operand.vmem [shape: f32[1,2,128], index: 3, kind: output, shape index: {}]  }
   0x1   :  { %v30_v0 = vld [vmem:[%s228_s1 + $0x78] sm:$0xff]  ;;  %v29_v1 = vld [vmem:[%s228_s1 + $0x70] sm:$0xff]  ;;  %v28_v4 = vld [vmem:[%s228_s1 + $0x68] sm:$0xff] }
   0x2   :  { %v46_v2 = vld [vmem:[%s228_s1 + $0xf8] sm:$0xff]  ;;  %57 = vmatpush.msra.mxu0 %v30_v0  ;;  %v45_v3 = vld [vmem:[%s228_s1 + $0xf0] sm:$0xff]  ;;  %v44_v5 = vld [vmem:[%s228_s1 + $0xe8] sm:$0xff] }
   0x3   :  { %77 = vmatpush.msra.mxu1 %v46_v2  ;;  %v27_v6 = vld [vmem:[%s228_s1 + $0x60] sm:$0xff]  ;;  %v26_v8 = vld [vmem:[%s228_s1 + $0x58] sm:$0xff]  ;;  %v25_v10 = vld [vmem:[%s228_s1 + $0x50] sm:$0xff] }
   0x4   :  { %58 = vmatpush.msra.mxu0 %v29_v1  ;;  %v43_v7 = vld [vmem:[%s228_s1 + $0xe0] sm:$0xff]  ;;  %v42_v9 = vld [vmem:[%s228_s1 + $0xd8] sm:$0xff]  ;;  %v41_v11 = vld [vmem:[%s228_s1 + $0xd0] sm:$0xff] }
   0x5   :  { %78 = vmatpush.msra.mxu1 %v45_v3  ;;  %v24_v12 = vld [vmem:[%s228_s1 + $0x48] sm:$0xff]  ;;  %v14_v14 = vld [vmem:[%s229_s0] sm:$0xf]  ;;  %v22_v17 = vld [vmem:[%s228_s1 + $0x38] sm:$0xff] }
   0x6   :  { %59 = vmatpush.msra.mxu0 %v28_v4  ;;  %v40_v13 = vld [vmem:[%s228_s1 + $0xc8] sm:$0xff]  ;;  %52 = vst [vmem:[#allocation1] ss:$4 sm:$0xff] %v14_v14  ;;  %v23_v15 = vld [vmem:[%s228_s1 + $0x40] sm:$0xff]  ;;  %v38_v18 = vld [vmem:[%s228_s1 + $0xb8] sm:$0xff] }
   0x7   :  { %79 = vmatpush.msra.mxu1 %v44_v5  ;;  %v39_v16 = vld [vmem:[%s228_s1 + $0xc0] sm:$0xff]  ;;  %v21_v19 = vld [vmem:[%s228_s1 + $0x30] sm:$0xff]  ;;  %v20_v21 = vld [vmem:[%s228_s1 + $0x28] sm:$0xff] }
   0x8   :  { %60 = vmatpush.msra.mxu0 %v27_v6  ;;  %v37_v20 = vld [vmem:[%s228_s1 + $0xb0] sm:$0xff]  ;;  %v36_v22 = vld [vmem:[%s228_s1 + $0xa8] sm:$0xff]  ;;  %v19_v23 = vld [vmem:[%s228_s1 + $0x20] sm:$0xff] }
   0x9   :  { %80 = vmatpush.msra.mxu1 %v43_v7  ;;  %v35_v24 = vld [vmem:[%s228_s1 + $0xa0] sm:$0xff]  ;;  %v18_v25 = vld [vmem:[%s228_s1 + $0x18] sm:$0xff]  ;;  %v17_v27 = vld [vmem:[%s228_s1 + $0x10] sm:$0xff] }
   0xa   :  { %61 = vmatpush.msra.mxu0 %v26_v8  ;;  %v34_v26 = vld [vmem:[%s228_s1 + $0x98] sm:$0xff]  ;;  %v33_v28 = vld [vmem:[%s228_s1 + $0x90] sm:$0xff]  ;;  %v16_v29 = vld [vmem:[%s228_s1 + $0x8] sm:$0xff] }
   0xb   :  { %81 = vmatpush.msra.mxu1 %v42_v9  ;;  %v32_v30 = vld [vmem:[%s228_s1 + $0x88] sm:$0xff]  ;;  %v15_v31 = vld [vmem:[%s228_s1] sm:$0xff] }
   0xc   :  { %62 = vmatpush.msra.mxu0 %v25_v10  ;;  %v31_v32 = vld [vmem:[%s228_s1 + $0x80] sm:$0xff] }
   0xd   :  { %82 = vmatpush.msra.mxu1 %v41_v11  ;;  %v53_v33 = vld.sshfl [vmem:[#allocation1] sm:$0xff pattern:$0x73625140]  ;;  %v54_v34 = vld.sshfl [vmem:[#allocation1 + $0x8] sm:$0xff pattern:$0x73625140] }
   0xe   :  { %63 = vmatpush.msra.mxu0 %v24_v12  ;;  %v102_v35 = vld [vmem:[%s230_s2] ss:$0 sm:$0xff] }
   0xf   :  { %83 = vmatpush.msra.mxu1 %v40_v13 }
  0x10   :  { %64 = vmatpush.msra.mxu0 %v23_v15 }
  0x11   :  { %84 = vmatpush.msra.mxu1 %v39_v16 }
  0x12   :  { %65 = vmatpush.msra.mxu0 %v22_v17 }
  0x13   :  { %85 = vmatpush.msra.mxu1 %v38_v18 }
  0x14   :  { %66 = vmatpush.msra.mxu0 %v21_v19 }
  0x15   :  { %86 = vmatpush.msra.mxu1 %v37_v20 }
  0x16   :  { %67 = vmatpush.msra.mxu0 %v20_v21 }
  0x17   :  { %87 = vmatpush.msra.mxu1 %v36_v22 }
  0x18   :  { %68 = vmatpush.msra.mxu0 %v19_v23 }
  0x19   :  { %88 = vmatpush.msra.mxu1 %v35_v24 }
  0x1a   :  { %69 = vmatpush.msra.mxu0 %v18_v25 }
  0x1b   :  { %89 = vmatpush.msra.mxu1 %v34_v26 }
  0x1c   :  { %70 = vmatpush.msra.mxu0 %v17_v27 }
  0x1d   :  { %90 = vmatpush.msra.mxu1 %v33_v28 }
  0x1e   :  { %71 = vmatpush.msra.mxu0 %v16_v29 }
  0x1f   :  { %91 = vmatpush.msra.mxu1 %v32_v30 }
  0x20   :  { %72 = vmatpush.msra.mxu0 %v15_v31 }
  0x21   :  { %92 = vmatpush.msra.mxu1 %v31_v32  ;;  %73 = vmatmul.f32.vlgmr.msra.gmra.mxu0 %v53_v33 }
  0x22   :  { %93 = vmatmul.f32.vlgmr.msra.gmra.mxu1 %v54_v34 }
  0x9e   :  { %v74_v36 = vpop.f32.mrf.mxu0 }
  0x9f   :  { %v94_v37 = vpop.f32.mrf.mxu1  ;;  %v75_v38 = vadd.f32 %v102_v35, %v74_v36 }
  0xa1   :  { %v95_v39 = vadd.f32 %v94_v37, %v75_v38 }
  0xa3   :  { %97 = vst [vmem:[%s231_s3] sm:$0x3] %v95_v39 }

// kernel: graphnet_forward.13
= control target key start
LH: loop header
LB: loop body
LE: loop exit
PB: predicated region body
PF: predicated region fallthrough
CT: control target
= control target key end

     0   :  { %s12546_s12 = smov 0   ;;  %s12548_s13 = smov 0   ;;  %s14660_s0 = inlined_call_operand.vmem [shape: f32[1,2,6160], index: 0, kind: input, shape index: {}]   ;;  %s14661_s1 = inlined_call_operand.vmem [shape: bf16[1,6160,1024], index: 1, kind: input, shape index: {}]   ;;  %s14662_s2 = inlined_call_operand.vmem [shape: f32[1,1,1024], index: 2, kind: input, shape index: {}]   ;;  %s14663_s3 = inlined_call_operand.vmem [shape: f32[1,2,1024], index: 3, kind: output, shape index: {}]  }
   0x1   :  { %s12550_s14 = smov 0   ;;  %s12552_s15 = smov 0  }
   0x2   :  { %s12554_s16 = smov 0  }
   0x3 LB: > { %s22_s17 = sadd.s32 1, %s12520_s15  ;;  %p67_p1 = scmp.ne.s32.totalorder %s12512_s13, %s12508_s12  ;;  %s12524_s16 = sphi %s12554_s16, %s13_s16   ;;  %s12520_s15 = sphi %s12552_s15, %s14667_s15   ;;  %s12516_s14 = sphi %s12550_s14, %s14666_s14   ;;  %s12512_s13 = sphi %s12548_s13, %s14665_s13   ;;  %s12508_s12 = sphi %s12546_s12, %s14664_s12  }
   0x4   : > { %p23_p0 = scmp.ge.s32.totalorder %s22_s17, 8  ;;  %p68_p2 = scmp.eq.s32.totalorder %s12524_s16, 0 }
   0x5   : > { %s60_s19 = sadd.s32 1, %s12512_s13  ;;  %p10511_p5 = scmp.ge.s32.totalorder %s12524_s16, 8 }
   0x6   : > { %s14669_s17 = smov (%p23_p0, %s22_s17), 0  ;;  %p69_p3 = por %p68_p2, %p67_p1 }
   0x7   : > { %s56_s18 = ssub.s32 %s12520_s15, %s14669_s17  ;;  %157 = sbr.rel (%p10511_p5) target bundleno = 786 (0x312), region = 20 }
   0x8   : > { %p58_p4 = scmp.eq.s32.totalorder %s56_s18, 0 }
   0xa   : > { %s12581_s20 = scalar_select %p58_p4, %s12512_s13, %s60_s19  }
   0xc   : > { %160 = sbr.rel (!%p69_p3) target bundleno = 786 (0x312), region = 24  ;;  %s162_s21 = sand.u32 (%p69_p3), 1, %s12512_s13  }
   0xd   : > { %s10512_s22 = sshll.u32 (%p69_p3), %s12520_s15, 2  ;;  %s12443_s23 = smul.u32 (%p69_p3), 3080, %s162_s21 }
   0xe   : > { %s12589_s26 = scalar_lea.vmem (%p69_p3), %s14661_s1, %s10512_s22 }
   0xf   : > { %v185_v0 = vld [vmem:[%s12589_s26] sm:$0xf] (%p69_p3)  ;;  %s12594_s27 = scalar_lea.vmem (%p69_p3), [#allocation2], %s12443_s23 }
  0x10   : > { %v187_v1 = vld [vmem:[%s12589_s26 + $0x20] sm:$0xf] (%p69_p3)  ;;  %186 = vst [vmem:[%s12594_s27] sm:$0xf] (%p69_p3), %v185_v0 }
  0x11   : > { %v189_v2 = vld [vmem:[%s12589_s26 + $0x40] sm:$0xf]  ;;  %188 = vst [vmem:[%s12594_s27 + $0x4] sm:$0xf] %v187_v1 }
  0x12   : > { %v191_v3 = vld [vmem:[%s12589_s26 + $0x60] sm:$0xf]  ;;  %190 = vst [vmem:[%s12594_s27 + $0x8] sm:$0xf] %v189_v2 }
  0x13   : > { %v193_v4 = vld [vmem:[%s12589_s26 + $0x80] sm:$0xf]  ;;  %192 = vst [vmem:[%s12594_s27 + $0xc] sm:$0xf] %v191_v3 }
  0x14   : > { %v195_v5 = vld [vmem:[%s12589_s26 + $0xa0] sm:$0xf]  ;;  %194 = vst [vmem:[%s12594_s27 + $0x10] sm:$0xf] %v193_v4 }
  0x15   : > { %v197_v6 = vld [vmem:[%s12589_s26 + $0xc0] sm:$0xf]  ;;  %196 = vst [vmem:[%s12594_s27 + $0x14] sm:$0xf] %v195_v5 }
  0x16   : > { %v199_v7 = vld [vmem:[%s12589_s26 + $0xe0] sm:$0xf]  ;;  %198 = vst [vmem:[%s12594_s27 + $0x18] sm:$0xf] %v197_v6 }
  0x17   : > { %v201_v8 = vld [vmem:[%s12589_s26 + $0x100] sm:$0xf]  ;;  %200 = vst [vmem:[%s12594_s27 + $0x1c] sm:$0xf] %v199_v7 }
  0x18   : > { %v203_v9 = vld [vmem:[%s12589_s26 + $0x120] sm:$0xf]  ;;  %202 = vst [vmem:[%s12594_s27 + $0x20] sm:$0xf] %v201_v8 }
  0x19   : > { %v205_v10 = vld [vmem:[%s12589_s26 + $0x140] sm:$0xf]  ;;  %204 = vst [vmem:[%s12594_s27 + $0x24] sm:$0xf] %v203_v9 }
  0x1a   : > { %v207_v11 = vld [vmem:[%s12589_s26 + $0x160] sm:$0xf]  ;;  %206 = vst [vmem:[%s12594_s27 + $0x28] sm:$0xf] %v205_v10 }
  0x1b   : > { %v209_v12 = vld [vmem:[%s12589_s26 + $0x180] sm:$0xf]  ;;  %208 = vst [vmem:[%s12594_s27 + $0x2c] sm:$0xf] %v207_v11 }
  0x1c   : > { %v211_v13 = vld [vmem:[%s12589_s26 + $0x1a0] sm:$0xf]  ;;  %210 = vst [vmem:[%s12594_s27 + $0x30] sm:$0xf] %v209_v12 }
  0x1d   : > { %v213_v14 = vld [vmem:[%s12589_s26 + $0x1c0] sm:$0xf]  ;;  %212 = vst [vmem:[%s12594_s27 + $0x34] sm:$0xf] %v211_v13 }
  0x1e   : > { %v215_v15 = vld [vmem:[%s12589_s26 + $0x1e0] sm:$0xf]  ;;  %214 = vst [vmem:[%s12594_s27 + $0x38] sm:$0xf] %v213_v14 }
  0x1f   : > { %v217_v16 = vld [vmem:[%s12589_s26 + $0x200] sm:$0xf]  ;;  %216 = vst [vmem:[%s12594_s27 + $0x3c] sm:$0xf] %v215_v15 }
  0x20   : > { %v219_v17 = vld [vmem:[%s12589_s26 + $0x220] sm:$0xf]  ;;  %218 = vst [vmem:[%s12594_s27 + $0x40] sm:$0xf] %v217_v16 }
  0x21   : > { %v221_v18 = vld [vmem:[%s12589_s26 + $0x240] sm:$0xf]  ;;  %220 = vst [vmem:[%s12594_s27 + $0x44] sm:$0xf] %v219_v17 }
  0x22   : > { %v223_v19 = vld [vmem:[%s12589_s26 + $0x260] sm:$0xf]  ;;  %222 = vst [vmem:[%s12594_s27 + $0x48] sm:$0xf] %v221_v18 }
  0x23   : > { %v225_v20 = vld [vmem:[%s12589_s26 + $0x280] sm:$0xf]  ;;  %224 = vst [vmem:[%s12594_s27 + $0x4c] sm:$0xf] %v223_v19 }
  0x24   : > { %v227_v21 = vld [vmem:[%s12589_s26 + $0x2a0] sm:$0xf]  ;;  %226 = vst [vmem:[%s12594_s27 + $0x50] sm:$0xf] %v225_v20 }
  0x25   : > { %v229_v22 = vld [vmem:[%s12589_s26 + $0x2c0] sm:$0xf]  ;;  %228 = vst [vmem:[%s12594_s27 + $0x54] sm:$0xf] %v227_v21 }
  0x26   : > { %v231_v23 = vld [vmem:[%s12589_s26 + $0x2e0] sm:$0xf]  ;;  %230 = vst [vmem:[%s12594_s27 + $0x58] sm:$0xf] %v229_v22 }
  0x27   : > { %v233_v24 = vld [vmem:[%s12589_s26 + $0x300] sm:$0xf]  ;;  %232 = vst [vmem:[%s12594_s27 + $0x5c] sm:$0xf] %v231_v23 }
  0x28   : > { %v235_v25 = vld [vmem:[%s12589_s26 + $0x320] sm:$0xf]  ;;  %234 = vst [vmem:[%s12594_s27 + $0x60] sm:$0xf] %v233_v24 }
  0x29   : > { %v237_v26 = vld [vmem:[%s12589_s26 + $0x340] sm:$0xf]  ;;  %236 = vst [vmem:[%s12594_s27 + $0x64] sm:$0xf] %v235_v25 }
  0x2a   : > { %v239_v27 = vld [vmem:[%s12589_s26 + $0x360] sm:$0xf]  ;;  %238 = vst [vmem:[%s12594_s27 + $0x68] sm:$0xf] %v237_v26 }
  0x2b   : > { %v241_v28 = vld [vmem:[%s12589_s26 + $0x380] sm:$0xf]  ;;  %240 = vst [vmem:[%s12594_s27 + $0x6c] sm:$0xf] %v239_v27 }
  0x2c   : > { %v243_v29 = vld [vmem:[%s12589_s26 + $0x3a0] sm:$0xf]  ;;  %242 = vst [vmem:[%s12594_s27 + $0x70] sm:$0xf] %v241_v28 }
  0x2d   : > { %v245_v30 = vld [vmem:[%s12589_s26 + $0x3c0] sm:$0xf]  ;;  %244 = vst [vmem:[%s12594_s27 + $0x74] sm:$0xf] %v243_v29 }
  0x2e   : > { %v247_v31 = vld [vmem:[%s12589_s26 + $0x3e0] sm:$0xf]  ;;  %246 = vst [vmem:[%s12594_s27 + $0x78] sm:$0xf] %v245_v30 }
  0x2f   : > { %v249_v32 = vld [vmem:[%s12589_s26 + $0x400] sm:$0xf]  ;;  %248 = vst [vmem:[%s12594_s27 + $0x7c] sm:$0xf] %v247_v31 }
  0x30   : > { %v251_v33 = vld [vmem:[%s12589_s26 + $0x420] sm:$0xf]  ;;  %250 = vst [vmem:[%s12594_s27 + $0x80] sm:$0xf] %v249_v32 }
  0x31   : > { %v253_v34 = vld [vmem:[%s12589_s26 + $0x440] sm:$0xf]  ;;  %252 = vst [vmem:[%s12594_s27 + $0x84] sm:$0xf] %v251_v33 }
  0x32   : > { %v255_v35 = vld [vmem:[%s12589_s26 + $0x460] sm:$0xf]  ;;  %254 = vst [vmem:[%s12594_s27 + $0x88] sm:$0xf] %v253_v34 }
  0x33   : > { %v257_v36 = vld [vmem:[%s12589_s26 + $0x480] sm:$0xf]  ;;  %256 = vst [vmem:[%s12594_s27 + $0x8c] sm:$0xf] %v255_v35 }
  0x34   : > { %v259_v37 = vld [vmem:[%s12589_s26 + $0x4a0] sm:$0xf]  ;;  %258 = vst [vmem:[%s12594_s27 + $0x90] sm:$0xf] %v257_v36 }
  0x35   : > { %v261_v38 = vld [vmem:[%s12589_s26 + $0x4c0] sm:$0xf]  ;;  %260 = vst [vmem:[%s12594_s27 + $0x94] sm:$0xf] %v259_v37 }
  0x36   : > { %v263_v39 = vld [vmem:[%s12589_s26 + $0x4e0] sm:$0xf]  ;;  %262 = vst [vmem:[%s12594_s27 + $0x98] sm:$0xf] %v261_v38 }
  0x37   : > { %v265_v40 = vld [vmem:[%s12589_s26 + $0x500] sm:$0xf]  ;;  %264 = vst [vmem:[%s12594_s27 + $0x9c] sm:$0xf] %v263_v39 }
  0x38   : > { %v267_v41 = vld [vmem:[%s12589_s26 + $0x520] sm:$0xf]  ;;  %266 = vst [vmem:[%s12594_s27 + $0xa0] sm:$0xf] %v265_v40 }
  0x39   : > { %v269_v42 = vld [vmem:[%s12589_s26 + $0x540] sm:$0xf]  ;;  %268 = vst [vmem:[%s12594_s27 + $0xa4] sm:$0xf] %v267_v41 }
  0x3a   : > { %v271_v43 = vld [vmem:[%s12589_s26 + $0x560] sm:$0xf]  ;;  %270 = vst [vmem:[%s12594_s27 + $0xa8] sm:$0xf] %v269_v42 }
  0x3b   : > { %v273_v44 = vld [vmem:[%s12589_s26 + $0x580] sm:$0xf]  ;;  %272 = vst [vmem:[%s12594_s27 + $0xac] sm:$0xf] %v271_v43 }
  0x3c   : > { %v275_v45 = vld [vmem:[%s12589_s26 + $0x5a0] sm:$0xf]  ;;  %274 = vst [vmem:[%s12594_s27 + $0xb0] sm:$0xf] %v273_v44 }
  0x3d   : > { %v277_v46 = vld [vmem:[%s12589_s26 + $0x5c0] sm:$0xf]  ;;  %276 = vst [vmem:[%s12594_s27 + $0xb4] sm:$0xf] %v275_v45 }
  0x3e   : > { %v279_v47 = vld [vmem:[%s12589_s26 + $0x5e0] sm:$0xf]  ;;  %278 = vst [vmem:[%s12594_s27 + $0xb8] sm:$0xf] %v277_v46 }
  0x3f   : > { %v281_v48 = vld [vmem:[%s12589_s26 + $0x600] sm:$0xf]  ;;  %280 = vst [vmem:[%s12594_s27 + $0xbc] sm:$0xf] %v279_v47 }
  0x40   : > { %v283_v49 = vld [vmem:[%s12589_s26 + $0x620] sm:$0xf]  ;;  %282 = vst [vmem:[%s12594_s27 + $0xc0] sm:$0xf] %v281_v48 }
  0x41   : > { %v285_v50 = vld [vmem:[%s12589_s26 + $0x640] sm:$0xf]  ;;  %284 = vst [vmem:[%s12594_s27 + $0xc4] sm:$0xf] %v283_v49 }
  0x42   : > { %v287_v51 = vld [vmem:[%s12589_s26 + $0x660] sm:$0xf]  ;;  %286 = vst [vmem:[%s12594_s27 + $0xc8] sm:$0xf] %v285_v50 }
  0x43   : > { %v289_v52 = vld [vmem:[%s12589_s26 + $0x680] sm:$0xf]  ;;  %288 = vst [vmem:[%s12594_s27 + $0xcc] sm:$0xf] %v287_v51 }
  0x44   : > { %v291_v53 = vld [vmem:[%s12589_s26 + $0x6a0] sm:$0xf]  ;;  %290 = vst [vmem:[%s12594_s27 + $0xd0] sm:$0xf] %v289_v52 }
  0x45   : > { %v293_v54 = vld [vmem:[%s12589_s26 + $0x6c0] sm:$0xf]  ;;  %292 = vst [vmem:[%s12594_s27 + $0xd4] sm:$0xf] %v291_v53 }
  0x46   : > { %v295_v55 = vld [vmem:[%s12589_s26 + $0x6e0] sm:$0xf]  ;;  %294 = vst [vmem:[%s12594_s27 + $0xd8] sm:$0xf] %v293_v54 }
  0x47   : > { %v297_v56 = vld [vmem:[%s12589_s26 + $0x700] sm:$0xf]  ;;  %296 = vst [vmem:[%s12594_s27 + $0xdc] sm:$0xf] %v295_v55 }
  0x48   : > { %v299_v57 = vld [vmem:[%s12589_s26 + $0x720] sm:$0xf]  ;;  %298 = vst [vmem:[%s12594_s27 + $0xe0] sm:$0xf] %v297_v56 }
  0x49   : > { %v301_v58 = vld [vmem:[%s12589_s26 + $0x740] sm:$0xf]  ;;  %300 = vst [vmem:[%s12594_s27 + $0xe4] sm:$0xf] %v299_v57 }
  0x4a   : > { %v303_v59 = vld [vmem:[%s12589_s26 + $0x760] sm:$0xf]  ;;  %302 = vst [vmem:[%s12594_s27 + $0xe8] sm:$0xf] %v301_v58 }
  0x4b   : > { %v305_v60 = vld [vmem:[%s12589_s26 + $0x780] sm:$0xf]  ;;  %304 = vst [vmem:[%s12594_s27 + $0xec] sm:$0xf] %v303_v59 }
  0x4c   : > { %v307_v61 = vld [vmem:[%s12589_s26 + $0x7a0] sm:$0xf]  ;;  %306 = vst [vmem:[%s12594_s27 + $0xf0] sm:$0xf] %v305_v60 }
  0x4d   : > { %v309_v62 = vld [vmem:[%s12589_s26 + $0x7c0] sm:$0xf]  ;;  %308 = vst [vmem:[%s12594_s27 + $0xf4] sm:$0xf] %v307_v61 }
  0x4e   : > { %v311_v63 = vld [vmem:[%s12589_s26 + $0x7e0] sm:$0xf]  ;;  %310 = vst [vmem:[%s12594_s27 + $0xf8] sm:$0xf] %v309_v62 }
  0x4f   : > { %v313_v0 = vld [vmem:[%s12589_s26 + $0x800] sm:$0xf]  ;;  %312 = vst [vmem:[%s12594_s27 + $0xfc] sm:$0xf] %v311_v63 }
  0x50   : > { %v315_v1 = vld [vmem:[%s12589_s26 + $0x820] sm:$0xf]  ;;  %314 = vst [vmem:[%s12594_s27 + $0x100] sm:$0xf] %v313_v0 }
  0x51   : > { %v317_v2 = vld [vmem:[%s12589_s26 + $0x840] sm:$0xf]  ;;  %316 = vst [vmem:[%s12594_s27 + $0x104] sm:$0xf] %v315_v1 }
  0x52   : > { %v319_v3 = vld [vmem:[%s12589_s26 + $0x860] sm:$0xf]  ;;  %318 = vst [vmem:[%s12594_s27 + $0x108] sm:$0xf] %v317_v2 }
  0x53   : > { %v321_v4 = vld [vmem:[%s12589_s26 + $0x880] sm:$0xf]  ;;  %320 = vst [vmem:[%s12594_s27 + $0x10c] sm:$0xf] %v319_v3 }
  0x54   : > { %v323_v5 = vld [vmem:[%s12589_s26 + $0x8a0] sm:$0xf]  ;;  %322 = vst [vmem:[%s12594_s27 + $0x110] sm:$0xf] %v321_v4 }
  0x55   : > { %v325_v6 = vld [vmem:[%s12589_s26 + $0x8c0] sm:$0xf]  ;;  %324 = vst [vmem:[%s12594_s27 + $0x114] sm:$0xf] %v323_v5 }
  0x56   : > { %v327_v7 = vld [vmem:[%s12589_s26 + $0x8e0] sm:$0xf]  ;;  %326 = vst [vmem:[%s12594_s27 + $0x118] sm:$0xf] %v325_v6 }
  0x57   : > { %v329_v8 = vld [vmem:[%s12589_s26 + $0x900] sm:$0xf]  ;;  %328 = vst [vmem:[%s12594_s27 + $0x11c] sm:$0xf] %v327_v7 }
  0x58   : > { %v331_v9 = vld [vmem:[%s12589_s26 + $0x920] sm:$0xf]  ;;  %330 = vst [vmem:[%s12594_s27 + $0x120] sm:$0xf] %v329_v8 }
  0x59   : > { %v333_v10 = vld [vmem:[%s12589_s26 + $0x940] sm:$0xf]  ;;  %332 = vst [vmem:[%s12594_s27 + $0x124] sm:$0xf] %v331_v9 }
  0x5a   : > { %v335_v11 = vld [vmem:[%s12589_s26 + $0x960] sm:$0xf]  ;;  %334 = vst [vmem:[%s12594_s27 + $0x128] sm:$0xf] %v333_v10 }
  0x5b   : > { %v337_v12 = vld [vmem:[%s12589_s26 + $0x980] sm:$0xf]  ;;  %336 = vst [vmem:[%s12594_s27 + $0x12c] sm:$0xf] %v335_v11 }
  0x5c   : > { %v339_v13 = vld [vmem:[%s12589_s26 + $0x9a0] sm:$0xf]  ;;  %338 = vst [vmem:[%s12594_s27 + $0x130] sm:$0xf] %v337_v12 }
  0x5d   : > { %v341_v14 = vld [vmem:[%s12589_s26 + $0x9c0] sm:$0xf]  ;;  %340 = vst [vmem:[%s12594_s27 + $0x134] sm:$0xf] %v339_v13 }
  0x5e   : > { %v343_v15 = vld [vmem:[%s12589_s26 + $0x9e0] sm:$0xf]  ;;  %342 = vst [vmem:[%s12594_s27 + $0x138] sm:$0xf] %v341_v14 }
  0x5f   : > { %v345_v16 = vld [vmem:[%s12589_s26 + $0xa00] sm:$0xf]  ;;  %344 = vst [vmem:[%s12594_s27 + $0x13c] sm:$0xf] %v343_v15 }
  0x60   : > { %v347_v17 = vld [vmem:[%s12589_s26 + $0xa20] sm:$0xf]  ;;  %346 = vst [vmem:[%s12594_s27 + $0x140] sm:$0xf] %v345_v16 }
  0x61   : > { %v349_v18 = vld [vmem:[%s12589_s26 + $0xa40] sm:$0xf]  ;;  %348 = vst [vmem:[%s12594_s27 + $0x144] sm:$0xf] %v347_v17 }
  0x62   : > { %v351_v19 = vld [vmem:[%s12589_s26 + $0xa60] sm:$0xf]  ;;  %350 = vst [vmem:[%s12594_s27 + $0x148] sm:$0xf] %v349_v18 }
  0x63   : > { %v353_v20 = vld [vmem:[%s12589_s26 + $0xa80] sm:$0xf]  ;;  %352 = vst [vmem:[%s12594_s27 + $0x14c] sm:$0xf] %v351_v19 }
  0x64   : > { %v355_v21 = vld [vmem:[%s12589_s26 + $0xaa0] sm:$0xf]  ;;  %354 = vst [vmem:[%s12594_s27 + $0x150] sm:$0xf] %v353_v20 }
  0x65   : > { %v357_v22 = vld [vmem:[%s12589_s26 + $0xac0] sm:$0xf]  ;;  %356 = vst [vmem:[%s12594_s27 + $0x154] sm:$0xf] %v355_v21 }
  0x66   : > { %v359_v23 = vld [vmem:[%s12589_s26 + $0xae0] sm:$0xf]  ;;  %358 = vst [vmem:[%s12594_s27 + $0x158] sm:$0xf] %v357_v22 }
  0x67   : > { %v361_v24 = vld [vmem:[%s12589_s26 + $0xb00] sm:$0xf]  ;;  %360 = vst [vmem:[%s12594_s27 + $0x15c] sm:$0xf] %v359_v23 }
  0x68   : > { %v363_v25 = vld [vmem:[%s12589_s26 + $0xb20] sm:$0xf]  ;;  %362 = vst [vmem:[%s12594_s27 + $0x160] sm:$0xf] %v361_v24 }
  0x69   : > { %v365_v26 = vld [vmem:[%s12589_s26 + $0xb40] sm:$0xf]  ;;  %364 = vst [vmem:[%s12594_s27 + $0x164] sm:$0xf] %v363_v25 }
  0x6a   : > { %v367_v27 = vld [vmem:[%s12589_s26 + $0xb60] sm:$0xf]  ;;  %366 = vst [vmem:[%s12594_s27 + $0x168] sm:$0xf] %v365_v26 }
  0x6b   : > { %v369_v28 = vld [vmem:[%s12589_s26 + $0xb80] sm:$0xf]  ;;  %368 = vst [vmem:[%s12594_s27 + $0x16c] sm:$0xf] %v367_v27 }
  0x6c   : > { %v371_v29 = vld [vmem:[%s12589_s26 + $0xba0] sm:$0xf]  ;;  %370 = vst [vmem:[%s12594_s27 + $0x170] sm:$0xf] %v369_v28 }
  0x6d   : > { %v373_v30 = vld [vmem:[%s12589_s26 + $0xbc0] sm:$0xf]  ;;  %372 = vst [vmem:[%s12594_s27 + $0x174] sm:$0xf] %v371_v29 }
  0x6e   : > { %v375_v31 = vld [vmem:[%s12589_s26 + $0xbe0] sm:$0xf]  ;;  %374 = vst [vmem:[%s12594_s27 + $0x178] sm:$0xf] %v373_v30 }
  0x6f   : > { %v377_v32 = vld [vmem:[%s12589_s26 + $0xc00] sm:$0xf]  ;;  %376 = vst [vmem:[%s12594_s27 + $0x17c] sm:$0xf] %v375_v31 }
  0x70   : > { %v379_v33 = vld [vmem:[%s12589_s26 + $0xc20] sm:$0xf]  ;;  %378 = vst [vmem:[%s12594_s27 + $0x180] sm:$0xf] %v377_v32 }
  0x71   : > { %v381_v34 = vld [vmem:[%s12589_s26 + $0xc40] sm:$0xf]  ;;  %380 = vst [vmem:[%s12594_s27 + $0x184] sm:$0xf] %v379_v33 }
  0x72   : > { %v383_v35 = vld [vmem:[%s12589_s26 + $0xc60] sm:$0xf]  ;;  %382 = vst [vmem:[%s12594_s27 + $0x188] sm:$0xf] %v381_v34 }
  0x73   : > { %v385_v36 = vld [vmem:[%s12589_s26 + $0xc80] sm:$0xf]  ;;  %384 = vst [vmem:[%s12594_s27 + $0x18c] sm:$0xf] %v383_v35 }
  0x74   : > { %v387_v37 = vld [vmem:[%s12589_s26 + $0xca0] sm:$0xf]  ;;  %386 = vst [vmem:[%s12594_s27 + $0x190] sm:$0xf] %v385_v36 }
  0x75   : > { %v389_v38 = vld [vmem:[%s12589_s26 + $0xcc0] sm:$0xf]  ;;  %388 = vst [vmem:[%s12594_s27 + $0x194] sm:$0xf] %v387_v37 }
  0x76   : > { %v391_v39 = vld [vmem:[%s12589_s26 + $0xce0] sm:$0xf]  ;;  %390 = vst [vmem:[%s12594_s27 + $0x198] sm:$0xf] %v389_v38 }
  0x77   : > { %v393_v40 = vld [vmem:[%s12589_s26 + $0xd00] sm:$0xf]  ;;  %392 = vst [vmem:[%s12594_s27 + $0x19c] sm:$0xf] %v391_v39 }
  0x78   : > { %v395_v41 = vld [vmem:[%s12589_s26 + $0xd20] sm:$0xf]  ;;  %394 = vst [vmem:[%s12594_s27 + $0x1a0] sm:$0xf] %v393_v40 }
  0x79   : > { %v397_v42 = vld [vmem:[%s12589_s26 + $0xd40] sm:$0xf]  ;;  %396 = vst [vmem:[%s12594_s27 + $0x1a4] sm:$0xf] %v395_v41 }
  0x7a   : > { %v399_v43 = vld [vmem:[%s12589_s26 + $0xd60] sm:$0xf]  ;;  %398 = vst [vmem:[%s12594_s27 + $0x1a8] sm:$0xf] %v397_v42 }
  0x7b   : > { %v401_v44 = vld [vmem:[%s12589_s26 + $0xd80] sm:$0xf]  ;;  %400 = vst [vmem:[%s12594_s27 + $0x1ac] sm:$0xf] %v399_v43 }
  0x7c   : > { %v403_v45 = vld [vmem:[%s12589_s26 + $0xda0] sm:$0xf]  ;;  %402 = vst [vmem:[%s12594_s27 + $0x1b0] sm:$0xf] %v401_v44 }
  0x7d   : > { %v405_v46 = vld [vmem:[%s12589_s26 + $0xdc0] sm:$0xf]  ;;  %404 = vst [vmem:[%s12594_s27 + $0x1b4] sm:$0xf] %v403_v45 }
  0x7e   : > { %v407_v47 = vld [vmem:[%s12589_s26 + $0xde0] sm:$0xf]  ;;  %406 = vst [vmem:[%s12594_s27 + $0x1b8] sm:$0xf] %v405_v46 }
  0x7f   : > { %v409_v48 = vld [vmem:[%s12589_s26 + $0xe00] sm:$0xf]  ;;  %408 = vst [vmem:[%s12594_s27 + $0x1bc] sm:$0xf] %v407_v47 }
  0x80   : > { %v411_v49 = vld [vmem:[%s12589_s26 + $0xe20] sm:$0xf]  ;;  %410 = vst [vmem:[%s12594_s27 + $0x1c0] sm:$0xf] %v409_v48 }
  0x81   : > { %v413_v50 = vld [vmem:[%s12589_s26 + $0xe40] sm:$0xf]  ;;  %412 = vst [vmem:[%s12594_s27 + $0x1c4] sm:$0xf] %v411_v49 }
  0x82   : > { %v415_v51 = vld [vmem:[%s12589_s26 + $0xe60] sm:$0xf]  ;;  %414 = vst [vmem:[%s12594_s27 + $0x1c8] sm:$0xf] %v413_v50 }
  0x83   : > { %v417_v52 = vld [vmem:[%s12589_s26 + $0xe80] sm:$0xf]  ;;  %416 = vst [vmem:[%s12594_s27 + $0x1cc] sm:$0xf] %v415_v51 }
  0x84   : > { %v419_v53 = vld [vmem:[%s12589_s26 + $0xea0] sm:$0xf]  ;;  %418 = vst [vmem:[%s12594_s27 + $0x1d0] sm:$0xf] %v417_v52 }
  0x85   : > { %v421_v54 = vld [vmem:[%s12589_s26 + $0xec0] sm:$0xf]  ;;  %420 = vst [vmem:[%s12594_s27 + $0x1d4] sm:$0xf] %v419_v53 }
  0x86   : > { %v423_v55 = vld [vmem:[%s12589_s26 + $0xee0] sm:$0xf]  ;;  %422 = vst [vmem:[%s12594_s27 + $0x1d8] sm:$0xf] %v421_v54 }
  0x87   : > { %v425_v56 = vld [vmem:[%s12589_s26 + $0xf00] sm:$0xf]  ;;  %424 = vst [vmem:[%s12594_s27 + $0x1dc] sm:$0xf] %v423_v55 }
  0x88   : > { %v427_v57 = vld [vmem:[%s12589_s26 + $0xf20] sm:$0xf]  ;;  %426 = vst [vmem:[%s12594_s27 + $0x1e0] sm:$0xf] %v425_v56 }
  0x89   : > { %v429_v58 = vld [vmem:[%s12589_s26 + $0xf40] sm:$0xf]  ;;  %428 = vst [vmem:[%s12594_s27 + $0x1e4] sm:$0xf] %v427_v57 }
  0x8a   : > { %v431_v59 = vld [vmem:[%s12589_s26 + $0xf60] sm:$0xf]  ;;  %430 = vst [vmem:[%s12594_s27 + $0x1e8] sm:$0xf] %v429_v58 }
  0x8b   : > { %v433_v60 = vld [vmem:[%s12589_s26 + $0xf80] sm:$0xf]  ;;  %432 = vst [vmem:[%s12594_s27 + $0x1ec] sm:$0xf] %v431_v59 }
  0x8c   : > { %v435_v61 = vld [vmem:[%s12589_s26 + $0xfa0] sm:$0xf]  ;;  %434 = vst [vmem:[%s12594_s27 + $0x1f0] sm:$0xf] %v433_v60 }
  0x8d   : > { %v437_v62 = vld [vmem:[%s12589_s26 + $0xfc0] sm:$0xf]  ;;  %436 = vst [vmem:[%s12594_s27 + $0x1f4] sm:$0xf] %v435_v61 }
  0x8e   : > { %v439_v63 = vld [vmem:[%s12589_s26 + $0xfe0] sm:$0xf]  ;;  %438 = vst [vmem:[%s12594_s27 + $0x1f8] sm:$0xf] %v437_v62 }
  0x8f   : > { %v441_v0 = vld [vmem:[%s12589_s26 + $0x1000] sm:$0xf]  ;;  %440 = vst [vmem:[%s12594_s27 + $0x1fc] sm:$0xf] %v439_v63 }
  0x90   : > { %v443_v1 = vld [vmem:[%s12589_s26 + $0x1020] sm:$0xf]  ;;  %442 = vst [vmem:[%s12594_s27 + $0x200] sm:$0xf] %v441_v0 }
  0x91   : > { %v445_v2 = vld [vmem:[%s12589_s26 + $0x1040] sm:$0xf]  ;;  %444 = vst [vmem:[%s12594_s27 + $0x204] sm:$0xf] %v443_v1 }
  0x92   : > { %v447_v3 = vld [vmem:[%s12589_s26 + $0x1060] sm:$0xf]  ;;  %446 = vst [vmem:[%s12594_s27 + $0x208] sm:$0xf] %v445_v2 }
  0x93   : > { %v449_v4 = vld [vmem:[%s12589_s26 + $0x1080] sm:$0xf]  ;;  %448 = vst [vmem:[%s12594_s27 + $0x20c] sm:$0xf] %v447_v3 }
  0x94   : > { %v451_v5 = vld [vmem:[%s12589_s26 + $0x10a0] sm:$0xf]  ;;  %450 = vst [vmem:[%s12594_s27 + $0x210] sm:$0xf] %v449_v4 }
  0x95   : > { %v453_v6 = vld [vmem:[%s12589_s26 + $0x10c0] sm:$0xf]  ;;  %452 = vst [vmem:[%s12594_s27 + $0x214] sm:$0xf] %v451_v5 }
  0x96   : > { %v455_v7 = vld [vmem:[%s12589_s26 + $0x10e0] sm:$0xf]  ;;  %454 = vst [vmem:[%s12594_s27 + $0x218] sm:$0xf] %v453_v6 }
  0x97   : > { %v457_v8 = vld [vmem:[%s12589_s26 + $0x1100] sm:$0xf]  ;;  %456 = vst [vmem:[%s12594_s27 + $0x21c] sm:$0xf] %v455_v7 }
  0x98   : > { %v459_v9 = vld [vmem:[%s12589_s26 + $0x1120] sm:$0xf]  ;;  %458 = vst [vmem:[%s12594_s27 + $0x220] sm:$0xf] %v457_v8 }
  0x99   : > { %v461_v10 = vld [vmem:[%s12589_s26 + $0x1140] sm:$0xf]  ;;  %460 = vst [vmem:[%s12594_s27 + $0x224] sm:$0xf] %v459_v9 }
  0x9a   : > { %v463_v11 = vld [vmem:[%s12589_s26 + $0x1160] sm:$0xf]  ;;  %462 = vst [vmem:[%s12594_s27 + $0x228] sm:$0xf] %v461_v10 }
  0x9b   : > { %v465_v12 = vld [vmem:[%s12589_s26 + $0x1180] sm:$0xf]  ;;  %464 = vst [vmem:[%s12594_s27 + $0x22c] sm:$0xf] %v463_v11 }
  0x9c   : > { %v467_v13 = vld [vmem:[%s12589_s26 + $0x11a0] sm:$0xf]  ;;  %466 = vst [vmem:[%s12594_s27 + $0x230] sm:$0xf] %v465_v12 }
  0x9d   : > { %v469_v14 = vld [vmem:[%s12589_s26 + $0x11c0] sm:$0xf]  ;;  %468 = vst [vmem:[%s12594_s27 + $0x234] sm:$0xf] %v467_v13 }
  0x9e   : > { %v471_v15 = vld [vmem:[%s12589_s26 + $0x11e0] sm:$0xf]  ;;  %470 = vst [vmem:[%s12594_s27 + $0x238] sm:$0xf] %v469_v14 }
  0x9f   : > { %v473_v16 = vld [vmem:[%s12589_s26 + $0x1200] sm:$0xf]  ;;  %472 = vst [vmem:[%s12594_s27 + $0x23c] sm:$0xf] %v471_v15 }
  0xa0   : > { %v475_v17 = vld [vmem:[%s12589_s26 + $0x1220] sm:$0xf]  ;;  %474 = vst [vmem:[%s12594_s27 + $0x240] sm:$0xf] %v473_v16 }
  0xa1   : > { %v477_v18 = vld [vmem:[%s12589_s26 + $0x1240] sm:$0xf]  ;;  %476 = vst [vmem:[%s12594_s27 + $0x244] sm:$0xf] %v475_v17 }
  0xa2   : > { %v479_v19 = vld [vmem:[%s12589_s26 + $0x1260] sm:$0xf]  ;;  %478 = vst [vmem:[%s12594_s27 + $0x248] sm:$0xf] %v477_v18 }
  0xa3   : > { %v481_v20 = vld [vmem:[%s12589_s26 + $0x1280] sm:$0xf]  ;;  %480 = vst [vmem:[%s12594_s27 + $0x24c] sm:$0xf] %v479_v19 }
  0xa4   : > { %v483_v21 = vld [vmem:[%s12589_s26 + $0x12a0] sm:$0xf]  ;;  %482 = vst [vmem:[%s12594_s27 + $0x250] sm:$0xf] %v481_v20 }
  0xa5   : > { %v485_v22 = vld [vmem:[%s12589_s26 + $0x12c0] sm:$0xf]  ;;  %484 = vst [vmem:[%s12594_s27 + $0x254] sm:$0xf] %v483_v21 }
  0xa6   : > { %v487_v23 = vld [vmem:[%s12589_s26 + $0x12e0] sm:$0xf]  ;;  %486 = vst [vmem:[%s12594_s27 + $0x258] sm:$0xf] %v485_v22 }
  0xa7   : > { %v489_v24 = vld [vmem:[%s12589_s26 + $0x1300] sm:$0xf]  ;;  %488 = vst [vmem:[%s12594_s27 + $0x25c] sm:$0xf] %v487_v23 }
  0xa8   : > { %v491_v25 = vld [vmem:[%s12589_s26 + $0x1320] sm:$0xf]  ;;  %490 = vst [vmem:[%s12594_s27 + $0x260] sm:$0xf] %v489_v24 }
  0xa9   : > { %v493_v26 = vld [vmem:[%s12589_s26 + $0x1340] sm:$0xf]  ;;  %492 = vst [vmem:[%s12594_s27 + $0x264] sm:$0xf] %v491_v25 }
  0xaa   : > { %v495_v27 = vld [vmem:[%s12589_s26 + $0x1360] sm:$0xf]  ;;  %494 = vst [vmem:[%s12594_s27 + $0x268] sm:$0xf] %v493_v26 }
  0xab   : > { %v497_v28 = vld [vmem:[%s12589_s26 + $0x1380] sm:$0xf]  ;;  %496 = vst [vmem:[%s12594_s27 + $0x26c] sm:$0xf] %v495_v27 }
  0xac   : > { %v499_v29 = vld [vmem:[%s12589_s26 + $0x13a0] sm:$0xf]  ;;  %498 = vst [vmem:[%s12594_s27 + $0x270] sm:$0xf] %v497_v28 }
  0xad   : > { %v501_v30 = vld [vmem:[%s12589_s26 + $0x13c0] sm:$0xf]  ;;  %500 = vst [vmem:[%s12594_s27 + $0x274] sm:$0xf] %v499_v29 }
  0xae   : > { %v503_v31 = vld [vmem:[%s12589_s26 + $0x13e0] sm:$0xf]  ;;  %502 = vst [vmem:[%s12594_s27 + $0x278] sm:$0xf] %v501_v30 }
  0xaf   : > { %v505_v32 = vld [vmem:[%s12589_s26 + $0x1400] sm:$0xf]  ;;  %504 = vst [vmem:[%s12594_s27 + $0x27c] sm:$0xf] %v503_v31 }
  0xb0   : > { %v507_v33 = vld [vmem:[%s12589_s26 + $0x1420] sm:$0xf]  ;;  %506 = vst [vmem:[%s12594_s27 + $0x280] sm:$0xf] %v505_v32 }
  0xb1   : > { %v509_v34 = vld [vmem:[%s12589_s26 + $0x1440] sm:$0xf]  ;;  %508 = vst [vmem:[%s12594_s27 + $0x284] sm:$0xf] %v507_v33 }
  0xb2   : > { %v511_v35 = vld [vmem:[%s12589_s26 + $0x1460] sm:$0xf]  ;;  %510 = vst [vmem:[%s12594_s27 + $0x288] sm:$0xf] %v509_v34 }
  0xb3   : > { %v513_v36 = vld [vmem:[%s12589_s26 + $0x1480] sm:$0xf]  ;;  %512 = vst [vmem:[%s12594_s27 + $0x28c] sm:$0xf] %v511_v35 }
  0xb4   : > { %v515_v37 = vld [vmem:[%s12589_s26 + $0x14a0] sm:$0xf]  ;;  %514 = vst [vmem:[%s12594_s27 + $0x290] sm:$0xf] %v513_v36 }
  0xb5   : > { %v517_v38 = vld [vmem:[%s12589_s26 + $0x14c0] sm:$0xf]  ;;  %516 = vst [vmem:[%s12594_s27 + $0x294] sm:$0xf] %v515_v37 }
  0xb6   : > { %v519_v39 = vld [vmem:[%s12589_s26 + $0x14e0] sm:$0xf]  ;;  %518 = vst [vmem:[%s12594_s27 + $0x298] sm:$0xf] %v517_v38 }
  0xb7   : > { %v521_v40 = vld [vmem:[%s12589_s26 + $0x1500] sm:$0xf]  ;;  %520 = vst [vmem:[%s12594_s27 + $0x29c] sm:$0xf] %v519_v39 }
  0xb8   : > { %v523_v41 = vld [vmem:[%s12589_s26 + $0x1520] sm:$0xf]  ;;  %522 = vst [vmem:[%s12594_s27 + $0x2a0] sm:$0xf] %v521_v40 }
  0xb9   : > { %v525_v42 = vld [vmem:[%s12589_s26 + $0x1540] sm:$0xf]  ;;  %524 = vst [vmem:[%s12594_s27 + $0x2a4] sm:$0xf] %v523_v41 }
  0xba   : > { %v527_v43 = vld [vmem:[%s12589_s26 + $0x1560] sm:$0xf]  ;;  %526 = vst [vmem:[%s12594_s27 + $0x2a8] sm:$0xf] %v525_v42 }
  0xbb   : > { %v529_v44 = vld [vmem:[%s12589_s26 + $0x1580] sm:$0xf]  ;;  %528 = vst [vmem:[%s12594_s27 + $0x2ac] sm:$0xf] %v527_v43 }
  0xbc   : > { %v531_v45 = vld [vmem:[%s12589_s26 + $0x15a0] sm:$0xf]  ;;  %530 = vst [vmem:[%s12594_s27 + $0x2b0] sm:$0xf] %v529_v44 }
  0xbd   : > { %v533_v46 = vld [vmem:[%s12589_s26 + $0x15c0] sm:$0xf]  ;;  %532 = vst [vmem:[%s12594_s27 + $0x2b4] sm:$0xf] %v531_v45 }
  0xbe   : > { %v535_v47 = vld [vmem:[%s12589_s26 + $0x15e0] sm:$0xf]  ;;  %534 = vst [vmem:[%s12594_s27 + $0x2b8] sm:$0xf] %v533_v46 }
  0xbf   : > { %v537_v48 = vld [vmem:[%s12589_s26 + $0x1600] sm:$0xf]  ;;  %536 = vst [vmem:[%s12594_s27 + $0x2bc] sm:$0xf] %v535_v47 }
  0xc0   : > { %v539_v49 = vld [vmem:[%s12589_s26 + $0x1620] sm:$0xf]  ;;  %538 = vst [vmem:[%s12594_s27 + $0x2c0] sm:$0xf] %v537_v48 }
  0xc1   : > { %v541_v50 = vld [vmem:[%s12589_s26 + $0x1640] sm:$0xf]  ;;  %540 = vst [vmem:[%s12594_s27 + $0x2c4] sm:$0xf] %v539_v49 }
  0xc2   : > { %v543_v51 = vld [vmem:[%s12589_s26 + $0x1660] sm:$0xf]  ;;  %542 = vst [vmem:[%s12594_s27 + $0x2c8] sm:$0xf] %v541_v50 }
  0xc3   : > { %v545_v52 = vld [vmem:[%s12589_s26 + $0x1680] sm:$0xf]  ;;  %544 = vst [vmem:[%s12594_s27 + $0x2cc] sm:$0xf] %v543_v51 }
  0xc4   : > { %v547_v53 = vld [vmem:[%s12589_s26 + $0x16a0] sm:$0xf]  ;;  %546 = vst [vmem:[%s12594_s27 + $0x2d0] sm:$0xf] %v545_v52 }
  0xc5   : > { %v549_v54 = vld [vmem:[%s12589_s26 + $0x16c0] sm:$0xf]  ;;  %548 = vst [vmem:[%s12594_s27 + $0x2d4] sm:$0xf] %v547_v53 }
  0xc6   : > { %v551_v55 = vld [vmem:[%s12589_s26 + $0x16e0] sm:$0xf]  ;;  %550 = vst [vmem:[%s12594_s27 + $0x2d8] sm:$0xf] %v549_v54 }
  0xc7   : > { %v553_v56 = vld [vmem:[%s12589_s26 + $0x1700] sm:$0xf]  ;;  %552 = vst [vmem:[%s12594_s27 + $0x2dc] sm:$0xf] %v551_v55 }
  0xc8   : > { %v555_v57 = vld [vmem:[%s12589_s26 + $0x1720] sm:$0xf]  ;;  %554 = vst [vmem:[%s12594_s27 + $0x2e0] sm:$0xf] %v553_v56 }
  0xc9   : > { %v557_v58 = vld [vmem:[%s12589_s26 + $0x1740] sm:$0xf]  ;;  %556 = vst [vmem:[%s12594_s27 + $0x2e4] sm:$0xf] %v555_v57 }
  0xca   : > { %v559_v59 = vld [vmem:[%s12589_s26 + $0x1760] sm:$0xf]  ;;  %558 = vst [vmem:[%s12594_s27 + $0x2e8] sm:$0xf] %v557_v58 }
  0xcb   : > { %v561_v60 = vld [vmem:[%s12589_s26 + $0x1780] sm:$0xf]  ;;  %560 = vst [vmem:[%s12594_s27 + $0x2ec] sm:$0xf] %v559_v59 }
  0xcc   : > { %v563_v61 = vld [vmem:[%s12589_s26 + $0x17a0] sm:$0xf]  ;;  %562 = vst [vmem:[%s12594_s27 + $0x2f0] sm:$0xf] %v561_v60 }
  0xcd   : > { %v565_v62 = vld [vmem:[%s12589_s26 + $0x17c0] sm:$0xf]  ;;  %564 = vst [vmem:[%s12594_s27 + $0x2f4] sm:$0xf] %v563_v61 }
  0xce   : > { %v567_v63 = vld [vmem:[%s12589_s26 + $0x17e0] sm:$0xf]  ;;  %566 = vst [vmem:[%s12594_s27 + $0x2f8] sm:$0xf] %v565_v62 }
  0xcf   : > { %v569_v0 = vld [vmem:[%s12589_s26 + $0x1800] sm:$0xf]  ;;  %568 = vst [vmem:[%s12594_s27 + $0x2fc] sm:$0xf] %v567_v63 }
  0xd0   : > { %v571_v1 = vld [vmem:[%s12589_s26 + $0x1820] sm:$0xf]  ;;  %570 = vst [vmem:[%s12594_s27 + $0x300] sm:$0xf] %v569_v0 }
  0xd1   : > { %v573_v2 = vld [vmem:[%s12589_s26 + $0x1840] sm:$0xf]  ;;  %572 = vst [vmem:[%s12594_s27 + $0x304] sm:$0xf] %v571_v1 }
  0xd2   : > { %v575_v3 = vld [vmem:[%s12589_s26 + $0x1860] sm:$0xf]  ;;  %574 = vst [vmem:[%s12594_s27 + $0x308] sm:$0xf] %v573_v2 }
  0xd3   : > { %v577_v4 = vld [vmem:[%s12589_s26 + $0x1880] sm:$0xf]  ;;  %576 = vst [vmem:[%s12594_s27 + $0x30c] sm:$0xf] %v575_v3 }
  0xd4   : > { %v579_v5 = vld [vmem:[%s12589_s26 + $0x18a0] sm:$0xf]  ;;  %578 = vst [vmem:[%s12594_s27 + $0x310] sm:$0xf] %v577_v4 }
  0xd5   : > { %v581_v6 = vld [vmem:[%s12589_s26 + $0x18c0] sm:$0xf]  ;;  %580 = vst [vmem:[%s12594_s27 + $0x314] sm:$0xf] %v579_v5 }
  0xd6   : > { %v583_v7 = vld [vmem:[%s12589_s26 + $0x18e0] sm:$0xf]  ;;  %582 = vst [vmem:[%s12594_s27 + $0x318] sm:$0xf] %v581_v6 }
  0xd7   : > { %v585_v8 = vld [vmem:[%s12589_s26 + $0x1900] sm:$0xf]  ;;  %584 = vst [vmem:[%s12594_s27 + $0x31c] sm:$0xf] %v583_v7 }
  0xd8   : > { %v587_v9 = vld [vmem:[%s12589_s26 + $0x1920] sm:$0xf]  ;;  %586 = vst [vmem:[%s12594_s27 + $0x320] sm:$0xf] %v585_v8 }
  0xd9   : > { %v589_v10 = vld [vmem:[%s12589_s26 + $0x1940] sm:$0xf]  ;;  %588 = vst [vmem:[%s12594_s27 + $0x324] sm:$0xf] %v587_v9 }
  0xda   : > { %v591_v11 = vld [vmem:[%s12589_s26 + $0x1960] sm:$0xf]  ;;  %590 = vst [vmem:[%s12594_s27 + $0x328] sm:$0xf] %v589_v10 }
  0xdb   : > { %v593_v12 = vld [vmem:[%s12589_s26 + $0x1980] sm:$0xf]  ;;  %592 = vst [vmem:[%s12594_s27 + $0x32c] sm:$0xf] %v591_v11 }
  0xdc   : > { %v595_v13 = vld [vmem:[%s12589_s26 + $0x19a0] sm:$0xf]  ;;  %594 = vst [vmem:[%s12594_s27 + $0x330] sm:$0xf] %v593_v12 }
  0xdd   : > { %v597_v14 = vld [vmem:[%s12589_s26 + $0x19c0] sm:$0xf]  ;;  %596 = vst [vmem:[%s12594_s27 + $0x334] sm:$0xf] %v595_v13 }
  0xde   : > { %v599_v15 = vld [vmem:[%s12589_s26 + $0x19e0] sm:$0xf]  ;;  %598 = vst [vmem:[%s12594_s27 + $0x338] sm:$0xf] %v597_v14 }
  0xdf   : > { %v601_v16 = vld [vmem:[%s12589_s26 + $0x1a00] sm:$0xf]  ;;  %600 = vst [vmem:[%s12594_s27 + $0x33c] sm:$0xf] %v599_v15 }
  0xe0   : > { %v603_v17 = vld [vmem:[%s12589_s26 + $0x1a20] sm:$0xf]  ;;  %602 = vst [vmem:[%s12594_s27 + $0x340] sm:$0xf] %v601_v16 }
  0xe1   : > { %v605_v18 = vld [vmem:[%s12589_s26 + $0x1a40] sm:$0xf]  ;;  %604 = vst [vmem:[%s12594_s27 + $0x344] sm:$0xf] %v603_v17 }
  0xe2   : > { %v607_v19 = vld [vmem:[%s12589_s26 + $0x1a60] sm:$0xf]  ;;  %606 = vst [vmem:[%s12594_s27 + $0x348] sm:$0xf] %v605_v18 }
  0xe3   : > { %v609_v20 = vld [vmem:[%s12589_s26 + $0x1a80] sm:$0xf]  ;;  %608 = vst [vmem:[%s12594_s27 + $0x34c] sm:$0xf] %v607_v19 }
  0xe4   : > { %v611_v21 = vld [vmem:[%s12589_s26 + $0x1aa0] sm:$0xf]  ;;  %610 = vst [vmem:[%s12594_s27 + $0x350] sm:$0xf] %v609_v20 }
  0xe5   : > { %v613_v22 = vld [vmem:[%s12589_s26 + $0x1ac0] sm:$0xf]  ;;  %612 = vst [vmem:[%s12594_s27 + $0x354] sm:$0xf] %v611_v21 }
  0xe6   : > { %v615_v23 = vld [vmem:[%s12589_s26 + $0x1ae0] sm:$0xf]  ;;  %614 = vst [vmem:[%s12594_s27 + $0x358] sm:$0xf] %v613_v22 }
  0xe7   : > { %v617_v24 = vld [vmem:[%s12589_s26 + $0x1b00] sm:$0xf]  ;;  %616 = vst [vmem:[%s12594_s27 + $0x35c] sm:$0xf] %v615_v23 }
  0xe8   : > { %v619_v25 = vld [vmem:[%s12589_s26 + $0x1b20] sm:$0xf]  ;;  %618 = vst [vmem:[%s12594_s27 + $0x360] sm:$0xf] %v617_v24 }
  0xe9   : > { %v621_v26 = vld [vmem:[%s12589_s26 + $0x1b40] sm:$0xf]  ;;  %620 = vst [vmem:[%s12594_s27 + $0x364] sm:$0xf] %v619_v25 }
  0xea   : > { %v623_v27 = vld [vmem:[%s12589_s26 + $0x1b60] sm:$0xf]  ;;  %622 = vst [vmem:[%s12594_s27 + $0x368] sm:$0xf] %v621_v26 }
  0xeb   : > { %v625_v28 = vld [vmem:[%s12589_s26 + $0x1b80] sm:$0xf]  ;;  %624 = vst [vmem:[%s12594_s27 + $0x36c] sm:$0xf] %v623_v27 }
  0xec   : > { %v627_v29 = vld [vmem:[%s12589_s26 + $0x1ba0] sm:$0xf]  ;;  %626 = vst [vmem:[%s12594_s27 + $0x370] sm:$0xf] %v625_v28 }
  0xed   : > { %v629_v30 = vld [vmem:[%s12589_s26 + $0x1bc0] sm:$0xf]  ;;  %628 = vst [vmem:[%s12594_s27 + $0x374] sm:$0xf] %v627_v29 }
  0xee   : > { %v631_v31 = vld [vmem:[%s12589_s26 + $0x1be0] sm:$0xf]  ;;  %630 = vst [vmem:[%s12594_s27 + $0x378] sm:$0xf] %v629_v30 }
  0xef   : > { %v633_v32 = vld [vmem:[%s12589_s26 + $0x1c00] sm:$0xf]  ;;  %632 = vst [vmem:[%s12594_s27 + $0x37c] sm:$0xf] %v631_v31 }
  0xf0   : > { %v635_v33 = vld [vmem:[%s12589_s26 + $0x1c20] sm:$0xf]  ;;  %634 = vst [vmem:[%s12594_s27 + $0x380] sm:$0xf] %v633_v32 }
  0xf1   : > { %v637_v34 = vld [vmem:[%s12589_s26 + $0x1c40] sm:$0xf]  ;;  %636 = vst [vmem:[%s12594_s27 + $0x384] sm:$0xf] %v635_v33 }
  0xf2   : > { %v639_v35 = vld [vmem:[%s12589_s26 + $0x1c60] sm:$0xf]  ;;  %638 = vst [vmem:[%s12594_s27 + $0x388] sm:$0xf] %v637_v34 }
  0xf3   : > { %v641_v36 = vld [vmem:[%s12589_s26 + $0x1c80] sm:$0xf]  ;;  %640 = vst [vmem:[%s12594_s27 + $0x38c] sm:$0xf] %v639_v35 }
  0xf4   : > { %v643_v37 = vld [vmem:[%s12589_s26 + $0x1ca0] sm:$0xf]  ;;  %642 = vst [vmem:[%s12594_s27 + $0x390] sm:$0xf] %v641_v36 }
  0xf5   : > { %v645_v38 = vld [vmem:[%s12589_s26 + $0x1cc0] sm:$0xf]  ;;  %644 = vst [vmem:[%s12594_s27 + $0x394] sm:$0xf] %v643_v37 }
  0xf6   : > { %v647_v39 = vld [vmem:[%s12589_s26 + $0x1ce0] sm:$0xf]  ;;  %646 = vst [vmem:[%s12594_s27 + $0x398] sm:$0xf] %v645_v38 }
  0xf7   : > { %v649_v40 = vld [vmem:[%s12589_s26 + $0x1d00] sm:$0xf]  ;;  %648 = vst [vmem:[%s12594_s27 + $0x39c] sm:$0xf] %v647_v39 }
  0xf8   : > { %v651_v41 = vld [vmem:[%s12589_s26 + $0x1d20] sm:$0xf]  ;;  %650 = vst [vmem:[%s12594_s27 + $0x3a0] sm:$0xf] %v649_v40 }
  0xf9   : > { %v653_v42 = vld [vmem:[%s12589_s26 + $0x1d40] sm:$0xf]  ;;  %652 = vst [vmem:[%s12594_s27 + $0x3a4] sm:$0xf] %v651_v41 }
  0xfa   : > { %v655_v43 = vld [vmem:[%s12589_s26 + $0x1d60] sm:$0xf]  ;;  %654 = vst [vmem:[%s12594_s27 + $0x3a8] sm:$0xf] %v653_v42 }
  0xfb   : > { %v657_v44 = vld [vmem:[%s12589_s26 + $0x1d80] sm:$0xf]  ;;  %656 = vst [vmem:[%s12594_s27 + $0x3ac] sm:$0xf] %v655_v43 }
  0xfc   : > { %v659_v45 = vld [vmem:[%s12589_s26 + $0x1da0] sm:$0xf]  ;;  %658 = vst [vmem:[%s12594_s27 + $0x3b0] sm:$0xf] %v657_v44 }
  0xfd   : > { %v661_v46 = vld [vmem:[%s12589_s26 + $0x1dc0] sm:$0xf]  ;;  %660 = vst [vmem:[%s12594_s27 + $0x3b4] sm:$0xf] %v659_v45 }
  0xfe   : > { %v663_v47 = vld [vmem:[%s12589_s26 + $0x1de0] sm:$0xf]  ;;  %662 = vst [vmem:[%s12594_s27 + $0x3b8] sm:$0xf] %v661_v46 }
  0xff   : > { %v665_v48 = vld [vmem:[%s12589_s26 + $0x1e00] sm:$0xf]  ;;  %664 = vst [vmem:[%s12594_s27 + $0x3bc] sm:$0xf] %v663_v47 }
 0x100   : > { %v667_v49 = vld [vmem:[%s12589_s26 + $0x1e20] sm:$0xf]  ;;  %666 = vst [vmem:[%s12594_s27 + $0x3c0] sm:$0xf] %v665_v48 }
 0x101   : > { %v669_v50 = vld [vmem:[%s12589_s26 + $0x1e40] sm:$0xf]  ;;  %668 = vst [vmem:[%s12594_s27 + $0x3c4] sm:$0xf] %v667_v49 }
 0x102   : > { %v671_v51 = vld [vmem:[%s12589_s26 + $0x1e60] sm:$0xf]  ;;  %670 = vst [vmem:[%s12594_s27 + $0x3c8] sm:$0xf] %v669_v50 }
 0x103   : > { %v673_v52 = vld [vmem:[%s12589_s26 + $0x1e80] sm:$0xf]  ;;  %672 = vst [vmem:[%s12594_s27 + $0x3cc] sm:$0xf] %v671_v51 }
 0x104   : > { %v675_v53 = vld [vmem:[%s12589_s26 + $0x1ea0] sm:$0xf]  ;;  %674 = vst [vmem:[%s12594_s27 + $0x3d0] sm:$0xf] %v673_v52 }
 0x105   : > { %v677_v54 = vld [vmem:[%s12589_s26 + $0x1ec0] sm:$0xf]  ;;  %676 = vst [vmem:[%s12594_s27 + $0x3d4] sm:$0xf] %v675_v53 }
 0x106   : > { %v679_v55 = vld [vmem:[%s12589_s26 + $0x1ee0] sm:$0xf]  ;;  %678 = vst [vmem:[%s12594_s27 + $0x3d8] sm:$0xf] %v677_v54 }
 0x107   : > { %v681_v56 = vld [vmem:[%s12589_s26 + $0x1f00] sm:$0xf]  ;;  %680 = vst [vmem:[%s12594_s27 + $0x3dc] sm:$0xf] %v679_v55 }
 0x108   : > { %v683_v57 = vld [vmem:[%s12589_s26 + $0x1f20] sm:$0xf]  ;;  %682 = vst [vmem:[%s12594_s27 + $0x3e0] sm:$0xf] %v681_v56 }
 0x109   : > { %v685_v58 = vld [vmem:[%s12589_s26 + $0x1f40] sm:$0xf]  ;;  %684 = vst [vmem:[%s12594_s27 + $0x3e4] sm:$0xf] %v683_v57 }
 0x10a   : > { %v687_v59 = vld [vmem:[%s12589_s26 + $0x1f60] sm:$0xf]  ;;  %686 = vst [vmem:[%s12594_s27 + $0x3e8] sm:$0xf] %v685_v58 }
 0x10b   : > { %v689_v60 = vld [vmem:[%s12589_s26 + $0x1f80] sm:$0xf]  ;;  %688 = vst [vmem:[%s12594_s27 + $0x3ec] sm:$0xf] %v687_v59 }
 0x10c   : > { %v691_v61 = vld [vmem:[%s12589_s26 + $0x1fa0] sm:$0xf]  ;;  %690 = vst [vmem:[%s12594_s27 + $0x3f0] sm:$0xf] %v689_v60 }
 0x10d   : > { %v693_v62 = vld [vmem:[%s12589_s26 + $0x1fc0] sm:$0xf]  ;;  %692 = vst [vmem:[%s12594_s27 + $0x3f4] sm:$0xf] %v691_v61 }
 0x10e   : > { %v695_v63 = vld [vmem:[%s12589_s26 + $0x1fe0] sm:$0xf]  ;;  %694 = vst [vmem:[%s12594_s27 + $0x3f8] sm:$0xf] %v693_v62 }
 0x10f   : > { %v697_v0 = vld [vmem:[%s12589_s26 + $0x2000] sm:$0xf]  ;;  %696 = vst [vmem:[%s12594_s27 + $0x3fc] sm:$0xf] %v695_v63 }
 0x110   : > { %v699_v1 = vld [vmem:[%s12589_s26 + $0x2020] sm:$0xf]  ;;  %698 = vst [vmem:[%s12594_s27 + $0x400] sm:$0xf] %v697_v0 }
 0x111   : > { %v701_v2 = vld [vmem:[%s12589_s26 + $0x2040] sm:$0xf]  ;;  %700 = vst [vmem:[%s12594_s27 + $0x404] sm:$0xf] %v699_v1 }
 0x112   : > { %v703_v3 = vld [vmem:[%s12589_s26 + $0x2060] sm:$0xf]  ;;  %702 = vst [vmem:[%s12594_s27 + $0x408] sm:$0xf] %v701_v2 }
 0x113   : > { %v705_v4 = vld [vmem:[%s12589_s26 + $0x2080] sm:$0xf]  ;;  %704 = vst [vmem:[%s12594_s27 + $0x40c] sm:$0xf] %v703_v3 }
 0x114   : > { %v707_v5 = vld [vmem:[%s12589_s26 + $0x20a0] sm:$0xf]  ;;  %706 = vst [vmem:[%s12594_s27 + $0x410] sm:$0xf] %v705_v4 }
 0x115   : > { %v709_v6 = vld [vmem:[%s12589_s26 + $0x20c0] sm:$0xf]  ;;  %708 = vst [vmem:[%s12594_s27 + $0x414] sm:$0xf] %v707_v5 }
 0x116   : > { %v711_v7 = vld [vmem:[%s12589_s26 + $0x20e0] sm:$0xf]  ;;  %710 = vst [vmem:[%s12594_s27 + $0x418] sm:$0xf] %v709_v6 }
 0x117   : > { %v713_v8 = vld [vmem:[%s12589_s26 + $0x2100] sm:$0xf]  ;;  %712 = vst [vmem:[%s12594_s27 + $0x41c] sm:$0xf] %v711_v7 }
 0x118   : > { %v715_v9 = vld [vmem:[%s12589_s26 + $0x2120] sm:$0xf]  ;;  %714 = vst [vmem:[%s12594_s27 + $0x420] sm:$0xf] %v713_v8 }
 0x119   : > { %v717_v10 = vld [vmem:[%s12589_s26 + $0x2140] sm:$0xf]  ;;  %716 = vst [vmem:[%s12594_s27 + $0x424] sm:$0xf] %v715_v9 }
 0x11a   : > { %v719_v11 = vld [vmem:[%s12589_s26 + $0x2160] sm:$0xf]  ;;  %718 = vst [vmem:[%s12594_s27 + $0x428] sm:$0xf] %v717_v10 }
 0x11b   : > { %v721_v12 = vld [vmem:[%s12589_s26 + $0x2180] sm:$0xf]  ;;  %720 = vst [vmem:[%s12594_s27 + $0x42c] sm:$0xf] %v719_v11 }
 0x11c   : > { %v723_v13 = vld [vmem:[%s12589_s26 + $0x21a0] sm:$0xf]  ;;  %722 = vst [vmem:[%s12594_s27 + $0x430] sm:$0xf] %v721_v12 }
 0x11d   : > { %v725_v14 = vld [vmem:[%s12589_s26 + $0x21c0] sm:$0xf]  ;;  %724 = vst [vmem:[%s12594_s27 + $0x434] sm:$0xf] %v723_v13 }
 0x11e   : > { %v727_v15 = vld [vmem:[%s12589_s26 + $0x21e0] sm:$0xf]  ;;  %726 = vst [vmem:[%s12594_s27 + $0x438] sm:$0xf] %v725_v14 }
 0x11f   : > { %v729_v16 = vld [vmem:[%s12589_s26 + $0x2200] sm:$0xf]  ;;  %728 = vst [vmem:[%s12594_s27 + $0x43c] sm:$0xf] %v727_v15 }
 0x120   : > { %v731_v17 = vld [vmem:[%s12589_s26 + $0x2220] sm:$0xf]  ;;  %730 = vst [vmem:[%s12594_s27 + $0x440] sm:$0xf] %v729_v16 }
 0x121   : > { %v733_v18 = vld [vmem:[%s12589_s26 + $0x2240] sm:$0xf]  ;;  %732 = vst [vmem:[%s12594_s27 + $0x444] sm:$0xf] %v731_v17 }
 0x122   : > { %v735_v19 = vld [vmem:[%s12589_s26 + $0x2260] sm:$0xf]  ;;  %734 = vst [vmem:[%s12594_s27 + $0x448] sm:$0xf] %v733_v18 }
 0x123   : > { %v737_v20 = vld [vmem:[%s12589_s26 + $0x2280] sm:$0xf]  ;;  %736 = vst [vmem:[%s12594_s27 + $0x44c] sm:$0xf] %v735_v19 }
 0x124   : > { %v739_v21 = vld [vmem:[%s12589_s26 + $0x22a0] sm:$0xf]  ;;  %738 = vst [vmem:[%s12594_s27 + $0x450] sm:$0xf] %v737_v20 }
 0x125   : > { %v741_v22 = vld [vmem:[%s12589_s26 + $0x22c0] sm:$0xf]  ;;  %740 = vst [vmem:[%s12594_s27 + $0x454] sm:$0xf] %v739_v21 }
 0x126   : > { %v743_v23 = vld [vmem:[%s12589_s26 + $0x22e0] sm:$0xf]  ;;  %742 = vst [vmem:[%s12594_s27 + $0x458] sm:$0xf] %v741_v22 }
 0x127   : > { %v745_v24 = vld [vmem:[%s12589_s26 + $0x2300] sm:$0xf]  ;;  %744 = vst [vmem:[%s12594_s27 + $0x45c] sm:$0xf] %v743_v23 }
 0x128   : > { %v747_v25 = vld [vmem:[%s12589_s26 + $0x2320] sm:$0xf]  ;;  %746 = vst [vmem:[%s12594_s27 + $0x460] sm:$0xf] %v745_v24 }
 0x129   : > { %v749_v26 = vld [vmem:[%s12589_s26 + $0x2340] sm:$0xf]  ;;  %748 = vst [vmem:[%s12594_s27 + $0x464] sm:$0xf] %v747_v25 }
 0x12a   : > { %v751_v27 = vld [vmem:[%s12589_s26 + $0x2360] sm:$0xf]  ;;  %750 = vst [vmem:[%s12594_s27 + $0x468] sm:$0xf] %v749_v26 }
 0x12b   : > { %v753_v28 = vld [vmem:[%s12589_s26 + $0x2380] sm:$0xf]  ;;  %752 = vst [vmem:[%s12594_s27 + $0x46c] sm:$0xf] %v751_v27 }
 0x12c   : > { %v755_v29 = vld [vmem:[%s12589_s26 + $0x23a0] sm:$0xf]  ;;  %754 = vst [vmem:[%s12594_s27 + $0x470] sm:$0xf] %v753_v28 }
 0x12d   : > { %v757_v30 = vld [vmem:[%s12589_s26 + $0x23c0] sm:$0xf]  ;;  %756 = vst [vmem:[%s12594_s27 + $0x474] sm:$0xf] %v755_v29 }
 0x12e   : > { %v759_v31 = vld [vmem:[%s12589_s26 + $0x23e0] sm:$0xf]  ;;  %758 = vst [vmem:[%s12594_s27 + $0x478] sm:$0xf] %v757_v30 }
 0x12f   : > { %v761_v32 = vld [vmem:[%s12589_s26 + $0x2400] sm:$0xf]  ;;  %760 = vst [vmem:[%s12594_s27 + $0x47c] sm:$0xf] %v759_v31 }
 0x130   : > { %v763_v33 = vld [vmem:[%s12589_s26 + $0x2420] sm:$0xf]  ;;  %762 = vst [vmem:[%s12594_s27 + $0x480] sm:$0xf] %v761_v32 }
 0x131   : > { %v765_v34 = vld [vmem:[%s12589_s26 + $0x2440] sm:$0xf]  ;;  %764 = vst [vmem:[%s12594_s27 + $0x484] sm:$0xf] %v763_v33 }
 0x132   : > { %v767_v35 = vld [vmem:[%s12589_s26 + $0x2460] sm:$0xf]  ;;  %766 = vst [vmem:[%s12594_s27 + $0x488] sm:$0xf] %v765_v34 }
 0x133   : > { %v769_v36 = vld [vmem:[%s12589_s26 + $0x2480] sm:$0xf]  ;;  %768 = vst [vmem:[%s12594_s27 + $0x48c] sm:$0xf] %v767_v35 }
 0x134   : > { %v771_v37 = vld [vmem:[%s12589_s26 + $0x24a0] sm:$0xf]  ;;  %770 = vst [vmem:[%s12594_s27 + $0x490] sm:$0xf] %v769_v36 }
 0x135   : > { %v773_v38 = vld [vmem:[%s12589_s26 + $0x24c0] sm:$0xf]  ;;  %772 = vst [vmem:[%s12594_s27 + $0x494] sm:$0xf] %v771_v37 }
 0x136   : > { %v775_v39 = vld [vmem:[%s12589_s26 + $0x24e0] sm:$0xf]  ;;  %774 = vst [vmem:[%s12594_s27 + $0x498] sm:$0xf] %v773_v38 }
 0x137   : > { %v777_v40 = vld [vmem:[%s12589_s26 + $0x2500] sm:$0xf]  ;;  %776 = vst [vmem:[%s12594_s27 + $0x49c] sm:$0xf] %v775_v39 }
 0x138   : > { %v779_v41 = vld [vmem:[%s12589_s26 + $0x2520] sm:$0xf]  ;;  %778 = vst [vmem:[%s12594_s27 + $0x4a0] sm:$0xf] %v777_v40 }
 0x139   : > { %v781_v42 = vld [vmem:[%s12589_s26 + $0x2540] sm:$0xf]  ;;  %780 = vst [vmem:[%s12594_s27 + $0x4a4] sm:$0xf] %v779_v41 }
 0x13a   : > { %v783_v43 = vld [vmem:[%s12589_s26 + $0x2560] sm:$0xf]  ;;  %782 = vst [vmem:[%s12594_s27 + $0x4a8] sm:$0xf] %v781_v42 }
 0x13b   : > { %v785_v44 = vld [vmem:[%s12589_s26 + $0x2580] sm:$0xf]  ;;  %784 = vst [vmem:[%s12594_s27 + $0x4ac] sm:$0xf] %v783_v43 }
 0x13c   : > { %v787_v45 = vld [vmem:[%s12589_s26 + $0x25a0] sm:$0xf]  ;;  %786 = vst [vmem:[%s12594_s27 + $0x4b0] sm:$0xf] %v785_v44 }
 0x13d   : > { %v789_v46 = vld [vmem:[%s12589_s26 + $0x25c0] sm:$0xf]  ;;  %788 = vst [vmem:[%s12594_s27 + $0x4b4] sm:$0xf] %v787_v45 }
 0x13e   : > { %v791_v47 = vld [vmem:[%s12589_s26 + $0x25e0] sm:$0xf]  ;;  %790 = vst [vmem:[%s12594_s27 + $0x4b8] sm:$0xf] %v789_v46 }
 0x13f   : > { %v793_v48 = vld [vmem:[%s12589_s26 + $0x2600] sm:$0xf]  ;;  %792 = vst [vmem:[%s12594_s27 + $0x4bc] sm:$0xf] %v791_v47 }
 0x140   : > { %v795_v49 = vld [vmem:[%s12589_s26 + $0x2620] sm:$0xf]  ;;  %794 = vst [vmem:[%s12594_s27 + $0x4c0] sm:$0xf] %v793_v48 }
 0x141   : > { %v797_v50 = vld [vmem:[%s12589_s26 + $0x2640] sm:$0xf]  ;;  %796 = vst [vmem:[%s12594_s27 + $0x4c4] sm:$0xf] %v795_v49 }
 0x142   : > { %v799_v51 = vld [vmem:[%s12589_s26 + $0x2660] sm:$0xf]  ;;  %798 = vst [vmem:[%s12594_s27 + $0x4c8] sm:$0xf] %v797_v50 }
 0x143   : > { %v801_v52 = vld [vmem:[%s12589_s26 + $0x2680] sm:$0xf]  ;;  %800 = vst [vmem:[%s12594_s27 + $0x4cc] sm:$0xf] %v799_v51 }
 0x144   : > { %v803_v53 = vld [vmem:[%s12589_s26 + $0x26a0] sm:$0xf]  ;;  %802 = vst [vmem:[%s12594_s27 + $0x4d0] sm:$0xf] %v801_v52 }
 0x145   : > { %v805_v54 = vld [vmem:[%s12589_s26 + $0x26c0] sm:$0xf]  ;;  %804 = vst [vmem:[%s12594_s27 + $0x4d4] sm:$0xf] %v803_v53 }
 0x146   : > { %v807_v55 = vld [vmem:[%s12589_s26 + $0x26e0] sm:$0xf]  ;;  %806 = vst [vmem:[%s12594_s27 + $0x4d8] sm:$0xf] %v805_v54 }
 0x147   : > { %v809_v56 = vld [vmem:[%s12589_s26 + $0x2700] sm:$0xf]  ;;  %808 = vst [vmem:[%s12594_s27 + $0x4dc] sm:$0xf] %v807_v55 }
 0x148   : > { %v811_v57 = vld [vmem:[%s12589_s26 + $0x2720] sm:$0xf]  ;;  %810 = vst [vmem:[%s12594_s27 + $0x4e0] sm:$0xf] %v809_v56 }
 0x149   : > { %v813_v58 = vld [vmem:[%s12589_s26 + $0x2740] sm:$0xf]  ;;  %812 = vst [vmem:[%s12594_s27 + $0x4e4] sm:$0xf] %v811_v57 }
 0x14a   : > { %v815_v59 = vld [vmem:[%s12589_s26 + $0x2760] sm:$0xf]  ;;  %814 = vst [vmem:[%s12594_s27 + $0x4e8] sm:$0xf] %v813_v58 }
 0x14b   : > { %v817_v60 = vld [vmem:[%s12589_s26 + $0x2780] sm:$0xf]  ;;  %816 = vst [vmem:[%s12594_s27 + $0x4ec] sm:$0xf] %v815_v59 }
 0x14c   : > { %v819_v61 = vld [vmem:[%s12589_s26 + $0x27a0] sm:$0xf]  ;;  %818 = vst [vmem:[%s12594_s27 + $0x4f0] sm:$0xf] %v817_v60 }
 0x14d   : > { %v821_v62 = vld [vmem:[%s12589_s26 + $0x27c0] sm:$0xf]  ;;  %820 = vst [vmem:[%s12594_s27 + $0x4f4] sm:$0xf] %v819_v61 }
 0x14e   : > { %v823_v63 = vld [vmem:[%s12589_s26 + $0x27e0] sm:$0xf]  ;;  %822 = vst [vmem:[%s12594_s27 + $0x4f8] sm:$0xf] %v821_v62 }
 0x14f   : > { %v825_v0 = vld [vmem:[%s12589_s26 + $0x2800] sm:$0xf]  ;;  %824 = vst [vmem:[%s12594_s27 + $0x4fc] sm:$0xf] %v823_v63 }
 0x150   : > { %v827_v1 = vld [vmem:[%s12589_s26 + $0x2820] sm:$0xf]  ;;  %826 = vst [vmem:[%s12594_s27 + $0x500] sm:$0xf] %v825_v0 }
 0x151   : > { %v829_v2 = vld [vmem:[%s12589_s26 + $0x2840] sm:$0xf]  ;;  %828 = vst [vmem:[%s12594_s27 + $0x504] sm:$0xf] %v827_v1 }
 0x152   : > { %v831_v3 = vld [vmem:[%s12589_s26 + $0x2860] sm:$0xf]  ;;  %830 = vst [vmem:[%s12594_s27 + $0x508] sm:$0xf] %v829_v2 }
 0x153   : > { %v833_v4 = vld [vmem:[%s12589_s26 + $0x2880] sm:$0xf]  ;;  %832 = vst [vmem:[%s12594_s27 + $0x50c] sm:$0xf] %v831_v3 }
 0x154   : > { %v835_v5 = vld [vmem:[%s12589_s26 + $0x28a0] sm:$0xf]  ;;  %834 = vst [vmem:[%s12594_s27 + $0x510] sm:$0xf] %v833_v4 }
 0x155   : > { %v837_v6 = vld [vmem:[%s12589_s26 + $0x28c0] sm:$0xf]  ;;  %836 = vst [vmem:[%s12594_s27 + $0x514] sm:$0xf] %v835_v5 }
 0x156   : > { %v839_v7 = vld [vmem:[%s12589_s26 + $0x28e0] sm:$0xf]  ;;  %838 = vst [vmem:[%s12594_s27 + $0x518] sm:$0xf] %v837_v6 }
 0x157   : > { %v841_v8 = vld [vmem:[%s12589_s26 + $0x2900] sm:$0xf]  ;;  %840 = vst [vmem:[%s12594_s27 + $0x51c] sm:$0xf] %v839_v7 }
 0x158   : > { %v843_v9 = vld [vmem:[%s12589_s26 + $0x2920] sm:$0xf]  ;;  %842 = vst [vmem:[%s12594_s27 + $0x520] sm:$0xf] %v841_v8 }
 0x159   : > { %v845_v10 = vld [vmem:[%s12589_s26 + $0x2940] sm:$0xf]  ;;  %844 = vst [vmem:[%s12594_s27 + $0x524] sm:$0xf] %v843_v9 }
 0x15a   : > { %v847_v11 = vld [vmem:[%s12589_s26 + $0x2960] sm:$0xf]  ;;  %846 = vst [vmem:[%s12594_s27 + $0x528] sm:$0xf] %v845_v10 }
 0x15b   : > { %v849_v12 = vld [vmem:[%s12589_s26 + $0x2980] sm:$0xf]  ;;  %848 = vst [vmem:[%s12594_s27 + $0x52c] sm:$0xf] %v847_v11 }
 0x15c   : > { %v851_v13 = vld [vmem:[%s12589_s26 + $0x29a0] sm:$0xf]  ;;  %850 = vst [vmem:[%s12594_s27 + $0x530] sm:$0xf] %v849_v12 }
 0x15d   : > { %v853_v14 = vld [vmem:[%s12589_s26 + $0x29c0] sm:$0xf]  ;;  %852 = vst [vmem:[%s12594_s27 + $0x534] sm:$0xf] %v851_v13 }
 0x15e   : > { %v855_v15 = vld [vmem:[%s12589_s26 + $0x29e0] sm:$0xf]  ;;  %854 = vst [vmem:[%s12594_s27 + $0x538] sm:$0xf] %v853_v14 }
 0x15f   : > { %v857_v16 = vld [vmem:[%s12589_s26 + $0x2a00] sm:$0xf]  ;;  %856 = vst [vmem:[%s12594_s27 + $0x53c] sm:$0xf] %v855_v15 }
 0x160   : > { %v859_v17 = vld [vmem:[%s12589_s26 + $0x2a20] sm:$0xf]  ;;  %858 = vst [vmem:[%s12594_s27 + $0x540] sm:$0xf] %v857_v16 }
 0x161   : > { %v861_v18 = vld [vmem:[%s12589_s26 + $0x2a40] sm:$0xf]  ;;  %860 = vst [vmem:[%s12594_s27 + $0x544] sm:$0xf] %v859_v17 }
 0x162   : > { %v863_v19 = vld [vmem:[%s12589_s26 + $0x2a60] sm:$0xf]  ;;  %862 = vst [vmem:[%s12594_s27 + $0x548] sm:$0xf] %v861_v18 }
 0x163   : > { %v865_v20 = vld [vmem:[%s12589_s26 + $0x2a80] sm:$0xf]  ;;  %864 = vst [vmem:[%s12594_s27 + $0x54c] sm:$0xf] %v863_v19 }
 0x164   : > { %v867_v21 = vld [vmem:[%s12589_s26 + $0x2aa0] sm:$0xf]  ;;  %866 = vst [vmem:[%s12594_s27 + $0x550] sm:$0xf] %v865_v20 }
 0x165   : > { %v869_v22 = vld [vmem:[%s12589_s26 + $0x2ac0] sm:$0xf]  ;;  %868 = vst [vmem:[%s12594_s27 + $0x554] sm:$0xf] %v867_v21 }
 0x166   : > { %v871_v23 = vld [vmem:[%s12589_s26 + $0x2ae0] sm:$0xf]  ;;  %870 = vst [vmem:[%s12594_s27 + $0x558] sm:$0xf] %v869_v22 }
 0x167   : > { %v873_v24 = vld [vmem:[%s12589_s26 + $0x2b00] sm:$0xf]  ;;  %872 = vst [vmem:[%s12594_s27 + $0x55c] sm:$0xf] %v871_v23 }
 0x168   : > { %v875_v25 = vld [vmem:[%s12589_s26 + $0x2b20] sm:$0xf]  ;;  %874 = vst [vmem:[%s12594_s27 + $0x560] sm:$0xf] %v873_v24 }
 0x169   : > { %v877_v26 = vld [vmem:[%s12589_s26 + $0x2b40] sm:$0xf]  ;;  %876 = vst [vmem:[%s12594_s27 + $0x564] sm:$0xf] %v875_v25 }
 0x16a   : > { %v879_v27 = vld [vmem:[%s12589_s26 + $0x2b60] sm:$0xf]  ;;  %878 = vst [vmem:[%s12594_s27 + $0x568] sm:$0xf] %v877_v26 }
 0x16b   : > { %v881_v28 = vld [vmem:[%s12589_s26 + $0x2b80] sm:$0xf]  ;;  %880 = vst [vmem:[%s12594_s27 + $0x56c] sm:$0xf] %v879_v27 }
 0x16c   : > { %v883_v29 = vld [vmem:[%s12589_s26 + $0x2ba0] sm:$0xf]  ;;  %882 = vst [vmem:[%s12594_s27 + $0x570] sm:$0xf] %v881_v28 }
 0x16d   : > { %v885_v30 = vld [vmem:[%s12589_s26 + $0x2bc0] sm:$0xf]  ;;  %884 = vst [vmem:[%s12594_s27 + $0x574] sm:$0xf] %v883_v29 }
 0x16e   : > { %v887_v31 = vld [vmem:[%s12589_s26 + $0x2be0] sm:$0xf]  ;;  %886 = vst [vmem:[%s12594_s27 + $0x578] sm:$0xf] %v885_v30 }
 0x16f   : > { %v889_v32 = vld [vmem:[%s12589_s26 + $0x2c00] sm:$0xf]  ;;  %888 = vst [vmem:[%s12594_s27 + $0x57c] sm:$0xf] %v887_v31 }
 0x170   : > { %v891_v33 = vld [vmem:[%s12589_s26 + $0x2c20] sm:$0xf]  ;;  %890 = vst [vmem:[%s12594_s27 + $0x580] sm:$0xf] %v889_v32 }
 0x171   : > { %v893_v34 = vld [vmem:[%s12589_s26 + $0x2c40] sm:$0xf]  ;;  %892 = vst [vmem:[%s12594_s27 + $0x584] sm:$0xf] %v891_v33 }
 0x172   : > { %v895_v35 = vld [vmem:[%s12589_s26 + $0x2c60] sm:$0xf]  ;;  %894 = vst [vmem:[%s12594_s27 + $0x588] sm:$0xf] %v893_v34 }
 0x173   : > { %v897_v36 = vld [vmem:[%s12589_s26 + $0x2c80] sm:$0xf]  ;;  %896 = vst [vmem:[%s12594_s27 + $0x58c] sm:$0xf] %v895_v35 }
 0x174   : > { %v899_v37 = vld [vmem:[%s12589_s26 + $0x2ca0] sm:$0xf]  ;;  %898 = vst [vmem:[%s12594_s27 + $0x590] sm:$0xf] %v897_v36 }
 0x175   : > { %v901_v38 = vld [vmem:[%s12589_s26 + $0x2cc0] sm:$0xf]  ;;  %900 = vst [vmem:[%s12594_s27 + $0x594] sm:$0xf] %v899_v37 }
 0x176   : > { %v903_v39 = vld [vmem:[%s12589_s26 + $0x2ce0] sm:$0xf]  ;;  %902 = vst [vmem:[%s12594_s27 + $0x598] sm:$0xf] %v901_v38 }
 0x177   : > { %v905_v40 = vld [vmem:[%s12589_s26 + $0x2d00] sm:$0xf]  ;;  %904 = vst [vmem:[%s12594_s27 + $0x59c] sm:$0xf] %v903_v39 }
 0x178   : > { %v907_v41 = vld [vmem:[%s12589_s26 + $0x2d20] sm:$0xf]  ;;  %906 = vst [vmem:[%s12594_s27 + $0x5a0] sm:$0xf] %v905_v40 }
 0x179   : > { %v909_v42 = vld [vmem:[%s12589_s26 + $0x2d40] sm:$0xf]  ;;  %908 = vst [vmem:[%s12594_s27 + $0x5a4] sm:$0xf] %v907_v41 }
 0x17a   : > { %v911_v43 = vld [vmem:[%s12589_s26 + $0x2d60] sm:$0xf]  ;;  %910 = vst [vmem:[%s12594_s27 + $0x5a8] sm:$0xf] %v909_v42 }
 0x17b   : > { %v913_v44 = vld [vmem:[%s12589_s26 + $0x2d80] sm:$0xf]  ;;  %912 = vst [vmem:[%s12594_s27 + $0x5ac] sm:$0xf] %v911_v43 }
 0x17c   : > { %v915_v45 = vld [vmem:[%s12589_s26 + $0x2da0] sm:$0xf]  ;;  %914 = vst [vmem:[%s12594_s27 + $0x5b0] sm:$0xf] %v913_v44 }
 0x17d   : > { %v917_v46 = vld [vmem:[%s12589_s26 + $0x2dc0] sm:$0xf]  ;;  %916 = vst [vmem:[%s12594_s27 + $0x5b4] sm:$0xf] %v915_v45 }
 0x17e   : > { %v919_v47 = vld [vmem:[%s12589_s26 + $0x2de0] sm:$0xf]  ;;  %918 = vst [vmem:[%s12594_s27 + $0x5b8] sm:$0xf] %v917_v46 }
 0x17f   : > { %v921_v48 = vld [vmem:[%s12589_s26 + $0x2e00] sm:$0xf]  ;;  %920 = vst [vmem:[%s12594_s27 + $0x5bc] sm:$0xf] %v919_v47 }
 0x180   : > { %v923_v49 = vld [vmem:[%s12589_s26 + $0x2e20] sm:$0xf]  ;;  %922 = vst [vmem:[%s12594_s27 + $0x5c0] sm:$0xf] %v921_v48 }
 0x181   : > { %v925_v50 = vld [vmem:[%s12589_s26 + $0x2e40] sm:$0xf]  ;;  %924 = vst [vmem:[%s12594_s27 + $0x5c4] sm:$0xf] %v923_v49 }
 0x182   : > { %v927_v51 = vld [vmem:[%s12589_s26 + $0x2e60] sm:$0xf]  ;;  %926 = vst [vmem:[%s12594_s27 + $0x5c8] sm:$0xf] %v925_v50 }
 0x183   : > { %v929_v52 = vld [vmem:[%s12589_s26 + $0x2e80] sm:$0xf]  ;;  %928 = vst [vmem:[%s12594_s27 + $0x5cc] sm:$0xf] %v927_v51 }
 0x184   : > { %v931_v53 = vld [vmem:[%s12589_s26 + $0x2ea0] sm:$0xf]  ;;  %930 = vst [vmem:[%s12594_s27 + $0x5d0] sm:$0xf] %v929_v52 }
 0x185   : > { %v933_v54 = vld [vmem:[%s12589_s26 + $0x2ec0] sm:$0xf]  ;;  %932 = vst [vmem:[%s12594_s27 + $0x5d4] sm:$0xf] %v931_v53 }
 0x186   : > { %v935_v55 = vld [vmem:[%s12589_s26 + $0x2ee0] sm:$0xf]  ;;  %934 = vst [vmem:[%s12594_s27 + $0x5d8] sm:$0xf] %v933_v54 }
 0x187   : > { %v937_v56 = vld [vmem:[%s12589_s26 + $0x2f00] sm:$0xf]  ;;  %936 = vst [vmem:[%s12594_s27 + $0x5dc] sm:$0xf] %v935_v55 }
 0x188   : > { %v939_v57 = vld [vmem:[%s12589_s26 + $0x2f20] sm:$0xf]  ;;  %938 = vst [vmem:[%s12594_s27 + $0x5e0] sm:$0xf] %v937_v56 }
 0x189   : > { %v941_v58 = vld [vmem:[%s12589_s26 + $0x2f40] sm:$0xf]  ;;  %940 = vst [vmem:[%s12594_s27 + $0x5e4] sm:$0xf] %v939_v57 }
 0x18a   : > { %v943_v59 = vld [vmem:[%s12589_s26 + $0x2f60] sm:$0xf]  ;;  %942 = vst [vmem:[%s12594_s27 + $0x5e8] sm:$0xf] %v941_v58 }
 0x18b   : > { %v945_v60 = vld [vmem:[%s12589_s26 + $0x2f80] sm:$0xf]  ;;  %944 = vst [vmem:[%s12594_s27 + $0x5ec] sm:$0xf] %v943_v59 }
 0x18c   : > { %v947_v61 = vld [vmem:[%s12589_s26 + $0x2fa0] sm:$0xf]  ;;  %946 = vst [vmem:[%s12594_s27 + $0x5f0] sm:$0xf] %v945_v60 }
 0x18d   : > { %v949_v62 = vld [vmem:[%s12589_s26 + $0x2fc0] sm:$0xf]  ;;  %948 = vst [vmem:[%s12594_s27 + $0x5f4] sm:$0xf] %v947_v61 }
 0x18e   : > { %v951_v63 = vld [vmem:[%s12589_s26 + $0x2fe0] sm:$0xf]  ;;  %950 = vst [vmem:[%s12594_s27 + $0x5f8] sm:$0xf] %v949_v62 }
 0x18f   : > { %v953_v0 = vld [vmem:[%s12589_s26 + $0x3000] sm:$0xf]  ;;  %952 = vst [vmem:[%s12594_s27 + $0x5fc] sm:$0xf] %v951_v63 }
 0x190   : > { %v955_v1 = vld [vmem:[%s12589_s26 + $0x3020] sm:$0xf]  ;;  %954 = vst [vmem:[%s12594_s27 + $0x600] sm:$0xf] %v953_v0 }
 0x191   : > { %v957_v2 = vld [vmem:[%s12589_s26 + $0x3040] sm:$0xf]  ;;  %956 = vst [vmem:[%s12594_s27 + $0x604] sm:$0xf] %v955_v1 }
 0x192   : > { %v959_v3 = vld [vmem:[%s12589_s26 + $0x3060] sm:$0xf]  ;;  %958 = vst [vmem:[%s12594_s27 + $0x608] sm:$0xf] %v957_v2 }
 0x193   : > { %v961_v4 = vld [vmem:[%s12589_s26 + $0x3080] sm:$0xf]  ;;  %960 = vst [vmem:[%s12594_s27 + $0x60c] sm:$0xf] %v959_v3 }
 0x194   : > { %v963_v5 = vld [vmem:[%s12589_s26 + $0x30a0] sm:$0xf]  ;;  %962 = vst [vmem:[%s12594_s27 + $0x610] sm:$0xf] %v961_v4 }
 0x195   : > { %v965_v6 = vld [vmem:[%s12589_s26 + $0x30c0] sm:$0xf]  ;;  %964 = vst [vmem:[%s12594_s27 + $0x614] sm:$0xf] %v963_v5 }
 0x196   : > { %v967_v7 = vld [vmem:[%s12589_s26 + $0x30e0] sm:$0xf]  ;;  %966 = vst [vmem:[%s12594_s27 + $0x618] sm:$0xf] %v965_v6 }
 0x197   : > { %v969_v8 = vld [vmem:[%s12589_s26 + $0x3100] sm:$0xf]  ;;  %968 = vst [vmem:[%s12594_s27 + $0x61c] sm:$0xf] %v967_v7 }
 0x198   : > { %v971_v9 = vld [vmem:[%s12589_s26 + $0x3120] sm:$0xf]  ;;  %970 = vst [vmem:[%s12594_s27 + $0x620] sm:$0xf] %v969_v8 }
 0x199   : > { %v973_v10 = vld [vmem:[%s12589_s26 + $0x3140] sm:$0xf]  ;;  %972 = vst [vmem:[%s12594_s27 + $0x624] sm:$0xf] %v971_v9 }
 0x19a   : > { %v975_v11 = vld [vmem:[%s12589_s26 + $0x3160] sm:$0xf]  ;;  %974 = vst [vmem:[%s12594_s27 + $0x628] sm:$0xf] %v973_v10 }
 0x19b   : > { %v977_v12 = vld [vmem:[%s12589_s26 + $0x3180] sm:$0xf]  ;;  %976 = vst [vmem:[%s12594_s27 + $0x62c] sm:$0xf] %v975_v11 }
 0x19c   : > { %v979_v13 = vld [vmem:[%s12589_s26 + $0x31a0] sm:$0xf]  ;;  %978 = vst [vmem:[%s12594_s27 + $0x630] sm:$0xf] %v977_v12 }
 0x19d   : > { %v981_v14 = vld [vmem:[%s12589_s26 + $0x31c0] sm:$0xf]  ;;  %980 = vst [vmem:[%s12594_s27 + $0x634] sm:$0xf] %v979_v13 }
 0x19e   : > { %v983_v15 = vld [vmem:[%s12589_s26 + $0x31e0] sm:$0xf]  ;;  %982 = vst [vmem:[%s12594_s27 + $0x638] sm:$0xf] %v981_v14 }
 0x19f   : > { %v985_v16 = vld [vmem:[%s12589_s26 + $0x3200] sm:$0xf]  ;;  %984 = vst [vmem:[%s12594_s27 + $0x63c] sm:$0xf] %v983_v15 }
 0x1a0   : > { %v987_v17 = vld [vmem:[%s12589_s26 + $0x3220] sm:$0xf]  ;;  %986 = vst [vmem:[%s12594_s27 + $0x640] sm:$0xf] %v985_v16 }
 0x1a1   : > { %v989_v18 = vld [vmem:[%s12589_s26 + $0x3240] sm:$0xf]  ;;  %988 = vst [vmem:[%s12594_s27 + $0x644] sm:$0xf] %v987_v17 }
 0x1a2   : > { %v991_v19 = vld [vmem:[%s12589_s26 + $0x3260] sm:$0xf]  ;;  %990 = vst [vmem:[%s12594_s27 + $0x648] sm:$0xf] %v989_v18 }
 0x1a3   : > { %v993_v20 = vld [vmem:[%s12589_s26 + $0x3280] sm:$0xf]  ;;  %992 = vst [vmem:[%s12594_s27 + $0x64c] sm:$0xf] %v991_v19 }
 0x1a4   : > { %v995_v21 = vld [vmem:[%s12589_s26 + $0x32a0] sm:$0xf]  ;;  %994 = vst [vmem:[%s12594_s27 + $0x650] sm:$0xf] %v993_v20 }
 0x1a5   : > { %v997_v22 = vld [vmem:[%s12589_s26 + $0x32c0] sm:$0xf]  ;;  %996 = vst [vmem:[%s12594_s27 + $0x654] sm:$0xf] %v995_v21 }
 0x1a6   : > { %v999_v23 = vld [vmem:[%s12589_s26 + $0x32e0] sm:$0xf]  ;;  %998 = vst [vmem:[%s12594_s27 + $0x658] sm:$0xf] %v997_v22 }
 0x1a7   : > { %v1001_v24 = vld [vmem:[%s12589_s26 + $0x3300] sm:$0xf]  ;;  %1000 = vst [vmem:[%s12594_s27 + $0x65c] sm:$0xf] %v999_v23 }
 0x1a8   : > { %v1003_v25 = vld [vmem:[%s12589_s26 + $0x3320] sm:$0xf]  ;;  %1002 = vst [vmem:[%s12594_s27 + $0x660] sm:$0xf] %v1001_v24 }
 0x1a9   : > { %v1005_v26 = vld [vmem:[%s12589_s26 + $0x3340] sm:$0xf]  ;;  %1004 = vst [vmem:[%s12594_s27 + $0x664] sm:$0xf] %v1003_v25 }
 0x1aa   : > { %v1007_v27 = vld [vmem:[%s12589_s26 + $0x3360] sm:$0xf]  ;;  %1006 = vst [vmem:[%s12594_s27 + $0x668] sm:$0xf] %v1005_v26 }
 0x1ab   : > { %v1009_v28 = vld [vmem:[%s12589_s26 + $0x3380] sm:$0xf]  ;;  %1008 = vst [vmem:[%s12594_s27 + $0x66c] sm:$0xf] %v1007_v27 }
 0x1ac   : > { %v1011_v29 = vld [vmem:[%s12589_s26 + $0x33a0] sm:$0xf]  ;;  %1010 = vst [vmem:[%s12594_s27 + $0x670] sm:$0xf] %v1009_v28 }
 0x1ad   : > { %v1013_v30 = vld [vmem:[%s12589_s26 + $0x33c0] sm:$0xf]  ;;  %1012 = vst [vmem:[%s12594_s27 + $0x674] sm:$0xf] %v1011_v29 }
 0x1ae   : > { %v1015_v31 = vld [vmem:[%s12589_s26 + $0x33e0] sm:$0xf]  ;;  %1014 = vst [vmem:[%s12594_s27 + $0x678] sm:$0xf] %v1013_v30 }
 0x1af   : > { %v1017_v32 = vld [vmem:[%s12589_s26 + $0x3400] sm:$0xf]  ;;  %1016 = vst [vmem:[%s12594_s27 + $0x67c] sm:$0xf] %v1015_v31 }
 0x1b0   : > { %v1019_v33 = vld [vmem:[%s12589_s26 + $0x3420] sm:$0xf]  ;;  %1018 = vst [vmem:[%s12594_s27 + $0x680] sm:$0xf] %v1017_v32 }
 0x1b1   : > { %v1021_v34 = vld [vmem:[%s12589_s26 + $0x3440] sm:$0xf]  ;;  %1020 = vst [vmem:[%s12594_s27 + $0x684] sm:$0xf] %v1019_v33 }
 0x1b2   : > { %v1023_v35 = vld [vmem:[%s12589_s26 + $0x3460] sm:$0xf]  ;;  %1022 = vst [vmem:[%s12594_s27 + $0x688] sm:$0xf] %v1021_v34 }
 0x1b3   : > { %v1025_v36 = vld [vmem:[%s12589_s26 + $0x3480] sm:$0xf]  ;;  %1024 = vst [vmem:[%s12594_s27 + $0x68c] sm:$0xf] %v1023_v35 }
 0x1b4   : > { %v1027_v37 = vld [vmem:[%s12589_s26 + $0x34a0] sm:$0xf]  ;;  %1026 = vst [vmem:[%s12594_s27 + $0x690] sm:$0xf] %v1025_v36 }
 0x1b5   : > { %v1029_v38 = vld [vmem:[%s12589_s26 + $0x34c0] sm:$0xf]  ;;  %1028 = vst [vmem:[%s12594_s27 + $0x694] sm:$0xf] %v1027_v37 }
 0x1b6   : > { %v1031_v39 = vld [vmem:[%s12589_s26 + $0x34e0] sm:$0xf]  ;;  %1030 = vst [vmem:[%s12594_s27 + $0x698] sm:$0xf] %v1029_v38 }
 0x1b7   : > { %v1033_v40 = vld [vmem:[%s12589_s26 + $0x3500] sm:$0xf]  ;;  %1032 = vst [vmem:[%s12594_s27 + $0x69c] sm:$0xf] %v1031_v39 }
 0x1b8   : > { %v1035_v41 = vld [vmem:[%s12589_s26 + $0x3520] sm:$0xf]  ;;  %1034 = vst [vmem:[%s12594_s27 + $0x6a0] sm:$0xf] %v1033_v40 }
 0x1b9   : > { %v1037_v42 = vld [vmem:[%s12589_s26 + $0x3540] sm:$0xf]  ;;  %1036 = vst [vmem:[%s12594_s27 + $0x6a4] sm:$0xf] %v1035_v41 }
 0x1ba   : > { %v1039_v43 = vld [vmem:[%s12589_s26 + $0x3560] sm:$0xf]  ;;  %1038 = vst [vmem:[%s12594_s27 + $0x6a8] sm:$0xf] %v1037_v42 }
 0x1bb   : > { %v1041_v44 = vld [vmem:[%s12589_s26 + $0x3580] sm:$0xf]  ;;  %1040 = vst [vmem:[%s12594_s27 + $0x6ac] sm:$0xf] %v1039_v43 }
 0x1bc   : > { %v1043_v45 = vld [vmem:[%s12589_s26 + $0x35a0] sm:$0xf]  ;;  %1042 = vst [vmem:[%s12594_s27 + $0x6b0] sm:$0xf] %v1041_v44 }
 0x1bd   : > { %v1045_v46 = vld [vmem:[%s12589_s26 + $0x35c0] sm:$0xf]  ;;  %1044 = vst [vmem:[%s12594_s27 + $0x6b4] sm:$0xf] %v1043_v45 }
 0x1be   : > { %v1047_v47 = vld [vmem:[%s12589_s26 + $0x35e0] sm:$0xf]  ;;  %1046 = vst [vmem:[%s12594_s27 + $0x6b8] sm:$0xf] %v1045_v46 }
 0x1bf   : > { %v1049_v48 = vld [vmem:[%s12589_s26 + $0x3600] sm:$0xf]  ;;  %1048 = vst [vmem:[%s12594_s27 + $0x6bc] sm:$0xf] %v1047_v47 }
 0x1c0   : > { %v1051_v49 = vld [vmem:[%s12589_s26 + $0x3620] sm:$0xf]  ;;  %1050 = vst [vmem:[%s12594_s27 + $0x6c0] sm:$0xf] %v1049_v48 }
 0x1c1   : > { %v1053_v50 = vld [vmem:[%s12589_s26 + $0x3640] sm:$0xf]  ;;  %1052 = vst [vmem:[%s12594_s27 + $0x6c4] sm:$0xf] %v1051_v49 }
 0x1c2   : > { %v1055_v51 = vld [vmem:[%s12589_s26 + $0x3660] sm:$0xf]  ;;  %1054 = vst [vmem:[%s12594_s27 + $0x6c8] sm:$0xf] %v1053_v50 }
 0x1c3   : > { %v1057_v52 = vld [vmem:[%s12589_s26 + $0x3680] sm:$0xf]  ;;  %1056 = vst [vmem:[%s12594_s27 + $0x6cc] sm:$0xf] %v1055_v51 }
 0x1c4   : > { %v1059_v53 = vld [vmem:[%s12589_s26 + $0x36a0] sm:$0xf]  ;;  %1058 = vst [vmem:[%s12594_s27 + $0x6d0] sm:$0xf] %v1057_v52 }
 0x1c5   : > { %v1061_v54 = vld [vmem:[%s12589_s26 + $0x36c0] sm:$0xf]  ;;  %1060 = vst [vmem:[%s12594_s27 + $0x6d4] sm:$0xf] %v1059_v53 }
 0x1c6   : > { %v1063_v55 = vld [vmem:[%s12589_s26 + $0x36e0] sm:$0xf]  ;;  %1062 = vst [vmem:[%s12594_s27 + $0x6d8] sm:$0xf] %v1061_v54 }
 0x1c7   : > { %v1065_v56 = vld [vmem:[%s12589_s26 + $0x3700] sm:$0xf]  ;;  %1064 = vst [vmem:[%s12594_s27 + $0x6dc] sm:$0xf] %v1063_v55 }
 0x1c8   : > { %v1067_v57 = vld [vmem:[%s12589_s26 + $0x3720] sm:$0xf]  ;;  %1066 = vst [vmem:[%s12594_s27 + $0x6e0] sm:$0xf] %v1065_v56 }
 0x1c9   : > { %v1069_v58 = vld [vmem:[%s12589_s26 + $0x3740] sm:$0xf]  ;;  %1068 = vst [vmem:[%s12594_s27 + $0x6e4] sm:$0xf] %v1067_v57 }
 0x1ca   : > { %v1071_v59 = vld [vmem:[%s12589_s26 + $0x3760] sm:$0xf]  ;;  %1070 = vst [vmem:[%s12594_s27 + $0x6e8] sm:$0xf] %v1069_v58 }
 0x1cb   : > { %v1073_v60 = vld [vmem:[%s12589_s26 + $0x3780] sm:$0xf]  ;;  %1072 = vst [vmem:[%s12594_s27 + $0x6ec] sm:$0xf] %v1071_v59 }
 0x1cc   : > { %v1075_v61 = vld [vmem:[%s12589_s26 + $0x37a0] sm:$0xf]  ;;  %1074 = vst [vmem:[%s12594_s27 + $0x6f0] sm:$0xf] %v1073_v60 }
 0x1cd   : > { %v1077_v62 = vld [vmem:[%s12589_s26 + $0x37c0] sm:$0xf]  ;;  %1076 = vst [vmem:[%s12594_s27 + $0x6f4] sm:$0xf] %v1075_v61 }
 0x1ce   : > { %v1079_v63 = vld [vmem:[%s12589_s26 + $0x37e0] sm:$0xf]  ;;  %1078 = vst [vmem:[%s12594_s27 + $0x6f8] sm:$0xf] %v1077_v62 }
 0x1cf   : > { %v1081_v0 = vld [vmem:[%s12589_s26 + $0x3800] sm:$0xf]  ;;  %1080 = vst [vmem:[%s12594_s27 + $0x6fc] sm:$0xf] %v1079_v63 }
 0x1d0   : > { %v1083_v1 = vld [vmem:[%s12589_s26 + $0x3820] sm:$0xf]  ;;  %1082 = vst [vmem:[%s12594_s27 + $0x700] sm:$0xf] %v1081_v0 }
 0x1d1   : > { %v1085_v2 = vld [vmem:[%s12589_s26 + $0x3840] sm:$0xf]  ;;  %1084 = vst [vmem:[%s12594_s27 + $0x704] sm:$0xf] %v1083_v1 }
 0x1d2   : > { %v1087_v3 = vld [vmem:[%s12589_s26 + $0x3860] sm:$0xf]  ;;  %1086 = vst [vmem:[%s12594_s27 + $0x708] sm:$0xf] %v1085_v2 }
 0x1d3   : > { %v1089_v4 = vld [vmem:[%s12589_s26 + $0x3880] sm:$0xf]  ;;  %1088 = vst [vmem:[%s12594_s27 + $0x70c] sm:$0xf] %v1087_v3 }
 0x1d4   : > { %v1091_v5 = vld [vmem:[%s12589_s26 + $0x38a0] sm:$0xf]  ;;  %1090 = vst [vmem:[%s12594_s27 + $0x710] sm:$0xf] %v1089_v4 }
 0x1d5   : > { %v1093_v6 = vld [vmem:[%s12589_s26 + $0x38c0] sm:$0xf]  ;;  %1092 = vst [vmem:[%s12594_s27 + $0x714] sm:$0xf] %v1091_v5 }
 0x1d6   : > { %v1095_v7 = vld [vmem:[%s12589_s26 + $0x38e0] sm:$0xf]  ;;  %1094 = vst [vmem:[%s12594_s27 + $0x718] sm:$0xf] %v1093_v6 }
 0x1d7   : > { %v1097_v8 = vld [vmem:[%s12589_s26 + $0x3900] sm:$0xf]  ;;  %1096 = vst [vmem:[%s12594_s27 + $0x71c] sm:$0xf] %v1095_v7 }
 0x1d8   : > { %v1099_v9 = vld [vmem:[%s12589_s26 + $0x3920] sm:$0xf]  ;;  %1098 = vst [vmem:[%s12594_s27 + $0x720] sm:$0xf] %v1097_v8 }
 0x1d9   : > { %v1101_v10 = vld [vmem:[%s12589_s26 + $0x3940] sm:$0xf]  ;;  %1100 = vst [vmem:[%s12594_s27 + $0x724] sm:$0xf] %v1099_v9 }
 0x1da   : > { %v1103_v11 = vld [vmem:[%s12589_s26 + $0x3960] sm:$0xf]  ;;  %1102 = vst [vmem:[%s12594_s27 + $0x728] sm:$0xf] %v1101_v10 }
 0x1db   : > { %v1105_v12 = vld [vmem:[%s12589_s26 + $0x3980] sm:$0xf]  ;;  %1104 = vst [vmem:[%s12594_s27 + $0x72c] sm:$0xf] %v1103_v11 }
 0x1dc   : > { %v1107_v13 = vld [vmem:[%s12589_s26 + $0x39a0] sm:$0xf]  ;;  %1106 = vst [vmem:[%s12594_s27 + $0x730] sm:$0xf] %v1105_v12 }
 0x1dd   : > { %v1109_v14 = vld [vmem:[%s12589_s26 + $0x39c0] sm:$0xf]  ;;  %1108 = vst [vmem:[%s12594_s27 + $0x734] sm:$0xf] %v1107_v13 }
 0x1de   : > { %v1111_v15 = vld [vmem:[%s12589_s26 + $0x39e0] sm:$0xf]  ;;  %1110 = vst [vmem:[%s12594_s27 + $0x738] sm:$0xf] %v1109_v14 }
 0x1df   : > { %v1113_v16 = vld [vmem:[%s12589_s26 + $0x3a00] sm:$0xf]  ;;  %1112 = vst [vmem:[%s12594_s27 + $0x73c] sm:$0xf] %v1111_v15 }
 0x1e0   : > { %v1115_v17 = vld [vmem:[%s12589_s26 + $0x3a20] sm:$0xf]  ;;  %1114 = vst [vmem:[%s12594_s27 + $0x740] sm:$0xf] %v1113_v16 }
 0x1e1   : > { %v1117_v18 = vld [vmem:[%s12589_s26 + $0x3a40] sm:$0xf]  ;;  %1116 = vst [vmem:[%s12594_s27 + $0x744] sm:$0xf] %v1115_v17 }
 0x1e2   : > { %v1119_v19 = vld [vmem:[%s12589_s26 + $0x3a60] sm:$0xf]  ;;  %1118 = vst [vmem:[%s12594_s27 + $0x748] sm:$0xf] %v1117_v18 }
 0x1e3   : > { %v1121_v20 = vld [vmem:[%s12589_s26 + $0x3a80] sm:$0xf]  ;;  %1120 = vst [vmem:[%s12594_s27 + $0x74c] sm:$0xf] %v1119_v19 }
 0x1e4   : > { %v1123_v21 = vld [vmem:[%s12589_s26 + $0x3aa0] sm:$0xf]  ;;  %1122 = vst [vmem:[%s12594_s27 + $0x750] sm:$0xf] %v1121_v20 }
 0x1e5   : > { %v1125_v22 = vld [vmem:[%s12589_s26 + $0x3ac0] sm:$0xf]  ;;  %1124 = vst [vmem:[%s12594_s27 + $0x754] sm:$0xf] %v1123_v21 }
 0x1e6   : > { %v1127_v23 = vld [vmem:[%s12589_s26 + $0x3ae0] sm:$0xf]  ;;  %1126 = vst [vmem:[%s12594_s27 + $0x758] sm:$0xf] %v1125_v22 }
 0x1e7   : > { %v1129_v24 = vld [vmem:[%s12589_s26 + $0x3b00] sm:$0xf]  ;;  %1128 = vst [vmem:[%s12594_s27 + $0x75c] sm:$0xf] %v1127_v23 }
 0x1e8   : > { %v1131_v25 = vld [vmem:[%s12589_s26 + $0x3b20] sm:$0xf]  ;;  %1130 = vst [vmem:[%s12594_s27 + $0x760] sm:$0xf] %v1129_v24 }
 0x1e9   : > { %v1133_v26 = vld [vmem:[%s12589_s26 + $0x3b40] sm:$0xf]  ;;  %1132 = vst [vmem:[%s12594_s27 + $0x764] sm:$0xf] %v1131_v25 }
 0x1ea   : > { %v1135_v27 = vld [vmem:[%s12589_s26 + $0x3b60] sm:$0xf]  ;;  %1134 = vst [vmem:[%s12594_s27 + $0x768] sm:$0xf] %v1133_v26 }
 0x1eb   : > { %v1137_v28 = vld [vmem:[%s12589_s26 + $0x3b80] sm:$0xf]  ;;  %1136 = vst [vmem:[%s12594_s27 + $0x76c] sm:$0xf] %v1135_v27 }
 0x1ec   : > { %v1139_v29 = vld [vmem:[%s12589_s26 + $0x3ba0] sm:$0xf]  ;;  %1138 = vst [vmem:[%s12594_s27 + $0x770] sm:$0xf] %v1137_v28 }
 0x1ed   : > { %v1141_v30 = vld [vmem:[%s12589_s26 + $0x3bc0] sm:$0xf]  ;;  %1140 = vst [vmem:[%s12594_s27 + $0x774] sm:$0xf] %v1139_v29 }
 0x1ee   : > { %v1143_v31 = vld [vmem:[%s12589_s26 + $0x3be0] sm:$0xf]  ;;  %1142 = vst [vmem:[%s12594_s27 + $0x778] sm:$0xf] %v1141_v30 }
 0x1ef   : > { %v1145_v32 = vld [vmem:[%s12589_s26 + $0x3c00] sm:$0xf]  ;;  %1144 = vst [vmem:[%s12594_s27 + $0x77c] sm:$0xf] %v1143_v31 }
 0x1f0   : > { %v1147_v33 = vld [vmem:[%s12589_s26 + $0x3c20] sm:$0xf]  ;;  %1146 = vst [vmem:[%s12594_s27 + $0x780] sm:$0xf] %v1145_v32 }
 0x1f1   : > { %v1149_v34 = vld [vmem:[%s12589_s26 + $0x3c40] sm:$0xf]  ;;  %1148 = vst [vmem:[%s12594_s27 + $0x784] sm:$0xf] %v1147_v33 }
 0x1f2   : > { %v1151_v35 = vld [vmem:[%s12589_s26 + $0x3c60] sm:$0xf]  ;;  %1150 = vst [vmem:[%s12594_s27 + $0x788] sm:$0xf] %v1149_v34 }
 0x1f3   : > { %v1153_v36 = vld [vmem:[%s12589_s26 + $0x3c80] sm:$0xf]  ;;  %1152 = vst [vmem:[%s12594_s27 + $0x78c] sm:$0xf] %v1151_v35 }
 0x1f4   : > { %v1155_v37 = vld [vmem:[%s12589_s26 + $0x3ca0] sm:$0xf]  ;;  %1154 = vst [vmem:[%s12594_s27 + $0x790] sm:$0xf] %v1153_v36 }
 0x1f5   : > { %v1157_v38 = vld [vmem:[%s12589_s26 + $0x3cc0] sm:$0xf]  ;;  %1156 = vst [vmem:[%s12594_s27 + $0x794] sm:$0xf] %v1155_v37 }
 0x1f6   : > { %v1159_v39 = vld [vmem:[%s12589_s26 + $0x3ce0] sm:$0xf]  ;;  %1158 = vst [vmem:[%s12594_s27 + $0x798] sm:$0xf] %v1157_v38 }
 0x1f7   : > { %v1161_v40 = vld [vmem:[%s12589_s26 + $0x3d00] sm:$0xf]  ;;  %1160 = vst [vmem:[%s12594_s27 + $0x79c] sm:$0xf] %v1159_v39 }
 0x1f8   : > { %v1163_v41 = vld [vmem:[%s12589_s26 + $0x3d20] sm:$0xf]  ;;  %1162 = vst [vmem:[%s12594_s27 + $0x7a0] sm:$0xf] %v1161_v40 }
 0x1f9   : > { %v1165_v42 = vld [vmem:[%s12589_s26 + $0x3d40] sm:$0xf]  ;;  %1164 = vst [vmem:[%s12594_s27 + $0x7a4] sm:$0xf] %v1163_v41 }
 0x1fa   : > { %v1167_v43 = vld [vmem:[%s12589_s26 + $0x3d60] sm:$0xf]  ;;  %1166 = vst [vmem:[%s12594_s27 + $0x7a8] sm:$0xf] %v1165_v42 }
 0x1fb   : > { %v1169_v44 = vld [vmem:[%s12589_s26 + $0x3d80] sm:$0xf]  ;;  %1168 = vst [vmem:[%s12594_s27 + $0x7ac] sm:$0xf] %v1167_v43 }
 0x1fc   : > { %v1171_v45 = vld [vmem:[%s12589_s26 + $0x3da0] sm:$0xf]  ;;  %1170 = vst [vmem:[%s12594_s27 + $0x7b0] sm:$0xf] %v1169_v44 }
 0x1fd   : > { %v1173_v46 = vld [vmem:[%s12589_s26 + $0x3dc0] sm:$0xf]  ;;  %1172 = vst [vmem:[%s12594_s27 + $0x7b4] sm:$0xf] %v1171_v45 }
 0x1fe   : > { %v1175_v47 = vld [vmem:[%s12589_s26 + $0x3de0] sm:$0xf]  ;;  %1174 = vst [vmem:[%s12594_s27 + $0x7b8] sm:$0xf] %v1173_v46 }
 0x1ff   : > { %v1177_v48 = vld [vmem:[%s12589_s26 + $0x3e00] sm:$0xf]  ;;  %1176 = vst [vmem:[%s12594_s27 + $0x7bc] sm:$0xf] %v1175_v47 }
 0x200   : > { %v1179_v49 = vld [vmem:[%s12589_s26 + $0x3e20] sm:$0xf]  ;;  %1178 = vst [vmem:[%s12594_s27 + $0x7c0] sm:$0xf] %v1177_v48 }
 0x201   : > { %v1181_v50 = vld [vmem:[%s12589_s26 + $0x3e40] sm:$0xf]  ;;  %1180 = vst [vmem:[%s12594_s27 + $0x7c4] sm:$0xf] %v1179_v49 }
 0x202   : > { %v1183_v51 = vld [vmem:[%s12589_s26 + $0x3e60] sm:$0xf]  ;;  %1182 = vst [vmem:[%s12594_s27 + $0x7c8] sm:$0xf] %v1181_v50 }
 0x203   : > { %v1185_v52 = vld [vmem:[%s12589_s26 + $0x3e80] sm:$0xf]  ;;  %1184 = vst [vmem:[%s12594_s27 + $0x7cc] sm:$0xf] %v1183_v51 }
 0x204   : > { %v1187_v53 = vld [vmem:[%s12589_s26 + $0x3ea0] sm:$0xf]  ;;  %1186 = vst [vmem:[%s12594_s27 + $0x7d0] sm:$0xf] %v1185_v52 }
 0x205   : > { %v1189_v54 = vld [vmem:[%s12589_s26 + $0x3ec0] sm:$0xf]  ;;  %1188 = vst [vmem:[%s12594_s27 + $0x7d4] sm:$0xf] %v1187_v53 }
 0x206   : > { %v1191_v55 = vld [vmem:[%s12589_s26 + $0x3ee0] sm:$0xf]  ;;  %1190 = vst [vmem:[%s12594_s27 + $0x7d8] sm:$0xf] %v1189_v54 }
 0x207   : > { %v1193_v56 = vld [vmem:[%s12589_s26 + $0x3f00] sm:$0xf]  ;;  %1192 = vst [vmem:[%s12594_s27 + $0x7dc] sm:$0xf] %v1191_v55 }
 0x208   : > { %v1195_v57 = vld [vmem:[%s12589_s26 + $0x3f20] sm:$0xf]  ;;  %1194 = vst [vmem:[%s12594_s27 + $0x7e0] sm:$0xf] %v1193_v56 }
 0x209   : > { %v1197_v58 = vld [vmem:[%s12589_s26 + $0x3f40] sm:$0xf]  ;;  %1196 = vst [vmem:[%s12594_s27 + $0x7e4] sm:$0xf] %v1195_v57 }
 0x20a   : > { %v1199_v59 = vld [vmem:[%s12589_s26 + $0x3f60] sm:$0xf]  ;;  %1198 = vst [vmem:[%s12594_s27 + $0x7e8] sm:$0xf] %v1197_v58 }
 0x20b   : > { %v1201_v60 = vld [vmem:[%s12589_s26 + $0x3f80] sm:$0xf]  ;;  %1200 = vst [vmem:[%s12594_s27 + $0x7ec] sm:$0xf] %v1199_v59 }
 0x20c   : > { %v1203_v61 = vld [vmem:[%s12589_s26 + $0x3fa0] sm:$0xf]  ;;  %1202 = vst [vmem:[%s12594_s27 + $0x7f0] sm:$0xf] %v1201_v60 }
 0x20d   : > { %v1205_v62 = vld [vmem:[%s12589_s26 + $0x3fc0] sm:$0xf]  ;;  %1204 = vst [vmem:[%s12594_s27 + $0x7f4] sm:$0xf] %v1203_v61 }
 0x20e   : > { %v1207_v63 = vld [vmem:[%s12589_s26 + $0x3fe0] sm:$0xf]  ;;  %1206 = vst [vmem:[%s12594_s27 + $0x7f8] sm:$0xf] %v1205_v62 }
 0x20f   : > { %v1209_v0 = vld [vmem:[%s12589_s26 + $0x4000] sm:$0xf]  ;;  %1208 = vst [vmem:[%s12594_s27 + $0x7fc] sm:$0xf] %v1207_v63 }
 0x210   : > { %v1211_v1 = vld [vmem:[%s12589_s26 + $0x4020] sm:$0xf]  ;;  %1210 = vst [vmem:[%s12594_s27 + $0x800] sm:$0xf] %v1209_v0 }
 0x211   : > { %v1213_v2 = vld [vmem:[%s12589_s26 + $0x4040] sm:$0xf]  ;;  %1212 = vst [vmem:[%s12594_s27 + $0x804] sm:$0xf] %v1211_v1 }
 0x212   : > { %v1215_v3 = vld [vmem:[%s12589_s26 + $0x4060] sm:$0xf]  ;;  %1214 = vst [vmem:[%s12594_s27 + $0x808] sm:$0xf] %v1213_v2 }
 0x213   : > { %v1217_v4 = vld [vmem:[%s12589_s26 + $0x4080] sm:$0xf]  ;;  %1216 = vst [vmem:[%s12594_s27 + $0x80c] sm:$0xf] %v1215_v3 }
 0x214   : > { %v1219_v5 = vld [vmem:[%s12589_s26 + $0x40a0] sm:$0xf]  ;;  %1218 = vst [vmem:[%s12594_s27 + $0x810] sm:$0xf] %v1217_v4 }
 0x215   : > { %v1221_v6 = vld [vmem:[%s12589_s26 + $0x40c0] sm:$0xf]  ;;  %1220 = vst [vmem:[%s12594_s27 + $0x814] sm:$0xf] %v1219_v5 }
 0x216   : > { %v1223_v7 = vld [vmem:[%s12589_s26 + $0x40e0] sm:$0xf]  ;;  %1222 = vst [vmem:[%s12594_s27 + $0x818] sm:$0xf] %v1221_v6 }
 0x217   : > { %v1225_v8 = vld [vmem:[%s12589_s26 + $0x4100] sm:$0xf]  ;;  %1224 = vst [vmem:[%s12594_s27 + $0x81c] sm:$0xf] %v1223_v7 }
 0x218   : > { %v1227_v9 = vld [vmem:[%s12589_s26 + $0x4120] sm:$0xf]  ;;  %1226 = vst [vmem:[%s12594_s27 + $0x820] sm:$0xf] %v1225_v8 }
 0x219   : > { %v1229_v10 = vld [vmem:[%s12589_s26 + $0x4140] sm:$0xf]  ;;  %1228 = vst [vmem:[%s12594_s27 + $0x824] sm:$0xf] %v1227_v9 }
 0x21a   : > { %v1231_v11 = vld [vmem:[%s12589_s26 + $0x4160] sm:$0xf]  ;;  %1230 = vst [vmem:[%s12594_s27 + $0x828] sm:$0xf] %v1229_v10 }
 0x21b   : > { %v1233_v12 = vld [vmem:[%s12589_s26 + $0x4180] sm:$0xf]  ;;  %1232 = vst [vmem:[%s12594_s27 + $0x82c] sm:$0xf] %v1231_v11 }
 0x21c   : > { %v1235_v13 = vld [vmem:[%s12589_s26 + $0x41a0] sm:$0xf]  ;;  %1234 = vst [vmem:[%s12594_s27 + $0x830] sm:$0xf] %v1233_v12 }
 0x21d   : > { %v1237_v14 = vld [vmem:[%s12589_s26 + $0x41c0] sm:$0xf]  ;;  %1236 = vst [vmem:[%s12594_s27 + $0x834] sm:$0xf] %v1235_v13 }
 0x21e   : > { %v1239_v15 = vld [vmem:[%s12589_s26 + $0x41e0] sm:$0xf]  ;;  %1238 = vst [vmem:[%s12594_s27 + $0x838] sm:$0xf] %v1237_v14 }
 0x21f   : > { %v1241_v16 = vld [vmem:[%s12589_s26 + $0x4200] sm:$0xf]  ;;  %1240 = vst [vmem:[%s12594_s27 + $0x83c] sm:$0xf] %v1239_v15 }
 0x220   : > { %v1243_v17 = vld [vmem:[%s12589_s26 + $0x4220] sm:$0xf]  ;;  %1242 = vst [vmem:[%s12594_s27 + $0x840] sm:$0xf] %v1241_v16 }
 0x221   : > { %v1245_v18 = vld [vmem:[%s12589_s26 + $0x4240] sm:$0xf]  ;;  %1244 = vst [vmem:[%s12594_s27 + $0x844] sm:$0xf] %v1243_v17 }
 0x222   : > { %v1247_v19 = vld [vmem:[%s12589_s26 + $0x4260] sm:$0xf]  ;;  %1246 = vst [vmem:[%s12594_s27 + $0x848] sm:$0xf] %v1245_v18 }
 0x223   : > { %v1249_v20 = vld [vmem:[%s12589_s26 + $0x4280] sm:$0xf]  ;;  %1248 = vst [vmem:[%s12594_s27 + $0x84c] sm:$0xf] %v1247_v19 }
 0x224   : > { %v1251_v21 = vld [vmem:[%s12589_s26 + $0x42a0] sm:$0xf]  ;;  %1250 = vst [vmem:[%s12594_s27 + $0x850] sm:$0xf] %v1249_v20 }
 0x225   : > { %v1253_v22 = vld [vmem:[%s12589_s26 + $0x42c0] sm:$0xf]  ;;  %1252 = vst [vmem:[%s12594_s27 + $0x854] sm:$0xf] %v1251_v21 }
 0x226   : > { %v1255_v23 = vld [vmem:[%s12589_s26 + $0x42e0] sm:$0xf]  ;;  %1254 = vst [vmem:[%s12594_s27 + $0x858] sm:$0xf] %v1253_v22 }
 0x227   : > { %v1257_v24 = vld [vmem:[%s12589_s26 + $0x4300] sm:$0xf]  ;;  %1256 = vst [vmem:[%s12594_s27 + $0x85c] sm:$0xf] %v1255_v23 }
 0x228   : > { %v1259_v25 = vld [vmem:[%s12589_s26 + $0x4320] sm:$0xf]  ;;  %1258 = vst [vmem:[%s12594_s27 + $0x860] sm:$0xf] %v1257_v24 }
 0x229   : > { %v1261_v26 = vld [vmem:[%s12589_s26 + $0x4340] sm:$0xf]  ;;  %1260 = vst [vmem:[%s12594_s27 + $0x864] sm:$0xf] %v1259_v25 }
 0x22a   : > { %v1263_v27 = vld [vmem:[%s12589_s26 + $0x4360] sm:$0xf]  ;;  %1262 = vst [vmem:[%s12594_s27 + $0x868] sm:$0xf] %v1261_v26 }
 0x22b   : > { %v1265_v28 = vld [vmem:[%s12589_s26 + $0x4380] sm:$0xf]  ;;  %1264 = vst [vmem:[%s12594_s27 + $0x86c] sm:$0xf] %v1263_v27 }
 0x22c   : > { %v1267_v29 = vld [vmem:[%s12589_s26 + $0x43a0] sm:$0xf]  ;;  %1266 = vst [vmem:[%s12594_s27 + $0x870] sm:$0xf] %v1265_v28 }
 0x22d   : > { %v1269_v30 = vld [vmem:[%s12589_s26 + $0x43c0] sm:$0xf]  ;;  %1268 = vst [vmem:[%s12594_s27 + $0x874] sm:$0xf] %v1267_v29 }
 0x22e   : > { %v1271_v31 = vld [vmem:[%s12589_s26 + $0x43e0] sm:$0xf]  ;;  %1270 = vst [vmem:[%s12594_s27 + $0x878] sm:$0xf] %v1269_v30 }
 0x22f   : > { %v1273_v32 = vld [vmem:[%s12589_s26 + $0x4400] sm:$0xf]  ;;  %1272 = vst [vmem:[%s12594_s27 + $0x87c] sm:$0xf] %v1271_v31 }
 0x230   : > { %v1275_v33 = vld [vmem:[%s12589_s26 + $0x4420] sm:$0xf]  ;;  %1274 = vst [vmem:[%s12594_s27 + $0x880] sm:$0xf] %v1273_v32 }
 0x231   : > { %v1277_v34 = vld [vmem:[%s12589_s26 + $0x4440] sm:$0xf]  ;;  %1276 = vst [vmem:[%s12594_s27 + $0x884] sm:$0xf] %v1275_v33 }
 0x232   : > { %v1279_v35 = vld [vmem:[%s12589_s26 + $0x4460] sm:$0xf]  ;;  %1278 = vst [vmem:[%s12594_s27 + $0x888] sm:$0xf] %v1277_v34 }
 0x233   : > { %v1281_v36 = vld [vmem:[%s12589_s26 + $0x4480] sm:$0xf]  ;;  %1280 = vst [vmem:[%s12594_s27 + $0x88c] sm:$0xf] %v1279_v35 }
 0x234   : > { %v1283_v37 = vld [vmem:[%s12589_s26 + $0x44a0] sm:$0xf]  ;;  %1282 = vst [vmem:[%s12594_s27 + $0x890] sm:$0xf] %v1281_v36 }
 0x235   : > { %v1285_v38 = vld [vmem:[%s12589_s26 + $0x44c0] sm:$0xf]  ;;  %1284 = vst [vmem:[%s12594_s27 + $0x894] sm:$0xf] %v1283_v37 }
 0x236   : > { %v1287_v39 = vld [vmem:[%s12589_s26 + $0x44e0] sm:$0xf]  ;;  %1286 = vst [vmem:[%s12594_s27 + $0x898] sm:$0xf] %v1285_v38 }
 0x237   : > { %v1289_v40 = vld [vmem:[%s12589_s26 + $0x4500] sm:$0xf]  ;;  %1288 = vst [vmem:[%s12594_s27 + $0x89c] sm:$0xf] %v1287_v39 }
 0x238   : > { %v1291_v41 = vld [vmem:[%s12589_s26 + $0x4520] sm:$0xf]  ;;  %1290 = vst [vmem:[%s12594_s27 + $0x8a0] sm:$0xf] %v1289_v40 }
 0x239   : > { %v1293_v42 = vld [vmem:[%s12589_s26 + $0x4540] sm:$0xf]  ;;  %1292 = vst [vmem:[%s12594_s27 + $0x8a4] sm:$0xf] %v1291_v41 }
 0x23a   : > { %v1295_v43 = vld [vmem:[%s12589_s26 + $0x4560] sm:$0xf]  ;;  %1294 = vst [vmem:[%s12594_s27 + $0x8a8] sm:$0xf] %v1293_v42 }
 0x23b   : > { %v1297_v44 = vld [vmem:[%s12589_s26 + $0x4580] sm:$0xf]  ;;  %1296 = vst [vmem:[%s12594_s27 + $0x8ac] sm:$0xf] %v1295_v43 }
 0x23c   : > { %v1299_v45 = vld [vmem:[%s12589_s26 + $0x45a0] sm:$0xf]  ;;  %1298 = vst [vmem:[%s12594_s27 + $0x8b0] sm:$0xf] %v1297_v44 }
 0x23d   : > { %v1301_v46 = vld [vmem:[%s12589_s26 + $0x45c0] sm:$0xf]  ;;  %1300 = vst [vmem:[%s12594_s27 + $0x8b4] sm:$0xf] %v1299_v45 }
 0x23e   : > { %v1303_v47 = vld [vmem:[%s12589_s26 + $0x45e0] sm:$0xf]  ;;  %1302 = vst [vmem:[%s12594_s27 + $0x8b8] sm:$0xf] %v1301_v46 }
 0x23f   : > { %v1305_v48 = vld [vmem:[%s12589_s26 + $0x4600] sm:$0xf]  ;;  %1304 = vst [vmem:[%s12594_s27 + $0x8bc] sm:$0xf] %v1303_v47 }
 0x240   : > { %v1307_v49 = vld [vmem:[%s12589_s26 + $0x4620] sm:$0xf]  ;;  %1306 = vst [vmem:[%s12594_s27 + $0x8c0] sm:$0xf] %v1305_v48 }
 0x241   : > { %v1309_v50 = vld [vmem:[%s12589_s26 + $0x4640] sm:$0xf]  ;;  %1308 = vst [vmem:[%s12594_s27 + $0x8c4] sm:$0xf] %v1307_v49 }
 0x242   : > { %v1311_v51 = vld [vmem:[%s12589_s26 + $0x4660] sm:$0xf]  ;;  %1310 = vst [vmem:[%s12594_s27 + $0x8c8] sm:$0xf] %v1309_v50 }
 0x243   : > { %v1313_v52 = vld [vmem:[%s12589_s26 + $0x4680] sm:$0xf]  ;;  %1312 = vst [vmem:[%s12594_s27 + $0x8cc] sm:$0xf] %v1311_v51 }
 0x244   : > { %v1315_v53 = vld [vmem:[%s12589_s26 + $0x46a0] sm:$0xf]  ;;  %1314 = vst [vmem:[%s12594_s27 + $0x8d0] sm:$0xf] %v1313_v52 }
 0x245   : > { %v1317_v54 = vld [vmem:[%s12589_s26 + $0x46c0] sm:$0xf]  ;;  %1316 = vst [vmem:[%s12594_s27 + $0x8d4] sm:$0xf] %v1315_v53 }
 0x246   : > { %v1319_v55 = vld [vmem:[%s12589_s26 + $0x46e0] sm:$0xf]  ;;  %1318 = vst [vmem:[%s12594_s27 + $0x8d8] sm:$0xf] %v1317_v54 }
 0x247   : > { %v1321_v56 = vld [vmem:[%s12589_s26 + $0x4700] sm:$0xf]  ;;  %1320 = vst [vmem:[%s12594_s27 + $0x8dc] sm:$0xf] %v1319_v55 }
 0x248   : > { %v1323_v57 = vld [vmem:[%s12589_s26 + $0x4720] sm:$0xf]  ;;  %1322 = vst [vmem:[%s12594_s27 + $0x8e0] sm:$0xf] %v1321_v56 }
 0x249   : > { %v1325_v58 = vld [vmem:[%s12589_s26 + $0x4740] sm:$0xf]  ;;  %1324 = vst [vmem:[%s12594_s27 + $0x8e4] sm:$0xf] %v1323_v57 }
 0x24a   : > { %v1327_v59 = vld [vmem:[%s12589_s26 + $0x4760] sm:$0xf]  ;;  %1326 = vst [vmem:[%s12594_s27 + $0x8e8] sm:$0xf] %v1325_v58 }
 0x24b   : > { %v1329_v60 = vld [vmem:[%s12589_s26 + $0x4780] sm:$0xf]  ;;  %1328 = vst [vmem:[%s12594_s27 + $0x8ec] sm:$0xf] %v1327_v59 }
 0x24c   : > { %v1331_v61 = vld [vmem:[%s12589_s26 + $0x47a0] sm:$0xf]  ;;  %1330 = vst [vmem:[%s12594_s27 + $0x8f0] sm:$0xf] %v1329_v60 }
 0x24d   : > { %v1333_v62 = vld [vmem:[%s12589_s26 + $0x47c0] sm:$0xf]  ;;  %1332 = vst [vmem:[%s12594_s27 + $0x8f4] sm:$0xf] %v1331_v61 }
 0x24e   : > { %v1335_v63 = vld [vmem:[%s12589_s26 + $0x47e0] sm:$0xf]  ;;  %1334 = vst [vmem:[%s12594_s27 + $0x8f8] sm:$0xf] %v1333_v62 }
 0x24f   : > { %v1337_v0 = vld [vmem:[%s12589_s26 + $0x4800] sm:$0xf]  ;;  %1336 = vst [vmem:[%s12594_s27 + $0x8fc] sm:$0xf] %v1335_v63 }
 0x250   : > { %v1339_v1 = vld [vmem:[%s12589_s26 + $0x4820] sm:$0xf]  ;;  %1338 = vst [vmem:[%s12594_s27 + $0x900] sm:$0xf] %v1337_v0 }
 0x251   : > { %v1341_v2 = vld [vmem:[%s12589_s26 + $0x4840] sm:$0xf]  ;;  %1340 = vst [vmem:[%s12594_s27 + $0x904] sm:$0xf] %v1339_v1 }
 0x252   : > { %v1343_v3 = vld [vmem:[%s12589_s26 + $0x4860] sm:$0xf]  ;;  %1342 = vst [vmem:[%s12594_s27 + $0x908] sm:$0xf] %v1341_v2 }
 0x253   : > { %v1345_v4 = vld [vmem:[%s12589_s26 + $0x4880] sm:$0xf]  ;;  %1344 = vst [vmem:[%s12594_s27 + $0x90c] sm:$0xf] %v1343_v3 }
 0x254   : > { %v1347_v5 = vld [vmem:[%s12589_s26 + $0x48a0] sm:$0xf]  ;;  %1346 = vst [vmem:[%s12594_s27 + $0x910] sm:$0xf] %v1345_v4 }
 0x255   : > { %v1349_v6 = vld [vmem:[%s12589_s26 + $0x48c0] sm:$0xf]  ;;  %1348 = vst [vmem:[%s12594_s27 + $0x914] sm:$0xf] %v1347_v5 }
 0x256   : > { %v1351_v7 = vld [vmem:[%s12589_s26 + $0x48e0] sm:$0xf]  ;;  %1350 = vst [vmem:[%s12594_s27 + $0x918] sm:$0xf] %v1349_v6 }
 0x257   : > { %v1353_v8 = vld [vmem:[%s12589_s26 + $0x4900] sm:$0xf]  ;;  %1352 = vst [vmem:[%s12594_s27 + $0x91c] sm:$0xf] %v1351_v7 }
 0x258   : > { %v1355_v9 = vld [vmem:[%s12589_s26 + $0x4920] sm:$0xf]  ;;  %1354 = vst [vmem:[%s12594_s27 + $0x920] sm:$0xf] %v1353_v8 }
 0x259   : > { %v1357_v10 = vld [vmem:[%s12589_s26 + $0x4940] sm:$0xf]  ;;  %1356 = vst [vmem:[%s12594_s27 + $0x924] sm:$0xf] %v1355_v9 }
 0x25a   : > { %v1359_v11 = vld [vmem:[%s12589_s26 + $0x4960] sm:$0xf]  ;;  %1358 = vst [vmem:[%s12594_s27 + $0x928] sm:$0xf] %v1357_v10 }
 0x25b   : > { %v1361_v12 = vld [vmem:[%s12589_s26 + $0x4980] sm:$0xf]  ;;  %1360 = vst [vmem:[%s12594_s27 + $0x92c] sm:$0xf] %v1359_v11 }
 0x25c   : > { %v1363_v13 = vld [vmem:[%s12589_s26 + $0x49a0] sm:$0xf]  ;;  %1362 = vst [vmem:[%s12594_s27 + $0x930] sm:$0xf] %v1361_v12 }
 0x25d   : > { %v1365_v14 = vld [vmem:[%s12589_s26 + $0x49c0] sm:$0xf]  ;;  %1364 = vst [vmem:[%s12594_s27 + $0x934] sm:$0xf] %v1363_v13 }
 0x25e   : > { %v1367_v15 = vld [vmem:[%s12589_s26 + $0x49e0] sm:$0xf]  ;;  %1366 = vst [vmem:[%s12594_s27 + $0x938] sm:$0xf] %v1365_v14 }
 0x25f   : > { %v1369_v16 = vld [vmem:[%s12589_s26 + $0x4a00] sm:$0xf]  ;;  %1368 = vst [vmem:[%s12594_s27 + $0x93c] sm:$0xf] %v1367_v15 }
 0x260   : > { %v1371_v17 = vld [vmem:[%s12589_s26 + $0x4a20] sm:$0xf]  ;;  %1370 = vst [vmem:[%s12594_s27 + $0x940] sm:$0xf] %v1369_v16 }
 0x261   : > { %v1373_v18 = vld [vmem:[%s12589_s26 + $0x4a40] sm:$0xf]  ;;  %1372 = vst [vmem:[%s12594_s27 + $0x944] sm:$0xf] %v1371_v17 }
 0x262   : > { %v1375_v19 = vld [vmem:[%s12589_s26 + $0x4a60] sm:$0xf]  ;;  %1374 = vst [vmem:[%s12594_s27 + $0x948] sm:$0xf] %v1373_v18 }
 0x263   : > { %v1377_v20 = vld [vmem:[%s12589_s26 + $0x4a80] sm:$0xf]  ;;  %1376 = vst [vmem:[%s12594_s27 + $0x94c] sm:$0xf] %v1375_v19 }
 0x264   : > { %v1379_v21 = vld [vmem:[%s12589_s26 + $0x4aa0] sm:$0xf]  ;;  %1378 = vst [vmem:[%s12594_s27 + $0x950] sm:$0xf] %v1377_v20 }
 0x265   : > { %v1381_v22 = vld [vmem:[%s12589_s26 + $0x4ac0] sm:$0xf]  ;;  %1380 = vst [vmem:[%s12594_s27 + $0x954] sm:$0xf] %v1379_v21 }
 0x266   : > { %v1383_v23 = vld [vmem:[%s12589_s26 + $0x4ae0] sm:$0xf]  ;;  %1382 = vst [vmem:[%s12594_s27 + $0x958] sm:$0xf] %v1381_v22 }
 0x267   : > { %v1385_v24 = vld [vmem:[%s12589_s26 + $0x4b00] sm:$0xf]  ;;  %1384 = vst [vmem:[%s12594_s27 + $0x95c] sm:$0xf] %v1383_v23 }
 0x268   : > { %v1387_v25 = vld [vmem:[%s12589_s26 + $0x4b20] sm:$0xf]  ;;  %1386 = vst [vmem:[%s12594_s27 + $0x960] sm:$0xf] %v1385_v24 }
 0x269   : > { %v1389_v26 = vld [vmem:[%s12589_s26 + $0x4b40] sm:$0xf]  ;;  %1388 = vst [vmem:[%s12594_s27 + $0x964] sm:$0xf] %v1387_v25 }
 0x26a   : > { %v1391_v27 = vld [vmem:[%s12589_s26 + $0x4b60] sm:$0xf]  ;;  %1390 = vst [vmem:[%s12594_s27 + $0x968] sm:$0xf] %v1389_v26 }
 0x26b   : > { %v1393_v28 = vld [vmem:[%s12589_s26 + $0x4b80] sm:$0xf]  ;;  %1392 = vst [vmem:[%s12594_s27 + $0x96c] sm:$0xf] %v1391_v27 }
 0x26c   : > { %v1395_v29 = vld [vmem:[%s12589_s26 + $0x4ba0] sm:$0xf]  ;;  %1394 = vst [vmem:[%s12594_s27 + $0x970] sm:$0xf] %v1393_v28 }
 0x26d   : > { %v1397_v30 = vld [vmem:[%s12589_s26 + $0x4bc0] sm:$0xf]  ;;  %1396 = vst [vmem:[%s12594_s27 + $0x974] sm:$0xf] %v1395_v29 }
 0x26e   : > { %v1399_v31 = vld [vmem:[%s12589_s26 + $0x4be0] sm:$0xf]  ;;  %1398 = vst [vmem:[%s12594_s27 + $0x978] sm:$0xf] %v1397_v30 }
 0x26f   : > { %v1401_v32 = vld [vmem:[%s12589_s26 + $0x4c00] sm:$0xf]  ;;  %1400 = vst [vmem:[%s12594_s27 + $0x97c] sm:$0xf] %v1399_v31 }
 0x270   : > { %v1403_v33 = vld [vmem:[%s12589_s26 + $0x4c20] sm:$0xf]  ;;  %1402 = vst [vmem:[%s12594_s27 + $0x980] sm:$0xf] %v1401_v32 }
 0x271   : > { %v1405_v34 = vld [vmem:[%s12589_s26 + $0x4c40] sm:$0xf]  ;;  %1404 = vst [vmem:[%s12594_s27 + $0x984] sm:$0xf] %v1403_v33 }
 0x272   : > { %v1407_v35 = vld [vmem:[%s12589_s26 + $0x4c60] sm:$0xf]  ;;  %1406 = vst [vmem:[%s12594_s27 + $0x988] sm:$0xf] %v1405_v34 }
 0x273   : > { %v1409_v36 = vld [vmem:[%s12589_s26 + $0x4c80] sm:$0xf]  ;;  %1408 = vst [vmem:[%s12594_s27 + $0x98c] sm:$0xf] %v1407_v35 }
 0x274   : > { %v1411_v37 = vld [vmem:[%s12589_s26 + $0x4ca0] sm:$0xf]  ;;  %1410 = vst [vmem:[%s12594_s27 + $0x990] sm:$0xf] %v1409_v36 }
 0x275   : > { %v1413_v38 = vld [vmem:[%s12589_s26 + $0x4cc0] sm:$0xf]  ;;  %1412 = vst [vmem:[%s12594_s27 + $0x994] sm:$0xf] %v1411_v37 }
 0x276   : > { %v1415_v39 = vld [vmem:[%s12589_s26 + $0x4ce0] sm:$0xf]  ;;  %1414 = vst [vmem:[%s12594_s27 + $0x998] sm:$0xf] %v1413_v38 }
 0x277   : > { %v1417_v40 = vld [vmem:[%s12589_s26 + $0x4d00] sm:$0xf]  ;;  %1416 = vst [vmem:[%s12594_s27 + $0x99c] sm:$0xf] %v1415_v39 }
 0x278   : > { %v1419_v41 = vld [vmem:[%s12589_s26 + $0x4d20] sm:$0xf]  ;;  %1418 = vst [vmem:[%s12594_s27 + $0x9a0] sm:$0xf] %v1417_v40 }
 0x279   : > { %v1421_v42 = vld [vmem:[%s12589_s26 + $0x4d40] sm:$0xf]  ;;  %1420 = vst [vmem:[%s12594_s27 + $0x9a4] sm:$0xf] %v1419_v41 }
 0x27a   : > { %v1423_v43 = vld [vmem:[%s12589_s26 + $0x4d60] sm:$0xf]  ;;  %1422 = vst [vmem:[%s12594_s27 + $0x9a8] sm:$0xf] %v1421_v42 }
 0x27b   : > { %v1425_v44 = vld [vmem:[%s12589_s26 + $0x4d80] sm:$0xf]  ;;  %1424 = vst [vmem:[%s12594_s27 + $0x9ac] sm:$0xf] %v1423_v43 }
 0x27c   : > { %v1427_v45 = vld [vmem:[%s12589_s26 + $0x4da0] sm:$0xf]  ;;  %1426 = vst [vmem:[%s12594_s27 + $0x9b0] sm:$0xf] %v1425_v44 }
 0x27d   : > { %v1429_v46 = vld [vmem:[%s12589_s26 + $0x4dc0] sm:$0xf]  ;;  %1428 = vst [vmem:[%s12594_s27 + $0x9b4] sm:$0xf] %v1427_v45 }
 0x27e   : > { %v1431_v47 = vld [vmem:[%s12589_s26 + $0x4de0] sm:$0xf]  ;;  %1430 = vst [vmem:[%s12594_s27 + $0x9b8] sm:$0xf] %v1429_v46 }
 0x27f   : > { %v1433_v48 = vld [vmem:[%s12589_s26 + $0x4e00] sm:$0xf]  ;;  %1432 = vst [vmem:[%s12594_s27 + $0x9bc] sm:$0xf] %v1431_v47 }
 0x280   : > { %v1435_v49 = vld [vmem:[%s12589_s26 + $0x4e20] sm:$0xf]  ;;  %1434 = vst [vmem:[%s12594_s27 + $0x9c0] sm:$0xf] %v1433_v48 }
 0x281   : > { %v1437_v50 = vld [vmem:[%s12589_s26 + $0x4e40] sm:$0xf]  ;;  %1436 = vst [vmem:[%s12594_s27 + $0x9c4] sm:$0xf] %v1435_v49 }
 0x282   : > { %v1439_v51 = vld [vmem:[%s12589_s26 + $0x4e60] sm:$0xf]  ;;  %1438 = vst [vmem:[%s12594_s27 + $0x9c8] sm:$0xf] %v1437_v50 }
 0x283   : > { %v1441_v52 = vld [vmem:[%s12589_s26 + $0x4e80] sm:$0xf]  ;;  %1440 = vst [vmem:[%s12594_s27 + $0x9cc] sm:$0xf] %v1439_v51 }
 0x284   : > { %v1443_v53 = vld [vmem:[%s12589_s26 + $0x4ea0] sm:$0xf]  ;;  %1442 = vst [vmem:[%s12594_s27 + $0x9d0] sm:$0xf] %v1441_v52 }
 0x285   : > { %v1445_v54 = vld [vmem:[%s12589_s26 + $0x4ec0] sm:$0xf]  ;;  %1444 = vst [vmem:[%s12594_s27 + $0x9d4] sm:$0xf] %v1443_v53 }
 0x286   : > { %v1447_v55 = vld [vmem:[%s12589_s26 + $0x4ee0] sm:$0xf]  ;;  %1446 = vst [vmem:[%s12594_s27 + $0x9d8] sm:$0xf] %v1445_v54 }
 0x287   : > { %v1449_v56 = vld [vmem:[%s12589_s26 + $0x4f00] sm:$0xf]  ;;  %1448 = vst [vmem:[%s12594_s27 + $0x9dc] sm:$0xf] %v1447_v55 }
 0x288   : > { %v1451_v57 = vld [vmem:[%s12589_s26 + $0x4f20] sm:$0xf]  ;;  %1450 = vst [vmem:[%s12594_s27 + $0x9e0] sm:$0xf] %v1449_v56 }
 0x289   : > { %v1453_v58 = vld [vmem:[%s12589_s26 + $0x4f40] sm:$0xf]  ;;  %1452 = vst [vmem:[%s12594_s27 + $0x9e4] sm:$0xf] %v1451_v57 }
 0x28a   : > { %v1455_v59 = vld [vmem:[%s12589_s26 + $0x4f60] sm:$0xf]  ;;  %1454 = vst [vmem:[%s12594_s27 + $0x9e8] sm:$0xf] %v1453_v58 }
 0x28b   : > { %v1457_v60 = vld [vmem:[%s12589_s26 + $0x4f80] sm:$0xf]  ;;  %1456 = vst [vmem:[%s12594_s27 + $0x9ec] sm:$0xf] %v1455_v59 }
 0x28c   : > { %v1459_v61 = vld [vmem:[%s12589_s26 + $0x4fa0] sm:$0xf]  ;;  %1458 = vst [vmem:[%s12594_s27 + $0x9f0] sm:$0xf] %v1457_v60 }
 0x28d   : > { %v1461_v62 = vld [vmem:[%s12589_s26 + $0x4fc0] sm:$0xf]  ;;  %1460 = vst [vmem:[%s12594_s27 + $0x9f4] sm:$0xf] %v1459_v61 }
 0x28e   : > { %v1463_v63 = vld [vmem:[%s12589_s26 + $0x4fe0] sm:$0xf]  ;;  %1462 = vst [vmem:[%s12594_s27 + $0x9f8] sm:$0xf] %v1461_v62 }
 0x28f   : > { %v1465_v0 = vld [vmem:[%s12589_s26 + $0x5000] sm:$0xf]  ;;  %1464 = vst [vmem:[%s12594_s27 + $0x9fc] sm:$0xf] %v1463_v63 }
 0x290   : > { %v1467_v1 = vld [vmem:[%s12589_s26 + $0x5020] sm:$0xf]  ;;  %1466 = vst [vmem:[%s12594_s27 + $0xa00] sm:$0xf] %v1465_v0 }
 0x291   : > { %v1469_v2 = vld [vmem:[%s12589_s26 + $0x5040] sm:$0xf]  ;;  %1468 = vst [vmem:[%s12594_s27 + $0xa04] sm:$0xf] %v1467_v1 }
 0x292   : > { %v1471_v3 = vld [vmem:[%s12589_s26 + $0x5060] sm:$0xf]  ;;  %1470 = vst [vmem:[%s12594_s27 + $0xa08] sm:$0xf] %v1469_v2 }
 0x293   : > { %v1473_v4 = vld [vmem:[%s12589_s26 + $0x5080] sm:$0xf]  ;;  %1472 = vst [vmem:[%s12594_s27 + $0xa0c] sm:$0xf] %v1471_v3 }
 0x294   : > { %v1475_v5 = vld [vmem:[%s12589_s26 + $0x50a0] sm:$0xf]  ;;  %1474 = vst [vmem:[%s12594_s27 + $0xa10] sm:$0xf] %v1473_v4 }
 0x295   : > { %v1477_v6 = vld [vmem:[%s12589_s26 + $0x50c0] sm:$0xf]  ;;  %1476 = vst [vmem:[%s12594_s27 + $0xa14] sm:$0xf] %v1475_v5 }
 0x296   : > { %v1479_v7 = vld [vmem:[%s12589_s26 + $0x50e0] sm:$0xf]  ;;  %1478 = vst [vmem:[%s12594_s27 + $0xa18] sm:$0xf] %v1477_v6 }
 0x297   : > { %v1481_v8 = vld [vmem:[%s12589_s26 + $0x5100] sm:$0xf]  ;;  %1480 = vst [vmem:[%s12594_s27 + $0xa1c] sm:$0xf] %v1479_v7 }
 0x298   : > { %v1483_v9 = vld [vmem:[%s12589_s26 + $0x5120] sm:$0xf]  ;;  %1482 = vst [vmem:[%s12594_s27 + $0xa20] sm:$0xf] %v1481_v8 }
 0x299   : > { %v1485_v10 = vld [vmem:[%s12589_s26 + $0x5140] sm:$0xf]  ;;  %1484 = vst [vmem:[%s12594_s27 + $0xa24] sm:$0xf] %v1483_v9 }
 0x29a   : > { %v1487_v11 = vld [vmem:[%s12589_s26 + $0x5160] sm:$0xf]  ;;  %1486 = vst [vmem:[%s12594_s27 + $0xa28] sm:$0xf] %v1485_v10 }
 0x29b   : > { %v1489_v12 = vld [vmem:[%s12589_s26 + $0x5180] sm:$0xf]  ;;  %1488 = vst [vmem:[%s12594_s27 + $0xa2c] sm:$0xf] %v1487_v11 }
 0x29c   : > { %v1491_v13 = vld [vmem:[%s12589_s26 + $0x51a0] sm:$0xf]  ;;  %1490 = vst [vmem:[%s12594_s27 + $0xa30] sm:$0xf] %v1489_v12 }
 0x29d   : > { %v1493_v14 = vld [vmem:[%s12589_s26 + $0x51c0] sm:$0xf]  ;;  %1492 = vst [vmem:[%s12594_s27 + $0xa34] sm:$0xf] %v1491_v13 }
 0x29e   : > { %v1495_v15 = vld [vmem:[%s12589_s26 + $0x51e0] sm:$0xf]  ;;  %1494 = vst [vmem:[%s12594_s27 + $0xa38] sm:$0xf] %v1493_v14 }
 0x29f   : > { %v1497_v16 = vld [vmem:[%s12589_s26 + $0x5200] sm:$0xf]  ;;  %1496 = vst [vmem:[%s12594_s27 + $0xa3c] sm:$0xf] %v1495_v15 }
 0x2a0   : > { %v1499_v17 = vld [vmem:[%s12589_s26 + $0x5220] sm:$0xf]  ;;  %1498 = vst [vmem:[%s12594_s27 + $0xa40] sm:$0xf] %v1497_v16 }
 0x2a1   : > { %v1501_v18 = vld [vmem:[%s12589_s26 + $0x5240] sm:$0xf]  ;;  %1500 = vst [vmem:[%s12594_s27 + $0xa44] sm:$0xf] %v1499_v17 }
 0x2a2   : > { %v1503_v19 = vld [vmem:[%s12589_s26 + $0x5260] sm:$0xf]  ;;  %1502 = vst [vmem:[%s12594_s27 + $0xa48] sm:$0xf] %v1501_v18 }
 0x2a3   : > { %v1505_v20 = vld [vmem:[%s12589_s26 + $0x5280] sm:$0xf]  ;;  %1504 = vst [vmem:[%s12594_s27 + $0xa4c] sm:$0xf] %v1503_v19 }
 0x2a4   : > { %v1507_v21 = vld [vmem:[%s12589_s26 + $0x52a0] sm:$0xf]  ;;  %1506 = vst [vmem:[%s12594_s27 + $0xa50] sm:$0xf] %v1505_v20 }
 0x2a5   : > { %v1509_v22 = vld [vmem:[%s12589_s26 + $0x52c0] sm:$0xf]  ;;  %1508 = vst [vmem:[%s12594_s27 + $0xa54] sm:$0xf] %v1507_v21 }
 0x2a6   : > { %v1511_v23 = vld [vmem:[%s12589_s26 + $0x52e0] sm:$0xf]  ;;  %1510 = vst [vmem:[%s12594_s27 + $0xa58] sm:$0xf] %v1509_v22 }
 0x2a7   : > { %v1513_v24 = vld [vmem:[%s12589_s26 + $0x5300] sm:$0xf]  ;;  %1512 = vst [vmem:[%s12594_s27 + $0xa5c] sm:$0xf] %v1511_v23 }
 0x2a8   : > { %v1515_v25 = vld [vmem:[%s12589_s26 + $0x5320] sm:$0xf]  ;;  %1514 = vst [vmem:[%s12594_s27 + $0xa60] sm:$0xf] %v1513_v24 }
 0x2a9   : > { %v1517_v26 = vld [vmem:[%s12589_s26 + $0x5340] sm:$0xf]  ;;  %1516 = vst [vmem:[%s12594_s27 + $0xa64] sm:$0xf] %v1515_v25 }
 0x2aa   : > { %v1519_v27 = vld [vmem:[%s12589_s26 + $0x5360] sm:$0xf]  ;;  %1518 = vst [vmem:[%s12594_s27 + $0xa68] sm:$0xf] %v1517_v26 }
 0x2ab   : > { %v1521_v28 = vld [vmem:[%s12589_s26 + $0x5380] sm:$0xf]  ;;  %1520 = vst [vmem:[%s12594_s27 + $0xa6c] sm:$0xf] %v1519_v27 }
 0x2ac   : > { %v1523_v29 = vld [vmem:[%s12589_s26 + $0x53a0] sm:$0xf]  ;;  %1522 = vst [vmem:[%s12594_s27 + $0xa70] sm:$0xf] %v1521_v28 }
 0x2ad   : > { %v1525_v30 = vld [vmem:[%s12589_s26 + $0x53c0] sm:$0xf]  ;;  %1524 = vst [vmem:[%s12594_s27 + $0xa74] sm:$0xf] %v1523_v29 }
 0x2ae   : > { %v1527_v31 = vld [vmem:[%s12589_s26 + $0x53e0] sm:$0xf]  ;;  %1526 = vst [vmem:[%s12594_s27 + $0xa78] sm:$0xf] %v1525_v30 }
 0x2af   : > { %v1529_v32 = vld [vmem:[%s12589_s26 + $0x5400] sm:$0xf]  ;;  %1528 = vst [vmem:[%s12594_s27 + $0xa7c] sm:$0xf] %v1527_v31 }
 0x2b0   : > { %v1531_v33 = vld [vmem:[%s12589_s26 + $0x5420] sm:$0xf]  ;;  %1530 = vst [vmem:[%s12594_s27 + $0xa80] sm:$0xf] %v1529_v32 }
 0x2b1   : > { %v1533_v34 = vld [vmem:[%s12589_s26 + $0x5440] sm:$0xf]  ;;  %1532 = vst [vmem:[%s12594_s27 + $0xa84] sm:$0xf] %v1531_v33 }
 0x2b2   : > { %v1535_v35 = vld [vmem:[%s12589_s26 + $0x5460] sm:$0xf]  ;;  %1534 = vst [vmem:[%s12594_s27 + $0xa88] sm:$0xf] %v1533_v34 }
 0x2b3   : > { %v1537_v36 = vld [vmem:[%s12589_s26 + $0x5480] sm:$0xf]  ;;  %1536 = vst [vmem:[%s12594_s27 + $0xa8c] sm:$0xf] %v1535_v35 }
 0x2b4   : > { %v1539_v37 = vld [vmem:[%s12589_s26 + $0x54a0] sm:$0xf]  ;;  %1538 = vst [vmem:[%s12594_s27 + $0xa90] sm:$0xf] %v1537_v36 }
 0x2b5   : > { %v1541_v38 = vld [vmem:[%s12589_s26 + $0x54c0] sm:$0xf]  ;;  %1540 = vst [vmem:[%s12594_s27 + $0xa94] sm:$0xf] %v1539_v37 }
 0x2b6   : > { %v1543_v39 = vld [vmem:[%s12589_s26 + $0x54e0] sm:$0xf]  ;;  %1542 = vst [vmem:[%s12594_s27 + $0xa98] sm:$0xf] %v1541_v38 }
 0x2b7   : > { %v1545_v40 = vld [vmem:[%s12589_s26 + $0x5500] sm:$0xf]  ;;  %1544 = vst [vmem:[%s12594_s27 + $0xa9c] sm:$0xf] %v1543_v39 }
 0x2b8   : > { %v1547_v41 = vld [vmem:[%s12589_s26 + $0x5520] sm:$0xf]  ;;  %1546 = vst [vmem:[%s12594_s27 + $0xaa0] sm:$0xf] %v1545_v40 }
 0x2b9   : > { %v1549_v42 = vld [vmem:[%s12589_s26 + $0x5540] sm:$0xf]  ;;  %1548 = vst [vmem:[%s12594_s27 + $0xaa4] sm:$0xf] %v1547_v41 }
 0x2ba   : > { %v1551_v43 = vld [vmem:[%s12589_s26 + $0x5560] sm:$0xf]  ;;  %1550 = vst [vmem:[%s12594_s27 + $0xaa8] sm:$0xf] %v1549_v42 }
 0x2bb   : > { %v1553_v44 = vld [vmem:[%s12589_s26 + $0x5580] sm:$0xf]  ;;  %1552 = vst [vmem:[%s12594_s27 + $0xaac] sm:$0xf] %v1551_v43 }
 0x2bc   : > { %v1555_v45 = vld [vmem:[%s12589_s26 + $0x55a0] sm:$0xf]  ;;  %1554 = vst [vmem:[%s12594_s27 + $0xab0] sm:$0xf] %v1553_v44 }
 0x2bd   : > { %v1557_v46 = vld [vmem:[%s12589_s26 + $0x55c0] sm:$0xf]  ;;  %1556 = vst [vmem:[%s12594_s27 + $0xab4] sm:$0xf] %v1555_v45 }
 0x2be   : > { %v1559_v47 = vld [vmem:[%s12589_s26 + $0x55e0] sm:$0xf]  ;;  %1558 = vst [vmem:[%s12594_s27 + $0xab8] sm:$0xf] %v1557_v46 }
 0x2bf   : > { %v1561_v48 = vld [vmem:[%s12589_s26 + $0x5600] sm:$0xf]  ;;  %1560 = vst [vmem:[%s12594_s27 + $0xabc] sm:$0xf] %v1559_v47 }
 0x2c0   : > { %v1563_v49 = vld [vmem:[%s12589_s26 + $0x5620] sm:$0xf]  ;;  %1562 = vst [vmem:[%s12594_s27 + $0xac0] sm:$0xf] %v1561_v48 }
 0x2c1   : > { %v1565_v50 = vld [vmem:[%s12589_s26 + $0x5640] sm:$0xf]  ;;  %1564 = vst [vmem:[%s12594_s27 + $0xac4] sm:$0xf] %v1563_v49 }
 0x2c2   : > { %v1567_v51 = vld [vmem:[%s12589_s26 + $0x5660] sm:$0xf]  ;;  %1566 = vst [vmem:[%s12594_s27 + $0xac8] sm:$0xf] %v1565_v50 }
 0x2c3   : > { %v1569_v52 = vld [vmem:[%s12589_s26 + $0x5680] sm:$0xf]  ;;  %1568 = vst [vmem:[%s12594_s27 + $0xacc] sm:$0xf] %v1567_v51 }
 0x2c4   : > { %v1571_v53 = vld [vmem:[%s12589_s26 + $0x56a0] sm:$0xf]  ;;  %1570 = vst [vmem:[%s12594_s27 + $0xad0] sm:$0xf] %v1569_v52 }
 0x2c5   : > { %v1573_v54 = vld [vmem:[%s12589_s26 + $0x56c0] sm:$0xf]  ;;  %1572 = vst [vmem:[%s12594_s27 + $0xad4] sm:$0xf] %v1571_v53 }
 0x2c6   : > { %v1575_v55 = vld [vmem:[%s12589_s26 + $0x56e0] sm:$0xf]  ;;  %1574 = vst [vmem:[%s12594_s27 + $0xad8] sm:$0xf] %v1573_v54 }
 0x2c7   : > { %v1577_v56 = vld [vmem:[%s12589_s26 + $0x5700] sm:$0xf]  ;;  %1576 = vst [vmem:[%s12594_s27 + $0xadc] sm:$0xf] %v1575_v55 }
 0x2c8   : > { %v1579_v57 = vld [vmem:[%s12589_s26 + $0x5720] sm:$0xf]  ;;  %1578 = vst [vmem:[%s12594_s27 + $0xae0] sm:$0xf] %v1577_v56 }
 0x2c9   : > { %v1581_v58 = vld [vmem:[%s12589_s26 + $0x5740] sm:$0xf]  ;;  %1580 = vst [vmem:[%s12594_s27 + $0xae4] sm:$0xf] %v1579_v57 }
 0x2ca   : > { %v1583_v59 = vld [vmem:[%s12589_s26 + $0x5760] sm:$0xf]  ;;  %1582 = vst [vmem:[%s12594_s27 + $0xae8] sm:$0xf] %v1581_v58 }
 0x2cb   : > { %v1585_v60 = vld [vmem:[%s12589_s26 + $0x5780] sm:$0xf]  ;;  %1584 = vst [vmem:[%s12594_s27 + $0xaec] sm:$0xf] %v1583_v59 }
 0x2cc   : > { %v1587_v61 = vld [vmem:[%s12589_s26 + $0x57a0] sm:$0xf]  ;;  %1586 = vst [vmem:[%s12594_s27 + $0xaf0] sm:$0xf] %v1585_v60 }
 0x2cd   : > { %v1589_v62 = vld [vmem:[%s12589_s26 + $0x57c0] sm:$0xf]  ;;  %1588 = vst [vmem:[%s12594_s27 + $0xaf4] sm:$0xf] %v1587_v61 }
 0x2ce   : > { %v1591_v63 = vld [vmem:[%s12589_s26 + $0x57e0] sm:$0xf]  ;;  %1590 = vst [vmem:[%s12594_s27 + $0xaf8] sm:$0xf] %v1589_v62 }
 0x2cf   : > { %v1593_v0 = vld [vmem:[%s12589_s26 + $0x5800] sm:$0xf]  ;;  %1592 = vst [vmem:[%s12594_s27 + $0xafc] sm:$0xf] %v1591_v63 }
 0x2d0   : > { %v1595_v1 = vld [vmem:[%s12589_s26 + $0x5820] sm:$0xf]  ;;  %1594 = vst [vmem:[%s12594_s27 + $0xb00] sm:$0xf] %v1593_v0 }
 0x2d1   : > { %v1597_v2 = vld [vmem:[%s12589_s26 + $0x5840] sm:$0xf]  ;;  %1596 = vst [vmem:[%s12594_s27 + $0xb04] sm:$0xf] %v1595_v1 }
 0x2d2   : > { %v1599_v3 = vld [vmem:[%s12589_s26 + $0x5860] sm:$0xf]  ;;  %1598 = vst [vmem:[%s12594_s27 + $0xb08] sm:$0xf] %v1597_v2 }
 0x2d3   : > { %v1601_v4 = vld [vmem:[%s12589_s26 + $0x5880] sm:$0xf]  ;;  %1600 = vst [vmem:[%s12594_s27 + $0xb0c] sm:$0xf] %v1599_v3 }
 0x2d4   : > { %v1603_v5 = vld [vmem:[%s12589_s26 + $0x58a0] sm:$0xf]  ;;  %1602 = vst [vmem:[%s12594_s27 + $0xb10] sm:$0xf] %v1601_v4 }
 0x2d5   : > { %v1605_v6 = vld [vmem:[%s12589_s26 + $0x58c0] sm:$0xf]  ;;  %1604 = vst [vmem:[%s12594_s27 + $0xb14] sm:$0xf] %v1603_v5 }
 0x2d6   : > { %v1607_v7 = vld [vmem:[%s12589_s26 + $0x58e0] sm:$0xf]  ;;  %1606 = vst [vmem:[%s12594_s27 + $0xb18] sm:$0xf] %v1605_v6 }
 0x2d7   : > { %v1609_v8 = vld [vmem:[%s12589_s26 + $0x5900] sm:$0xf]  ;;  %1608 = vst [vmem:[%s12594_s27 + $0xb1c] sm:$0xf] %v1607_v7 }
 0x2d8   : > { %v1611_v9 = vld [vmem:[%s12589_s26 + $0x5920] sm:$0xf]  ;;  %1610 = vst [vmem:[%s12594_s27 + $0xb20] sm:$0xf] %v1609_v8 }
 0x2d9   : > { %v1613_v10 = vld [vmem:[%s12589_s26 + $0x5940] sm:$0xf]  ;;  %1612 = vst [vmem:[%s12594_s27 + $0xb24] sm:$0xf] %v1611_v9 }
 0x2da   : > { %v1615_v11 = vld [vmem:[%s12589_s26 + $0x5960] sm:$0xf]  ;;  %1614 = vst [vmem:[%s12594_s27 + $0xb28] sm:$0xf] %v1613_v10 }
 0x2db   : > { %v1617_v12 = vld [vmem:[%s12589_s26 + $0x5980] sm:$0xf]  ;;  %1616 = vst [vmem:[%s12594_s27 + $0xb2c] sm:$0xf] %v1615_v11 }
 0x2dc   : > { %v1619_v13 = vld [vmem:[%s12589_s26 + $0x59a0] sm:$0xf]  ;;  %1618 = vst [vmem:[%s12594_s27 + $0xb30] sm:$0xf] %v1617_v12 }
 0x2dd   : > { %v1621_v14 = vld [vmem:[%s12589_s26 + $0x59c0] sm:$0xf]  ;;  %1620 = vst [vmem:[%s12594_s27 + $0xb34] sm:$0xf] %v1619_v13 }
 0x2de   : > { %v1623_v15 = vld [vmem:[%s12589_s26 + $0x59e0] sm:$0xf]  ;;  %1622 = vst [vmem:[%s12594_s27 + $0xb38] sm:$0xf] %v1621_v14 }
 0x2df   : > { %v1625_v16 = vld [vmem:[%s12589_s26 + $0x5a00] sm:$0xf]  ;;  %1624 = vst [vmem:[%s12594_s27 + $0xb3c] sm:$0xf] %v1623_v15 }
 0x2e0   : > { %v1627_v17 = vld [vmem:[%s12589_s26 + $0x5a20] sm:$0xf]  ;;  %1626 = vst [vmem:[%s12594_s27 + $0xb40] sm:$0xf] %v1625_v16 }
 0x2e1   : > { %v1629_v18 = vld [vmem:[%s12589_s26 + $0x5a40] sm:$0xf]  ;;  %1628 = vst [vmem:[%s12594_s27 + $0xb44] sm:$0xf] %v1627_v17 }
 0x2e2   : > { %v1631_v19 = vld [vmem:[%s12589_s26 + $0x5a60] sm:$0xf]  ;;  %1630 = vst [vmem:[%s12594_s27 + $0xb48] sm:$0xf] %v1629_v18 }
 0x2e3   : > { %v1633_v20 = vld [vmem:[%s12589_s26 + $0x5a80] sm:$0xf]  ;;  %1632 = vst [vmem:[%s12594_s27 + $0xb4c] sm:$0xf] %v1631_v19 }
 0x2e4   : > { %v1635_v21 = vld [vmem:[%s12589_s26 + $0x5aa0] sm:$0xf]  ;;  %1634 = vst [vmem:[%s12594_s27 + $0xb50] sm:$0xf] %v1633_v20 }
 0x2e5   : > { %v1637_v22 = vld [vmem:[%s12589_s26 + $0x5ac0] sm:$0xf]  ;;  %1636 = vst [vmem:[%s12594_s27 + $0xb54] sm:$0xf] %v1635_v21 }
 0x2e6   : > { %v1639_v23 = vld [vmem:[%s12589_s26 + $0x5ae0] sm:$0xf]  ;;  %1638 = vst [vmem:[%s12594_s27 + $0xb58] sm:$0xf] %v1637_v22 }
 0x2e7   : > { %v1641_v24 = vld [vmem:[%s12589_s26 + $0x5b00] sm:$0xf]  ;;  %1640 = vst [vmem:[%s12594_s27 + $0xb5c] sm:$0xf] %v1639_v23 }
 0x2e8   : > { %v1643_v25 = vld [vmem:[%s12589_s26 + $0x5b20] sm:$0xf]  ;;  %1642 = vst [vmem:[%s12594_s27 + $0xb60] sm:$0xf] %v1641_v24 }
 0x2e9   : > { %v1645_v26 = vld [vmem:[%s12589_s26 + $0x5b40] sm:$0xf]  ;;  %1644 = vst [vmem:[%s12594_s27 + $0xb64] sm:$0xf] %v1643_v25 }
 0x2ea   : > { %v1647_v27 = vld [vmem:[%s12589_s26 + $0x5b60] sm:$0xf]  ;;  %1646 = vst [vmem:[%s12594_s27 + $0xb68] sm:$0xf] %v1645_v26 }
 0x2eb   : > { %v1649_v28 = vld [vmem:[%s12589_s26 + $0x5b80] sm:$0xf]  ;;  %1648 = vst [vmem:[%s12594_s27 + $0xb6c] sm:$0xf] %v1647_v27 }
 0x2ec   : > { %v1651_v29 = vld [vmem:[%s12589_s26 + $0x5ba0] sm:$0xf]  ;;  %1650 = vst [vmem:[%s12594_s27 + $0xb70] sm:$0xf] %v1649_v28 }
 0x2ed   : > { %v1653_v30 = vld [vmem:[%s12589_s26 + $0x5bc0] sm:$0xf]  ;;  %1652 = vst [vmem:[%s12594_s27 + $0xb74] sm:$0xf] %v1651_v29 }
 0x2ee   : > { %v1655_v31 = vld [vmem:[%s12589_s26 + $0x5be0] sm:$0xf]  ;;  %1654 = vst [vmem:[%s12594_s27 + $0xb78] sm:$0xf] %v1653_v30 }
 0x2ef   : > { %v1657_v32 = vld [vmem:[%s12589_s26 + $0x5c00] sm:$0xf]  ;;  %1656 = vst [vmem:[%s12594_s27 + $0xb7c] sm:$0xf] %v1655_v31 }
 0x2f0   : > { %v1659_v33 = vld [vmem:[%s12589_s26 + $0x5c20] sm:$0xf]  ;;  %1658 = vst [vmem:[%s12594_s27 + $0xb80] sm:$0xf] %v1657_v32 }
 0x2f1   : > { %v1661_v34 = vld [vmem:[%s12589_s26 + $0x5c40] sm:$0xf]  ;;  %1660 = vst [vmem:[%s12594_s27 + $0xb84] sm:$0xf] %v1659_v33 }
 0x2f2   : > { %v1663_v35 = vld [vmem:[%s12589_s26 + $0x5c60] sm:$0xf]  ;;  %1662 = vst [vmem:[%s12594_s27 + $0xb88] sm:$0xf] %v1661_v34 }
 0x2f3   : > { %v1665_v36 = vld [vmem:[%s12589_s26 + $0x5c80] sm:$0xf]  ;;  %1664 = vst [vmem:[%s12594_s27 + $0xb8c] sm:$0xf] %v1663_v35 }
 0x2f4   : > { %v1667_v37 = vld [vmem:[%s12589_s26 + $0x5ca0] sm:$0xf]  ;;  %1666 = vst [vmem:[%s12594_s27 + $0xb90] sm:$0xf] %v1665_v36 }
 0x2f5   : > { %v1669_v38 = vld [vmem:[%s12589_s26 + $0x5cc0] sm:$0xf]  ;;  %1668 = vst [vmem:[%s12594_s27 + $0xb94] sm:$0xf] %v1667_v37 }
 0x2f6   : > { %v1671_v39 = vld [vmem:[%s12589_s26 + $0x5ce0] sm:$0xf]  ;;  %1670 = vst [vmem:[%s12594_s27 + $0xb98] sm:$0xf] %v1669_v38 }
 0x2f7   : > { %v1673_v40 = vld [vmem:[%s12589_s26 + $0x5d00] sm:$0xf]  ;;  %1672 = vst [vmem:[%s12594_s27 + $0xb9c] sm:$0xf] %v1671_v39 }
 0x2f8   : > { %v1675_v41 = vld [vmem:[%s12589_s26 + $0x5d20] sm:$0xf]  ;;  %1674 = vst [vmem:[%s12594_s27 + $0xba0] sm:$0xf] %v1673_v40 }
 0x2f9   : > { %v1677_v42 = vld [vmem:[%s12589_s26 + $0x5d40] sm:$0xf]  ;;  %1676 = vst [vmem:[%s12594_s27 + $0xba4] sm:$0xf] %v1675_v41 }
 0x2fa   : > { %v1679_v43 = vld [vmem:[%s12589_s26 + $0x5d60] sm:$0xf]  ;;  %1678 = vst [vmem:[%s12594_s27 + $0xba8] sm:$0xf] %v1677_v42 }
 0x2fb   : > { %v1681_v44 = vld [vmem:[%s12589_s26 + $0x5d80] sm:$0xf]  ;;  %1680 = vst [vmem:[%s12594_s27 + $0xbac] sm:$0xf] %v1679_v43 }
 0x2fc   : > { %v1683_v45 = vld [vmem:[%s12589_s26 + $0x5da0] sm:$0xf]  ;;  %1682 = vst [vmem:[%s12594_s27 + $0xbb0] sm:$0xf] %v1681_v44 }
 0x2fd   : > { %v1685_v46 = vld [vmem:[%s12589_s26 + $0x5dc0] sm:$0xf]  ;;  %1684 = vst [vmem:[%s12594_s27 + $0xbb4] sm:$0xf] %v1683_v45 }
 0x2fe   : > { %v1687_v47 = vld [vmem:[%s12589_s26 + $0x5de0] sm:$0xf]  ;;  %1686 = vst [vmem:[%s12594_s27 + $0xbb8] sm:$0xf] %v1685_v46 }
 0x2ff   : > { %v1689_v48 = vld [vmem:[%s12589_s26 + $0x5e00] sm:$0xf]  ;;  %1688 = vst [vmem:[%s12594_s27 + $0xbbc] sm:$0xf] %v1687_v47 }
 0x300   : > { %v1691_v49 = vld [vmem:[%s12589_s26 + $0x5e20] sm:$0xf]  ;;  %1690 = vst [vmem:[%s12594_s27 + $0xbc0] sm:$0xf] %v1689_v48 }
 0x301   : > { %v1693_v50 = vld [vmem:[%s12589_s26 + $0x5e40] sm:$0xf]  ;;  %1692 = vst [vmem:[%s12594_s27 + $0xbc4] sm:$0xf] %v1691_v49 }
 0x302   : > { %v1695_v51 = vld [vmem:[%s12589_s26 + $0x5e60] sm:$0xf]  ;;  %1694 = vst [vmem:[%s12594_s27 + $0xbc8] sm:$0xf] %v1693_v50 }
 0x303   : > { %v1697_v52 = vld [vmem:[%s12589_s26 + $0x5e80] sm:$0xf]  ;;  %1696 = vst [vmem:[%s12594_s27 + $0xbcc] sm:$0xf] %v1695_v51 }
 0x304   : > { %v1699_v53 = vld [vmem:[%s12589_s26 + $0x5ea0] sm:$0xf]  ;;  %1698 = vst [vmem:[%s12594_s27 + $0xbd0] sm:$0xf] %v1697_v52 }
 0x305   : > { %v1701_v54 = vld [vmem:[%s12589_s26 + $0x5ec0] sm:$0xf]  ;;  %1700 = vst [vmem:[%s12594_s27 + $0xbd4] sm:$0xf] %v1699_v53 }
 0x306   : > { %v1703_v55 = vld [vmem:[%s12589_s26 + $0x5ee0] sm:$0xf]  ;;  %1702 = vst [vmem:[%s12594_s27 + $0xbd8] sm:$0xf] %v1701_v54 }
 0x307   : > { %v1705_v56 = vld [vmem:[%s12589_s26 + $0x5f00] sm:$0xf]  ;;  %1704 = vst [vmem:[%s12594_s27 + $0xbdc] sm:$0xf] %v1703_v55 }
 0x308   : > { %v1707_v57 = vld [vmem:[%s12589_s26 + $0x5f20] sm:$0xf]  ;;  %1706 = vst [vmem:[%s12594_s27 + $0xbe0] sm:$0xf] %v1705_v56 }
 0x309   : > { %v1709_v58 = vld [vmem:[%s12589_s26 + $0x5f40] sm:$0xf]  ;;  %1708 = vst [vmem:[%s12594_s27 + $0xbe4] sm:$0xf] %v1707_v57 }
 0x30a   : > { %v1711_v59 = vld [vmem:[%s12589_s26 + $0x5f60] sm:$0xf]  ;;  %1710 = vst [vmem:[%s12594_s27 + $0xbe8] sm:$0xf] %v1709_v58 }
 0x30b   : > { %v1713_v60 = vld [vmem:[%s12589_s26 + $0x5f80] sm:$0xf]  ;;  %1712 = vst [vmem:[%s12594_s27 + $0xbec] sm:$0xf] %v1711_v59 }
 0x30c   : > { %v1715_v61 = vld [vmem:[%s12589_s26 + $0x5fa0] sm:$0xf]  ;;  %1714 = vst [vmem:[%s12594_s27 + $0xbf0] sm:$0xf] %v1713_v60 }
 0x30d   : > { %v1717_v62 = vld [vmem:[%s12589_s26 + $0x5fc0] sm:$0xf]  ;;  %1716 = vst [vmem:[%s12594_s27 + $0xbf4] sm:$0xf] %v1715_v61 }
 0x30e   : > { %v1719_v63 = vld [vmem:[%s12589_s26 + $0x5fe0] sm:$0xf]  ;;  %1718 = vst [vmem:[%s12594_s27 + $0xbf8] sm:$0xf] %v1717_v62 }
 0x30f   : > { %v1721_v0 = vld [vmem:[%s12589_s26 + $0x6000] sm:$0xf]  ;;  %1720 = vst [vmem:[%s12594_s27 + $0xbfc] sm:$0xf] %v1719_v63 }
 0x310   : > { %v1723_v1 = vld [vmem:[%s12589_s26 + $0x6020] sm:$0xf]  ;;  %1722 = vst [vmem:[%s12594_s27 + $0xc00] sm:$0xf] %v1721_v0 }
 0x311   : > { %1724 = vst [vmem:[%s12594_s27 + $0xc04] sm:$0xf] %v1723_v1 }
 0x312 PF: > { %p10513_p6 = scmp.ge.s32.totalorder %s12524_s16, 1  ;;  %p6403_p7 = scmp.lt.s32.totalorder %s12524_s16, 9 }
 0x314   : > { %p6404_p8 = pnand %p10513_p6, %p6403_p7 }
 0x315   : > { %s6410_s28 = sand.u32 (!%p6404_p8), 1, %s12508_s12   ;;  %p6455_p9 = scmp.lt.s32.totalorder (!%p6404_p8), %s12516_s14, 7 }
 0x316   : > { %6407 = sbr.rel (%p6404_p8) target bundleno = 1329 (0x531), region = 80 }
 0x317   : > { %s12444_s29 = smul.u32 (!%p6404_p8), 3080, %s6410_s28 }
 0x319   : > { %s14136_s30 = scalar_lea.vmem (!%p6404_p8), [#allocation2], %s12444_s29 }
 0x31b   : > { %v12065_v2 = vld [vmem:[%s14136_s30 + $0x38] sm:$0xff]  ;;  %v12064_v6 = vld [vmem:[%s14136_s30 + $0x30] sm:$0xff]  ;;  %v12063_v10 = vld [vmem:[%s14136_s30 + $0x28] sm:$0xff]  ;;  %s14671_s14 = smov (!%p6455_p9, %s12516_s14), 7  ;;  %vm9740_vm0 = vcmask 130048  }
 0x31c   : > { %v12081_v3 = vld [vmem:[%s14136_s30 + $0xb8] sm:$0xff]  ;;  %9744 = vmatpush.bf16.msra.mxu0 %v12065_v2  ;;  %v12080_v7 = vld [vmem:[%s14136_s30 + $0xb0] sm:$0xff]  ;;  %v12079_v11 = vld [vmem:[%s14136_s30 + $0xa8] sm:$0xff]  ;;  %s6459_s19 = scalar_lea.vmem %s14662_s2, %s14671_s14 }
 0x31d   : > { %v12073_v4 = vld [vmem:[%s14136_s30 + $0x78] sm:$0xff]  ;;  %9770 = vmatpush.bf16.msra.mxu2 %v12081_v3  ;;  %v12072_v8 = vld [vmem:[%s14136_s30 + $0x70] sm:$0xff]  ;;  %v12071_v12 = vld [vmem:[%s14136_s30 + $0x68] sm:$0xff] }
 0x31e   : > { %v12089_v5 = vld [vmem:[%s14136_s30 + $0xf8] sm:$0xff]  ;;  %9757 = vmatpush.bf16.msra.mxu1 %v12073_v4  ;;  %v12088_v9 = vld [vmem:[%s14136_s30 + $0xf0] sm:$0xff]  ;;  %v12087_v13 = vld [vmem:[%s14136_s30 + $0xe8] sm:$0xff] }
 0x31f   : > { %9783 = vmatpush.bf16.msra.mxu3 %v12089_v5  ;;  %v12062_v14 = vld [vmem:[%s14136_s30 + $0x20] sm:$0xff]  ;;  %v12061_v18 = vld [vmem:[%s14136_s30 + $0x18] sm:$0xff]  ;;  %v12060_v23 = vld [vmem:[%s14136_s30 + $0x10] sm:$0xff] }
 0x320   : > { %9745 = vmatpush.bf16.msra.mxu0 %v12064_v6  ;;  %v12078_v15 = vld [vmem:[%s14136_s30 + $0xa0] sm:$0xff]  ;;  %v12077_v19 = vld [vmem:[%s14136_s30 + $0x98] sm:$0xff]  ;;  %v12076_v24 = vld [vmem:[%s14136_s30 + $0x90] sm:$0xff] }
 0x321   : > { %9771 = vmatpush.bf16.msra.mxu2 %v12080_v7  ;;  %v12070_v16 = vld [vmem:[%s14136_s30 + $0x60] sm:$0xff]  ;;  %v12069_v20 = vld [vmem:[%s14136_s30 + $0x58] sm:$0xff]  ;;  %v12068_v25 = vld [vmem:[%s14136_s30 + $0x50] sm:$0xff] }
 0x322   : > { %9758 = vmatpush.bf16.msra.mxu1 %v12072_v8  ;;  %v12086_v17 = vld [vmem:[%s14136_s30 + $0xe0] sm:$0xff]  ;;  %v12085_v21 = vld [vmem:[%s14136_s30 + $0xd8] sm:$0xff]  ;;  %v12084_v26 = vld [vmem:[%s14136_s30 + $0xd0] sm:$0xff] }
 0x323   : > { %9784 = vmatpush.bf16.msra.mxu3 %v12088_v9  ;;  %v6469_v22 = vld [vmem:[%s14660_s0] sm:$0xff]  ;;  %v12059_v27 = vld [vmem:[%s14136_s30 + $0x8] sm:$0xff]  ;;  %v6470_v31 = vld [vmem:[%s14660_s0 + $0x8] sm:$0xff] }
 0x324   : > { %9746 = vmatpush.bf16.msra.mxu0 %v12063_v10  ;;  %7265 = vst [vmem:[#allocation1] ss:$4 sm:$0xff] %v6469_v22  ;;  %v12075_v28 = vld [vmem:[%s14136_s30 + $0x88] sm:$0xff]  ;;  %v12058_v32 = vld [vmem:[%s14136_s30] sm:$0xff]  ;;  %v12097_v39 = vld [vmem:[%s14136_s30 + $0x138] sm:$0xff] }
 0x325   : > { %9772 = vmatpush.bf16.msra.mxu2 %v12079_v11  ;;  %v12067_v29 = vld [vmem:[%s14136_s30 + $0x48] sm:$0xff]  ;;  %v12074_v33 = vld [vmem:[%s14136_s30 + $0x80] sm:$0xff]  ;;  %7267 = vst [vmem:[#allocation1 + $0x20] ss:$4 sm:$0xff] %v6470_v31  ;;  %v12113_v40 = vld [vmem:[%s14136_s30 + $0x1b8] sm:$0xff] }
 0x326   : > { %9759 = vmatpush.bf16.msra.mxu1 %v12071_v12  ;;  %v12083_v30 = vld [vmem:[%s14136_s30 + $0xc8] sm:$0xff]  ;;  %v12066_v41 = vld [vmem:[%s14136_s30 + $0x40] sm:$0xff]  ;;  %v12105_v43 = vld [vmem:[%s14136_s30 + $0x178] sm:$0xff] }
 0x327   : > { %9785 = vmatpush.bf16.msra.mxu3 %v12087_v13  ;;  %v6471_v34 = vld [vmem:[%s14660_s0 + $0x10] sm:$0xff]  ;;  %v12121_v44 = vld [vmem:[%s14136_s30 + $0x1f8] sm:$0xff]  ;;  %v12096_v47 = vld [vmem:[%s14136_s30 + $0x130] sm:$0xff] }
 0x328   : > { %9747 = vmatpush.bf16.msra.mxu0 %v12062_v14  ;;  %v12082_v42 = vld [vmem:[%s14136_s30 + $0xc0] sm:$0xff]  ;;  %v12112_v48 = vld [vmem:[%s14136_s30 + $0x1b0] sm:$0xff]  ;;  %v12095_v53 = vld [vmem:[%s14136_s30 + $0x128] sm:$0xff] }
 0x329   : > { %9773 = vmatpush.bf16.msra.mxu2 %v12078_v15  ;;  %v12104_v51 = vld [vmem:[%s14136_s30 + $0x170] sm:$0xff]  ;;  %v12111_v54 = vld [vmem:[%s14136_s30 + $0x1a8] sm:$0xff]  ;;  %v12094_v62 = vld [vmem:[%s14136_s30 + $0x120] sm:$0xff] }
 0x32a   : > { %9760 = vmatpush.bf16.msra.mxu1 %v12070_v16  ;;  %v12120_v52 = vld [vmem:[%s14136_s30 + $0x1f0] sm:$0xff]  ;;  %v12103_v60 = vld [vmem:[%s14136_s30 + $0x168] sm:$0xff]  ;;  %v12110_v63 = vld [vmem:[%s14136_s30 + $0x1a0] sm:$0xff] }
 0x32b   : > { %9786 = vmatpush.bf16.msra.mxu3 %v12086_v17  ;;  %v7270_v35 = vld.sshfl [vmem:[#allocation1 + $0x10] sm:$0xff pattern:$0x73625140]  ;;  %v7268_v36 = vld.sshfl [vmem:[#allocation1] sm:$0xff pattern:$0x73625140] }
 0x32c   : > { %9748 = vmatpush.bf16.msra.mxu0 %v12061_v18  ;;  %v7271_v37 = vld.sshfl [vmem:[#allocation1 + $0x18] sm:$0xff pattern:$0x73625140]  ;;  %v7269_v38 = vld.sshfl [vmem:[#allocation1 + $0x8] sm:$0xff pattern:$0x73625140]  ;;  %v7379_v45 = vpack.c.bf16 %v7270_v35, %v7270_v35  ;;  %v7377_v46 = vpack.c.bf16 %v7268_v36, %v7268_v36 }
 0x32d   : > { %9774 = vmatpush.bf16.msra.mxu2 %v12077_v19  ;;  %7276 = vst [vmem:[#allocation1] ss:$4 sm:$0xff] %v6471_v34  ;;  %v7380_v49 = vpack.c.bf16 %v7271_v37, %v7271_v37  ;;  %v7378_v50 = vpack.c.bf16 %v7269_v38, %v7269_v38  ;;  %v14189_v55 = vld.sshfl [vmem:[#allocation1 + $0x30] sm:$0xff pattern:$0x73625140]  ;;  %v6472_v58 = vld [vmem:[%s14660_s0 + $0x18] sm:$0xff] }
 0x32e   : > { %9761 = vmatpush.bf16.msra.mxu1 %v12069_v20  ;;  %v14191_v56 = vld.sshfl [vmem:[#allocation1 + $0x20] sm:$0xff pattern:$0x73625140]  ;;  %v14193_v57 = vld.sshfl [vmem:[#allocation1 + $0x38] sm:$0xff pattern:$0x73625140] }
 0x32f   : > { %9787 = vmatpush.bf16.msra.mxu3 %v12085_v21  ;;  %v14198_v59 = vld.sshfl [vmem:[#allocation1 + $0x28] sm:$0xff pattern:$0x73625140]  ;;  %v12119_v61 = vld [vmem:[%s14136_s30 + $0x1e8] sm:$0xff]  ;;  %v12092_v6 = vld [vmem:[%s14136_s30 + $0x110] sm:$0xff] }
 0x330   : > { %9749 = vmatpush.bf16.msra.mxu0 %v12060_v23  ;;  %7277 = vst [vmem:[#allocation1 + $0x20] ss:$4 sm:$0xff] %v6472_v58  ;;  %v12102_v0 = vld [vmem:[%s14136_s30 + $0x160] sm:$0xff]  ;;  %v12093_v2 = vld [vmem:[%s14136_s30 + $0x118] sm:$0xff]  ;;  %v12108_v7 = vld [vmem:[%s14136_s30 + $0x190] sm:$0xff] }
 0x331   : > { %9775 = vmatpush.bf16.msra.mxu2 %v12076_v24  ;;  %v12118_v1 = vld [vmem:[%s14136_s30 + $0x1e0] sm:$0xff]  ;;  %v12109_v3 = vld [vmem:[%s14136_s30 + $0x198] sm:$0xff]  ;;  %v12100_v8 = vld [vmem:[%s14136_s30 + $0x150] sm:$0xff]  ;;  %v7383_v24 = vpack.c.bf16 %v14189_v55, %v14189_v55 }
 0x332   : > { %9762 = vmatpush.bf16.msra.mxu1 %v12068_v25  ;;  %v12101_v4 = vld [vmem:[%s14136_s30 + $0x158] sm:$0xff]  ;;  %v12116_v9 = vld [vmem:[%s14136_s30 + $0x1d0] sm:$0xff]  ;;  %v12091_v10 = vld [vmem:[%s14136_s30 + $0x108] sm:$0xff]  ;;  %v7381_v25 = vpack.c.bf16 %v14191_v56, %v14191_v56 }
 0x333   : > { %9788 = vmatpush.bf16.msra.mxu3 %v12084_v26  ;;  %v12117_v5 = vld [vmem:[%s14136_s30 + $0x1d8] sm:$0xff]  ;;  %v12107_v11 = vld [vmem:[%s14136_s30 + $0x188] sm:$0xff]  ;;  %v12090_v14 = vld [vmem:[%s14136_s30 + $0x100] sm:$0xff] }
 0x334   : > { %9750 = vmatpush.bf16.msra.mxu0 %v12059_v27  ;;  %v12099_v12 = vld [vmem:[%s14136_s30 + $0x148] sm:$0xff]  ;;  %v12106_v15 = vld [vmem:[%s14136_s30 + $0x180] sm:$0xff]  ;;  %v12129_v16 = vld [vmem:[%s14136_s30 + $0x238] sm:$0xff] }
 0x335   : > { %9776 = vmatpush.bf16.msra.mxu2 %v12075_v28  ;;  %v12115_v13 = vld [vmem:[%s14136_s30 + $0x1c8] sm:$0xff]  ;;  %v12145_v17 = vld [vmem:[%s14136_s30 + $0x2b8] sm:$0xff]  ;;  %v12098_v18 = vld [vmem:[%s14136_s30 + $0x140] sm:$0xff] }
 0x336   : > { %9763 = vmatpush.bf16.msra.mxu1 %v12067_v29  ;;  %v12114_v19 = vld [vmem:[%s14136_s30 + $0x1c0] sm:$0xff]  ;;  %v12137_v20 = vld [vmem:[%s14136_s30 + $0x278] sm:$0xff]  ;;  %v12128_v22 = vld [vmem:[%s14136_s30 + $0x230] sm:$0xff]  ;;  %v7384_v29 = vpack.c.bf16 %v14193_v57, %v14193_v57 }
 0x337   : > { %9789 = vmatpush.bf16.msra.mxu3 %v12083_v30  ;;  %v12153_v21 = vld [vmem:[%s14136_s30 + $0x2f8] sm:$0xff]  ;;  %v12144_v23 = vld [vmem:[%s14136_s30 + $0x2b0] sm:$0xff]  ;;  %v14242_v27 = vld.sshfl [vmem:[#allocation1 + $0x10] sm:$0xff pattern:$0x73625140]  ;;  %v7382_v30 = vpack.c.bf16 %v14198_v59, %v14198_v59 }
 0x338   : > { %9751 = vmatpush.bf16.msra.mxu0 %v12058_v32  ;;  %v14240_v26 = vld.sshfl [vmem:[#allocation1] sm:$0xff pattern:$0x73625140]  ;;  %v14244_v28 = vld.sshfl [vmem:[#allocation1 + $0x8] sm:$0xff pattern:$0x73625140] }
 0x339   : > { %9777 = vmatpush.bf16.msra.mxu2 %v12074_v33  ;;  %v6473_v31 = vld [vmem:[%s14660_s0 + $0x20] sm:$0xff]  ;;  %v14253_v32 = vld.sshfl [vmem:[#allocation1 + $0x18] sm:$0xff pattern:$0x73625140]  ;;  %v12122_v55 = vld [vmem:[%s14136_s30 + $0x200] sm:$0xff] }
 0x33a   : > { %9764 = vmatpush.bf16.msra.mxu1 %v12066_v41  ;;  %v12136_v33 = vld [vmem:[%s14136_s30 + $0x270] sm:$0xff]  ;;  %7286 = vst [vmem:[#allocation1] ss:$4 sm:$0xff] %v6473_v31  ;;  %v12127_v35 = vld [vmem:[%s14136_s30 + $0x228] sm:$0xff]  ;;  %v12134_v41 = vld [vmem:[%s14136_s30 + $0x260] sm:$0xff] }
 0x33b   : > { %9790 = vmatpush.bf16.msra.mxu3 %v12082_v42  ;;  %9752 = vmatmul.bf16.vlgmr.msra.gmra.mxu0 %v7377_v46  ;;  %v12152_v34 = vld [vmem:[%s14136_s30 + $0x2f0] sm:$0xff]  ;;  %v12143_v36 = vld [vmem:[%s14136_s30 + $0x2a8] sm:$0xff]  ;;  %v12150_v42 = vld [vmem:[%s14136_s30 + $0x2e0] sm:$0xff] }
 0x33c   : > { %9796 = vmatpush.bf16.msrb.mxu0 %v12097_v39  ;;  %9778 = vmatmul.bf16.vlgmr.msra.gmra.mxu2 %v7379_v45  ;;  %v12135_v37 = vld [vmem:[%s14136_s30 + $0x268] sm:$0xff]  ;;  %v12126_v39 = vld [vmem:[%s14136_s30 + $0x220] sm:$0xff]  ;;  %v12133_v45 = vld [vmem:[%s14136_s30 + $0x258] sm:$0xff] }
 0x33d   : > { %9822 = vmatpush.bf16.msrb.mxu2 %v12113_v40  ;;  %9765 = vmatmul.bf16.vlgmr.msra.gmra.mxu1 %v7378_v50  ;;  %v12151_v38 = vld [vmem:[%s14136_s30 + $0x2e8] sm:$0xff]  ;;  %v12142_v40 = vld [vmem:[%s14136_s30 + $0x2a0] sm:$0xff]  ;;  %v12149_v46 = vld [vmem:[%s14136_s30 + $0x2d8] sm:$0xff] }
 0x33e   : > { %9809 = vmatpush.bf16.msrb.mxu1 %v12105_v43  ;;  %9791 = vmatmul.bf16.vlgmr.msra.gmra.mxu3 %v7380_v49  ;;  %v12125_v43 = vld [vmem:[%s14136_s30 + $0x218] sm:$0xff]  ;;  %v12132_v49 = vld [vmem:[%s14136_s30 + $0x250] sm:$0xff]  ;;  %v12138_v56 = vld [vmem:[%s14136_s30 + $0x280] sm:$0xff] }
 0x33f   : > { %9835 = vmatpush.bf16.msrb.mxu3 %v12121_v44  ;;  %v12141_v44 = vld [vmem:[%s14136_s30 + $0x298] sm:$0xff]  ;;  %v12148_v50 = vld [vmem:[%s14136_s30 + $0x2d0] sm:$0xff]  ;;  %v12130_v59 = vld [vmem:[%s14136_s30 + $0x240] sm:$0xff] }
 0x340   : > { %9797 = vmatpush.bf16.msrb.mxu0 %v12096_v47  ;;  %v12124_v47 = vld [vmem:[%s14136_s30 + $0x210] sm:$0xff]  ;;  %v12161_v57 = vld [vmem:[%s14136_s30 + $0x338] sm:$0xff]  ;;  %v12179_v31 = vld [vmem:[%s14136_s30 + $0x3c8] sm:$0xff] }
 0x341   : > { %9823 = vmatpush.bf16.msrb.mxu2 %v12112_v48  ;;  %v12140_v48 = vld [vmem:[%s14136_s30 + $0x290] sm:$0xff]  ;;  %v12177_v58 = vld [vmem:[%s14136_s30 + $0x3b8] sm:$0xff] }
 0x342   : > { %9810 = vmatpush.bf16.msrb.mxu1 %v12104_v51  ;;  %v12123_v51 = vld [vmem:[%s14136_s30 + $0x208] sm:$0xff] }
 0x343   : > { %9836 = vmatpush.bf16.msrb.mxu3 %v12120_v52  ;;  %v12139_v52 = vld [vmem:[%s14136_s30 + $0x288] sm:$0xff] }
 0x344   : > { %9798 = vmatpush.bf16.msrb.mxu0 %v12095_v53  ;;  %v12131_v53 = vld [vmem:[%s14136_s30 + $0x248] sm:$0xff] }
 0x345   : > { %9824 = vmatpush.bf16.msrb.mxu2 %v12111_v54  ;;  %v12147_v54 = vld [vmem:[%s14136_s30 + $0x2c8] sm:$0xff] }
 0x346   : > { %9811 = vmatpush.bf16.msrb.mxu1 %v12103_v60  ;;  %v12146_v60 = vld [vmem:[%s14136_s30 + $0x2c0] sm:$0xff] }
 0x347   : > { %9837 = vmatpush.bf16.msrb.mxu3 %v12119_v61  ;;  %v7385_v61 = vpack.c.bf16 %v14240_v26, %v14240_v26  ;;  %v12164_v26 = vld [vmem:[%s14136_s30 + $0x350] sm:$0xff] }
 0x348   : > { %9799 = vmatpush.bf16.msrb.mxu0 %v12094_v62  ;;  %v7387_v62 = vpack.c.bf16 %v14242_v27, %v14242_v27  ;;  %v12180_v27 = vld [vmem:[%s14136_s30 + $0x3d0] sm:$0xff] }
 0x349   : > { %9825 = vmatpush.bf16.msrb.mxu2 %v12110_v63  ;;  %v12169_v63 = vld [vmem:[%s14136_s30 + $0x378] sm:$0xff] }
 0x34a   : > { %9812 = vmatpush.bf16.msrb.mxu1 %v12102_v0  ;;  %v12185_v0 = vld [vmem:[%s14136_s30 + $0x3f8] sm:$0xff] }
 0x34b   : > { %9838 = vmatpush.bf16.msrb.mxu3 %v12118_v1  ;;  %v7386_v1 = vpack.c.bf16 %v14244_v28, %v14244_v28  ;;  %v12155_v28 = vld [vmem:[%s14136_s30 + $0x308] sm:$0xff] }
 0x34c   : > { %9800 = vmatpush.bf16.msrb.mxu0 %v12093_v2  ;;  %v7388_v2 = vpack.c.bf16 %v14253_v32, %v14253_v32  ;;  %v12154_v32 = vld [vmem:[%s14136_s30 + $0x300] sm:$0xff] }
 0x34d   : > { %9826 = vmatpush.bf16.msrb.mxu2 %v12109_v3  ;;  %v12160_v3 = vld [vmem:[%s14136_s30 + $0x330] sm:$0xff] }
 0x34e   : > { %9813 = vmatpush.bf16.msrb.mxu1 %v12101_v4  ;;  %v12176_v4 = vld [vmem:[%s14136_s30 + $0x3b0] sm:$0xff] }
 0x34f   : > { %9839 = vmatpush.bf16.msrb.mxu3 %v12117_v5  ;;  %v14295_v5 = vld.sshfl [vmem:[#allocation1 + $0x20] sm:$0xff pattern:$0x73625140] }
 0x350   : > { %9801 = vmatpush.bf16.msrb.mxu0 %v12092_v6  ;;  %v14297_v6 = vld.sshfl [vmem:[#allocation1 + $0x30] sm:$0xff pattern:$0x73625140] }
 0x351   : > { %9827 = vmatpush.bf16.msrb.mxu2 %v12108_v7  ;;  %v14299_v7 = vld.sshfl [vmem:[#allocation1 + $0x28] sm:$0xff pattern:$0x73625140] }
 0x352   : > { %9814 = vmatpush.bf16.msrb.mxu1 %v12100_v8  ;;  %v6474_v8 = vld [vmem:[%s14660_s0 + $0x28] sm:$0xff] }
 0x353   : > { %9840 = vmatpush.bf16.msrb.mxu3 %v12116_v9  ;;  %v14304_v9 = vld.sshfl [vmem:[#allocation1 + $0x38] sm:$0xff pattern:$0x73625140] }
 0x354   : > { %9802 = vmatpush.bf16.msrb.mxu0 %v12091_v10  ;;  %v12168_v10 = vld [vmem:[%s14136_s30 + $0x370] sm:$0xff]  ;;  %7287 = vst [vmem:[#allocation1 + $0x20] ss:$4 sm:$0xff] %v6474_v8  ;;  %v7290_v8 = vld.sshfl [vmem:[#allocation1 + $0x10] sm:$0xff pattern:$0x73625140] }
 0x355   : > { %9828 = vmatpush.bf16.msrb.mxu2 %v12107_v11  ;;  %v12184_v11 = vld [vmem:[%s14136_s30 + $0x3f0] sm:$0xff] }
 0x356   : > { %9815 = vmatpush.bf16.msrb.mxu1 %v12099_v12  ;;  %v12159_v12 = vld [vmem:[%s14136_s30 + $0x328] sm:$0xff] }
 0x357   : > { %9841 = vmatpush.bf16.msrb.mxu3 %v12115_v13  ;;  %v12175_v13 = vld [vmem:[%s14136_s30 + $0x3a8] sm:$0xff] }
 0x358   : > { %9803 = vmatpush.bf16.msrb.mxu0 %v12090_v14  ;;  %v12167_v14 = vld [vmem:[%s14136_s30 + $0x368] sm:$0xff] }
 0x359   : > { %9829 = vmatpush.bf16.msrb.mxu2 %v12106_v15  ;;  %v12183_v15 = vld [vmem:[%s14136_s30 + $0x3e8] sm:$0xff] }
 0x35a   : > { %9816 = vmatpush.bf16.msrb.mxu1 %v12098_v18  ;;  %v12166_v18 = vld [vmem:[%s14136_s30 + $0x360] sm:$0xff] }
 0x35b   : > { %9842 = vmatpush.bf16.msrb.mxu3 %v12114_v19  ;;  %9804 = vmatmul.bf16.vlgmr.msrb.gmra.mxu0 %v7381_v25  ;;  %v12182_v19 = vld [vmem:[%s14136_s30 + $0x3e0] sm:$0xff]  ;;  %v12172_v25 = vld [vmem:[%s14136_s30 + $0x390] sm:$0xff] }
 0x35c   : > { %9848 = vmatpush.bf16.msra.mxu0 %v12129_v16  ;;  %9830 = vmatmul.bf16.vlgmr.msrb.gmra.mxu2 %v7383_v24  ;;  %v12158_v16 = vld [vmem:[%s14136_s30 + $0x320] sm:$0xff]  ;;  %v12156_v24 = vld [vmem:[%s14136_s30 + $0x310] sm:$0xff] }
 0x35d   : > { %9874 = vmatpush.bf16.msra.mxu2 %v12145_v17  ;;  %9817 = vmatmul.bf16.vlgmr.msrb.gmra.mxu1 %v7382_v30  ;;  %v12174_v17 = vld [vmem:[%s14136_s30 + $0x3a0] sm:$0xff]  ;;  %v12163_v30 = vld [vmem:[%s14136_s30 + $0x348] sm:$0xff] }
 0x35e   : > { %9861 = vmatpush.bf16.msra.mxu1 %v12137_v20  ;;  %9843 = vmatmul.bf16.vlgmr.msrb.gmra.mxu3 %v7384_v29  ;;  %v12157_v20 = vld [vmem:[%s14136_s30 + $0x318] sm:$0xff]  ;;  %v12171_v29 = vld [vmem:[%s14136_s30 + $0x388] sm:$0xff] }
 0x35f   : > { %9887 = vmatpush.bf16.msra.mxu3 %v12153_v21  ;;  %v12173_v21 = vld [vmem:[%s14136_s30 + $0x398] sm:$0xff] }
 0x360   : > { %9849 = vmatpush.bf16.msra.mxu0 %v12128_v22  ;;  %v12165_v22 = vld [vmem:[%s14136_s30 + $0x358] sm:$0xff] }
 0x361   : > { %9875 = vmatpush.bf16.msra.mxu2 %v12144_v23  ;;  %v12181_v23 = vld [vmem:[%s14136_s30 + $0x3d8] sm:$0xff] }
 0x362   : > { %9862 = vmatpush.bf16.msra.mxu1 %v12136_v33  ;;  %v12170_v33 = vld [vmem:[%s14136_s30 + $0x380] sm:$0xff] }
 0x363   : > { %9888 = vmatpush.bf16.msra.mxu3 %v12152_v34  ;;  %v12193_v34 = vld [vmem:[%s14136_s30 + $0x438] sm:$0xff] }
 0x364   : > { %9850 = vmatpush.bf16.msra.mxu0 %v12127_v35  ;;  %v12209_v35 = vld [vmem:[%s14136_s30 + $0x4b8] sm:$0xff] }
 0x365   : > { %9876 = vmatpush.bf16.msra.mxu2 %v12143_v36  ;;  %v12162_v36 = vld [vmem:[%s14136_s30 + $0x340] sm:$0xff] }
 0x366   : > { %9863 = vmatpush.bf16.msra.mxu1 %v12135_v37  ;;  %v12178_v37 = vld [vmem:[%s14136_s30 + $0x3c0] sm:$0xff] }
 0x367   : > { %9889 = vmatpush.bf16.msra.mxu3 %v12151_v38  ;;  %v7389_v38 = vpack.c.bf16 %v14295_v5, %v14295_v5  ;;  %v12202_v5 = vld [vmem:[%s14136_s30 + $0x480] sm:$0xff] }
 0x368   : > { %9851 = vmatpush.bf16.msra.mxu0 %v12126_v39  ;;  %v7391_v39 = vpack.c.bf16 %v14297_v6, %v14297_v6  ;;  %v12225_v6 = vld [vmem:[%s14136_s30 + $0x538] sm:$0xff] }
 0x369   : > { %9877 = vmatpush.bf16.msra.mxu2 %v12142_v40  ;;  %v12201_v40 = vld [vmem:[%s14136_s30 + $0x478] sm:$0xff] }
 0x36a   : > { %9864 = vmatpush.bf16.msra.mxu1 %v12134_v41  ;;  %v12217_v41 = vld [vmem:[%s14136_s30 + $0x4f8] sm:$0xff] }
 0x36b   : > { %9890 = vmatpush.bf16.msra.mxu3 %v12150_v42  ;;  %v7390_v42 = vpack.c.bf16 %v14299_v7, %v14299_v7  ;;  %v7288_v7 = vld.sshfl [vmem:[#allocation1] sm:$0xff pattern:$0x73625140] }
 0x36c   : > { %9852 = vmatpush.bf16.msra.mxu0 %v12125_v43  ;;  %v7392_v43 = vpack.c.bf16 %v14304_v9, %v14304_v9  ;;  %v12241_v9 = vld [vmem:[%s14136_s30 + $0x5b8] sm:$0xff] }
 0x36d   : > { %9878 = vmatpush.bf16.msra.mxu2 %v12141_v44  ;;  %v12192_v44 = vld [vmem:[%s14136_s30 + $0x430] sm:$0xff] }
 0x36e   : > { %9865 = vmatpush.bf16.msra.mxu1 %v12133_v45  ;;  %v12208_v45 = vld [vmem:[%s14136_s30 + $0x4b0] sm:$0xff] }
 0x36f   : > { %9891 = vmatpush.bf16.msra.mxu3 %v12149_v46  ;;  %v12200_v46 = vld [vmem:[%s14136_s30 + $0x470] sm:$0xff] }
 0x370   : > { %9853 = vmatpush.bf16.msra.mxu0 %v12124_v47  ;;  %v12216_v47 = vld [vmem:[%s14136_s30 + $0x4f0] sm:$0xff] }
 0x371   : > { %9879 = vmatpush.bf16.msra.mxu2 %v12140_v48  ;;  %v12191_v48 = vld [vmem:[%s14136_s30 + $0x428] sm:$0xff] }
 0x372   : > { %9866 = vmatpush.bf16.msra.mxu1 %v12132_v49  ;;  %v12207_v49 = vld [vmem:[%s14136_s30 + $0x4a8] sm:$0xff] }
 0x373   : > { %9892 = vmatpush.bf16.msra.mxu3 %v12148_v50  ;;  %v12199_v50 = vld [vmem:[%s14136_s30 + $0x468] sm:$0xff] }
 0x374   : > { %9854 = vmatpush.bf16.msra.mxu0 %v12123_v51  ;;  %v12215_v51 = vld [vmem:[%s14136_s30 + $0x4e8] sm:$0xff] }
 0x375   : > { %9880 = vmatpush.bf16.msra.mxu2 %v12139_v52  ;;  %v12190_v52 = vld [vmem:[%s14136_s30 + $0x420] sm:$0xff] }
 0x376   : > { %9867 = vmatpush.bf16.msra.mxu1 %v12131_v53  ;;  %v12206_v53 = vld [vmem:[%s14136_s30 + $0x4a0] sm:$0xff] }
 0x377   : > { %9893 = vmatpush.bf16.msra.mxu3 %v12147_v54  ;;  %v12198_v54 = vld [vmem:[%s14136_s30 + $0x460] sm:$0xff] }
 0x378   : > { %9855 = vmatpush.bf16.msra.mxu0 %v12122_v55  ;;  %v12214_v55 = vld [vmem:[%s14136_s30 + $0x4e0] sm:$0xff] }
 0x379   : > { %9881 = vmatpush.bf16.msra.mxu2 %v12138_v56  ;;  %v12189_v56 = vld [vmem:[%s14136_s30 + $0x418] sm:$0xff] }
 0x37a   : > { %9868 = vmatpush.bf16.msra.mxu1 %v12130_v59  ;;  %v12213_v59 = vld [vmem:[%s14136_s30 + $0x4d8] sm:$0xff] }
 0x37b   : > { %9894 = vmatpush.bf16.msra.mxu3 %v12146_v60  ;;  %9856 = vmatmul.bf16.vlgmr.msra.gmra.mxu0 %v7385_v61  ;;  %v12188_v60 = vld [vmem:[%s14136_s30 + $0x410] sm:$0xff] }
 0x37c   : > { %9900 = vmatpush.bf16.msrb.mxu0 %v12161_v57  ;;  %9882 = vmatmul.bf16.vlgmr.msra.gmra.mxu2 %v7387_v62  ;;  %v12205_v57 = vld [vmem:[%s14136_s30 + $0x498] sm:$0xff]  ;;  %v12204_v61 = vld [vmem:[%s14136_s30 + $0x490] sm:$0xff] }
 0x37d   : > { %9926 = vmatpush.bf16.msrb.mxu2 %v12177_v58  ;;  %9869 = vmatmul.bf16.vlgmr.msra.gmra.mxu1 %v7386_v1  ;;  %v12197_v58 = vld [vmem:[%s14136_s30 + $0x458] sm:$0xff]  ;;  %v12196_v62 = vld [vmem:[%s14136_s30 + $0x450] sm:$0xff]  ;;  %v12203_v1 = vld [vmem:[%s14136_s30 + $0x488] sm:$0xff] }
 0x37e   : > { %9913 = vmatpush.bf16.msrb.mxu1 %v12169_v63  ;;  %9895 = vmatmul.bf16.vlgmr.msra.gmra.mxu3 %v7388_v2  ;;  %v12212_v63 = vld [vmem:[%s14136_s30 + $0x4d0] sm:$0xff]  ;;  %v12195_v2 = vld [vmem:[%s14136_s30 + $0x448] sm:$0xff] }
 0x37f   : > { %9939 = vmatpush.bf16.msrb.mxu3 %v12185_v0  ;;  %v12187_v0 = vld [vmem:[%s14136_s30 + $0x408] sm:$0xff] }
 0x380   : > { %9901 = vmatpush.bf16.msrb.mxu0 %v12160_v3  ;;  %v12211_v3 = vld [vmem:[%s14136_s30 + $0x4c8] sm:$0xff] }
 0x381   : > { %9927 = vmatpush.bf16.msrb.mxu2 %v12176_v4  ;;  %v12186_v4 = vld [vmem:[%s14136_s30 + $0x400] sm:$0xff] }
 0x382   : > { %9914 = vmatpush.bf16.msrb.mxu1 %v12168_v10  ;;  %v12194_v10 = vld [vmem:[%s14136_s30 + $0x440] sm:$0xff] }
 0x383   : > { %9940 = vmatpush.bf16.msrb.mxu3 %v12184_v11  ;;  %v12210_v11 = vld [vmem:[%s14136_s30 + $0x4c0] sm:$0xff] }
 0x384   : > { %9902 = vmatpush.bf16.msrb.mxu0 %v12159_v12  ;;  %v7289_v12 = vld.sshfl [vmem:[#allocation1 + $0x8] sm:$0xff pattern:$0x73625140] }
 0x385   : > { %9928 = vmatpush.bf16.msrb.mxu2 %v12175_v13  ;;  %v7291_v13 = vld.sshfl [vmem:[#allocation1 + $0x18] sm:$0xff pattern:$0x73625140] }
 0x386   : > { %9915 = vmatpush.bf16.msrb.mxu1 %v12167_v14  ;;  %v7393_v14 = vpack.c.bf16 %v7288_v7, %v7288_v7  ;;  %v12281_v7 = vld [vmem:[%s14136_s30 + $0x6f8] sm:$0xff] }
 0x387   : > { %9941 = vmatpush.bf16.msrb.mxu3 %v12183_v15  ;;  %v7395_v15 = vpack.c.bf16 %v7290_v8, %v7290_v8 }
 0x388   : > { %9903 = vmatpush.bf16.msrb.mxu0 %v12158_v16  ;;  %v12233_v16 = vld [vmem:[%s14136_s30 + $0x578] sm:$0xff] }
 0x389   : > { %9929 = vmatpush.bf16.msrb.mxu2 %v12174_v17  ;;  %v12249_v17 = vld [vmem:[%s14136_s30 + $0x5f8] sm:$0xff] }
 0x38a   : > { %9916 = vmatpush.bf16.msrb.mxu1 %v12166_v18  ;;  %v7394_v18 = vpack.c.bf16 %v7289_v12, %v7289_v12  ;;  %v12264_v12 = vld [vmem:[%s14136_s30 + $0x670] sm:$0xff] }
 0x38b   : > { %9942 = vmatpush.bf16.msrb.mxu3 %v12182_v19  ;;  %v7396_v19 = vpack.c.bf16 %v7291_v13, %v7291_v13  ;;  %v12280_v13 = vld [vmem:[%s14136_s30 + $0x6f0] sm:$0xff] }
 0x38c   : > { %9904 = vmatpush.bf16.msrb.mxu0 %v12157_v20  ;;  %v12224_v20 = vld [vmem:[%s14136_s30 + $0x530] sm:$0xff] }
 0x38d   : > { %9930 = vmatpush.bf16.msrb.mxu2 %v12173_v21  ;;  %v12240_v21 = vld [vmem:[%s14136_s30 + $0x5b0] sm:$0xff] }
 0x38e   : > { %9917 = vmatpush.bf16.msrb.mxu1 %v12165_v22  ;;  %v12232_v22 = vld [vmem:[%s14136_s30 + $0x570] sm:$0xff] }
 0x38f   : > { %9943 = vmatpush.bf16.msrb.mxu3 %v12181_v23  ;;  %v12248_v23 = vld [vmem:[%s14136_s30 + $0x5f0] sm:$0xff] }
 0x390   : > { %9905 = vmatpush.bf16.msrb.mxu0 %v12156_v24  ;;  %v12223_v24 = vld [vmem:[%s14136_s30 + $0x528] sm:$0xff] }
 0x391   : > { %9931 = vmatpush.bf16.msrb.mxu2 %v12172_v25  ;;  %v12239_v25 = vld [vmem:[%s14136_s30 + $0x5a8] sm:$0xff] }
 0x392   : > { %9918 = vmatpush.bf16.msrb.mxu1 %v12164_v26  ;;  %v12231_v26 = vld [vmem:[%s14136_s30 + $0x568] sm:$0xff] }
 0x393   : > { %9944 = vmatpush.bf16.msrb.mxu3 %v12180_v27  ;;  %v12247_v27 = vld [vmem:[%s14136_s30 + $0x5e8] sm:$0xff] }
 0x394   : > { %9906 = vmatpush.bf16.msrb.mxu0 %v12155_v28  ;;  %v12485_v28 = vld [vmem:[%s6459_s19] ss:$0 sm:$0xff] }
 0x395   : > { %9932 = vmatpush.bf16.msrb.mxu2 %v12171_v29  ;;  %v12222_v29 = vld [vmem:[%s14136_s30 + $0x520] sm:$0xff] }
 0x396   : > { %9919 = vmatpush.bf16.msrb.mxu1 %v12163_v30  ;;  %v12238_v30 = vld [vmem:[%s14136_s30 + $0x5a0] sm:$0xff] }
 0x397   : > { %9945 = vmatpush.bf16.msrb.mxu3 %v12179_v31 }
 0x398   : > { %9907 = vmatpush.bf16.msrb.mxu0 %v12154_v32  ;;  %v12230_v32 = vld [vmem:[%s14136_s30 + $0x560] sm:$0xff] }
 0x399   : > { %9933 = vmatpush.bf16.msrb.mxu2 %v12170_v33  ;;  %v12246_v33 = vld [vmem:[%s14136_s30 + $0x5e0] sm:$0xff] }
 0x39a   : > { %9920 = vmatpush.bf16.msrb.mxu1 %v12162_v36  ;;  %v12221_v36 = vld [vmem:[%s14136_s30 + $0x518] sm:$0xff] }
 0x39b   : > { %9946 = vmatpush.bf16.msrb.mxu3 %v12178_v37  ;;  %9908 = vmatmul.bf16.vlgmr.msrb.gmra.mxu0 %v7389_v38  ;;  %v12237_v37 = vld [vmem:[%s14136_s30 + $0x598] sm:$0xff] }
 0x39c   : > { %9952 = vmatpush.bf16.msra.mxu0 %v12193_v34  ;;  %9934 = vmatmul.bf16.vlgmr.msrb.gmra.mxu2 %v7391_v39  ;;  %v12229_v39 = vld [vmem:[%s14136_s30 + $0x558] sm:$0xff] }
 0x39d   : > { %9978 = vmatpush.bf16.msra.mxu2 %v12209_v35  ;;  %9921 = vmatmul.bf16.vlgmr.msrb.gmra.mxu1 %v7390_v42  ;;  %v12220_v42 = vld [vmem:[%s14136_s30 + $0x510] sm:$0xff] }
 0x39e   : > { %9965 = vmatpush.bf16.msra.mxu1 %v12201_v40  ;;  %9947 = vmatmul.bf16.vlgmr.msrb.gmra.mxu3 %v7392_v43  ;;  %v12245_v40 = vld [vmem:[%s14136_s30 + $0x5d8] sm:$0xff]  ;;  %v12236_v43 = vld [vmem:[%s14136_s30 + $0x590] sm:$0xff] }
 0x39f   : > { %9991 = vmatpush.bf16.msra.mxu3 %v12217_v41 }
 0x3a0   : > { %9953 = vmatpush.bf16.msra.mxu0 %v12192_v44 }
 0x3a1   : > { %9979 = vmatpush.bf16.msra.mxu2 %v12208_v45 }
 0x3a2   : > { %9966 = vmatpush.bf16.msra.mxu1 %v12200_v46 }
 0x3a3   : > { %9992 = vmatpush.bf16.msra.mxu3 %v12216_v47  ;;  %v12228_v47 = vld [vmem:[%s14136_s30 + $0x550] sm:$0xff] }
 0x3a4   : > { %9954 = vmatpush.bf16.msra.mxu0 %v12191_v48  ;;  %v12244_v48 = vld [vmem:[%s14136_s30 + $0x5d0] sm:$0xff] }
 0x3a5   : > { %9980 = vmatpush.bf16.msra.mxu2 %v12207_v49 }
 0x3a6   : > { %9967 = vmatpush.bf16.msra.mxu1 %v12199_v50  ;;  %v6475_v50 = vld [vmem:[%s14660_s0 + $0x30] sm:$0xff] }
 0x3a7   : > { %9993 = vmatpush.bf16.msra.mxu3 %v12215_v51  ;;  %7296 = vst [vmem:[#allocation1] ss:$4 sm:$0xff] %v6475_v50 }
 0x3a8   : > { %9955 = vmatpush.bf16.msra.mxu0 %v12190_v52  ;;  %v12219_v52 = vld [vmem:[%s14136_s30 + $0x508] sm:$0xff] }
 0x3a9   : > { %9981 = vmatpush.bf16.msra.mxu2 %v12206_v53  ;;  %v12235_v53 = vld [vmem:[%s14136_s30 + $0x588] sm:$0xff] }
 0x3aa   : > { %9968 = vmatpush.bf16.msra.mxu1 %v12198_v54  ;;  %v12227_v54 = vld [vmem:[%s14136_s30 + $0x548] sm:$0xff] }
 0x3ab   : > { %9994 = vmatpush.bf16.msra.mxu3 %v12214_v55  ;;  %v12243_v55 = vld [vmem:[%s14136_s30 + $0x5c8] sm:$0xff] }
 0x3ac   : > { %9956 = vmatpush.bf16.msra.mxu0 %v12189_v56  ;;  %v12218_v56 = vld [vmem:[%s14136_s30 + $0x500] sm:$0xff] }
 0x3ad   : > { %9982 = vmatpush.bf16.msra.mxu2 %v12205_v57  ;;  %v12234_v57 = vld [vmem:[%s14136_s30 + $0x580] sm:$0xff] }
 0x3ae   : > { %9969 = vmatpush.bf16.msra.mxu1 %v12197_v58  ;;  %v12257_v58 = vld [vmem:[%s14136_s30 + $0x638] sm:$0xff]  ;;  %v7300_v50 = vld.sshfl [vmem:[#allocation1 + $0x10] sm:$0xff pattern:$0x73625140] }
 0x3af   : > { %9995 = vmatpush.bf16.msra.mxu3 %v12213_v59 }
 0x3b0   : > { %9957 = vmatpush.bf16.msra.mxu0 %v12188_v60  ;;  %v7292_v60 = vld.sshfl [vmem:[#allocation1 + $0x20] sm:$0xff pattern:$0x73625140] }
 0x3b1   : > { %9983 = vmatpush.bf16.msra.mxu2 %v12204_v61  ;;  %v7294_v61 = vld.sshfl [vmem:[#allocation1 + $0x30] sm:$0xff pattern:$0x73625140] }
 0x3b2   : > { %9970 = vmatpush.bf16.msra.mxu1 %v12196_v62  ;;  %v12273_v62 = vld [vmem:[%s14136_s30 + $0x6b8] sm:$0xff] }
 0x3b3   : > { %9996 = vmatpush.bf16.msra.mxu3 %v12212_v63  ;;  %v12226_v63 = vld [vmem:[%s14136_s30 + $0x540] sm:$0xff] }
 0x3b4   : > { %9958 = vmatpush.bf16.msra.mxu0 %v12187_v0  ;;  %v12242_v0 = vld [vmem:[%s14136_s30 + $0x5c0] sm:$0xff] }
 0x3b5   : > { %9984 = vmatpush.bf16.msra.mxu2 %v12203_v1 }
 0x3b6   : > { %9971 = vmatpush.bf16.msra.mxu1 %v12195_v2  ;;  %v7293_v2 = vld.sshfl [vmem:[#allocation1 + $0x28] sm:$0xff pattern:$0x73625140] }
 0x3b7   : > { %9997 = vmatpush.bf16.msra.mxu3 %v12211_v3  ;;  %v7295_v3 = vld.sshfl [vmem:[#allocation1 + $0x38] sm:$0xff pattern:$0x73625140]  ;;  %v7398_v8 = vpack.c.bf16 %v7293_v2, %v7293_v2 }
 0x3b8   : > { %9959 = vmatpush.bf16.msra.mxu0 %v12186_v4  ;;  %v9753_v31 = vpop.f32.mrf.mxu0  ;;  %v7397_v4 = vpack.c.bf16 %v7292_v60, %v7292_v60  ;;  %v12313_v60 = vld [vmem:[%s14136_s30 + $0x7f8] sm:$0xff]  ;;  %v12312_v2 = vld [vmem:[%s14136_s30 + $0x7f0] sm:$0xff] }
 0x3b9   : > { %9985 = vmatpush.bf16.msra.mxu2 %v12202_v5  ;;  %v9754_v34 = vadd.f32 %v12485_v28, %v9753_v31  ;;  %v7399_v5 = vpack.c.bf16 %v7294_v61, %v7294_v61  ;;  %v12261_v28 = vld [vmem:[%s14136_s30 + $0x658] sm:$0xff] }
 0x3ba   : > { %9972 = vmatpush.bf16.msra.mxu1 %v12194_v10  ;;  %v9766_v35 = vpop.f32.mrf.mxu1  ;;  %v12256_v10 = vld [vmem:[%s14136_s30 + $0x630] sm:$0xff] }
 0x3bb   : > { %9998 = vmatpush.bf16.msra.mxu3 %v12210_v11  ;;  %9960 = vmatmul.bf16.vlgmr.msra.gmra.mxu0 %v7393_v14  ;;  %v9767_v38 = vadd.f32 %v9766_v35, %v9754_v34  ;;  %v12272_v11 = vld [vmem:[%s14136_s30 + $0x6b0] sm:$0xff]  ;;  %v12255_v14 = vld [vmem:[%s14136_s30 + $0x628] sm:$0xff] }
 0x3bc   : > { %10004 = vmatpush.bf16.msrb.mxu0 %v12225_v6  ;;  %9986 = vmatmul.bf16.vlgmr.msra.gmra.mxu2 %v7395_v15  ;;  %v12265_v6 = vld [vmem:[%s14136_s30 + $0x678] sm:$0xff]  ;;  %v12271_v15 = vld [vmem:[%s14136_s30 + $0x6a8] sm:$0xff] }
 0x3bd   : > { %10030 = vmatpush.bf16.msrb.mxu2 %v12241_v9  ;;  %9973 = vmatmul.bf16.vlgmr.msra.gmra.mxu1 %v7394_v18  ;;  %v7400_v9 = vpack.c.bf16 %v7295_v3, %v7295_v3  ;;  %v12254_v18 = vld [vmem:[%s14136_s30 + $0x620] sm:$0xff]  ;;  %v12287_v3 = vld [vmem:[%s14136_s30 + $0x728] sm:$0xff] }
 0x3be   : > { %10017 = vmatpush.bf16.msrb.mxu1 %v12233_v16  ;;  %9999 = vmatmul.bf16.vlgmr.msra.gmra.mxu3 %v7396_v19  ;;  %v12263_v16 = vld [vmem:[%s14136_s30 + $0x668] sm:$0xff]  ;;  %v12270_v19 = vld [vmem:[%s14136_s30 + $0x6a0] sm:$0xff] }
 0x3bf   : > { %10043 = vmatpush.bf16.msrb.mxu3 %v12249_v17  ;;  %v9779_v41 = vpop.f32.mrf.mxu2  ;;  %v12279_v17 = vld [vmem:[%s14136_s30 + $0x6e8] sm:$0xff] }
 0x3c0   : > { %10005 = vmatpush.bf16.msrb.mxu0 %v12224_v20  ;;  %v9780_v44 = vadd.f32 %v9779_v41, %v9767_v38  ;;  %v9755_v46 = vpop.f32.mrf.mxu0  ;;  %v12276_v38 = vld [vmem:[%s14136_s30 + $0x6d0] sm:$0xff]  ;;  %v12251_v41 = vld [vmem:[%s14136_s30 + $0x608] sm:$0xff] }
 0x3c1   : > { %10031 = vmatpush.bf16.msrb.mxu2 %v12240_v21  ;;  %v9792_v45 = vpop.f32.mrf.mxu3  ;;  %v12250_v46 = vld [vmem:[%s14136_s30 + $0x600] sm:$0xff] }
 0x3c2   : > { %10018 = vmatpush.bf16.msrb.mxu1 %v12232_v22  ;;  %v14401_v49 = vadd.f32 %v9792_v45, %v9780_v44  ;;  %v9768_v51 = vpop.f32.mrf.mxu1  ;;  %v12262_v22 = vld [vmem:[%s14136_s30 + $0x660] sm:$0xff]  ;;  %v12275_v44 = vld [vmem:[%s14136_s30 + $0x6c8] sm:$0xff] }
 0x3c3   : > { %10044 = vmatpush.bf16.msrb.mxu3 %v12248_v23  ;;  %v12278_v23 = vld [vmem:[%s14136_s30 + $0x6e0] sm:$0xff] }
 0x3c4   : > { %10006 = vmatpush.bf16.msrb.mxu0 %v12223_v24 }
 0x3c5   : > { %10032 = vmatpush.bf16.msrb.mxu2 %v12239_v25 }
 0x3c6   : > { %10019 = vmatpush.bf16.msrb.mxu1 %v12231_v26  ;;  %v12253_v26 = vld [vmem:[%s14136_s30 + $0x618] sm:$0xff] }
 0x3c7   : > { %10045 = vmatpush.bf16.msrb.mxu3 %v12247_v27  ;;  %v9781_v59 = vpop.f32.mrf.mxu2  ;;  %v12269_v27 = vld [vmem:[%s14136_s30 + $0x698] sm:$0xff] }
 0x3c8   : > { %10007 = vmatpush.bf16.msrb.mxu0 %v12222_v29  ;;  %v12277_v29 = vld [vmem:[%s14136_s30 + $0x6d8] sm:$0xff] }
 0x3c9   : > { %10033 = vmatpush.bf16.msrb.mxu2 %v12238_v30  ;;  %v9794_v1 = vpop.f32.mrf.mxu3  ;;  %v12297_v59 = vld [vmem:[%s14136_s30 + $0x778] sm:$0xff] }
 0x3ca   : > { %10020 = vmatpush.bf16.msrb.mxu1 %v12230_v32  ;;  %v12252_v32 = vld [vmem:[%s14136_s30 + $0x610] sm:$0xff] }
 0x3cb   : > { %10046 = vmatpush.bf16.msrb.mxu3 %v12246_v33  ;;  %v12268_v33 = vld [vmem:[%s14136_s30 + $0x690] sm:$0xff] }
 0x3cc   : > { %10008 = vmatpush.bf16.msrb.mxu0 %v12221_v36  ;;  %v12296_v1 = vld [vmem:[%s14136_s30 + $0x770] sm:$0xff] }
 0x3cd   : > { %10034 = vmatpush.bf16.msrb.mxu2 %v12237_v37  ;;  %v12260_v37 = vld [vmem:[%s14136_s30 + $0x650] sm:$0xff] }
 0x3ce   : > { %10021 = vmatpush.bf16.msrb.mxu1 %v12229_v39 }
 0x3cf   : > { %10047 = vmatpush.bf16.msrb.mxu3 %v12245_v40  ;;  %v6476_v40 = vld [vmem:[%s14660_s0 + $0x38] sm:$0xff] }
 0x3d0   : > { %10009 = vmatpush.bf16.msrb.mxu0 %v12220_v42  ;;  %7297 = vst [vmem:[#allocation1 + $0x20] ss:$4 sm:$0xff] %v6476_v40  ;;  %v12267_v42 = vld [vmem:[%s14136_s30 + $0x688] sm:$0xff] }
 0x3d1   : > { %10035 = vmatpush.bf16.msrb.mxu2 %v12236_v43  ;;  %v12259_v43 = vld [vmem:[%s14136_s30 + $0x648] sm:$0xff] }
 0x3d2   : > { %10022 = vmatpush.bf16.msrb.mxu1 %v12228_v47  ;;  %v12266_v47 = vld [vmem:[%s14136_s30 + $0x680] sm:$0xff] }
 0x3d3   : > { %10048 = vmatpush.bf16.msrb.mxu3 %v12244_v48  ;;  %v12289_v48 = vld [vmem:[%s14136_s30 + $0x738] sm:$0xff] }
 0x3d4   : > { %10010 = vmatpush.bf16.msrb.mxu0 %v12219_v52  ;;  %v12305_v52 = vld [vmem:[%s14136_s30 + $0x7b8] sm:$0xff] }
 0x3d5   : > { %10036 = vmatpush.bf16.msrb.mxu2 %v12235_v53  ;;  %v12258_v53 = vld [vmem:[%s14136_s30 + $0x640] sm:$0xff] }
 0x3d6   : > { %10023 = vmatpush.bf16.msrb.mxu1 %v12227_v54  ;;  %v12274_v54 = vld [vmem:[%s14136_s30 + $0x6c0] sm:$0xff] }
 0x3d7   : > { %10049 = vmatpush.bf16.msrb.mxu3 %v12243_v55  ;;  %v7299_v55 = vld.sshfl [vmem:[#allocation1 + $0x8] sm:$0xff pattern:$0x73625140]  ;;  %v7304_v40 = vld.sshfl [vmem:[#allocation1 + $0x30] sm:$0xff pattern:$0x73625140] }
 0x3d8   : > { %10011 = vmatpush.bf16.msrb.mxu0 %v12218_v56  ;;  %v9805_v20 = vpop.f32.mrf.mxu0  ;;  %v7301_v56 = vld.sshfl [vmem:[#allocation1 + $0x18] sm:$0xff pattern:$0x73625140]  ;;  %v7402_v61 = vpack.c.bf16 %v7299_v55, %v7299_v55 }
 0x3d9   : > { %10037 = vmatpush.bf16.msrb.mxu2 %v12234_v57  ;;  %v9806_v21 = vadd.f32 %v9805_v20, %v14401_v49  ;;  %v7298_v49 = vld.sshfl [vmem:[#allocation1] sm:$0xff pattern:$0x73625140] }
 0x3da   : > { %10024 = vmatpush.bf16.msrb.mxu1 %v12226_v63  ;;  %v9818_v24 = vpop.f32.mrf.mxu1  ;;  %v7401_v57 = vpack.c.bf16 %v7298_v49, %v7298_v49  ;;  %v12288_v63 = vld [vmem:[%s14136_s30 + $0x730] sm:$0xff]  ;;  %v12309_v20 = vld [vmem:[%s14136_s30 + $0x7d8] sm:$0xff] }
 0x3db   : > { %10050 = vmatpush.bf16.msrb.mxu3 %v12242_v0  ;;  %10012 = vmatmul.bf16.vlgmr.msrb.gmra.mxu0 %v7397_v4  ;;  %v9819_v25 = vadd.f32 %v9818_v24, %v9806_v21  ;;  %v12304_v0 = vld [vmem:[%s14136_s30 + $0x7b0] sm:$0xff]  ;;  %v12303_v4 = vld [vmem:[%s14136_s30 + $0x7a8] sm:$0xff]  ;;  %v12345_v49 = vld [vmem:[%s14136_s30 + $0x8f8] sm:$0xff] }
 0x3dc   : > { %10056 = vmatpush.bf16.msra.mxu0 %v12257_v58  ;;  %10038 = vmatmul.bf16.vlgmr.msrb.gmra.mxu2 %v7399_v5  ;;  %v7403_v58 = vpack.c.bf16 %v7300_v50, %v7300_v50  ;;  %v12295_v5 = vld [vmem:[%s14136_s30 + $0x768] sm:$0xff]  ;;  %v12284_v24 = vld [vmem:[%s14136_s30 + $0x710] sm:$0xff] }
 0x3dd   : > { %10082 = vmatpush.bf16.msra.mxu2 %v12273_v62  ;;  %10025 = vmatmul.bf16.vlgmr.msrb.gmra.mxu1 %v7398_v8  ;;  %v7404_v62 = vpack.c.bf16 %v7301_v56, %v7301_v56  ;;  %v12344_v55 = vld [vmem:[%s14136_s30 + $0x8f0] sm:$0xff]  ;;  %v12319_v56 = vld [vmem:[%s14136_s30 + $0x828] sm:$0xff] }
 0x3de   : > { %10069 = vmatpush.bf16.msra.mxu1 %v12265_v6  ;;  %10051 = vmatmul.bf16.vlgmr.msrb.gmra.mxu3 %v7400_v9  ;;  %v12311_v6 = vld [vmem:[%s14136_s30 + $0x7e8] sm:$0xff]  ;;  %v12286_v9 = vld [vmem:[%s14136_s30 + $0x720] sm:$0xff] }
 0x3df   : > { %10095 = vmatpush.bf16.msra.mxu3 %v12281_v7  ;;  %v9831_v30 = vpop.f32.mrf.mxu2 }
 0x3e0   : > { %10057 = vmatpush.bf16.msra.mxu0 %v12256_v10  ;;  %v9832_v31 = vadd.f32 %v9831_v30, %v9819_v25  ;;  %v9807_v35 = vpop.f32.mrf.mxu0  ;;  %v12302_v10 = vld [vmem:[%s14136_s30 + $0x7a0] sm:$0xff]  ;;  %v12300_v25 = vld [vmem:[%s14136_s30 + $0x790] sm:$0xff]  ;;  %v12283_v30 = vld [vmem:[%s14136_s30 + $0x708] sm:$0xff] }
 0x3e1   : > { %10083 = vmatpush.bf16.msra.mxu2 %v12272_v11  ;;  %v9844_v34 = vpop.f32.mrf.mxu3 }
 0x3e2   : > { %10070 = vmatpush.bf16.msra.mxu1 %v12264_v12  ;;  %v14437_v36 = vadd.f32 %v9844_v34, %v9832_v31  ;;  %v9820_v39 = vpop.f32.mrf.mxu1  ;;  %v12299_v31 = vld [vmem:[%s14136_s30 + $0x788] sm:$0xff] }
 0x3e3   : > { %10096 = vmatpush.bf16.msra.mxu3 %v12280_v13  ;;  %v12294_v13 = vld [vmem:[%s14136_s30 + $0x760] sm:$0xff]  ;;  %v12307_v34 = vld [vmem:[%s14136_s30 + $0x7c8] sm:$0xff]  ;;  %v7302_v39 = vld.sshfl [vmem:[#allocation1 + $0x20] sm:$0xff pattern:$0x73625140] }
 0x3e4   : > { %10058 = vmatpush.bf16.msra.mxu0 %v12255_v14  ;;  %v12310_v14 = vld [vmem:[%s14136_s30 + $0x7e0] sm:$0xff] }
 0x3e5   : > { %10084 = vmatpush.bf16.msra.mxu2 %v12271_v15  ;;  %v12285_v15 = vld [vmem:[%s14136_s30 + $0x718] sm:$0xff] }
 0x3e6   : > { %10071 = vmatpush.bf16.msra.mxu1 %v12263_v16  ;;  %v12301_v16 = vld [vmem:[%s14136_s30 + $0x798] sm:$0xff] }
 0x3e7   : > { %10097 = vmatpush.bf16.msra.mxu3 %v12279_v17  ;;  %v9833_v45 = vpop.f32.mrf.mxu2 }
 0x3e8   : > { %10059 = vmatpush.bf16.msra.mxu0 %v12254_v18  ;;  %v7305_v45 = vld.sshfl [vmem:[#allocation1 + $0x38] sm:$0xff pattern:$0x73625140] }
 0x3e9   : > { %10085 = vmatpush.bf16.msra.mxu2 %v12270_v19  ;;  %v9846_v51 = vpop.f32.mrf.mxu3  ;;  %v12293_v19 = vld [vmem:[%s14136_s30 + $0x758] sm:$0xff] }
 0x3ea   : > { %10072 = vmatpush.bf16.msra.mxu1 %v12262_v22  ;;  %v7408_v51 = vpack.c.bf16 %v7305_v45, %v7305_v45  ;;  %v12351_v45 = vld [vmem:[%s14136_s30 + $0x928] sm:$0xff] }
 0x3eb   : > { %10098 = vmatpush.bf16.msra.mxu3 %v12278_v23 }
 0x3ec   : > { %10060 = vmatpush.bf16.msra.mxu0 %v12253_v26 }
 0x3ed   : > { %10086 = vmatpush.bf16.msra.mxu2 %v12269_v27  ;;  %v12292_v27 = vld [vmem:[%s14136_s30 + $0x750] sm:$0xff] }
 0x3ee   : > { %10073 = vmatpush.bf16.msra.mxu1 %v12261_v28  ;;  %v12308_v28 = vld [vmem:[%s14136_s30 + $0x7d0] sm:$0xff] }
 0x3ef   : > { %10099 = vmatpush.bf16.msra.mxu3 %v12277_v29  ;;  %v6477_v29 = vld [vmem:[%s14660_s0 + $0x40] sm:$0xff] }
 0x3f0   : > { %10061 = vmatpush.bf16.msra.mxu0 %v12252_v32  ;;  %7306 = vst [vmem:[#allocation1] ss:$4 sm:$0xff] %v6477_v29 }
 0x3f1   : > { %10087 = vmatpush.bf16.msra.mxu2 %v12268_v33  ;;  %v12291_v33 = vld [vmem:[%s14136_s30 + $0x748] sm:$0xff] }
 0x3f2   : > { %10074 = vmatpush.bf16.msra.mxu1 %v12260_v37  ;;  %v12298_v37 = vld [vmem:[%s14136_s30 + $0x780] sm:$0xff] }
 0x3f3   : > { %10100 = vmatpush.bf16.msra.mxu3 %v12276_v38  ;;  %v12321_v38 = vld [vmem:[%s14136_s30 + $0x838] sm:$0xff] }
 0x3f4   : > { %10062 = vmatpush.bf16.msra.mxu0 %v12251_v41  ;;  %v12337_v41 = vld [vmem:[%s14136_s30 + $0x8b8] sm:$0xff] }
 0x3f5   : > { %10088 = vmatpush.bf16.msra.mxu2 %v12267_v42  ;;  %v12290_v42 = vld [vmem:[%s14136_s30 + $0x740] sm:$0xff] }
 0x3f6   : > { %10075 = vmatpush.bf16.msra.mxu1 %v12259_v43  ;;  %v12306_v43 = vld [vmem:[%s14136_s30 + $0x7c0] sm:$0xff] }
 0x3f7   : > { %10101 = vmatpush.bf16.msra.mxu3 %v12275_v44  ;;  %v7303_v44 = vld.sshfl [vmem:[#allocation1 + $0x28] sm:$0xff pattern:$0x73625140]  ;;  %v7310_v29 = vld.sshfl [vmem:[#allocation1 + $0x10] sm:$0xff pattern:$0x73625140] }
 0x3f8   : > { %10063 = vmatpush.bf16.msra.mxu0 %v12250_v46  ;;  %v9857_v7 = vpop.f32.mrf.mxu0  ;;  %v7405_v46 = vpack.c.bf16 %v7302_v39, %v7302_v39  ;;  %v7406_v50 = vpack.c.bf16 %v7303_v44, %v7303_v44  ;;  %v12376_v44 = vld [vmem:[%s14136_s30 + $0x9f0] sm:$0xff] }
 0x3f9   : > { %10089 = vmatpush.bf16.msra.mxu2 %v12266_v47  ;;  %v9858_v8 = vadd.f32 %v9857_v7, %v14437_v36  ;;  %v12282_v36 = vld [vmem:[%s14136_s30 + $0x700] sm:$0xff]  ;;  %v7407_v47 = vpack.c.bf16 %v7304_v40, %v7304_v40 }
 0x3fa   : > { %10076 = vmatpush.bf16.msra.mxu1 %v12258_v53  ;;  %v9870_v11 = vpop.f32.mrf.mxu1  ;;  %v12336_v53 = vld [vmem:[%s14136_s30 + $0x8b0] sm:$0xff] }
 0x3fb   : > { %10102 = vmatpush.bf16.msra.mxu3 %v12274_v54  ;;  %10064 = vmatmul.bf16.vlgmr.msra.gmra.mxu0 %v7401_v57  ;;  %v9871_v12 = vadd.f32 %v9870_v11, %v9858_v8  ;;  %v12328_v54 = vld [vmem:[%s14136_s30 + $0x870] sm:$0xff]  ;;  %v12335_v57 = vld [vmem:[%s14136_s30 + $0x8a8] sm:$0xff]  ;;  %v12325_v8 = vld [vmem:[%s14136_s30 + $0x858] sm:$0xff] }
 0x3fc   : > { %10108 = vmatpush.bf16.msrb.mxu0 %v12289_v48  ;;  %10090 = vmatmul.bf16.vlgmr.msra.gmra.mxu2 %v7403_v58  ;;  %v12329_v48 = vld [vmem:[%s14136_s30 + $0x878] sm:$0xff]  ;;  %v12327_v58 = vld [vmem:[%s14136_s30 + $0x868] sm:$0xff] }
 0x3fd   : > { %10134 = vmatpush.bf16.msrb.mxu2 %v12305_v52  ;;  %10077 = vmatmul.bf16.vlgmr.msra.gmra.mxu1 %v7402_v61  ;;  %v12320_v52 = vld [vmem:[%s14136_s30 + $0x830] sm:$0xff] }
 0x3fe   : > { %10121 = vmatpush.bf16.msrb.mxu1 %v12297_v59  ;;  %10103 = vmatmul.bf16.vlgmr.msra.gmra.mxu3 %v7404_v62  ;;  %v12343_v59 = vld [vmem:[%s14136_s30 + $0x8e8] sm:$0xff]  ;;  %v12318_v62 = vld [vmem:[%s14136_s30 + $0x820] sm:$0xff] }
 0x3ff   : > { %10147 = vmatpush.bf16.msrb.mxu3 %v12313_v60  ;;  %v9883_v17 = vpop.f32.mrf.mxu2 }
 0x400   : > { %10109 = vmatpush.bf16.msrb.mxu0 %v12288_v63  ;;  %v9884_v18 = vadd.f32 %v9883_v17, %v9871_v12  ;;  %v9859_v22 = vpop.f32.mrf.mxu0  ;;  %v12334_v63 = vld [vmem:[%s14136_s30 + $0x8a0] sm:$0xff]  ;;  %v12340_v17 = vld [vmem:[%s14136_s30 + $0x8d0] sm:$0xff] }
 0x401   : > { %10135 = vmatpush.bf16.msrb.mxu2 %v12304_v0  ;;  %v9896_v21 = vpop.f32.mrf.mxu3  ;;  %v12323_v22 = vld [vmem:[%s14136_s30 + $0x848] sm:$0xff] }
 0x402   : > { %10122 = vmatpush.bf16.msrb.mxu1 %v12296_v1  ;;  %v14473_v23 = vadd.f32 %v9896_v21, %v9884_v18  ;;  %v9872_v26 = vpop.f32.mrf.mxu1  ;;  %v6478_v18 = vld [vmem:[%s14660_s0 + $0x48] sm:$0xff] }
 0x403   : > { %10148 = vmatpush.bf16.msrb.mxu3 %v12312_v2  ;;  %v12326_v2 = vld [vmem:[%s14136_s30 + $0x860] sm:$0xff]  ;;  %7307 = vst [vmem:[#allocation1 + $0x20] ss:$4 sm:$0xff] %v6478_v18 }
 0x404   : > { %10110 = vmatpush.bf16.msrb.mxu0 %v12287_v3  ;;  %v12342_v3 = vld [vmem:[%s14136_s30 + $0x8e0] sm:$0xff] }
 0x405   : > { %10136 = vmatpush.bf16.msrb.mxu2 %v12303_v4  ;;  %v12317_v4 = vld [vmem:[%s14136_s30 + $0x818] sm:$0xff]  ;;  %v12330_v26 = vld [vmem:[%s14136_s30 + $0x880] sm:$0xff] }
 0x406   : > { %10123 = vmatpush.bf16.msrb.mxu1 %v12295_v5  ;;  %v12333_v5 = vld [vmem:[%s14136_s30 + $0x898] sm:$0xff] }
 0x407   : > { %10149 = vmatpush.bf16.msrb.mxu3 %v12311_v6  ;;  %v9885_v32 = vpop.f32.mrf.mxu2 }
 0x408   : > { %10111 = vmatpush.bf16.msrb.mxu0 %v12286_v9  ;;  %v12341_v9 = vld [vmem:[%s14136_s30 + $0x8d8] sm:$0xff]  ;;  %v12338_v32 = vld [vmem:[%s14136_s30 + $0x8c0] sm:$0xff] }
 0x409   : > { %10137 = vmatpush.bf16.msrb.mxu2 %v12302_v10  ;;  %v9898_v35 = vpop.f32.mrf.mxu3 }
 0x40a   : > { %10124 = vmatpush.bf16.msrb.mxu1 %v12294_v13  ;;  %v12316_v13 = vld [vmem:[%s14136_s30 + $0x810] sm:$0xff]  ;;  %v7314_v18 = vld.sshfl [vmem:[#allocation1 + $0x30] sm:$0xff pattern:$0x73625140] }
 0x40b   : > { %10150 = vmatpush.bf16.msrb.mxu3 %v12310_v14  ;;  %v12332_v14 = vld [vmem:[%s14136_s30 + $0x890] sm:$0xff] }
 0x40c   : > { %10112 = vmatpush.bf16.msrb.mxu0 %v12285_v15 }
 0x40d   : > { %10138 = vmatpush.bf16.msrb.mxu2 %v12301_v16  ;;  %v12324_v16 = vld [vmem:[%s14136_s30 + $0x850] sm:$0xff] }
 0x40e   : > { %10125 = vmatpush.bf16.msrb.mxu1 %v12293_v19  ;;  %v12315_v19 = vld [vmem:[%s14136_s30 + $0x808] sm:$0xff] }
 0x40f   : > { %10151 = vmatpush.bf16.msrb.mxu3 %v12309_v20  ;;  %v12331_v20 = vld [vmem:[%s14136_s30 + $0x888] sm:$0xff] }
 0x410   : > { %10113 = vmatpush.bf16.msrb.mxu0 %v12284_v24 }
 0x411   : > { %10139 = vmatpush.bf16.msrb.mxu2 %v12300_v25  ;;  %v12314_v25 = vld [vmem:[%s14136_s30 + $0x800] sm:$0xff] }
 0x412   : > { %10126 = vmatpush.bf16.msrb.mxu1 %v12292_v27  ;;  %v12353_v27 = vld [vmem:[%s14136_s30 + $0x938] sm:$0xff] }
 0x413   : > { %10152 = vmatpush.bf16.msrb.mxu3 %v12308_v28  ;;  %v7308_v28 = vld.sshfl [vmem:[#allocation1] sm:$0xff pattern:$0x73625140] }
 0x414   : > { %10114 = vmatpush.bf16.msrb.mxu0 %v12283_v30  ;;  %v12369_v30 = vld [vmem:[%s14136_s30 + $0x9b8] sm:$0xff]  ;;  %v7409_v35 = vpack.c.bf16 %v7308_v28, %v7308_v28 }
 0x415   : > { %10140 = vmatpush.bf16.msrb.mxu2 %v12299_v31  ;;  %v12322_v31 = vld [vmem:[%s14136_s30 + $0x840] sm:$0xff] }
 0x416   : > { %10127 = vmatpush.bf16.msrb.mxu1 %v12291_v33  ;;  %v7309_v33 = vld.sshfl [vmem:[#allocation1 + $0x8] sm:$0xff pattern:$0x73625140] }
 0x417   : > { %10153 = vmatpush.bf16.msrb.mxu3 %v12307_v34  ;;  %v7311_v34 = vld.sshfl [vmem:[#allocation1 + $0x18] sm:$0xff pattern:$0x73625140]  ;;  %v7410_v39 = vpack.c.bf16 %v7309_v33, %v7309_v33 }
 0x418   : > { %10115 = vmatpush.bf16.msrb.mxu0 %v12282_v36  ;;  %v9909_v60 = vpop.f32.mrf.mxu0  ;;  %v7411_v36 = vpack.c.bf16 %v7310_v29, %v7310_v29  ;;  %v7412_v40 = vpack.c.bf16 %v7311_v34, %v7311_v34  ;;  %v12408_v33 = vld [vmem:[%s14136_s30 + $0xaf0] sm:$0xff]  ;;  %v12383_v34 = vld [vmem:[%s14136_s30 + $0xa28] sm:$0xff] }
 0x419   : > { %10141 = vmatpush.bf16.msrb.mxu2 %v12298_v37  ;;  %v9910_v61 = vadd.f32 %v9909_v60, %v14473_v23  ;;  %v12339_v23 = vld [vmem:[%s14136_s30 + $0x8c8] sm:$0xff]  ;;  %v12361_v37 = vld [vmem:[%s14136_s30 + $0x978] sm:$0xff] }
 0x41a   : > { %10128 = vmatpush.bf16.msrb.mxu1 %v12290_v42  ;;  %v9922_v0 = vpop.f32.mrf.mxu1  ;;  %v12368_v42 = vld [vmem:[%s14136_s30 + $0x9b0] sm:$0xff] }
 0x41b   : > { %10154 = vmatpush.bf16.msrb.mxu3 %v12306_v43  ;;  %10116 = vmatmul.bf16.vlgmr.msrb.gmra.mxu0 %v7405_v46  ;;  %v9923_v1 = vadd.f32 %v9922_v0, %v9910_v61  ;;  %v12360_v43 = vld [vmem:[%s14136_s30 + $0x970] sm:$0xff]  ;;  %v12367_v46 = vld [vmem:[%s14136_s30 + $0x9a8] sm:$0xff]  ;;  %v12357_v61 = vld [vmem:[%s14136_s30 + $0x958] sm:$0xff] }
 0x41c   : > { %10160 = vmatpush.bf16.msra.mxu0 %v12321_v38  ;;  %10142 = vmatmul.bf16.vlgmr.msrb.gmra.mxu2 %v7407_v47  ;;  %v12377_v38 = vld [vmem:[%s14136_s30 + $0x9f8] sm:$0xff]  ;;  %v12359_v47 = vld [vmem:[%s14136_s30 + $0x968] sm:$0xff] }
 0x41d   : > { %10186 = vmatpush.bf16.msra.mxu2 %v12337_v41  ;;  %10129 = vmatmul.bf16.vlgmr.msrb.gmra.mxu1 %v7406_v50  ;;  %v12352_v41 = vld [vmem:[%s14136_s30 + $0x930] sm:$0xff] }
 0x41e   : > { %10173 = vmatpush.bf16.msra.mxu1 %v12329_v48  ;;  %10155 = vmatmul.bf16.vlgmr.msrb.gmra.mxu3 %v7408_v51  ;;  %v12375_v48 = vld [vmem:[%s14136_s30 + $0x9e8] sm:$0xff]  ;;  %v12350_v51 = vld [vmem:[%s14136_s30 + $0x920] sm:$0xff] }
 0x41f   : > { %10199 = vmatpush.bf16.msra.mxu3 %v12345_v49  ;;  %v9935_v6 = vpop.f32.mrf.mxu2 }
 0x420   : > { %10161 = vmatpush.bf16.msra.mxu0 %v12320_v52  ;;  %v9936_v7 = vadd.f32 %v9935_v6, %v9923_v1  ;;  %v9911_v11 = vpop.f32.mrf.mxu0  ;;  %v12366_v52 = vld [vmem:[%s14136_s30 + $0x9a0] sm:$0xff]  ;;  %v12372_v6 = vld [vmem:[%s14136_s30 + $0x9d0] sm:$0xff] }
 0x421   : > { %10187 = vmatpush.bf16.msra.mxu2 %v12336_v53  ;;  %v9948_v10 = vpop.f32.mrf.mxu3  ;;  %v12355_v11 = vld [vmem:[%s14136_s30 + $0x948] sm:$0xff] }
 0x422   : > { %10174 = vmatpush.bf16.msra.mxu1 %v12328_v54  ;;  %v14511_v12 = vadd.f32 %v9948_v10, %v9936_v7  ;;  %v9924_v15 = vpop.f32.mrf.mxu1  ;;  %v6479_v7 = vld [vmem:[%s14660_s0 + $0x50] sm:$0xff] }
 0x423   : > { %10200 = vmatpush.bf16.msra.mxu3 %v12344_v55  ;;  %v12358_v55 = vld [vmem:[%s14136_s30 + $0x960] sm:$0xff]  ;;  %7316 = vst [vmem:[#allocation1] ss:$4 sm:$0xff] %v6479_v7 }
 0x424   : > { %10162 = vmatpush.bf16.msra.mxu0 %v12319_v56  ;;  %v12374_v56 = vld [vmem:[%s14136_s30 + $0x9e0] sm:$0xff] }
 0x425   : > { %10188 = vmatpush.bf16.msra.mxu2 %v12335_v57  ;;  %v12349_v57 = vld [vmem:[%s14136_s30 + $0x918] sm:$0xff]  ;;  %v12362_v15 = vld [vmem:[%s14136_s30 + $0x980] sm:$0xff] }
 0x426   : > { %10175 = vmatpush.bf16.msra.mxu1 %v12327_v58  ;;  %v12365_v58 = vld [vmem:[%s14136_s30 + $0x998] sm:$0xff] }
 0x427   : > { %10201 = vmatpush.bf16.msra.mxu3 %v12343_v59  ;;  %v9937_v21 = vpop.f32.mrf.mxu2 }
 0x428   : > { %10163 = vmatpush.bf16.msra.mxu0 %v12318_v62  ;;  %v12373_v62 = vld [vmem:[%s14136_s30 + $0x9d8] sm:$0xff]  ;;  %v12370_v21 = vld [vmem:[%s14136_s30 + $0x9c0] sm:$0xff] }
 0x429   : > { %10189 = vmatpush.bf16.msra.mxu2 %v12334_v63  ;;  %v9950_v24 = vpop.f32.mrf.mxu3 }
 0x42a   : > { %10176 = vmatpush.bf16.msra.mxu1 %v12326_v2  ;;  %v12348_v2 = vld [vmem:[%s14136_s30 + $0x910] sm:$0xff]  ;;  %v7320_v7 = vld.sshfl [vmem:[#allocation1 + $0x10] sm:$0xff pattern:$0x73625140] }
 0x42b   : > { %10202 = vmatpush.bf16.msra.mxu3 %v12342_v3  ;;  %v12364_v3 = vld [vmem:[%s14136_s30 + $0x990] sm:$0xff] }
 0x42c   : > { %10164 = vmatpush.bf16.msra.mxu0 %v12317_v4 }
 0x42d   : > { %10190 = vmatpush.bf16.msra.mxu2 %v12333_v5  ;;  %v12356_v5 = vld [vmem:[%s14136_s30 + $0x950] sm:$0xff] }
 0x42e   : > { %10177 = vmatpush.bf16.msra.mxu1 %v12325_v8  ;;  %v12347_v8 = vld [vmem:[%s14136_s30 + $0x908] sm:$0xff] }
 0x42f   : > { %10203 = vmatpush.bf16.msra.mxu3 %v12341_v9  ;;  %v12363_v9 = vld [vmem:[%s14136_s30 + $0x988] sm:$0xff] }
 0x430   : > { %10165 = vmatpush.bf16.msra.mxu0 %v12316_v13 }
 0x431   : > { %10191 = vmatpush.bf16.msra.mxu2 %v12332_v14  ;;  %v12346_v14 = vld [vmem:[%s14136_s30 + $0x900] sm:$0xff] }
 0x432   : > { %10178 = vmatpush.bf16.msra.mxu1 %v12324_v16  ;;  %v12385_v16 = vld [vmem:[%s14136_s30 + $0xa38] sm:$0xff] }
 0x433   : > { %10204 = vmatpush.bf16.msra.mxu3 %v12340_v17  ;;  %v7312_v17 = vld.sshfl [vmem:[#allocation1 + $0x20] sm:$0xff pattern:$0x73625140] }
 0x434   : > { %10166 = vmatpush.bf16.msra.mxu0 %v12315_v19  ;;  %v12401_v19 = vld [vmem:[%s14136_s30 + $0xab8] sm:$0xff]  ;;  %v7413_v24 = vpack.c.bf16 %v7312_v17, %v7312_v17 }
 0x435   : > { %10192 = vmatpush.bf16.msra.mxu2 %v12331_v20  ;;  %v12354_v20 = vld [vmem:[%s14136_s30 + $0x940] sm:$0xff] }
 0x436   : > { %10179 = vmatpush.bf16.msra.mxu1 %v12323_v22  ;;  %v7313_v22 = vld.sshfl [vmem:[#allocation1 + $0x28] sm:$0xff pattern:$0x73625140] }
 0x437   : > { %10205 = vmatpush.bf16.msra.mxu3 %v12339_v23  ;;  %v7315_v23 = vld.sshfl [vmem:[#allocation1 + $0x38] sm:$0xff pattern:$0x73625140]  ;;  %v7414_v28 = vpack.c.bf16 %v7313_v22, %v7313_v22 }
 0x438   : > { %10167 = vmatpush.bf16.msra.mxu0 %v12314_v25  ;;  %v9961_v49 = vpop.f32.mrf.mxu0  ;;  %v7415_v25 = vpack.c.bf16 %v7314_v18, %v7314_v18  ;;  %v7416_v29 = vpack.c.bf16 %v7315_v23, %v7315_v23  ;;  %v12440_v22 = vld [vmem:[%s14136_s30 + $0xbf0] sm:$0xff]  ;;  %v12415_v23 = vld [vmem:[%s14136_s30 + $0xb28] sm:$0xff] }
 0x439   : > { %10193 = vmatpush.bf16.msra.mxu2 %v12330_v26  ;;  %v9962_v50 = vadd.f32 %v9961_v49, %v14511_v12  ;;  %v12371_v12 = vld [vmem:[%s14136_s30 + $0x9c8] sm:$0xff]  ;;  %v12393_v26 = vld [vmem:[%s14136_s30 + $0xa78] sm:$0xff] }
 0x43a   : > { %10180 = vmatpush.bf16.msra.mxu1 %v12322_v31  ;;  %v9974_v53 = vpop.f32.mrf.mxu1  ;;  %v12400_v31 = vld [vmem:[%s14136_s30 + $0xab0] sm:$0xff] }
 0x43b   : > { %10206 = vmatpush.bf16.msra.mxu3 %v12338_v32  ;;  %10168 = vmatmul.bf16.vlgmr.msra.gmra.mxu0 %v7409_v35  ;;  %v9975_v54 = vadd.f32 %v9974_v53, %v9962_v50  ;;  %v12392_v32 = vld [vmem:[%s14136_s30 + $0xa70] sm:$0xff]  ;;  %v12399_v35 = vld [vmem:[%s14136_s30 + $0xaa8] sm:$0xff]  ;;  %v12389_v50 = vld [vmem:[%s14136_s30 + $0xa58] sm:$0xff] }
 0x43c   : > { %10212 = vmatpush.bf16.msrb.mxu0 %v12353_v27  ;;  %10194 = vmatmul.bf16.vlgmr.msra.gmra.mxu2 %v7411_v36  ;;  %v12409_v27 = vld [vmem:[%s14136_s30 + $0xaf8] sm:$0xff]  ;;  %v12391_v36 = vld [vmem:[%s14136_s30 + $0xa68] sm:$0xff] }
 0x43d   : > { %10238 = vmatpush.bf16.msrb.mxu2 %v12369_v30  ;;  %10181 = vmatmul.bf16.vlgmr.msra.gmra.mxu1 %v7410_v39  ;;  %v12384_v30 = vld [vmem:[%s14136_s30 + $0xa30] sm:$0xff] }
 0x43e   : > { %10225 = vmatpush.bf16.msrb.mxu1 %v12361_v37  ;;  %10207 = vmatmul.bf16.vlgmr.msra.gmra.mxu3 %v7412_v40  ;;  %v12407_v37 = vld [vmem:[%s14136_s30 + $0xae8] sm:$0xff]  ;;  %v12382_v40 = vld [vmem:[%s14136_s30 + $0xa20] sm:$0xff] }
 0x43f   : > { %10251 = vmatpush.bf16.msrb.mxu3 %v12377_v38  ;;  %v9987_v59 = vpop.f32.mrf.mxu2 }
 0x440   : > { %10213 = vmatpush.bf16.msrb.mxu0 %v12352_v41  ;;  %v9988_v60 = vadd.f32 %v9987_v59, %v9975_v54  ;;  %v9963_v0 = vpop.f32.mrf.mxu0  ;;  %v12398_v41 = vld [vmem:[%s14136_s30 + $0xaa0] sm:$0xff]  ;;  %v12404_v59 = vld [vmem:[%s14136_s30 + $0xad0] sm:$0xff] }
 0x441   : > { %10239 = vmatpush.bf16.msrb.mxu2 %v12368_v42  ;;  %v10000_v63 = vpop.f32.mrf.mxu3  ;;  %v12387_v0 = vld [vmem:[%s14136_s30 + $0xa48] sm:$0xff] }
 0x442   : > { %10226 = vmatpush.bf16.msrb.mxu1 %v12360_v43  ;;  %v14549_v1 = vadd.f32 %v10000_v63, %v9988_v60  ;;  %v9976_v4 = vpop.f32.mrf.mxu1  ;;  %v6480_v60 = vld [vmem:[%s14660_s0 + $0x58] sm:$0xff] }
 0x443   : > { %10252 = vmatpush.bf16.msrb.mxu3 %v12376_v44  ;;  %v12390_v44 = vld [vmem:[%s14136_s30 + $0xa60] sm:$0xff]  ;;  %7317 = vst [vmem:[#allocation1 + $0x20] ss:$4 sm:$0xff] %v6480_v60 }
 0x444   : > { %10214 = vmatpush.bf16.msrb.mxu0 %v12351_v45  ;;  %v12406_v45 = vld [vmem:[%s14136_s30 + $0xae0] sm:$0xff] }
 0x445   : > { %10240 = vmatpush.bf16.msrb.mxu2 %v12367_v46  ;;  %v12381_v46 = vld [vmem:[%s14136_s30 + $0xa18] sm:$0xff]  ;;  %v12394_v4 = vld [vmem:[%s14136_s30 + $0xa80] sm:$0xff] }
 0x446   : > { %10227 = vmatpush.bf16.msrb.mxu1 %v12359_v47  ;;  %v12397_v47 = vld [vmem:[%s14136_s30 + $0xa98] sm:$0xff]  ;;  %v12418_v60 = vld [vmem:[%s14136_s30 + $0xb40] sm:$0xff] }
 0x447   : > { %10253 = vmatpush.bf16.msrb.mxu3 %v12375_v48  ;;  %v9989_v10 = vpop.f32.mrf.mxu2 }
 0x448   : > { %10215 = vmatpush.bf16.msrb.mxu0 %v12350_v51  ;;  %v12405_v51 = vld [vmem:[%s14136_s30 + $0xad8] sm:$0xff]  ;;  %v12402_v10 = vld [vmem:[%s14136_s30 + $0xac0] sm:$0xff] }
 0x449   : > { %10241 = vmatpush.bf16.msrb.mxu2 %v12366_v52  ;;  %v10002_v13 = vpop.f32.mrf.mxu3 }
 0x44a   : > { %10228 = vmatpush.bf16.msrb.mxu1 %v12358_v55  ;;  %v12380_v55 = vld [vmem:[%s14136_s30 + $0xa10] sm:$0xff] }
 0x44b   : > { %10254 = vmatpush.bf16.msrb.mxu3 %v12374_v56  ;;  %v12396_v56 = vld [vmem:[%s14136_s30 + $0xa90] sm:$0xff] }
 0x44c   : > { %10216 = vmatpush.bf16.msrb.mxu0 %v12349_v57 }
 0x44d   : > { %10242 = vmatpush.bf16.msrb.mxu2 %v12365_v58  ;;  %v12388_v58 = vld [vmem:[%s14136_s30 + $0xa50] sm:$0xff] }
 0x44e   : > { %10229 = vmatpush.bf16.msrb.mxu1 %v12357_v61  ;;  %v12379_v61 = vld [vmem:[%s14136_s30 + $0xa08] sm:$0xff] }
 0x44f   : > { %10255 = vmatpush.bf16.msrb.mxu3 %v12373_v62  ;;  %v12395_v62 = vld [vmem:[%s14136_s30 + $0xa88] sm:$0xff] }
 0x450   : > { %10217 = vmatpush.bf16.msrb.mxu0 %v12348_v2 }
 0x451   : > { %10243 = vmatpush.bf16.msrb.mxu2 %v12364_v3  ;;  %v12378_v3 = vld [vmem:[%s14136_s30 + $0xa00] sm:$0xff] }
 0x452   : > { %10230 = vmatpush.bf16.msrb.mxu1 %v12356_v5  ;;  %v12417_v5 = vld [vmem:[%s14136_s30 + $0xb38] sm:$0xff] }
 0x453   : > { %10256 = vmatpush.bf16.msrb.mxu3 %v12372_v6  ;;  %v7318_v6 = vld.sshfl [vmem:[#allocation1] sm:$0xff pattern:$0x73625140] }
 0x454   : > { %10218 = vmatpush.bf16.msrb.mxu0 %v12347_v8  ;;  %v12433_v8 = vld [vmem:[%s14136_s30 + $0xbb8] sm:$0xff]  ;;  %v7417_v13 = vpack.c.bf16 %v7318_v6, %v7318_v6 }
 0x455   : > { %10244 = vmatpush.bf16.msrb.mxu2 %v12363_v9  ;;  %v12386_v9 = vld [vmem:[%s14136_s30 + $0xa40] sm:$0xff] }
 0x456   : > { %10231 = vmatpush.bf16.msrb.mxu1 %v12355_v11  ;;  %v7319_v11 = vld.sshfl [vmem:[#allocation1 + $0x8] sm:$0xff pattern:$0x73625140] }
 0x457   : > { %10257 = vmatpush.bf16.msrb.mxu3 %v12371_v12  ;;  %v7321_v12 = vld.sshfl [vmem:[#allocation1 + $0x18] sm:$0xff pattern:$0x73625140]  ;;  %v7418_v17 = vpack.c.bf16 %v7319_v11, %v7319_v11 }
 0x458   : > { %10219 = vmatpush.bf16.msrb.mxu0 %v12346_v14  ;;  %v10013_v38 = vpop.f32.mrf.mxu0  ;;  %v7419_v14 = vpack.c.bf16 %v7320_v7, %v7320_v7  ;;  %v7420_v18 = vpack.c.bf16 %v7321_v12, %v7321_v12 }
 0x459   : > { %10245 = vmatpush.bf16.msrb.mxu2 %v12362_v15  ;;  %v10014_v39 = vadd.f32 %v10013_v38, %v14549_v1  ;;  %v12403_v1 = vld [vmem:[%s14136_s30 + $0xac8] sm:$0xff]  ;;  %v12425_v15 = vld [vmem:[%s14136_s30 + $0xb78] sm:$0xff] }
 0x45a   : > { %10232 = vmatpush.bf16.msrb.mxu1 %v12354_v20  ;;  %v10026_v42 = vpop.f32.mrf.mxu1  ;;  %v12432_v20 = vld [vmem:[%s14136_s30 + $0xbb0] sm:$0xff] }
 0x45b   : > { %10258 = vmatpush.bf16.msrb.mxu3 %v12370_v21  ;;  %10220 = vmatmul.bf16.vlgmr.msrb.gmra.mxu0 %v7413_v24  ;;  %v10027_v43 = vadd.f32 %v10026_v42, %v10014_v39  ;;  %v12424_v21 = vld [vmem:[%s14136_s30 + $0xb70] sm:$0xff]  ;;  %v12431_v24 = vld [vmem:[%s14136_s30 + $0xba8] sm:$0xff] }
 0x45c   : > { %10264 = vmatpush.bf16.msra.mxu0 %v12385_v16  ;;  %10246 = vmatmul.bf16.vlgmr.msrb.gmra.mxu2 %v7415_v25  ;;  %v12441_v16 = vld [vmem:[%s14136_s30 + $0xbf8] sm:$0xff] }
 0x45d   : > { %10290 = vmatpush.bf16.msra.mxu2 %v12401_v19  ;;  %10233 = vmatmul.bf16.vlgmr.msrb.gmra.mxu1 %v7414_v28  ;;  %v12416_v19 = vld [vmem:[%s14136_s30 + $0xb30] sm:$0xff] }
 0x45e   : > { %10277 = vmatpush.bf16.msra.mxu1 %v12393_v26  ;;  %10259 = vmatmul.bf16.vlgmr.msrb.gmra.mxu3 %v7416_v29  ;;  %v6481_v25 = vld [vmem:[%s14660_s0 + $0x60] sm:$0x3]  ;;  %v12423_v26 = vld [vmem:[%s14136_s30 + $0xb68] sm:$0xff] }
 0x45f   : > { %10303 = vmatpush.bf16.msra.mxu3 %v12409_v27  ;;  %v10039_v48 = vpop.f32.mrf.mxu2  ;;  %7326 = vst [vmem:[#allocation1] ss:$4 sm:$0xff] %v6481_v25  ;;  %v12439_v27 = vld [vmem:[%s14136_s30 + $0xbe8] sm:$0xff] }
 0x460   : > { %10265 = vmatpush.bf16.msra.mxu0 %v12384_v30  ;;  %v10040_v49 = vadd.f32 %v10039_v48, %v10027_v43  ;;  %v10015_v53 = vpop.f32.mrf.mxu0  ;;  %v12414_v30 = vld [vmem:[%s14136_s30 + $0xb20] sm:$0xff]  ;;  %v12420_v48 = vld [vmem:[%s14136_s30 + $0xb50] sm:$0xff] }
 0x461   : > { %10291 = vmatpush.bf16.msra.mxu2 %v12400_v31  ;;  %v10052_v52 = vpop.f32.mrf.mxu3  ;;  %v12430_v31 = vld [vmem:[%s14136_s30 + $0xba0] sm:$0xff]  ;;  %v12419_v53 = vld [vmem:[%s14136_s30 + $0xb48] sm:$0xff] }
 0x462   : > { %10278 = vmatpush.bf16.msra.mxu1 %v12392_v32  ;;  %v14587_v54 = vadd.f32 %v10052_v52, %v10040_v49  ;;  %v10028_v57 = vpop.f32.mrf.mxu1  ;;  %v12436_v49 = vld [vmem:[%s14136_s30 + $0xbd0] sm:$0xff] }
 0x463   : > { %10304 = vmatpush.bf16.msra.mxu3 %v12408_v33  ;;  %v12426_v57 = vld [vmem:[%s14136_s30 + $0xb80] sm:$0xff] }
 0x464   : > { %10266 = vmatpush.bf16.msra.mxu0 %v12383_v34  ;;  %v12422_v34 = vld [vmem:[%s14136_s30 + $0xb60] sm:$0xff] }
 0x465   : > { %10292 = vmatpush.bf16.msra.mxu2 %v12399_v35  ;;  %v12438_v35 = vld [vmem:[%s14136_s30 + $0xbe0] sm:$0xff] }
 0x466   : > { %10279 = vmatpush.bf16.msra.mxu1 %v12391_v36  ;;  %v12413_v36 = vld [vmem:[%s14136_s30 + $0xb18] sm:$0xff] }
 0x467   : > { %10305 = vmatpush.bf16.msra.mxu3 %v12407_v37  ;;  %v10041_v63 = vpop.f32.mrf.mxu2  ;;  %v12429_v37 = vld [vmem:[%s14136_s30 + $0xb98] sm:$0xff] }
 0x468   : > { %10267 = vmatpush.bf16.msra.mxu0 %v12382_v40  ;;  %v12421_v40 = vld [vmem:[%s14136_s30 + $0xb58] sm:$0xff] }
 0x469   : > { %10293 = vmatpush.bf16.msra.mxu2 %v12398_v41  ;;  %v10054_v2 = vpop.f32.mrf.mxu3  ;;  %v12437_v41 = vld [vmem:[%s14136_s30 + $0xbd8] sm:$0xff] }
 0x46a   : > { %10280 = vmatpush.bf16.msra.mxu1 %v12390_v44  ;;  %v7323_v63 = vld.sshfl [vmem:[#allocation1 + $0x28] sm:$0xff pattern:$0x73625140] }
 0x46b   : > { %10306 = vmatpush.bf16.msra.mxu3 %v12406_v45  ;;  %v12412_v45 = vld [vmem:[%s14136_s30 + $0xb10] sm:$0xff] }
 0x46c   : > { %10268 = vmatpush.bf16.msra.mxu0 %v12381_v46  ;;  %v12428_v46 = vld [vmem:[%s14136_s30 + $0xb90] sm:$0xff] }
 0x46d   : > { %10294 = vmatpush.bf16.msra.mxu2 %v12397_v47 }
 0x46e   : > { %10281 = vmatpush.bf16.msra.mxu1 %v12389_v50  ;;  %v12411_v50 = vld [vmem:[%s14136_s30 + $0xb08] sm:$0xff] }
 0x46f   : > { %10307 = vmatpush.bf16.msra.mxu3 %v12405_v51  ;;  %v12427_v51 = vld [vmem:[%s14136_s30 + $0xb88] sm:$0xff] }
 0x470   : > { %10269 = vmatpush.bf16.msra.mxu0 %v12380_v55 }
 0x471   : > { %10295 = vmatpush.bf16.msra.mxu2 %v12396_v56  ;;  %v12410_v56 = vld [vmem:[%s14136_s30 + $0xb00] sm:$0xff] }
 0x472   : > { %10282 = vmatpush.bf16.msra.mxu1 %v12388_v58  ;;  %v7322_v58 = vld.sshfl [vmem:[#allocation1 + $0x20] sm:$0xff pattern:$0x73625140] }
 0x473   : > { %10308 = vmatpush.bf16.msra.mxu3 %v12404_v59  ;;  %v7324_v59 = vld.sshfl [vmem:[#allocation1 + $0x30] sm:$0xff pattern:$0x73625140] }
 0x474   : > { %10270 = vmatpush.bf16.msra.mxu0 %v12379_v61  ;;  %v12434_v61 = vld [vmem:[%s14136_s30 + $0xbc0] sm:$0xff]  ;;  %v7423_v2 = vpack.c.bf16 %v7324_v59, %v7324_v59 }
 0x475   : > { %10296 = vmatpush.bf16.msra.mxu2 %v12395_v62  ;;  %v12442_v62 = vld [vmem:[%s14136_s30 + $0xc00] sm:$0xff] }
 0x476   : > { %10283 = vmatpush.bf16.msra.mxu1 %v12387_v0  ;;  %v7325_v0 = vld.sshfl [vmem:[#allocation1 + $0x38] sm:$0xff pattern:$0x73625140] }
 0x477   : > { %10309 = vmatpush.bf16.msra.mxu3 %v12403_v1  ;;  %v7421_v1 = vpack.c.bf16 %v7322_v58, %v7322_v58 }
 0x478   : > { %10271 = vmatpush.bf16.msra.mxu0 %v12378_v3  ;;  %v10065_v28 = vpop.f32.mrf.mxu0  ;;  %v7422_v3 = vpack.c.bf16 %v7323_v63, %v7323_v63 }
 0x479   : > { %10297 = vmatpush.bf16.msra.mxu2 %v12394_v4  ;;  %v10066_v29 = vadd.f32 %v10065_v28, %v14587_v54  ;;  %v12435_v54 = vld [vmem:[%s14136_s30 + $0xbc8] sm:$0xff]  ;;  %v7424_v4 = vpack.c.bf16 %v7325_v0, %v7325_v0  ;;  %s10514_s30 = sshll.u32 %s14671_s14, 1 }
 0x47a   : > { %10284 = vmatpush.bf16.msra.mxu1 %v12386_v9  ;;  %v10078_v32 = vpop.f32.mrf.mxu1  ;;  %v7327_v9 = vld.sshfl [vmem:[#allocation1] sm:$0xff pattern:$0x73625140]  ;;  %s6467_s23 = scalar_lea.vmem %s14663_s3, %s10514_s30 }
 0x47b   : > { %10310 = vmatpush.bf16.msra.mxu3 %v12402_v10  ;;  %10272 = vmatmul.bf16.vlgmr.msra.gmra.mxu0 %v7417_v13  ;;  %v10079_v33 = vadd.f32 %v10078_v32, %v10066_v29  ;;  %v7425_v12 = vpack.c.bf16 %v7327_v9, %v7327_v9 }
 0x47c   : > { %10316 = vmatpush.bf16.msrb.mxu0 %v12417_v5  ;;  %10298 = vmatmul.bf16.vlgmr.msra.gmra.mxu2 %v7419_v14 }
 0x47d   : > { %10342 = vmatpush.bf16.msrb.mxu2 %v12433_v8  ;;  %10285 = vmatmul.bf16.vlgmr.msra.gmra.mxu1 %v7418_v17 }
 0x47e   : > { %10329 = vmatpush.bf16.msrb.mxu1 %v12425_v15  ;;  %10311 = vmatmul.bf16.vlgmr.msra.gmra.mxu3 %v7420_v18 }
 0x47f   : > { %10355 = vmatpush.bf16.msrb.mxu3 %v12441_v16  ;;  %v10091_v38 = vpop.f32.mrf.mxu2 }
 0x480   : > { %10317 = vmatpush.bf16.msrb.mxu0 %v12416_v19  ;;  %v10092_v39 = vadd.f32 %v10091_v38, %v10079_v33  ;;  %v10067_v43 = vpop.f32.mrf.mxu0 }
 0x481   : > { %10343 = vmatpush.bf16.msrb.mxu2 %v12432_v20  ;;  %v10104_v42 = vpop.f32.mrf.mxu3 }
 0x482   : > { %10330 = vmatpush.bf16.msrb.mxu1 %v12424_v21  ;;  %v10105_v44 = vadd.f32 %v10104_v42, %v10092_v39  ;;  %v10080_v47 = vpop.f32.mrf.mxu1 }
 0x483   : > { %10356 = vmatpush.bf16.msrb.mxu3 %v12440_v22 }
 0x484   : > { %10318 = vmatpush.bf16.msrb.mxu0 %v12415_v23 }
 0x485   : > { %10344 = vmatpush.bf16.msrb.mxu2 %v12431_v24 }
 0x486   : > { %10331 = vmatpush.bf16.msrb.mxu1 %v12423_v26 }
 0x487   : > { %10357 = vmatpush.bf16.msrb.mxu3 %v12439_v27  ;;  %v10093_v52 = vpop.f32.mrf.mxu2 }
 0x488   : > { %10319 = vmatpush.bf16.msrb.mxu0 %v12414_v30 }
 0x489   : > { %10345 = vmatpush.bf16.msrb.mxu2 %v12430_v31  ;;  %v10106_v55 = vpop.f32.mrf.mxu3 }
 0x48a   : > { %10332 = vmatpush.bf16.msrb.mxu1 %v12422_v34 }
 0x48b   : > { %10358 = vmatpush.bf16.msrb.mxu3 %v12438_v35 }
 0x48c   : > { %10320 = vmatpush.bf16.msrb.mxu0 %v12413_v36 }
 0x48d   : > { %10346 = vmatpush.bf16.msrb.mxu2 %v12429_v37 }
 0x48e   : > { %10333 = vmatpush.bf16.msrb.mxu1 %v12421_v40 }
 0x48f   : > { %10359 = vmatpush.bf16.msrb.mxu3 %v12437_v41 }
 0x490   : > { %10321 = vmatpush.bf16.msrb.mxu0 %v12412_v45 }
 0x491   : > { %10347 = vmatpush.bf16.msrb.mxu2 %v12428_v46 }
 0x492   : > { %10334 = vmatpush.bf16.msrb.mxu1 %v12420_v48 }
 0x493   : > { %10360 = vmatpush.bf16.msrb.mxu3 %v12436_v49 }
 0x494   : > { %10322 = vmatpush.bf16.msrb.mxu0 %v12411_v50 }
 0x495   : > { %10348 = vmatpush.bf16.msrb.mxu2 %v12427_v51 }
 0x496   : > { %10335 = vmatpush.bf16.msrb.mxu1 %v12419_v53 }
 0x497   : > { %10361 = vmatpush.bf16.msrb.mxu3 %v12435_v54 }
 0x498   : > { %10323 = vmatpush.bf16.msrb.mxu0 %v12410_v56  ;;  %v10117_v5 = vpop.f32.mrf.mxu0 }
 0x499   : > { %10349 = vmatpush.bf16.msrb.mxu2 %v12426_v57  ;;  %v10118_v6 = vadd.f32 %v10117_v5, %v10105_v44 }
 0x49a   : > { %10336 = vmatpush.bf16.msrb.mxu1 %v12418_v60  ;;  %v10130_v7 = vpop.f32.mrf.mxu1 }
 0x49b   : > { %10362 = vmatpush.bf16.msrb.mxu3 %v12434_v61  ;;  %10324 = vmatmul.bf16.vlgmr.msrb.gmra.mxu0 %v7421_v1  ;;  %v10131_v8 = vadd.f32 %v10130_v7, %v10118_v6 }
 0x49c   : > { %10375 = vmatpush.bf16.msra.mxu0 %v12442_v62  ;;  %10350 = vmatmul.bf16.vlgmr.msrb.gmra.mxu2 %v7423_v2 }
 0x49d   : > { %10337 = vmatmul.bf16.vlgmr.msrb.gmra.mxu1 %v7422_v3 }
 0x49e   : > { %10363 = vmatmul.bf16.vlgmr.msrb.gmra.mxu3 %v7424_v4 }
 0x49f   : > { %v10143_v10 = vpop.f32.mrf.mxu2 }
 0x4a0   : > { %v10144_v11 = vadd.f32 %v10143_v10, %v10131_v8  ;;  %v10119_v14 = vpop.f32.mrf.mxu0 }
 0x4a1   : > { %v10156_v13 = vpop.f32.mrf.mxu3 }
 0x4a2   : > { %v10157_v15 = vadd.f32 %v10156_v13, %v10144_v11  ;;  %v10132_v16 = vpop.f32.mrf.mxu1 }
 0x4a7   : > { %v10145_v17 = vpop.f32.mrf.mxu2 }
 0x4a9   : > { %v10158_v18 = vpop.f32.mrf.mxu3 }
 0x4ab   : > { %12055 = vmatmul.msk.bf16.vlgmr.msra.gmra.mxu0 %vm9740_vm0, %v7425_v12 }
 0x4b8   : > { %v10169_v19 = vpop.f32.mrf.mxu0 }
 0x4b9   : > { %v10170_v20 = vadd.f32 %v10169_v19, %v10157_v15 }
 0x4ba   : > { %v10182_v21 = vpop.f32.mrf.mxu1 }
 0x4bb   : > { %v10183_v22 = vadd.f32 %v10182_v21, %v10170_v20 }
 0x4bf   : > { %v10195_v23 = vpop.f32.mrf.mxu2 }
 0x4c0   : > { %v10196_v24 = vadd.f32 %v10195_v23, %v10183_v22  ;;  %v10171_v26 = vpop.f32.mrf.mxu0 }
 0x4c1   : > { %v10208_v25 = vpop.f32.mrf.mxu3 }
 0x4c2   : > { %v10209_v27 = vadd.f32 %v10208_v25, %v10196_v24  ;;  %v10184_v28 = vpop.f32.mrf.mxu1 }
 0x4c7   : > { %v10197_v29 = vpop.f32.mrf.mxu2 }
 0x4c9   : > { %v10210_v30 = vpop.f32.mrf.mxu3 }
 0x4d8   : > { %v10221_v31 = vpop.f32.mrf.mxu0 }
 0x4d9   : > { %v10222_v45 = vadd.f32 %v10221_v31, %v10209_v27 }
 0x4da   : > { %v10234_v32 = vpop.f32.mrf.mxu1 }
 0x4db   : > { %v10235_v47 = vadd.f32 %v10234_v32, %v10222_v45 }
 0x4df   : > { %v10247_v33 = vpop.f32.mrf.mxu2 }
 0x4e0   : > { %v10223_v35 = vpop.f32.mrf.mxu0  ;;  %v10248_v49 = vadd.f32 %v10247_v33, %v10235_v47 }
 0x4e1   : > { %v10260_v34 = vpop.f32.mrf.mxu3 }
 0x4e2   : > { %v10236_v36 = vpop.f32.mrf.mxu1  ;;  %v10261_v50 = vadd.f32 %v10260_v34, %v10248_v49 }
 0x4e7   : > { %v10249_v37 = vpop.f32.mrf.mxu2 }
 0x4e9   : > { %v10262_v38 = vpop.f32.mrf.mxu3 }
 0x4f8   : > { %v10273_v39 = vpop.f32.mrf.mxu0 }
 0x4f9   : > { %v10274_v51 = vadd.f32 %v10273_v39, %v10261_v50 }
 0x4fa   : > { %v10286_v40 = vpop.f32.mrf.mxu1 }
 0x4fb   : > { %v10287_v52 = vadd.f32 %v10286_v40, %v10274_v51 }
 0x4ff   : > { %v10299_v41 = vpop.f32.mrf.mxu2 }
 0x500   : > { %v10275_v43 = vpop.f32.mrf.mxu0  ;;  %v10300_v53 = vadd.f32 %v10299_v41, %v10287_v52 }
 0x501   : > { %v10312_v42 = vpop.f32.mrf.mxu3 }
 0x502   : > { %v10288_v44 = vpop.f32.mrf.mxu1  ;;  %v10313_v56 = vadd.f32 %v10312_v42, %v10300_v53 }
 0x507   : > { %v10301_v46 = vpop.f32.mrf.mxu2 }
 0x509   : > { %v10314_v48 = vpop.f32.mrf.mxu3 }
 0x518   : > { %v10325_v54 = vpop.f32.mrf.mxu0 }
 0x519   : > { %v10326_v57 = vadd.f32 %v10325_v54, %v10313_v56 }
 0x51a   : > { %v10338_v55 = vpop.f32.mrf.mxu1 }
 0x51b   : > { %v10339_v61 = vadd.f32 %v10338_v55, %v10326_v57 }
 0x51f   : > { %v10351_v58 = vpop.f32.mrf.mxu2 }
 0x520   : > { %v10327_v59 = vpop.f32.mrf.mxu0  ;;  %v10352_v63 = vadd.f32 %v10351_v58, %v10339_v61 }
 0x521   : > { %v10364_v60 = vpop.f32.mrf.mxu3 }
 0x522   : > { %v10340_v62 = vpop.f32.mrf.mxu1  ;;  %v10365_v1 = vadd.f32 %v10364_v60, %v10352_v63 }
 0x527   : > { %v10353_v0 = vpop.f32.mrf.mxu2 }
 0x528   : > { %v10377_v3 = vpop.f32.mrf.mxu0 }
 0x529   : > { %v10366_v2 = vpop.f32.mrf.mxu3  ;;  %v10378_v4 = vadd.f32 %v10377_v3, %v10365_v1 }
 0x52b   : > { %v10381_v5 = vmax.f32 %v10378_v4, 0.0 }
 0x52d   : > { %10382 = vst [vmem:[%s6467_s23] sm:$0x3] %v10381_v5 }
 0x530   : > { %v10379_v6 = vpop.f32.mrf.mxu0 }
 0x531 PF: > { %s13_s16 = sadd.s32 1, %s12524_s16   ;;  %s14664_s12 = smov %s12512_s13 }
 0x532   : > { %p10_p10 = scmp.ge.s32.totalorder %s13_s16, 10   ;;  %s14665_s13 = smov %s12581_s20 }
 0x533   : > { %s14666_s14 = smov %s12520_s15  ;;  %s14667_s15 = smov %s14669_s17 }
 0x534   :  { %12 = sbr.rel (!%p10_p10) target bundleno = 3 (0x3), region = 130 }

</bundles_post_ra>
